<compile_context>
chip_gen: v7x
topology: tpu7x:2x2x1
jax: 0.10.0
libtpu: 0.0.40
codegen_flags: <defaults>
</compile_context>

<pallas_src>
import functools

import numpy as np
import jax
import jax.numpy as jnp
from jax import lax
from jax.experimental import pallas as pl
from jax.experimental.pallas import tpu as pltpu


# -----------------------------------------------------------------------------
# Fused encoder kernel.
#
# Activation storage conventions (per grid step of NB images):
#   a0   (input) : (8, 5*NB, C*33)  row-phase mod 8 ; rows (i, n) ; cols (c, w),
#                                   col 32 and phase-0 row i=4 are the conv zero pads.
#   act1 scratch : (4, 5*NB, 32*17) row-phase mod 4 ; cols (co, ox), ox=16 = pad col.
#   act2 scratch : (2, 5*NB, 32*9)  row-phase mod 2 ; cols (co, ox), ox=8  = pad col.
#   act3 scratch : (4*NB, 32*4)     rows (oy, n) ; cols (co, ox).
# For every conv, tap ky of output row `r` reads input row 2r+ky; with the phase
# decompositions above this is always a contiguous slice  [carry*NB : (carry+4)*NB).
# -----------------------------------------------------------------------------
def _encoder_kernel(a0_ref, ws1_ref, ws2_ref, ws3_ref,
                    bc1_ref, bc2_ref, bc3_ref, wl_ref, bl_ref,
                    o_ref, act1_ref, act2_ref, act3_ref, *, nb):
    f32 = jnp.float32

    def tap_gemm(z, w_ref, k):
        z = z.astype(w_ref.dtype)
        return jnp.dot(z, w_ref[k], preferred_element_type=f32)

    # ---- conv1: 32x32 -> 16x16.  input rows mod-8 phased, output rows mod-4.
    for p_out in range(4):
        acc = None
        for ky in range(3):
            src = 2 * p_out + ky                      # input row = 8*a + src
            p_src, carry = src % 8, src // 8
            z = a0_ref[0, p_src, carry * nb:(carry + 4) * nb, :]
            t = tap_gemm(z, ws1_ref, ky)
            acc = t if acc is None else acc + t
        act1_ref[p_out, 0:4 * nb, :] = jnp.maximum(acc + bc1_ref[...], 0.0)
        act1_ref[p_out, 4 * nb:5 * nb, :] = jnp.zeros((nb, 32 * 17), f32)  # pad row

    # ---- conv2: 16x16 -> 8x8.  input rows mod-4 phased, output rows mod-2.
    for p_out in range(2):
        acc = None
        for ky in range(3):
            src = 2 * p_out + ky                      # input row = 4*a + src
            p_src, carry = src % 4, src // 4
            z = act1_ref[p_src, carry * nb:(carry + 4) * nb, :]
            t = tap_gemm(z, ws2_ref, ky)
            acc = t if acc is None else acc + t
        act2_ref[p_out, 0:4 * nb, :] = jnp.maximum(acc + bc2_ref[...], 0.0)
        act2_ref[p_out, 4 * nb:5 * nb, :] = jnp.zeros((nb, 32 * 9), f32)   # pad row

    # ---- conv3: 8x8 -> 4x4.  input rows mod-2 phased, output rows ordered (oy, n).
    acc = None
    for ky in range(3):
        p_src, carry = ky % 2, ky // 2                # input row = 2*oy + ky
        z = act2_ref[p_src, carry * nb:(carry + 4) * nb, :]
        t = tap_gemm(z, ws3_ref, ky)
        acc = t if acc is None else acc + t
    act3_ref[...] = jnp.maximum(acc + bc3_ref[...], 0.0)

    # ---- Linear(32*4*4 -> out_dim), fused.  Lane-dense (NB, od_pad) store.
    out = None
    for oy in range(4):
        z = act3_ref[oy * nb:(oy + 1) * nb, :]
        t = tap_gemm(z, wl_ref, oy)
        out = t if out is None else out + t
    o_ref[0, :, :] = (out + bl_ref[...]).astype(o_ref.dtype)


# -----------------------------------------------------------------------------
# Weight-side plumbing (done once in the wrapper, no activation traffic):
# fold the stride-2 column selection + right zero-pad column into the weights.
#   WS[ky, ci*Wp + w, co*OC + ox] = w[co, ci, ky, kx]  iff  w == 2*ox + kx.
# -----------------------------------------------------------------------------
def _build_ws(w, w_in_pad, ow, pad_col, dtype):
    cout, cin = w.shape[0], w.shape[1]
    sel = np.zeros((3, w_in_pad, ow), np.float32)
    for kx in range(3):
        for ox in range(ow):
            sel[kx, 2 * ox + kx, ox] = 1.0
    ws = jnp.einsum("oiyx,xwp->yiwop",
                    w.astype(jnp.float32), jnp.asarray(sel))   # (3, ci, Wp, co, OW)
    if pad_col:
        ws = jnp.pad(ws, ((0, 0), (0, 0), (0, 0), (0, 0), (0, 1)))
    oc = ow + int(pad_col)
    return ws.reshape(3, cin * w_in_pad, cout * oc).astype(dtype)


def _build_bias_cols(b, ow, pad_col):
    cout = b.shape[0]
    bc = jnp.broadcast_to(b.astype(jnp.float32)[:, None], (cout, ow))
    if pad_col:
        bc = jnp.pad(bc, ((0, 0), (0, 1)))     # pad column keeps exact zero
    return bc.reshape(1, -1)


# -----------------------------------------------------------------------------
# Forward pass.
# -----------------------------------------------------------------------------
def image_encoder_forward(x, params, *, img_size, channels, nb=8,
                          compute_dtype=jnp.float32):
    """x: (B, T, channels*img_size*img_size) -> (B, T, out_dim)."""
    B, T, D = x.shape
    assert img_size == 32, "Linear(32*4*4, .) forces img_size == 32"
    assert D == channels * img_size * img_size
    assert nb % 8 == 0
    f32 = jnp.float32
    N = B * T
    G = pl.cdiv(N, nb)
    Np = G * nb

    # --- input layout plumbing (pure data movement, once per call): row-phase
    #     decompose mod 8 and add the conv zero pads (bottom row 32, right col 32).
    x4 = x.reshape(N, channels, 32, 32).astype(f32)
    if Np != N:
        x4 = jnp.pad(x4, ((0, Np - N), (0, 0), (0, 0), (0, 0)))
    xp = jnp.pad(x4, ((0, 0), (0, 0), (0, 8), (0, 1)))          # (Np, C, 40, 33)
    a0 = xp.reshape(G, nb, channels, 5, 8, 33)
    a0 = jnp.transpose(a0, (0, 4, 3, 1, 2, 5))                  # (G, 8, 5, nb, C, 33)
    a0 = a0.reshape(G, 8, 5 * nb, channels * 33).astype(compute_dtype)

    # --- weight repacking (input-independent).
    # TODO(synk): this prep could be cached outside the jitted forward for repeated calls.
    ws1 = _build_ws(params["w_conv1"], 33, 16, True, compute_dtype)   # (3, C*33, 544)
    ws2 = _build_ws(params["w_conv2"], 17, 8, True, compute_dtype)    # (3, 544, 288)
    ws3 = _build_ws(params["w_conv3"], 9, 4, False, compute_dtype)    # (3, 288, 128)
    bc1 = _build_bias_cols(params["b_conv1"], 16, True)               # (1, 544)
    bc2 = _build_bias_cols(params["b_conv2"], 8, True)                # (1, 288)
    bc3 = _build_bias_cols(params["b_conv3"], 4, False)               # (1, 128)

    out_dim = params["w_lin"].shape[0]
    od_pad = ((out_dim + 127) // 128) * 128                     # lane-dense output
    wl = params["w_lin"].astype(f32).reshape(out_dim, 32, 4, 4)
    wl = jnp.transpose(wl, (2, 1, 3, 0)).reshape(4, 32 * 4, out_dim)  # (oy, co*4+ox, od)
    wl = jnp.pad(wl, ((0, 0), (0, 0), (0, od_pad - out_dim))).astype(compute_dtype)
    bl = jnp.pad(params["b_lin"].astype(f32), (0, od_pad - out_dim)).reshape(1, od_pad)

    # --- advisory cost for XLA scheduling.
    conv_macs = (channels * 9 * 32 * 16 * 16 + 32 * 9 * 32 * 8 * 8
                 + 32 * 9 * 32 * 4 * 4 + 32 * 4 * 4 * out_dim)
    elt = jnp.dtype(compute_dtype).itemsize
    weight_bytes = (sum(int(a.size) * elt for a in (ws1, ws2, ws3, wl))
                    + sum(int(a.size) * 4 for a in (bc1, bc2, bc3, bl)))
    cost = pl.CostEstimate(flops=int(2 * Np * conv_macs), transcendentals=0,
                           bytes_accessed=int(int(a0.size) * elt + weight_bytes
                                              + Np * od_pad * 4))

    def _const_spec(arr):
        if arr.ndim == 2:
            return pl.BlockSpec(arr.shape, lambda g: (0, 0))
        return pl.BlockSpec(arr.shape, lambda g: (0, 0, 0))

    out = pl.pallas_call(
        functools.partial(_encoder_kernel, nb=nb),
        out_shape=jax.ShapeDtypeStruct((G, nb, od_pad), f32),
        grid_spec=pltpu.PrefetchScalarGridSpec(
            num_scalar_prefetch=0,
            grid=(G,),
            in_specs=[
                pl.BlockSpec((1, 8, 5 * nb, channels * 33), lambda g: (g, 0, 0, 0)),
                _const_spec(ws1), _const_spec(ws2), _const_spec(ws3),
                _const_spec(bc1), _const_spec(bc2), _const_spec(bc3),
                _const_spec(wl), _const_spec(bl),
            ],
            out_specs=pl.BlockSpec((1, nb, od_pad), lambda g: (g, 0, 0)),
            scratch_shapes=[
                pltpu.VMEM((4, 5 * nb, 32 * 17), f32),   # conv1 activations (VMEM resident)
                pltpu.VMEM((2, 5 * nb, 32 * 9), f32),    # conv2 activations
                pltpu.VMEM((4 * nb, 32 * 4), f32),       # conv3 activations
            ],
        ),
        compiler_params=pltpu.CompilerParams(
            dimension_semantics=("parallel",),
            vmem_limit_bytes=32 * 1024 * 1024),
        cost_estimate=cost,
    )(a0, ws1, ws2, ws3, bc1, bc2, bc3, wl, bl)

    out = out.reshape(Np, od_pad)[:N, :out_dim]
    return out.reshape(B, T, out_dim)


# -----------------------------------------------------------------------------
# Pure-JAX reference (lax.conv) for the correctness check.
# -----------------------------------------------------------------------------
def image_encoder_reference(x, params, *, img_size, channels):
    B, T, _ = x.shape
    z = x.reshape(B * T, channels, img_size, img_size).astype(jnp.float32)

    def conv(z, w, b):
        out = lax.conv_general_dilated(
            z, w, window_strides=(2, 2), padding=((0, 1), (0, 1)),
            dimension_numbers=("NCHW", "OIHW", "NCHW"),
            precision=jax.lax.Precision.HIGHEST)
        return jax.nn.relu(out + b.reshape(1, -1, 1, 1))

    z = conv(z, params["w_conv1"], params["b_conv1"])
    z = conv(z, params["w_conv2"], params["b_conv2"])
    z = conv(z, params["w_conv3"], params["b_conv3"])
    feat = z.reshape(B * T, -1)                               # (N, 512) in (C,H,W) order
    h = jnp.dot(feat, params["w_lin"].T,
                precision=jax.lax.Precision.HIGHEST) + params["b_lin"]
    return h.reshape(B, T, -1)


# -----------------------------------------------------------------------------
# Deterministic parameter construction (shapes from ImageEncoder.__init__).
# -----------------------------------------------------------------------------
def make_params(key, channels, out_dim):
    ks = jax.random.split(key, 8)

    def u(k, shape, fan_in):
        s = 1.0 / np.sqrt(fan_in)
        return jax.random.uniform(k, shape, jnp.float32, minval=-s, maxval=s)

    return {
        "w_conv1": u(ks[0], (32, channels, 3, 3), channels * 9),
        "b_conv1": u(ks[1], (32,), channels * 9),
        "w_conv2": u(ks[2], (32, 32, 3, 3), 32 * 9),
        "b_conv2": u(ks[3], (32,), 32 * 9),
        "w_conv3": u(ks[4], (32, 32, 3, 3), 32 * 9),
        "b_conv3": u(ks[5], (32,), 32 * 9),
        "w_lin":   u(ks[6], (out_dim, 32 * 4 * 4), 32 * 4 * 4),
        "b_lin":   u(ks[7], (out_dim,), 32 * 4 * 4),
    }


if __name__ == "__main__":
    # Small shapes consistent with ImageEncoder.forward: x is (B, T, C*H*W).
    # img_size must be 32 because the Linear expects 32*4*4 features.
    B, T = 2, 8
    channels, img_size, out_dim = 1, 32, 32

    key = jax.random.PRNGKey(0)
    k_par, k_x = jax.random.split(key)
    params = make_params(k_par, channels, out_dim)
    x = jax.random.normal(k_x, (B, T, channels * img_size * img_size), jnp.float32)

    fwd = jax.jit(functools.partial(
        image_encoder_forward, img_size=img_size, channels=channels))
    out = jax.block_until_ready(fwd(x, params))

    ref = jax.block_until_ready(
        image_encoder_reference(x, params, img_size=img_size, channels=channels))

    assert out.shape == (B, T, out_dim)
    np.testing.assert_allclose(np.asarray(out), np.asarray(ref),
                               rtol=5e-3, atol=5e-3)
    print("KERNEL_OK")
</pallas_src>

<mosaic_0001>
module attributes {stable_mosaic.version = 11 : i64} {
  func.func @_encoder_kernel(%arg0: i32, %arg1: memref<1x8x40x33xf32, #tpu.memory_space<vmem>>, %arg2: memref<3x33x544xf32, #tpu.memory_space<vmem>>, %arg3: memref<3x544x288xf32, #tpu.memory_space<vmem>>, %arg4: memref<3x288x128xf32, #tpu.memory_space<vmem>>, %arg5: memref<1x544xf32, #tpu.memory_space<vmem>>, %arg6: memref<1x288xf32, #tpu.memory_space<vmem>>, %arg7: memref<1x128xf32, #tpu.memory_space<vmem>>, %arg8: memref<4x128x128xf32, #tpu.memory_space<vmem>>, %arg9: memref<1x128xf32, #tpu.memory_space<vmem>>, %arg10: memref<1x8x128xf32, #tpu.memory_space<vmem>>, %arg11: memref<4x40x544xf32, #tpu.memory_space<vmem>>, %arg12: memref<2x40x288xf32, #tpu.memory_space<vmem>>, %arg13: memref<32x128xf32, #tpu.memory_space<vmem>>) attributes {dimension_semantics = [#tpu.dimension_semantics<parallel>], iteration_bounds = array<i64: 2>, scalar_prefetch = 0 : i64, scratch_operands = 3 : i64, tpu.core_type = #tpu.core_type<tc>, window_params = [{transform_indices = @transform_0, window_bounds = array<i64: 1, 8, 40, 33>}, {pipeline_mode = #tpu.pipeline_mode<synchronous>, transform_indices = @transform_1, window_bounds = array<i64: 3, 33, 544>}, {pipeline_mode = #tpu.pipeline_mode<synchronous>, transform_indices = @transform_2, window_bounds = array<i64: 3, 544, 288>}, {pipeline_mode = #tpu.pipeline_mode<synchronous>, transform_indices = @transform_3, window_bounds = array<i64: 3, 288, 128>}, {pipeline_mode = #tpu.pipeline_mode<synchronous>, transform_indices = @transform_4, window_bounds = array<i64: 1, 544>}, {pipeline_mode = #tpu.pipeline_mode<synchronous>, transform_indices = @transform_5, window_bounds = array<i64: 1, 288>}, {pipeline_mode = #tpu.pipeline_mode<synchronous>, transform_indices = @transform_6, window_bounds = array<i64: 1, 128>}, {pipeline_mode = #tpu.pipeline_mode<synchronous>, transform_indices = @transform_7, window_bounds = array<i64: 4, 128, 128>}, {pipeline_mode = #tpu.pipeline_mode<synchronous>, transform_indices = @transform_8, window_bounds = array<i64: 1, 128>}, {transform_indices = @transform_9, window_bounds = array<i64: 1, 8, 128>}]} {
    %c0 = arith.constant 0 : index
    %c0_0 = arith.constant 0 : index
    %c0_1 = arith.constant 0 : index
    %c0_2 = arith.constant 0 : index
    %0 = vector.load %arg1[%c0, %c0_0, %c0_1, %c0_2] : memref<1x8x40x33xf32, #tpu.memory_space<vmem>>, vector<1x1x32x33xf32>
    %1 = vector.shape_cast %0 : vector<1x1x32x33xf32> to vector<32x33xf32>
    %c0_3 = arith.constant 0 : index
    %c0_4 = arith.constant 0 : index
    %c0_5 = arith.constant 0 : index
    %2 = vector.load %arg2[%c0_3, %c0_4, %c0_5] : memref<3x33x544xf32, #tpu.memory_space<vmem>>, vector<1x33x544xf32>
    %3 = vector.shape_cast %2 : vector<1x33x544xf32> to vector<33x544xf32>
    %cst = arith.constant dense<0.000000e+00> : vector<32x544xf32>
    %4 = tpu.matmul %1, %3, %cst {dimension_numbers = #tpu.dot_dimension_numbers<[1], [0], [0], [1], [0, 0, 1, 1], [], []>} : vector<32x33xf32>, vector<33x544xf32>, vector<32x544xf32> -> vector<32x544xf32>
    %c0_6 = arith.constant 0 : index
    %c1 = arith.constant 1 : index
    %c0_7 = arith.constant 0 : index
    %c0_8 = arith.constant 0 : index
    %5 = vector.load %arg1[%c0_6, %c1, %c0_7, %c0_8] : memref<1x8x40x33xf32, #tpu.memory_space<vmem>>, vector<1x1x32x33xf32>
    %6 = vector.shape_cast %5 : vector<1x1x32x33xf32> to vector<32x33xf32>
    %c1_9 = arith.constant 1 : index
    %c0_10 = arith.constant 0 : index
    %c0_11 = arith.constant 0 : index
    %7 = vector.load %arg2[%c1_9, %c0_10, %c0_11] : memref<3x33x544xf32, #tpu.memory_space<vmem>>, vector<1x33x544xf32>
    %8 = vector.shape_cast %7 : vector<1x33x544xf32> to vector<33x544xf32>
    %cst_12 = arith.constant dense<0.000000e+00> : vector<32x544xf32>
    %9 = tpu.matmul %6, %8, %cst_12 {dimension_numbers = #tpu.dot_dimension_numbers<[1], [0], [0], [1], [0, 0, 1, 1], [], []>} : vector<32x33xf32>, vector<33x544xf32>, vector<32x544xf32> -> vector<32x544xf32>
    %10 = arith.addf %4, %9 : vector<32x544xf32>
    %c0_13 = arith.constant 0 : index
    %c2 = arith.constant 2 : index
    %c0_14 = arith.constant 0 : index
    %c0_15 = arith.constant 0 : index
    %11 = vector.load %arg1[%c0_13, %c2, %c0_14, %c0_15] : memref<1x8x40x33xf32, #tpu.memory_space<vmem>>, vector<1x1x32x33xf32>
    %12 = vector.shape_cast %11 : vector<1x1x32x33xf32> to vector<32x33xf32>
    %c2_16 = arith.constant 2 : index
    %c0_17 = arith.constant 0 : index
    %c0_18 = arith.constant 0 : index
    %13 = vector.load %arg2[%c2_16, %c0_17, %c0_18] : memref<3x33x544xf32, #tpu.memory_space<vmem>>, vector<1x33x544xf32>
    %14 = vector.shape_cast %13 : vector<1x33x544xf32> to vector<33x544xf32>
    %cst_19 = arith.constant dense<0.000000e+00> : vector<32x544xf32>
    %15 = tpu.matmul %12, %14, %cst_19 {dimension_numbers = #tpu.dot_dimension_numbers<[1], [0], [0], [1], [0, 0, 1, 1], [], []>} : vector<32x33xf32>, vector<33x544xf32>, vector<32x544xf32> -> vector<32x544xf32>
    %16 = arith.addf %10, %15 : vector<32x544xf32>
    %c0_20 = arith.constant 0 : index
    %c0_21 = arith.constant 0 : index
    %17 = vector.load %arg5[%c0_20, %c0_21] : memref<1x544xf32, #tpu.memory_space<vmem>>, vector<1x544xf32>
    %18 = vector.broadcast %17 : vector<1x544xf32> to vector<32x544xf32>
    %19 = arith.addf %16, %18 : vector<32x544xf32>
    %cst_22 = arith.constant 0.000000e+00 : f32
    %20 = vector.broadcast %cst_22 : f32 to vector<32x544xf32>
    %21 = arith.maximumf %19, %20 : vector<32x544xf32>
    %c0_23 = arith.constant 0 : index
    %c0_24 = arith.constant 0 : index
    %c0_25 = arith.constant 0 : index
    %22 = vector.load %arg11[%c0_23, %c0_24, %c0_25] : memref<4x40x544xf32, #tpu.memory_space<vmem>>, vector<1x32x544xf32>
    %23 = vector.shape_cast %22 : vector<1x32x544xf32> to vector<32x544xf32>
    %24 = vector.shape_cast %21 : vector<32x544xf32> to vector<1x32x544xf32>
    tpu.vector_store %arg11[%c0_23, %c0_24, %c0_25], %24 {strides = array<i32>} : memref<4x40x544xf32, #tpu.memory_space<vmem>>, vector<1x32x544xf32>,
    %cst_26 = arith.constant 0.000000e+00 : f32
    %25 = vector.broadcast %cst_26 : f32 to vector<8x544xf32>
    %c0_27 = arith.constant 0 : index
    %c32 = arith.constant 32 : index
    %c0_28 = arith.constant 0 : index
    %26 = vector.load %arg11[%c0_27, %c32, %c0_28] : memref<4x40x544xf32, #tpu.memory_space<vmem>>, vector<1x8x544xf32>
    %27 = vector.shape_cast %26 : vector<1x8x544xf32> to vector<8x544xf32>
    %28 = vector.shape_cast %25 : vector<8x544xf32> to vector<1x8x544xf32>
    tpu.vector_store %arg11[%c0_27, %c32, %c0_28], %28 {strides = array<i32>} : memref<4x40x544xf32, #tpu.memory_space<vmem>>, vector<1x8x544xf32>,
    %c0_29 = arith.constant 0 : index
    %c2_30 = arith.constant 2 : index
    %c0_31 = arith.constant 0 : index
    %c0_32 = arith.constant 0 : index
    %29 = vector.load %arg1[%c0_29, %c2_30, %c0_31, %c0_32] : memref<1x8x40x33xf32, #tpu.memory_space<vmem>>, vector<1x1x32x33xf32>
    %30 = vector.shape_cast %29 : vector<1x1x32x33xf32> to vector<32x33xf32>
    %c0_33 = arith.constant 0 : index
    %c0_34 = arith.constant 0 : index
    %c0_35 = arith.constant 0 : index
    %31 = vector.load %arg2[%c0_33, %c0_34, %c0_35] : memref<3x33x544xf32, #tpu.memory_space<vmem>>, vector<1x33x544xf32>
    %32 = vector.shape_cast %31 : vector<1x33x544xf32> to vector<33x544xf32>
    %cst_36 = arith.constant dense<0.000000e+00> : vector<32x544xf32>
    %33 = tpu.matmul %30, %32, %cst_36 {dimension_numbers = #tpu.dot_dimension_numbers<[1], [0], [0], [1], [0, 0, 1, 1], [], []>} : vector<32x33xf32>, vector<33x544xf32>, vector<32x544xf32> -> vector<32x544xf32>
    %c0_37 = arith.constant 0 : index
    %c3 = arith.constant 3 : index
    %c0_38 = arith.constant 0 : index
    %c0_39 = arith.constant 0 : index
    %34 = vector.load %arg1[%c0_37, %c3, %c0_38, %c0_39] : memref<1x8x40x33xf32, #tpu.memory_space<vmem>>, vector<1x1x32x33xf32>
    %35 = vector.shape_cast %34 : vector<1x1x32x33xf32> to vector<32x33xf32>
    %c1_40 = arith.constant 1 : index
    %c0_41 = arith.constant 0 : index
    %c0_42 = arith.constant 0 : index
    %36 = vector.load %arg2[%c1_40, %c0_41, %c0_42] : memref<3x33x544xf32, #tpu.memory_space<vmem>>, vector<1x33x544xf32>
    %37 = vector.shape_cast %36 : vector<1x33x544xf32> to vector<33x544xf32>
    %cst_43 = arith.constant dense<0.000000e+00> : vector<32x544xf32>
    %38 = tpu.matmul %35, %37, %cst_43 {dimension_numbers = #tpu.dot_dimension_numbers<[1], [0], [0], [1], [0, 0, 1, 1], [], []>} : vector<32x33xf32>, vector<33x544xf32>, vector<32x544xf32> -> vector<32x544xf32>
    %39 = arith.addf %33, %38 : vector<32x544xf32>
    %c0_44 = arith.constant 0 : index
    %c4 = arith.constant 4 : index
    %c0_45 = arith.constant 0 : index
    %c0_46 = arith.constant 0 : index
    %40 = vector.load %arg1[%c0_44, %c4, %c0_45, %c0_46] : memref<1x8x40x33xf32, #tpu.memory_space<vmem>>, vector<1x1x32x33xf32>
    %41 = vector.shape_cast %40 : vector<1x1x32x33xf32> to vector<32x33xf32>
    %c2_47 = arith.constant 2 : index
    %c0_48 = arith.constant 0 : index
    %c0_49 = arith.constant 0 : index
    %42 = vector.load %arg2[%c2_47, %c0_48, %c0_49] : memref<3x33x544xf32, #tpu.memory_space<vmem>>, vector<1x33x544xf32>
    %43 = vector.shape_cast %42 : vector<1x33x544xf32> to vector<33x544xf32>
    %cst_50 = arith.constant dense<0.000000e+00> : vector<32x544xf32>
    %44 = tpu.matmul %41, %43, %cst_50 {dimension_numbers = #tpu.dot_dimension_numbers<[1], [0], [0], [1], [0, 0, 1, 1], [], []>} : vector<32x33xf32>, vector<33x544xf32>, vector<32x544xf32> -> vector<32x544xf32>
    %45 = arith.addf %39, %44 : vector<32x544xf32>
    %c0_51 = arith.constant 0 : index
    %c0_52 = arith.constant 0 : index
    %46 = vector.load %arg5[%c0_51, %c0_52] : memref<1x544xf32, #tpu.memory_space<vmem>>, vector<1x544xf32>
    %47 = vector.broadcast %46 : vector<1x544xf32> to vector<32x544xf32>
    %48 = arith.addf %45, %47 : vector<32x544xf32>
    %cst_53 = arith.constant 0.000000e+00 : f32
    %49 = vector.broadcast %cst_53 : f32 to vector<32x544xf32>
    %50 = arith.maximumf %48, %49 : vector<32x544xf32>
    %c1_54 = arith.constant 1 : index
    %c0_55 = arith.constant 0 : index
    %c0_56 = arith.constant 0 : index
    %51 = vector.load %arg11[%c1_54, %c0_55, %c0_56] : memref<4x40x544xf32, #tpu.memory_space<vmem>>, vector<1x32x544xf32>
    %52 = vector.shape_cast %51 : vector<1x32x544xf32> to vector<32x544xf32>
    %53 = vector.shape_cast %50 : vector<32x544xf32> to vector<1x32x544xf32>
    tpu.vector_store %arg11[%c1_54, %c0_55, %c0_56], %53 {strides = array<i32>} : memref<4x40x544xf32, #tpu.memory_space<vmem>>, vector<1x32x544xf32>,
    %cst_57 = arith.constant 0.000000e+00 : f32
    %54 = vector.broadcast %cst_57 : f32 to vector<8x544xf32>
    %c1_58 = arith.constant 1 : index
    %c32_59 = arith.constant 32 : index
    %c0_60 = arith.constant 0 : index
    %55 = vector.load %arg11[%c1_58, %c32_59, %c0_60] : memref<4x40x544xf32, #tpu.memory_space<vmem>>, vector<1x8x544xf32>
    %56 = vector.shape_cast %55 : vector<1x8x544xf32> to vector<8x544xf32>
    %57 = vector.shape_cast %54 : vector<8x544xf32> to vector<1x8x544xf32>
    tpu.vector_store %arg11[%c1_58, %c32_59, %c0_60], %57 {strides = array<i32>} : memref<4x40x544xf32, #tpu.memory_space<vmem>>, vector<1x8x544xf32>,
    %c0_61 = arith.constant 0 : index
    %c4_62 = arith.constant 4 : index
    %c0_63 = arith.constant 0 : index
    %c0_64 = arith.constant 0 : index
    %58 = vector.load %arg1[%c0_61, %c4_62, %c0_63, %c0_64] : memref<1x8x40x33xf32, #tpu.memory_space<vmem>>, vector<1x1x32x33xf32>
    %59 = vector.shape_cast %58 : vector<1x1x32x33xf32> to vector<32x33xf32>
    %c0_65 = arith.constant 0 : index
    %c0_66 = arith.constant 0 : index
    %c0_67 = arith.constant 0 : index
    %60 = vector.load %arg2[%c0_65, %c0_66, %c0_67] : memref<3x33x544xf32, #tpu.memory_space<vmem>>, vector<1x33x544xf32>
    %61 = vector.shape_cast %60 : vector<1x33x544xf32> to vector<33x544xf32>
    %cst_68 = arith.constant dense<0.000000e+00> : vector<32x544xf32>
    %62 = tpu.matmul %59, %61, %cst_68 {dimension_numbers = #tpu.dot_dimension_numbers<[1], [0], [0], [1], [0, 0, 1, 1], [], []>} : vector<32x33xf32>, vector<33x544xf32>, vector<32x544xf32> -> vector<32x544xf32>
    %c0_69 = arith.constant 0 : index
    %c5 = arith.constant 5 : index
    %c0_70 = arith.constant 0 : index
    %c0_71 = arith.constant 0 : index
    %63 = vector.load %arg1[%c0_69, %c5, %c0_70, %c0_71] : memref<1x8x40x33xf32, #tpu.memory_space<vmem>>, vector<1x1x32x33xf32>
    %64 = vector.shape_cast %63 : vector<1x1x32x33xf32> to vector<32x33xf32>
    %c1_72 = arith.constant 1 : index
    %c0_73 = arith.constant 0 : index
    %c0_74 = arith.constant 0 : index
    %65 = vector.load %arg2[%c1_72, %c0_73, %c0_74] : memref<3x33x544xf32, #tpu.memory_space<vmem>>, vector<1x33x544xf32>
    %66 = vector.shape_cast %65 : vector<1x33x544xf32> to vector<33x544xf32>
    %cst_75 = arith.constant dense<0.000000e+00> : vector<32x544xf32>
    %67 = tpu.matmul %64, %66, %cst_75 {dimension_numbers = #tpu.dot_dimension_numbers<[1], [0], [0], [1], [0, 0, 1, 1], [], []>} : vector<32x33xf32>, vector<33x544xf32>, vector<32x544xf32> -> vector<32x544xf32>
    %68 = arith.addf %62, %67 : vector<32x544xf32>
    %c0_76 = arith.constant 0 : index
    %c6 = arith.constant 6 : index
    %c0_77 = arith.constant 0 : index
    %c0_78 = arith.constant 0 : index
    %69 = vector.load %arg1[%c0_76, %c6, %c0_77, %c0_78] : memref<1x8x40x33xf32, #tpu.memory_space<vmem>>, vector<1x1x32x33xf32>
    %70 = vector.shape_cast %69 : vector<1x1x32x33xf32> to vector<32x33xf32>
    %c2_79 = arith.constant 2 : index
    %c0_80 = arith.constant 0 : index
    %c0_81 = arith.constant 0 : index
    %71 = vector.load %arg2[%c2_79, %c0_80, %c0_81] : memref<3x33x544xf32, #tpu.memory_space<vmem>>, vector<1x33x544xf32>
    %72 = vector.shape_cast %71 : vector<1x33x544xf32> to vector<33x544xf32>
    %cst_82 = arith.constant dense<0.000000e+00> : vector<32x544xf32>
    %73 = tpu.matmul %70, %72, %cst_82 {dimension_numbers = #tpu.dot_dimension_numbers<[1], [0], [0], [1], [0, 0, 1, 1], [], []>} : vector<32x33xf32>, vector<33x544xf32>, vector<32x544xf32> -> vector<32x544xf32>
    %74 = arith.addf %68, %73 : vector<32x544xf32>
    %c0_83 = arith.constant 0 : index
    %c0_84 = arith.constant 0 : index
    %75 = vector.load %arg5[%c0_83, %c0_84] : memref<1x544xf32, #tpu.memory_space<vmem>>, vector<1x544xf32>
    %76 = vector.broadcast %75 : vector<1x544xf32> to vector<32x544xf32>
    %77 = arith.addf %74, %76 : vector<32x544xf32>
    %cst_85 = arith.constant 0.000000e+00 : f32
    %78 = vector.broadcast %cst_85 : f32 to vector<32x544xf32>
    %79 = arith.maximumf %77, %78 : vector<32x544xf32>
    %c2_86 = arith.constant 2 : index
    %c0_87 = arith.constant 0 : index
    %c0_88 = arith.constant 0 : index
    %80 = vector.load %arg11[%c2_86, %c0_87, %c0_88] : memref<4x40x544xf32, #tpu.memory_space<vmem>>, vector<1x32x544xf32>
    %81 = vector.shape_cast %80 : vector<1x32x544xf32> to vector<32x544xf32>
    %82 = vector.shape_cast %79 : vector<32x544xf32> to vector<1x32x544xf32>
    tpu.vector_store %arg11[%c2_86, %c0_87, %c0_88], %82 {strides = array<i32>} : memref<4x40x544xf32, #tpu.memory_space<vmem>>, vector<1x32x544xf32>,
    %cst_89 = arith.constant 0.000000e+00 : f32
    %83 = vector.broadcast %cst_89 : f32 to vector<8x544xf32>
    %c2_90 = arith.constant 2 : index
    %c32_91 = arith.constant 32 : index
    %c0_92 = arith.constant 0 : index
    %84 = vector.load %arg11[%c2_90, %c32_91, %c0_92] : memref<4x40x544xf32, #tpu.memory_space<vmem>>, vector<1x8x544xf32>
    %85 = vector.shape_cast %84 : vector<1x8x544xf32> to vector<8x544xf32>
    %86 = vector.shape_cast %83 : vector<8x544xf32> to vector<1x8x544xf32>
    tpu.vector_store %arg11[%c2_90, %c32_91, %c0_92], %86 {strides = array<i32>} : memref<4x40x544xf32, #tpu.memory_space<vmem>>, vector<1x8x544xf32>,
    %c0_93 = arith.constant 0 : index
    %c6_94 = arith.constant 6 : index
    %c0_95 = arith.constant 0 : index
    %c0_96 = arith.constant 0 : index
    %87 = vector.load %arg1[%c0_93, %c6_94, %c0_95, %c0_96] : memref<1x8x40x33xf32, #tpu.memory_space<vmem>>, vector<1x1x32x33xf32>
    %88 = vector.shape_cast %87 : vector<1x1x32x33xf32> to vector<32x33xf32>
    %c0_97 = arith.constant 0 : index
    %c0_98 = arith.constant 0 : index
    %c0_99 = arith.constant 0 : index
    %89 = vector.load %arg2[%c0_97, %c0_98, %c0_99] : memref<3x33x544xf32, #tpu.memory_space<vmem>>, vector<1x33x544xf32>
    %90 = vector.shape_cast %89 : vector<1x33x544xf32> to vector<33x544xf32>
    %cst_100 = arith.constant dense<0.000000e+00> : vector<32x544xf32>
    %91 = tpu.matmul %88, %90, %cst_100 {dimension_numbers = #tpu.dot_dimension_numbers<[1], [0], [0], [1], [0, 0, 1, 1], [], []>} : vector<32x33xf32>, vector<33x544xf32>, vector<32x544xf32> -> vector<32x544xf32>
    %c0_101 = arith.constant 0 : index
    %c7 = arith.constant 7 : index
    %c0_102 = arith.constant 0 : index
    %c0_103 = arith.constant 0 : index
    %92 = vector.load %arg1[%c0_101, %c7, %c0_102, %c0_103] : memref<1x8x40x33xf32, #tpu.memory_space<vmem>>, vector<1x1x32x33xf32>
    %93 = vector.shape_cast %92 : vector<1x1x32x33xf32> to vector<32x33xf32>
    %c1_104 = arith.constant 1 : index
    %c0_105 = arith.constant 0 : index
    %c0_106 = arith.constant 0 : index
    %94 = vector.load %arg2[%c1_104, %c0_105, %c0_106] : memref<3x33x544xf32, #tpu.memory_space<vmem>>, vector<1x33x544xf32>
    %95 = vector.shape_cast %94 : vector<1x33x544xf32> to vector<33x544xf32>
    %cst_107 = arith.constant dense<0.000000e+00> : vector<32x544xf32>
    %96 = tpu.matmul %93, %95, %cst_107 {dimension_numbers = #tpu.dot_dimension_numbers<[1], [0], [0], [1], [0, 0, 1, 1], [], []>} : vector<32x33xf32>, vector<33x544xf32>, vector<32x544xf32> -> vector<32x544xf32>
    %97 = arith.addf %91, %96 : vector<32x544xf32>
    %c0_108 = arith.constant 0 : index
    %c0_109 = arith.constant 0 : index
    %c8 = arith.constant 8 : index
    %c0_110 = arith.constant 0 : index
    %98 = vector.load %arg1[%c0_108, %c0_109, %c8, %c0_110] : memref<1x8x40x33xf32, #tpu.memory_space<vmem>>, vector<1x1x32x33xf32>
    %99 = vector.shape_cast %98 : vector<1x1x32x33xf32> to vector<32x33xf32>
    %c2_111 = arith.constant 2 : index
    %c0_112 = arith.constant 0 : index
    %c0_113 = arith.constant 0 : index
    %100 = vector.load %arg2[%c2_111, %c0_112, %c0_113] : memref<3x33x544xf32, #tpu.memory_space<vmem>>, vector<1x33x544xf32>
    %101 = vector.shape_cast %100 : vector<1x33x544xf32> to vector<33x544xf32>
    %cst_114 = arith.constant dense<0.000000e+00> : vector<32x544xf32>
    %102 = tpu.matmul %99, %101, %cst_114 {dimension_numbers = #tpu.dot_dimension_numbers<[1], [0], [0], [1], [0, 0, 1, 1], [], []>} : vector<32x33xf32>, vector<33x544xf32>, vector<32x544xf32> -> vector<32x544xf32>
    %103 = arith.addf %97, %102 : vector<32x544xf32>
    %c0_115 = arith.constant 0 : index
    %c0_116 = arith.constant 0 : index
    %104 = vector.load %arg5[%c0_115, %c0_116] : memref<1x544xf32, #tpu.memory_space<vmem>>, vector<1x544xf32>
    %105 = vector.broadcast %104 : vector<1x544xf32> to vector<32x544xf32>
    %106 = arith.addf %103, %105 : vector<32x544xf32>
    %cst_117 = arith.constant 0.000000e+00 : f32
    %107 = vector.broadcast %cst_117 : f32 to vector<32x544xf32>
    %108 = arith.maximumf %106, %107 : vector<32x544xf32>
    %c3_118 = arith.constant 3 : index
    %c0_119 = arith.constant 0 : index
    %c0_120 = arith.constant 0 : index
    %109 = vector.load %arg11[%c3_118, %c0_119, %c0_120] : memref<4x40x544xf32, #tpu.memory_space<vmem>>, vector<1x32x544xf32>
    %110 = vector.shape_cast %109 : vector<1x32x544xf32> to vector<32x544xf32>
    %111 = vector.shape_cast %108 : vector<32x544xf32> to vector<1x32x544xf32>
    tpu.vector_store %arg11[%c3_118, %c0_119, %c0_120], %111 {strides = array<i32>} : memref<4x40x544xf32, #tpu.memory_space<vmem>>, vector<1x32x544xf32>,
    %cst_121 = arith.constant 0.000000e+00 : f32
    %112 = vector.broadcast %cst_121 : f32 to vector<8x544xf32>
    %c3_122 = arith.constant 3 : index
    %c32_123 = arith.constant 32 : index
    %c0_124 = arith.constant 0 : index
    %113 = vector.load %arg11[%c3_122, %c32_123, %c0_124] : memref<4x40x544xf32, #tpu.memory_space<vmem>>, vector<1x8x544xf32>
    %114 = vector.shape_cast %113 : vector<1x8x544xf32> to vector<8x544xf32>
    %115 = vector.shape_cast %112 : vector<8x544xf32> to vector<1x8x544xf32>
    tpu.vector_store %arg11[%c3_122, %c32_123, %c0_124], %115 {strides = array<i32>} : memref<4x40x544xf32, #tpu.memory_space<vmem>>, vector<1x8x544xf32>,
    %c0_125 = arith.constant 0 : index
    %c0_126 = arith.constant 0 : index
    %c0_127 = arith.constant 0 : index
    %116 = vector.load %arg11[%c0_125, %c0_126, %c0_127] : memref<4x40x544xf32, #tpu.memory_space<vmem>>, vector<1x32x544xf32>
    %117 = vector.shape_cast %116 : vector<1x32x544xf32> to vector<32x544xf32>
    %c0_128 = arith.constant 0 : index
    %c0_129 = arith.constant 0 : index
    %c0_130 = arith.constant 0 : index
    %118 = vector.load %arg3[%c0_128, %c0_129, %c0_130] : memref<3x544x288xf32, #tpu.memory_space<vmem>>, vector<1x544x288xf32>
    %119 = vector.shape_cast %118 : vector<1x544x288xf32> to vector<544x288xf32>
    %cst_131 = arith.constant dense<0.000000e+00> : vector<32x288xf32>
    %120 = tpu.matmul %117, %119, %cst_131 {dimension_numbers = #tpu.dot_dimension_numbers<[1], [0], [0], [1], [0, 0, 1, 1], [], []>} : vector<32x544xf32>, vector<544x288xf32>, vector<32x288xf32> -> vector<32x288xf32>
    %c1_132 = arith.constant 1 : index
    %c0_133 = arith.constant 0 : index
    %c0_134 = arith.constant 0 : index
    %121 = vector.load %arg11[%c1_132, %c0_133, %c0_134] : memref<4x40x544xf32, #tpu.memory_space<vmem>>, vector<1x32x544xf32>
    %122 = vector.shape_cast %121 : vector<1x32x544xf32> to vector<32x544xf32>
    %c1_135 = arith.constant 1 : index
    %c0_136 = arith.constant 0 : index
    %c0_137 = arith.constant 0 : index
    %123 = vector.load %arg3[%c1_135, %c0_136, %c0_137] : memref<3x544x288xf32, #tpu.memory_space<vmem>>, vector<1x544x288xf32>
    %124 = vector.shape_cast %123 : vector<1x544x288xf32> to vector<544x288xf32>
    %cst_138 = arith.constant dense<0.000000e+00> : vector<32x288xf32>
    %125 = tpu.matmul %122, %124, %cst_138 {dimension_numbers = #tpu.dot_dimension_numbers<[1], [0], [0], [1], [0, 0, 1, 1], [], []>} : vector<32x544xf32>, vector<544x288xf32>, vector<32x288xf32> -> vector<32x288xf32>
    %126 = arith.addf %120, %125 : vector<32x288xf32>
    %c2_139 = arith.constant 2 : index
    %c0_140 = arith.constant 0 : index
    %c0_141 = arith.constant 0 : index
    %127 = vector.load %arg11[%c2_139, %c0_140, %c0_141] : memref<4x40x544xf32, #tpu.memory_space<vmem>>, vector<1x32x544xf32>
    %128 = vector.shape_cast %127 : vector<1x32x544xf32> to vector<32x544xf32>
    %c2_142 = arith.constant 2 : index
    %c0_143 = arith.constant 0 : index
    %c0_144 = arith.constant 0 : index
    %129 = vector.load %arg3[%c2_142, %c0_143, %c0_144] : memref<3x544x288xf32, #tpu.memory_space<vmem>>, vector<1x544x288xf32>
    %130 = vector.shape_cast %129 : vector<1x544x288xf32> to vector<544x288xf32>
    %cst_145 = arith.constant dense<0.000000e+00> : vector<32x288xf32>
    %131 = tpu.matmul %128, %130, %cst_145 {dimension_numbers = #tpu.dot_dimension_numbers<[1], [0], [0], [1], [0, 0, 1, 1], [], []>} : vector<32x544xf32>, vector<544x288xf32>, vector<32x288xf32> -> vector<32x288xf32>
    %132 = arith.addf %126, %131 : vector<32x288xf32>
    %c0_146 = arith.constant 0 : index
    %c0_147 = arith.constant 0 : index
    %133 = vector.load %arg6[%c0_146, %c0_147] : memref<1x288xf32, #tpu.memory_space<vmem>>, vector<1x288xf32>
    %134 = vector.broadcast %133 : vector<1x288xf32> to vector<32x288xf32>
    %135 = arith.addf %132, %134 : vector<32x288xf32>
    %cst_148 = arith.constant 0.000000e+00 : f32
    %136 = vector.broadcast %cst_148 : f32 to vector<32x288xf32>
    %137 = arith.maximumf %135, %136 : vector<32x288xf32>
    %c0_149 = arith.constant 0 : index
    %c0_150 = arith.constant 0 : index
    %c0_151 = arith.constant 0 : index
    %138 = vector.load %arg12[%c0_149, %c0_150, %c0_151] : memref<2x40x288xf32, #tpu.memory_space<vmem>>, vector<1x32x288xf32>
    %139 = vector.shape_cast %138 : vector<1x32x288xf32> to vector<32x288xf32>
    %140 = vector.shape_cast %137 : vector<32x288xf32> to vector<1x32x288xf32>
    tpu.vector_store %arg12[%c0_149, %c0_150, %c0_151], %140 {strides = array<i32>} : memref<2x40x288xf32, #tpu.memory_space<vmem>>, vector<1x32x288xf32>,
    %cst_152 = arith.constant 0.000000e+00 : f32
    %141 = vector.broadcast %cst_152 : f32 to vector<8x288xf32>
    %c0_153 = arith.constant 0 : index
    %c32_154 = arith.constant 32 : index
    %c0_155 = arith.constant 0 : index
    %142 = vector.load %arg12[%c0_153, %c32_154, %c0_155] : memref<2x40x288xf32, #tpu.memory_space<vmem>>, vector<1x8x288xf32>
    %143 = vector.shape_cast %142 : vector<1x8x288xf32> to vector<8x288xf32>
    %144 = vector.shape_cast %141 : vector<8x288xf32> to vector<1x8x288xf32>
    tpu.vector_store %arg12[%c0_153, %c32_154, %c0_155], %144 {strides = array<i32>} : memref<2x40x288xf32, #tpu.memory_space<vmem>>, vector<1x8x288xf32>,
    %c2_156 = arith.constant 2 : index
    %c0_157 = arith.constant 0 : index
    %c0_158 = arith.constant 0 : index
    %145 = vector.load %arg11[%c2_156, %c0_157, %c0_158] : memref<4x40x544xf32, #tpu.memory_space<vmem>>, vector<1x32x544xf32>
    %146 = vector.shape_cast %145 : vector<1x32x544xf32> to vector<32x544xf32>
    %c0_159 = arith.constant 0 : index
    %c0_160 = arith.constant 0 : index
    %c0_161 = arith.constant 0 : index
    %147 = vector.load %arg3[%c0_159, %c0_160, %c0_161] : memref<3x544x288xf32, #tpu.memory_space<vmem>>, vector<1x544x288xf32>
    %148 = vector.shape_cast %147 : vector<1x544x288xf32> to vector<544x288xf32>
    %cst_162 = arith.constant dense<0.000000e+00> : vector<32x288xf32>
    %149 = tpu.matmul %146, %148, %cst_162 {dimension_numbers = #tpu.dot_dimension_numbers<[1], [0], [0], [1], [0, 0, 1, 1], [], []>} : vector<32x544xf32>, vector<544x288xf32>, vector<32x288xf32> -> vector<32x288xf32>
    %c3_163 = arith.constant 3 : index
    %c0_164 = arith.constant 0 : index
    %c0_165 = arith.constant 0 : index
    %150 = vector.load %arg11[%c3_163, %c0_164, %c0_165] : memref<4x40x544xf32, #tpu.memory_space<vmem>>, vector<1x32x544xf32>
    %151 = vector.shape_cast %150 : vector<1x32x544xf32> to vector<32x544xf32>
    %c1_166 = arith.constant 1 : index
    %c0_167 = arith.constant 0 : index
    %c0_168 = arith.constant 0 : index
    %152 = vector.load %arg3[%c1_166, %c0_167, %c0_168] : memref<3x544x288xf32, #tpu.memory_space<vmem>>, vector<1x544x288xf32>
    %153 = vector.shape_cast %152 : vector<1x544x288xf32> to vector<544x288xf32>
    %cst_169 = arith.constant dense<0.000000e+00> : vector<32x288xf32>
    %154 = tpu.matmul %151, %153, %cst_169 {dimension_numbers = #tpu.dot_dimension_numbers<[1], [0], [0], [1], [0, 0, 1, 1], [], []>} : vector<32x544xf32>, vector<544x288xf32>, vector<32x288xf32> -> vector<32x288xf32>
    %155 = arith.addf %149, %154 : vector<32x288xf32>
    %c0_170 = arith.constant 0 : index
    %c8_171 = arith.constant 8 : index
    %c0_172 = arith.constant 0 : index
    %156 = vector.load %arg11[%c0_170, %c8_171, %c0_172] : memref<4x40x544xf32, #tpu.memory_space<vmem>>, vector<1x32x544xf32>
    %157 = vector.shape_cast %156 : vector<1x32x544xf32> to vector<32x544xf32>
    %c2_173 = arith.constant 2 : index
    %c0_174 = arith.constant 0 : index
    %c0_175 = arith.constant 0 : index
    %158 = vector.load %arg3[%c2_173, %c0_174, %c0_175] : memref<3x544x288xf32, #tpu.memory_space<vmem>>, vector<1x544x288xf32>
    %159 = vector.shape_cast %158 : vector<1x544x288xf32> to vector<544x288xf32>
    %cst_176 = arith.constant dense<0.000000e+00> : vector<32x288xf32>
    %160 = tpu.matmul %157, %159, %cst_176 {dimension_numbers = #tpu.dot_dimension_numbers<[1], [0], [0], [1], [0, 0, 1, 1], [], []>} : vector<32x544xf32>, vector<544x288xf32>, vector<32x288xf32> -> vector<32x288xf32>
    %161 = arith.addf %155, %160 : vector<32x288xf32>
    %c0_177 = arith.constant 0 : index
    %c0_178 = arith.constant 0 : index
    %162 = vector.load %arg6[%c0_177, %c0_178] : memref<1x288xf32, #tpu.memory_space<vmem>>, vector<1x288xf32>
    %163 = vector.broadcast %162 : vector<1x288xf32> to vector<32x288xf32>
    %164 = arith.addf %161, %163 : vector<32x288xf32>
    %cst_179 = arith.constant 0.000000e+00 : f32
    %165 = vector.broadcast %cst_179 : f32 to vector<32x288xf32>
    %166 = arith.maximumf %164, %165 : vector<32x288xf32>
    %c1_180 = arith.constant 1 : index
    %c0_181 = arith.constant 0 : index
    %c0_182 = arith.constant 0 : index
    %167 = vector.load %arg12[%c1_180, %c0_181, %c0_182] : memref<2x40x288xf32, #tpu.memory_space<vmem>>, vector<1x32x288xf32>
    %168 = vector.shape_cast %167 : vector<1x32x288xf32> to vector<32x288xf32>
    %169 = vector.shape_cast %166 : vector<32x288xf32> to vector<1x32x288xf32>
    tpu.vector_store %arg12[%c1_180, %c0_181, %c0_182], %169 {strides = array<i32>} : memref<2x40x288xf32, #tpu.memory_space<vmem>>, vector<1x32x288xf32>,
    %cst_183 = arith.constant 0.000000e+00 : f32
    %170 = vector.broadcast %cst_183 : f32 to vector<8x288xf32>
    %c1_184 = arith.constant 1 : index
    %c32_185 = arith.constant 32 : index
    %c0_186 = arith.constant 0 : index
    %171 = vector.load %arg12[%c1_184, %c32_185, %c0_186] : memref<2x40x288xf32, #tpu.memory_space<vmem>>, vector<1x8x288xf32>
    %172 = vector.shape_cast %171 : vector<1x8x288xf32> to vector<8x288xf32>
    %173 = vector.shape_cast %170 : vector<8x288xf32> to vector<1x8x288xf32>
    tpu.vector_store %arg12[%c1_184, %c32_185, %c0_186], %173 {strides = array<i32>} : memref<2x40x288xf32, #tpu.memory_space<vmem>>, vector<1x8x288xf32>,
    %c0_187 = arith.constant 0 : index
    %c0_188 = arith.constant 0 : index
    %c0_189 = arith.constant 0 : index
    %174 = vector.load %arg12[%c0_187, %c0_188, %c0_189] : memref<2x40x288xf32, #tpu.memory_space<vmem>>, vector<1x32x288xf32>
    %175 = vector.shape_cast %174 : vector<1x32x288xf32> to vector<32x288xf32>
    %c0_190 = arith.constant 0 : index
    %c0_191 = arith.constant 0 : index
    %c0_192 = arith.constant 0 : index
    %176 = vector.load %arg4[%c0_190, %c0_191, %c0_192] : memref<3x288x128xf32, #tpu.memory_space<vmem>>, vector<1x288x128xf32>
    %177 = vector.shape_cast %176 : vector<1x288x128xf32> to vector<288x128xf32>
    %cst_193 = arith.constant dense<0.000000e+00> : vector<32x128xf32>
    %178 = tpu.matmul %175, %177, %cst_193 {dimension_numbers = #tpu.dot_dimension_numbers<[1], [0], [0], [1], [0, 0, 1, 1], [], []>} : vector<32x288xf32>, vector<288x128xf32>, vector<32x128xf32> -> vector<32x128xf32>
    %c1_194 = arith.constant 1 : index
    %c0_195 = arith.constant 0 : index
    %c0_196 = arith.constant 0 : index
    %179 = vector.load %arg12[%c1_194, %c0_195, %c0_196] : memref<2x40x288xf32, #tpu.memory_space<vmem>>, vector<1x32x288xf32>
    %180 = vector.shape_cast %179 : vector<1x32x288xf32> to vector<32x288xf32>
    %c1_197 = arith.constant 1 : index
    %c0_198 = arith.constant 0 : index
    %c0_199 = arith.constant 0 : index
    %181 = vector.load %arg4[%c1_197, %c0_198, %c0_199] : memref<3x288x128xf32, #tpu.memory_space<vmem>>, vector<1x288x128xf32>
    %182 = vector.shape_cast %181 : vector<1x288x128xf32> to vector<288x128xf32>
    %cst_200 = arith.constant dense<0.000000e+00> : vector<32x128xf32>
    %183 = tpu.matmul %180, %182, %cst_200 {dimension_numbers = #tpu.dot_dimension_numbers<[1], [0], [0], [1], [0, 0, 1, 1], [], []>} : vector<32x288xf32>, vector<288x128xf32>, vector<32x128xf32> -> vector<32x128xf32>
    %184 = arith.addf %178, %183 : vector<32x128xf32>
    %c0_201 = arith.constant 0 : index
    %c8_202 = arith.constant 8 : index
    %c0_203 = arith.constant 0 : index
    %185 = vector.load %arg12[%c0_201, %c8_202, %c0_203] : memref<2x40x288xf32, #tpu.memory_space<vmem>>, vector<1x32x288xf32>
    %186 = vector.shape_cast %185 : vector<1x32x288xf32> to vector<32x288xf32>
    %c2_204 = arith.constant 2 : index
    %c0_205 = arith.constant 0 : index
    %c0_206 = arith.constant 0 : index
    %187 = vector.load %arg4[%c2_204, %c0_205, %c0_206] : memref<3x288x128xf32, #tpu.memory_space<vmem>>, vector<1x288x128xf32>
    %188 = vector.shape_cast %187 : vector<1x288x128xf32> to vector<288x128xf32>
    %cst_207 = arith.constant dense<0.000000e+00> : vector<32x128xf32>
    %189 = tpu.matmul %186, %188, %cst_207 {dimension_numbers = #tpu.dot_dimension_numbers<[1], [0], [0], [1], [0, 0, 1, 1], [], []>} : vector<32x288xf32>, vector<288x128xf32>, vector<32x128xf32> -> vector<32x128xf32>
    %190 = arith.addf %184, %189 : vector<32x128xf32>
    %c0_208 = arith.constant 0 : index
    %c0_209 = arith.constant 0 : index
    %191 = vector.load %arg7[%c0_208, %c0_209] : memref<1x128xf32, #tpu.memory_space<vmem>>, vector<1x128xf32>
    %192 = vector.broadcast %191 : vector<1x128xf32> to vector<32x128xf32>
    %193 = arith.addf %190, %192 : vector<32x128xf32>
    %cst_210 = arith.constant 0.000000e+00 : f32
    %194 = vector.broadcast %cst_210 : f32 to vector<32x128xf32>
    %195 = arith.maximumf %193, %194 : vector<32x128xf32>
    %c0_211 = arith.constant 0 : index
    %c0_212 = arith.constant 0 : index
    %196 = vector.load %arg13[%c0_211, %c0_212] : memref<32x128xf32, #tpu.memory_space<vmem>>, vector<32x128xf32>
    tpu.vector_store %arg13[%c0_211, %c0_212], %195 {strides = array<i32>} : memref<32x128xf32, #tpu.memory_space<vmem>>, vector<32x128xf32>,
    %c0_213 = arith.constant 0 : index
    %c0_214 = arith.constant 0 : index
    %197 = vector.load %arg13[%c0_213, %c0_214] : memref<32x128xf32, #tpu.memory_space<vmem>>, vector<8x128xf32>
    %c0_215 = arith.constant 0 : index
    %c0_216 = arith.constant 0 : index
    %c0_217 = arith.constant 0 : index
    %198 = vector.load %arg8[%c0_215, %c0_216, %c0_217] : memref<4x128x128xf32, #tpu.memory_space<vmem>>, vector<1x128x128xf32>
    %199 = vector.shape_cast %198 : vector<1x128x128xf32> to vector<128x128xf32>
    %cst_218 = arith.constant dense<0.000000e+00> : vector<8x128xf32>
    %200 = tpu.matmul %197, %199, %cst_218 {dimension_numbers = #tpu.dot_dimension_numbers<[1], [0], [0], [1], [0, 0, 1, 1], [], []>} : vector<8x128xf32>, vector<128x128xf32>, vector<8x128xf32> -> vector<8x128xf32>
    %c8_219 = arith.constant 8 : index
    %c0_220 = arith.constant 0 : index
    %201 = vector.load %arg13[%c8_219, %c0_220] : memref<32x128xf32, #tpu.memory_space<vmem>>, vector<8x128xf32>
    %c1_221 = arith.constant 1 : index
    %c0_222 = arith.constant 0 : index
    %c0_223 = arith.constant 0 : index
    %202 = vector.load %arg8[%c1_221, %c0_222, %c0_223] : memref<4x128x128xf32, #tpu.memory_space<vmem>>, vector<1x128x128xf32>
    %203 = vector.shape_cast %202 : vector<1x128x128xf32> to vector<128x128xf32>
    %cst_224 = arith.constant dense<0.000000e+00> : vector<8x128xf32>
    %204 = tpu.matmul %201, %203, %cst_224 {dimension_numbers = #tpu.dot_dimension_numbers<[1], [0], [0], [1], [0, 0, 1, 1], [], []>} : vector<8x128xf32>, vector<128x128xf32>, vector<8x128xf32> -> vector<8x128xf32>
    %205 = arith.addf %200, %204 : vector<8x128xf32>
    %c16 = arith.constant 16 : index
    %c0_225 = arith.constant 0 : index
    %206 = vector.load %arg13[%c16, %c0_225] : memref<32x128xf32, #tpu.memory_space<vmem>>, vector<8x128xf32>
    %c2_226 = arith.constant 2 : index
    %c0_227 = arith.constant 0 : index
    %c0_228 = arith.constant 0 : index
    %207 = vector.load %arg8[%c2_226, %c0_227, %c0_228] : memref<4x128x128xf32, #tpu.memory_space<vmem>>, vector<1x128x128xf32>
    %208 = vector.shape_cast %207 : vector<1x128x128xf32> to vector<128x128xf32>
    %cst_229 = arith.constant dense<0.000000e+00> : vector<8x128xf32>
    %209 = tpu.matmul %206, %208, %cst_229 {dimension_numbers = #tpu.dot_dimension_numbers<[1], [0], [0], [1], [0, 0, 1, 1], [], []>} : vector<8x128xf32>, vector<128x128xf32>, vector<8x128xf32> -> vector<8x128xf32>
    %210 = arith.addf %205, %209 : vector<8x128xf32>
    %c24 = arith.constant 24 : index
    %c0_230 = arith.constant 0 : index
    %211 = vector.load %arg13[%c24, %c0_230] : memref<32x128xf32, #tpu.memory_space<vmem>>, vector<8x128xf32>
    %c3_231 = arith.constant 3 : index
    %c0_232 = arith.constant 0 : index
    %c0_233 = arith.constant 0 : index
    %212 = vector.load %arg8[%c3_231, %c0_232, %c0_233] : memref<4x128x128xf32, #tpu.memory_space<vmem>>, vector<1x128x128xf32>
    %213 = vector.shape_cast %212 : vector<1x128x128xf32> to vector<128x128xf32>
    %cst_234 = arith.constant dense<0.000000e+00> : vector<8x128xf32>
    %214 = tpu.matmul %211, %213, %cst_234 {dimension_numbers = #tpu.dot_dimension_numbers<[1], [0], [0], [1], [0, 0, 1, 1], [], []>} : vector<8x128xf32>, vector<128x128xf32>, vector<8x128xf32> -> vector<8x128xf32>
    %215 = arith.addf %210, %214 : vector<8x128xf32>
    %c0_235 = arith.constant 0 : index
    %c0_236 = arith.constant 0 : index
    %216 = vector.load %arg9[%c0_235, %c0_236] : memref<1x128xf32, #tpu.memory_space<vmem>>, vector<1x128xf32>
    %217 = vector.broadcast %216 : vector<1x128xf32> to vector<8x128xf32>
    %218 = arith.addf %215, %217 : vector<8x128xf32>
    %c0_237 = arith.constant 0 : index
    %c0_238 = arith.constant 0 : index
    %c0_239 = arith.constant 0 : index
    %219 = vector.load %arg10[%c0_237, %c0_238, %c0_239] : memref<1x8x128xf32, #tpu.memory_space<vmem>>, vector<1x8x128xf32>
    %220 = vector.shape_cast %219 : vector<1x8x128xf32> to vector<8x128xf32>
    %221 = vector.shape_cast %218 : vector<8x128xf32> to vector<1x8x128xf32>
    tpu.vector_store %arg10[%c0_237, %c0_238, %c0_239], %221 {strides = array<i32>} : memref<1x8x128xf32, #tpu.memory_space<vmem>>, vector<1x8x128xf32>,
    return
  }
  func.func @transform_0(%arg0: i32) -> (i32, i32, i32, i32) {
    %c0_i32 = arith.constant 0 : i32
    %c0_i32_0 = arith.constant 0 : i32
    %c0_i32_1 = arith.constant 0 : i32
    %c0_i32_2 = arith.constant 0 : i32
    return %arg0, %c0_i32, %c0_i32_0, %c0_i32_1 : i32, i32, i32, i32
  }
  func.func @transform_1(%arg0: i32) -> (i32, i32, i32) {
    %c0_i32 = arith.constant 0 : i32
    %c0_i32_0 = arith.constant 0 : i32
    %c0_i32_1 = arith.constant 0 : i32
    %c0_i32_2 = arith.constant 0 : i32
    return %c0_i32, %c0_i32_0, %c0_i32_1 : i32, i32, i32
  }
  func.func @transform_2(%arg0: i32) -> (i32, i32, i32) {
    %c0_i32 = arith.constant 0 : i32
    %c0_i32_0 = arith.constant 0 : i32
    %c0_i32_1 = arith.constant 0 : i32
    %c0_i32_2 = arith.constant 0 : i32
    return %c0_i32, %c0_i32_0, %c0_i32_1 : i32, i32, i32
  }
  func.func @transform_3(%arg0: i32) -> (i32, i32, i32) {
    %c0_i32 = arith.constant 0 : i32
    %c0_i32_0 = arith.constant 0 : i32
    %c0_i32_1 = arith.constant 0 : i32
    %c0_i32_2 = arith.constant 0 : i32
    return %c0_i32, %c0_i32_0, %c0_i32_1 : i32, i32, i32
  }
  func.func @transform_4(%arg0: i32) -> (i32, i32) {
    %c0_i32 = arith.constant 0 : i32
    %c0_i32_0 = arith.constant 0 : i32
    %c0_i32_1 = arith.constant 0 : i32
    return %c0_i32, %c0_i32_0 : i32, i32
  }
  func.func @transform_5(%arg0: i32) -> (i32, i32) {
    %c0_i32 = arith.constant 0 : i32
    %c0_i32_0 = arith.constant 0 : i32
    %c0_i32_1 = arith.constant 0 : i32
    return %c0_i32, %c0_i32_0 : i32, i32
  }
  func.func @transform_6(%arg0: i32) -> (i32, i32) {
    %c0_i32 = arith.constant 0 : i32
    %c0_i32_0 = arith.constant 0 : i32
    %c0_i32_1 = arith.constant 0 : i32
    return %c0_i32, %c0_i32_0 : i32, i32
  }
  func.func @transform_7(%arg0: i32) -> (i32, i32, i32) {
    %c0_i32 = arith.constant 0 : i32
    %c0_i32_0 = arith.constant 0 : i32
    %c0_i32_1 = arith.constant 0 : i32
    %c0_i32_2 = arith.constant 0 : i32
    return %c0_i32, %c0_i32_0, %c0_i32_1 : i32, i32, i32
  }
  func.func @transform_8(%arg0: i32) -> (i32, i32) {
    %c0_i32 = arith.constant 0 : i32
    %c0_i32_0 = arith.constant 0 : i32
    %c0_i32_1 = arith.constant 0 : i32
    return %c0_i32, %c0_i32_0 : i32, i32
  }
  func.func @transform_9(%arg0: i32) -> (i32, i32, i32) {
    %c0_i32 = arith.constant 0 : i32
    %c0_i32_0 = arith.constant 0 : i32
    %c0_i32_1 = arith.constant 0 : i32
    return %arg0, %c0_i32, %c0_i32_0 : i32, i32, i32
  }
}

</mosaic_0001>

<bundles_post_ra>
// kernel: image_encoder_forward.1
= control target key start
LH: loop header
LB: loop body
LE: loop exit
PB: predicated region body
PF: predicated region fallthrough
CT: control target
= control target key end

     0   :  { %s15481_s30 = smov 0   ;;  %s21899_s0 = inlined_call_operand.vmem [shape: f32[2,8,40,33], index: 0, kind: input, shape index: {}]   ;;  %s21900_s1 = inlined_call_operand.vmem [shape: f32[3,33,544], index: 1, kind: input, shape index: {}]   ;;  %s21901_s2 = inlined_call_operand.vmem [shape: f32[3,544,288], index: 2, kind: input, shape index: {}]   ;;  %s21902_s3 = inlined_call_operand.vmem [shape: f32[3,288,128], index: 3, kind: input, shape index: {}]   ;;  %s21903_s4 = inlined_call_operand.vmem [shape: f32[1,544], index: 4, kind: input, shape index: {}]   ;;  %s21904_s5 = inlined_call_operand.vmem [shape: f32[1,288], index: 5, kind: input, shape index: {}]   ;;  %s21905_s6 = inlined_call_operand.vmem [shape: f32[1,128], index: 6, kind: input, shape index: {}]   ;;  %s21906_s7 = inlined_call_operand.vmem [shape: f32[4,128,128], index: 7, kind: input, shape index: {}]   ;;  %s21907_s8 = inlined_call_operand.vmem [shape: f32[1,128], index: 8, kind: input, shape index: {}]   ;;  %s21908_s9 = inlined_call_operand.vmem [shape: f32[2,8,128], index: 9, kind: output, shape index: {}]  }
   0x1 LB: > { %s10439_s10 = sadd.s32 4294967295, %s15426_s30   ;;  %p10443_p0 = scmp.ge.s32.totalorder %s15426_s30, 1  ;;  %s15426_s30 = sphi %s15481_s30, %s19_s30  }
   0x2   : > { %p287_p1 = scmp.lt.s32.totalorder %s15426_s30, 3 }
   0x4   : > { %p288_p2 = pnand %p10443_p0, %p287_p1 }
   0x5   : > { %v10451_v0 = vld [vmem:[%s21900_s1 + $0xd0] sm:$0xff] (!%p288_p2)  ;;  %v10456_v1 = vld [vmem:[%s21900_s1 + $0xf8] sm:$0xff] (!%p288_p2)  ;;  %v10453_v2 = vld [vmem:[%s21900_s1 + $0xe0] sm:$0xff] (!%p288_p2)  ;;  %p15498_p3 = scmp.lt.s32.totalorder (!%p288_p2), %s10439_s10, 1  ;;  %v15428_v7 = vmov (!%p288_p2), 0.0   ;;  %vm404_vm0 = vcmask (!%p288_p2), 1040384  }
   0x6   : > { %291 = sbr.rel (%p288_p2) target bundleno = 1927 (0x787), region = 56  ;;  %v15502_v3 = vpack.c.bf16 (!%p288_p2), %v10456_v1, %v10451_v0  ;;  %v10458_v4 = vld [vmem:[%s21900_s1 + $0x108] sm:$0xff] (!%p288_p2)  ;;  %v10455_v6 = vld [vmem:[%s21900_s1 + $0xf0] sm:$0xff] (!%p288_p2)  ;;  %484 = vmatprep.mubr.f32.mxu0 (!%p288_p2), %v15428_v7  ;;  %1402 = vst [vmem:[#allocation2 + $0xa0] sm:$0xff] (!%p288_p2), %v15428_v7  ;;  %579 = vmatprep.mubr.f32.mxu1 (!%p288_p2), %v15428_v7  ;;  %v10452_v10 = vld [vmem:[%s21900_s1 + $0xd8] sm:$0xff] (!%p288_p2)  ;;  %vm391_vm1 = vcmask (!%p288_p2), 269312  }
   0x7   : > { %v10450_v5 = vld [vmem:[%s21900_s1 + $0xc8] sm:$0xff] (!%p288_p2)  ;;  %v15516_v8 = vpack.c.bf16 (!%p288_p2), %v10458_v4, %v10453_v2  ;;  %v10457_v11 = vld [vmem:[%s21900_s1 + $0x100] sm:$0xff] (!%p288_p2)  ;;  %v10463_v15 = vld [vmem:[%s21900_s1 + $0x130] sm:$0xff] (!%p288_p2)  ;;  %vm1385_vm2 = vcmask (!%p288_p2), 261120   ;;  %vm15430_vm3 = vmmov (!%p288_p2), 0  }
   0x8   : > { %v15518_v9 = vpack.c.bf16 (!%p288_p2), %v10455_v6, %v10450_v5  ;;  %v10461_v12 = vld [vmem:[%s21900_s1 + $0x120] sm:$0xff] (!%p288_p2)  ;;  %13257 = vmatprep.subr.bf16.mxu0 (!%p288_p2), %v15502_v3  ;;  %v15534_v13 = vpack.c.bf16 (!%p288_p2), %v10457_v11, %v10452_v10  ;;  %v10466_v14 = vld [vmem:[%s21900_s1 + $0x148] sm:$0xff] (!%p288_p2)  ;;  %v10468_v16 = vld [vmem:[%s21900_s1 + $0x158] sm:$0xff] (!%p288_p2) }
   0x9   : > { %15008 = vmatprep.subr.bf16.mxu1 (!%p288_p2), %v15516_v8  ;;  %v15547_v17 = vpack.c.bf16 (!%p288_p2), %v10466_v14, %v10461_v12  ;;  %v15549_v18 = vpack.c.bf16 (!%p288_p2), %v10468_v16, %v10463_v15  ;;  %v10460_v19 = vld [vmem:[%s21900_s1 + $0x118] sm:$0xff] (!%p288_p2)  ;;  %v10465_v20 = vld [vmem:[%s21900_s1 + $0x140] sm:$0xff] (!%p288_p2)  ;;  %v10462_v21 = vld [vmem:[%s21900_s1 + $0x128] sm:$0xff] (!%p288_p2) }
   0xa   : > { %13259 = vmatpush1.bf16.msra.mxu0 (!%p288_p2), %v15518_v9  ;;  %15011 = vmatpush1.bf16.msra.mxu1 (!%p288_p2), %v15534_v13  ;;  %v15562_v22 = vpack.c.bf16 (!%p288_p2), %v10465_v20, %v10460_v19  ;;  %v10467_v23 = vld [vmem:[%s21900_s1 + $0x150] sm:$0xff] (!%p288_p2)  ;;  %v10473_v26 = vld [vmem:[%s21900_s1 + $0x180] sm:$0x1] (!%p288_p2)  ;;  %v338_v27 = vld [vmem:[%s21900_s1 + $0x18] sm:$0xff] (!%p288_p2) }
   0xb   : > { %13261 = vmatprep.subr.bf16.mxu0 (!%p288_p2), %v15547_v17  ;;  %15009 = vmatprep.subr.bf16.mxu1 (!%p288_p2), %v15549_v18  ;;  %v15569_v24 = vpack.c.bf16 (!%p288_p2), %v10467_v23, %v10462_v21  ;;  %v10471_v25 = vld [vmem:[%s21900_s1 + $0x170] sm:$0x1] (!%p288_p2)  ;;  %v343_v28 = vld [vmem:[%s21900_s1 + $0x40] sm:$0xff] (!%p288_p2)  ;;  %v10470_v29 = vld [vmem:[%s21900_s1 + $0x168] sm:$0x1] (!%p288_p2) }
   0xc   : > { %v10472_v30 = vld [vmem:[%s21900_s1 + $0x178] sm:$0x1] (!%p288_p2)  ;;  %v337_v32 = vld [vmem:[%s21900_s1 + $0x10] sm:$0xff] (!%p288_p2)  ;;  %v15610_v35 = vpack.c.bf16 (!%p288_p2), %v343_v28, %v338_v27  ;;  %v348_v36 = vld [vmem:[%s21900_s1 + $0x68] sm:$0xff] (!%p288_p2) }
   0xd   : > { %s21911_s10 = smov (!%p15498_p3, %s10439_s10), 1  ;;  %v342_v33 = vld [vmem:[%s21900_s1 + $0x38] sm:$0xff]  ;;  %v353_v37 = vld [vmem:[%s21900_s1 + $0x90] sm:$0xff]  ;;  %v347_v39 = vld [vmem:[%s21900_s1 + $0x60] sm:$0xff] }
   0xe   : > { %s15370_s23 = smul.u32 320, %s21911_s10  ;;  %13263 = vmatpush1.bf16.msra.mxu0 %v15562_v22  ;;  %15012 = vmatpush1.bf16.msra.mxu1 %v15569_v24  ;;  %v15622_v38 = vpack.c.bf16 %v342_v33, %v337_v32  ;;  %v352_v40 = vld [vmem:[%s21900_s1 + $0x88] sm:$0xff]  ;;  %v15638_v42 = vpack.c.bf16 %v353_v37, %v348_v36  ;;  %v358_v45 = vld [vmem:[%s21900_s1 + $0xb8] sm:$0x1]  ;;  %v10459_v47 = vld [vmem:[%s21900_s1 + $0x110] sm:$0xff]  ;;  %s10445_s28 = sshll.u32 %s21911_s10, 3 }
   0xf   : > { %10475 = vmatprep.subr.msk.mxu0 %vm404_vm0, %v10471_v25  ;;  %15010 = vmatprep.subr.msk.mxu1 %vm404_vm0, %v10473_v26  ;;  %v15645_v43 = vpack.c.bf16 %v352_v40, %v347_v39  ;;  %v10454_v46 = vld [vmem:[%s21900_s1 + $0xe8] sm:$0xff]  ;;  %v10521_v49 = vld [vmem:[%s21900_s1 + $0x1d0] sm:$0xff]  ;;  %v10515_v51 = vld [vmem:[%s21900_s1 + $0x1a0] sm:$0xff]  ;;  %s330_s15 = scalar_lea.vmem %s21908_s9, %s10445_s28 }
  0x10   : > { %s15580_s13 = scalar_lea.vmem %s21899_s0, %s15370_s23  ;;  %v10516_v48 = vld [vmem:[%s21900_s1 + $0x1a8] sm:$0xff]  ;;  %v357_v50 = vld [vmem:[%s21900_s1 + $0xb0] sm:$0x1]  ;;  %v15692_v54 = vpack.c.bf16 %v10459_v47, %v10454_v46  ;;  %v10464_v56 = vld [vmem:[%s21900_s1 + $0x138] sm:$0xff] }
  0x11   : > { %v15599_v31 = vld [vmem:[%s15580_s13 + $0x28] sm:$0xff]  ;;  %v15608_v34 = vld [vmem:[%s15580_s13 + $0x30] sm:$0xff]  ;;  %v15636_v41 = vld [vmem:[%s15580_s13 + $0x38] sm:$0xff]  ;;  %v15696_v55 = vpack.c.bf16 %v10521_v49, %v10516_v48 }
  0x12   : > { %10476 = vmatpush1.msk.msra.mxu0 %vm404_vm0, %v10470_v29  ;;  %15013 = vmatpush1.msk.msra.mxu1 %vm404_vm0, %v10472_v30  ;;  %v15653_v44 = vld [vmem:[%s15580_s13 + $0x40] sm:$0xff]  ;;  %v10520_v52 = vld [vmem:[%s21900_s1 + $0x1c8] sm:$0xff]  ;;  %v10526_v59 = vld [vmem:[%s21900_s1 + $0x1f8] sm:$0xff] }
  0x13   : > { %10477 = vmatmul.mubr.msk.f32.vlgmr.msra.gmra.mrb[0].mxu0 %vm391_vm1, %v15599_v31  ;;  %13265 = vmatprep.subr.bf16.mxu0 %v15516_v8  ;;  %v15690_v53 = vld [vmem:[%s15580_s13] sm:$0xff]  ;;  %v15707_v58 = vpack.c.bf16 %v10520_v52, %v10515_v51  ;;  %v10525_v61 = vld [vmem:[%s21900_s1 + $0x1f0] sm:$0xff]  ;;  %v10530_v62 = vld [vmem:[%s21900_s1 + $0x218] sm:$0xff] }
  0x14   : > { %10484 = vmatmul.mubr.msk.f32.vlgmr.msra.gmra.mrb[0].mxu1 %vm391_vm1, %v15608_v34  ;;  %13267 = vmatpush1.bf16.msra.mxu0 %v15534_v13  ;;  %v10469_v57 = vld [vmem:[%s21900_s1 + $0x160] sm:$0xff]  ;;  %v15727_v63 = vld [vmem:[%s15580_s13 + $0x8] sm:$0xff]  ;;  %v15737_v2 = vpack.c.bf16 %v10530_v62, %v10525_v61  ;;  %v15745_v4 = vld [vmem:[%s15580_s13 + $0x10] sm:$0xff] }
  0x15   : > { %13289 = vmatprep.subr.bf16.mxu1 %v15610_v35  ;;  %490 = vmatprep.mubr.f32.mxu0 %v15428_v7  ;;  %v10531_v60 = vld [vmem:[%s21900_s1 + $0x220] sm:$0xff]  ;;  %v15729_v0 = vpack.c.bf16 %v10469_v57, %v10464_v56  ;;  %v10474_v5 = vld [vmem:[%s21900_s1 + $0x188] sm:$0x1]  ;;  %v341_v10 = vld [vmem:[%s21900_s1 + $0x30] sm:$0xff] }
  0x16   : > { %585 = vmatprep.mubr.f32.mxu1 %v15428_v7  ;;  %13291 = vmatpush1.bf16.msra.mxu1 %v15622_v38  ;;  %v15732_v1 = vpack.c.bf16 %v10531_v60, %v10526_v59  ;;  %v336_v6 = vld [vmem:[%s21900_s1 + $0x8] sm:$0xff]  ;;  %v335_v11 = vld [vmem:[%s21900_s1] sm:$0xff]  ;;  %v346_v16 = vld [vmem:[%s21900_s1 + $0x58] sm:$0xff] }
  0x17   : > { %10478 = vmatmul.mubr.msk.f32.gmra.mrb[2].mxu0 %vm391_vm1, %v15608_v34  ;;  %13269 = vmatprep.subr.bf16.mxu0 %v15549_v18  ;;  %v340_v12 = vld [vmem:[%s21900_s1 + $0x28] sm:$0xff]  ;;  %v10535_v15 = vld [vmem:[%s21900_s1 + $0x240] sm:$0x1]  ;;  %v15784_v20 = vld [vmem:[%s15580_s13 + $0x18] sm:$0xff]  ;;  %v15786_v21 = vpack.c.bf16 %v341_v10, %v336_v6 }
  0x18   : > { %10485 = vmatmul.mubr.msk.f32.gmra.mrb[2].mxu1 %vm391_vm1, %v15636_v41  ;;  %13293 = vmatprep.subr.bf16.mxu1 %v15638_v42  ;;  %v10536_v14 = vld [vmem:[%s21900_s1 + $0x248] sm:$0x1]  ;;  %v351_v19 = vld [vmem:[%s21900_s1 + $0x80] sm:$0xff]  ;;  %v15788_v23 = vpack.c.bf16 %v340_v12, %v335_v11  ;;  %v350_v27 = vld [vmem:[%s21900_s1 + $0x78] sm:$0xff] }
  0x19   : > { %496 = vmatprep.mubr.f32.mxu0 %v15428_v7  ;;  %13271 = vmatpush1.bf16.msra.mxu0 %v15569_v24  ;;  %v15792_v25 = vpack.c.bf16 %v351_v19, %v346_v16  ;;  %v15807_v28 = vld [vmem:[%s15580_s13 + $0x50] sm:$0xff]  ;;  %v344_v32 = vld [vmem:[%s21900_s1 + $0x48] sm:$0xff]  ;;  %v15832_v33 = vld [vmem:[%s15580_s13 + $0x58] sm:$0xff] }
  0x1a   : > { %591 = vmatprep.mubr.f32.mxu1 %v15428_v7  ;;  %13295 = vmatpush1.bf16.msra.mxu1 %v15645_v43  ;;  %v349_v37 = vld [vmem:[%s21900_s1 + $0x70] sm:$0xff]  ;;  %v354_v39 = vld [vmem:[%s21900_s1 + $0x98] sm:$0xff]  ;;  %v15854_v40 = vld [vmem:[%s15580_s13 + $0x60] sm:$0xff] }
  0x1b   : > { %10479 = vmatmul.mubr.msk.f32.gmra.mrb[4].mxu0 %vm391_vm1, %v15636_v41  ;;  %10498 = vmatprep.subr.msk.mxu1 %vm404_vm0, %v358_v45  ;;  %v15871_v45 = vld [vmem:[%s15580_s13 + $0x68] sm:$0xff]  ;;  %v359_v47 = vld [vmem:[%s21900_s1 + $0xc0] sm:$0x1]  ;;  %v10514_v48 = vld [vmem:[%s21900_s1 + $0x198] sm:$0xff] }
  0x1c   : > { %10486 = vmatmul.mubr.msk.f32.gmra.mrb[4].mxu1 %vm391_vm1, %v15653_v44  ;;  %502 = vmatprep.mubr.f32.mxu0 %v15428_v7  ;;  %v10583_v46 = vld [vmem:[%s21900_s1 + $0x168] sm:$0x1]  ;;  %v10519_v49 = vld [vmem:[%s21900_s1 + $0x1c0] sm:$0xff]  ;;  %v10513_v56 = vld [vmem:[%s21900_s1 + $0x190] sm:$0xff] }
  0x1d   : > { %10481 = vmatprep.subr.msk.mxu0 %vm404_vm0, %v10473_v26  ;;  %863 = vmatprep.mubr.f32.mxu1 %v15428_v7  ;;  %v345_v26 = vld [vmem:[%s21900_s1 + $0x50] sm:$0xff]  ;;  %v15900_v51 = vpack.c.bf16 %v10519_v49, %v10514_v48  ;;  %v15911_v52 = vld [vmem:[%s15580_s13 + $0x80] sm:$0xff]  ;;  %v10524_v57 = vld [vmem:[%s21900_s1 + $0x1e8] sm:$0xff] }
  0x1e   : > { %10482 = vmatpush1.msk.msra.mxu0 %vm404_vm0, %v10472_v30  ;;  %10499 = vmatpush1.msk.msra.mxu1 %vm404_vm0, %v357_v50  ;;  %v15811_v29 = vpack.c.bf16 %v350_v27, %v345_v26  ;;  %v356_v30 = vld [vmem:[%s21900_s1 + $0xa8] sm:$0x1]  ;;  %v15896_v50 = vld [vmem:[%s15580_s13 + $0x78] sm:$0xff]  ;;  %v10529_v59 = vld [vmem:[%s21900_s1 + $0x210] sm:$0xff] }
  0x1f   : > { %10480 = vmatmul.mubr.msk.f32.gmra.mrb[6].mxu0 %vm391_vm1, %v15653_v44  ;;  %13273 = vmatprep.subr.bf16.mxu0 %v15692_v54  ;;  %v10586_v60 = vld [vmem:[%s21900_s1 + $0x180] sm:$0x1]  ;;  %v15941_v61 = vld [vmem:[%s15580_s13 + $0x88] sm:$0xff]  ;;  %v15943_v62 = vpack.c.bf16 %v10529_v59, %v10524_v57  ;;  %v10517_v10 = vld [vmem:[%s21900_s1 + $0x1b0] sm:$0xff] }
  0x20   : > { %10500 = vmatmul.mubr.msk.f32.vlgmr.msra.gmra.mrb[6].mxu1 %vm391_vm1, %v15690_v53  ;;  %573 = vmatprep.mubr.f32.mxu0 %v15428_v7  ;;  %v10522_v11 = vld [vmem:[%s21900_s1 + $0x1d8] sm:$0xff]  ;;  %v10532_v12 = vld [vmem:[%s21900_s1 + $0x228] sm:$0xff]  ;;  %v10537_v19 = vld [vmem:[%s21900_s1 + $0x250] sm:$0x1] }
  0x21   : > { %869 = vmatprep.mubr.f32.mxu1 %v15428_v7  ;;  %13313 = vmatprep.subr.bf16.mxu1 %v15696_v55  ;;  %v1431_v26 = vld [vmem:[%s21900_s1 + $0xa0] sm:$0x1]  ;;  %v1434_v27 = vld [vmem:[%s21900_s1 + $0xb8] sm:$0x1] }
  0x22   : > { %13315 = vmatpush1.bf16.msra.mxu1 %v15707_v58  ;;  %v10699_v57 = vld [vmem:[%s21900_s1 + $0x180] sm:$0x1]  ;;  %v16253_v59 = vld [vmem:[%s15580_s13 + $0xd8] sm:$0xff] }
  0x23   : > { %10483 = vmatmul.mubr.msk.f32.vlgmr.msra.gmra.mrb[8].mxu0 %vm391_vm1, %v15599_v31  ;;  %13317 = vmatprep.subr.bf16.mxu1 %v15732_v1 }
  0x24   : > { %13275 = vmatpush3.bf16.msra.mxu0 %v15692_v54  ;;  %10501 = vmatmul.mubr.msk.f32.gmra.mrb[0].mxu1 %vm391_vm1, %v15727_v63 }
  0x25   : > { %13277 = vmatprep.subr.bf16.mxu0 %v15729_v0  ;;  %875 = vmatprep.mubr.f32.mxu1 %v15428_v7 }
  0x26   : > { %12808 = vmatprep.mubr.msk.f32.mxu0 %vm391_vm1, %v15599_v31  ;;  %13319 = vmatpush1.bf16.msra.mxu1 %v15737_v2  ;;  %v339_v31 = vld [vmem:[%s21900_s1 + $0x20] sm:$0xff] }
  0x27   : > { %10544 = vmatprep.subr.msk.mxu1 %vm404_vm0, %v10536_v14  ;;  %v15840_v36 = vpack.c.bf16 %v344_v32, %v339_v31  ;;  %v10533_v14 = vld [vmem:[%s21900_s1 + $0x230] sm:$0x1]  ;;  %v16147_v32 = vld [vmem:[%s15580_s13 + $0xa8] sm:$0xff] }
  0x28   : > { %13279 = vmatpush3.bf16.msra.mxu0 %v15729_v0  ;;  %10502 = vmatmul.mubr.msk.f32.gmra.mrb[2].mxu1 %vm391_vm1, %v15745_v4  ;;  %v10646_v31 = vld [vmem:[%s21900_s1 + $0x230] sm:$0x1] }
  0x29   : > { %12806 = vmatprep.subr.msk.mxu0 %vm404_vm0, %v10474_v5  ;;  %881 = vmatprep.mubr.f32.mxu1 %v15428_v7 }
  0x2a   : > { %10545 = vmatpush1.msk.msra.mxu1 %vm404_vm0, %v10535_v15  ;;  %v15997_v15 = vpack.c.bf16 %v10522_v11, %v10517_v10  ;;  %v2504_v11 = vld [vmem:[%s21900_s1 + $0xa8] sm:$0x1] }
  0x2b   : > { %13329 = vmatprep.subr.bf16.mxu1 %v15502_v3 }
  0x2c   : > { %12807 = vmatpush3.msk.msra.mxu0 %vm404_vm0, %v10474_v5  ;;  %10503 = vmatmul.mubr.msk.f32.gmra.mrb[4].mxu1 %vm391_vm1, %v15784_v20  ;;  %v10585_v5 = vld [vmem:[%s21900_s1 + $0x178] sm:$0x1] }
  0x2d   : > { %13281 = vmatprep.subr.bf16.mxu0 %v15786_v21  ;;  %12809 = vmatmul.mubr.msk.f32.vlgmr.msra.gmra.mrb[10].mxu0 %vm391_vm1, %v15608_v34  ;;  %v355_v34 = vld [vmem:[%s21900_s1 + $0xa0] sm:$0x1] }
  0x2e   : > { %13283 = vmatpush1.bf16.msra.mxu0 %v15788_v23  ;;  %1184 = vmatprep.mubr.f32.mxu1 %v15428_v7 }
  0x2f   : > { %13285 = vmatprep.subr.bf16.mxu0 %v15792_v25  ;;  %12811 = vmatprep.mubr.msk.f32.mxu0 %vm391_vm1, %v15636_v41  ;;  %v15857_v41 = vpack.c.bf16 %v354_v39, %v349_v37  ;;  %v10795_v37 = vld [vmem:[%s21900_s1 + $0xf8] sm:$0xff]  ;;  %v10684_v39 = vld [vmem:[%s21900_s1 + $0x108] sm:$0xff] }
  0x30   : > { %10546 = vmatmul.mubr.msk.f32.vlgmr.msra.gmra.mrb[6].mxu1 %vm391_vm1, %v15807_v28 }
  0x31   : > { %12812 = vmatmul.mubr.msk.f32.gmra.mrb[12].mxu0 %vm391_vm1, %v15653_v44  ;;  %1190 = vmatprep.mubr.f32.mxu1 %v15428_v7  ;;  %v10584_v44 = vld [vmem:[%s21900_s1 + $0x170] sm:$0x1] }
  0x32   : > { %13287 = vmatpush1.bf16.msra.mxu0 %v15811_v29  ;;  %774 = vmatprep.mubr.f32.mxu0 %v15428_v7 }
  0x33   : > { %10492 = vmatprep.subr.msk.mxu0 %vm404_vm0, %v356_v30  ;;  %13331 = vmatpush1.bf16.msra.mxu1 %v15518_v9  ;;  %v10647_v30 = vld [vmem:[%s21900_s1 + $0x238] sm:$0x1] }
  0x34   : > { %10547 = vmatmul.mubr.msk.f32.gmra.mrb[0].mxu1 %vm391_vm1, %v15832_v33  ;;  %13333 = vmatprep.subr.bf16.mxu1 %v15547_v17 }
  0x35   : > { %1196 = vmatprep.mubr.f32.mxu1 %v15428_v7 }
  0x36   : > { %10493 = vmatpush1.msk.msra.mxu0 %vm404_vm0, %v355_v34  ;;  %v16164_v34 = vld [vmem:[%s15580_s13 + $0xb8] sm:$0xff] }
  0x37   : > { %10494 = vmatmul.mubr.msk.f32.vlgmr.msra.gmra.mrb[0].mxu0 %vm391_vm1, %v15690_v53  ;;  %13297 = vmatprep.subr.bf16.mxu0 %v15840_v36 }
  0x38   : > { %13299 = vmatpush3.bf16.msra.mxu0 %v15840_v36  ;;  %10548 = vmatmul.mubr.msk.f32.gmra.mrb[2].mxu1 %vm391_vm1, %v15854_v40 }
  0x39   : > { %780 = vmatprep.mubr.f32.mxu0 %v15428_v7  ;;  %1202 = vmatprep.mubr.f32.mxu1 %v15428_v7 }
  0x3a   : > { %13335 = vmatpush1.bf16.msra.mxu1 %v15562_v22  ;;  %13301 = vmatprep.subr.bf16.mxu0 %v15857_v41 }
  0x3b   : > { %10495 = vmatmul.mubr.msk.f32.gmra.mrb[2].mxu0 %vm391_vm1, %v15727_v63  ;;  %10588 = vmatprep.subr.msk.mxu1 %vm404_vm0, %v10584_v44  ;;  %v10696_v44 = vld [vmem:[%s21900_s1 + $0x168] sm:$0x1] }
  0x3c   : > { %10549 = vmatmul.mubr.msk.f32.gmra.mrb[4].mxu1 %vm391_vm1, %v15871_v45  ;;  %786 = vmatprep.mubr.f32.mxu0 %v15428_v7 }
  0x3d   : > { %13303 = vmatpush3.bf16.msra.mxu0 %v15857_v41  ;;  %1557 = vmatprep.mubr.f32.mxu1 %v15428_v7 }
  0x3e   : > { %10589 = vmatpush1.msk.msra.mxu1 %vm404_vm0, %v10583_v46  ;;  %12822 = vmatprep.subr.msk.mxu0 %vm404_vm0, %v359_v47  ;;  %v10694_v46 = vld [vmem:[%s21900_s1 + $0x158] sm:$0xff] }
  0x3f   : > { %10496 = vmatmul.mubr.msk.f32.gmra.mrb[4].mxu0 %vm391_vm1, %v15745_v4  ;;  %13337 = vmatprep.subr.bf16.mxu1 %v15516_v8  ;;  %v10518_v8 = vld [vmem:[%s21900_s1 + $0x1b8] sm:$0xff] }
  0x40   : > { %10590 = vmatmul.mubr.msk.f32.vlgmr.msra.gmra.mrb[8].mxu1 %vm391_vm1, %v15896_v50  ;;  %792 = vmatprep.mubr.f32.mxu0 %v15428_v7 }
  0x41   : > { %12823 = vmatpush3.msk.msra.mxu0 %vm404_vm0, %v359_v47  ;;  %1563 = vmatprep.mubr.f32.mxu1 %v15428_v7  ;;  %v16223_v47 = vld [vmem:[%s15580_s13 + $0xc8] sm:$0xff] }
  0x42   : > { %13305 = vmatprep.subr.bf16.mxu0 %v15900_v51  ;;  %13339 = vmatpush1.bf16.msra.mxu1 %v15534_v13  ;;  %v15934_v13 = vpack.c.bf16 %v10518_v8, %v10513_v56  ;;  %v16239_v56 = vld [vmem:[%s15580_s13 + $0xd0] sm:$0xff] }
  0x43   : > { %10497 = vmatmul.mubr.msk.f32.gmra.mrb[6].mxu0 %vm391_vm1, %v15784_v20  ;;  %13341 = vmatprep.subr.bf16.mxu1 %v15549_v18  ;;  %v10523_v18 = vld [vmem:[%s21900_s1 + $0x1e0] sm:$0xff] }
  0x44   : > { %10591 = vmatmul.mubr.msk.f32.gmra.mrb[10].mxu1 %vm391_vm1, %v15911_v52  ;;  %12824 = vmatprep.mubr.msk.f32.mxu0 %vm391_vm1, %v15690_v53  ;;  %v10528_v53 = vld [vmem:[%s21900_s1 + $0x208] sm:$0xff] }
  0x45   : > { %1569 = vmatprep.mubr.f32.mxu1 %v15428_v7  ;;  %v15961_v6 = vpack.c.bf16 %v10528_v53, %v10523_v18  ;;  %v10793_v18 = vld [vmem:[%s21900_s1 + $0xe8] sm:$0xff]  ;;  %v10798_v53 = vld [vmem:[%s21900_s1 + $0x110] sm:$0xff] }
  0x46   : > { %13343 = vmatpush1.bf16.msra.mxu1 %v15569_v24  ;;  %v15967_v24 = vld [vmem:[%s15580_s13 + $0x90] sm:$0xff] }
  0x47   : > { %12825 = vmatmul.mubr.msk.f32.vlgmr.msra.gmra.mrb[10].mxu0 %vm391_vm1, %v15727_v63  ;;  %10594 = vmatprep.subr.msk.mxu1 %vm404_vm0, %v10586_v60  ;;  %v10534_v63 = vld [vmem:[%s21900_s1 + $0x238] sm:$0x1]  ;;  %v10675_v60 = vld [vmem:[%s15580_s13 + $0xe0] sm:$0xff] }
  0x48   : > { %13307 = vmatpush1.bf16.msra.mxu0 %v15934_v13  ;;  %10592 = vmatmul.mubr.msk.f32.gmra.mrb[12].mxu1 %vm391_vm1, %v15941_v61 }
  0x49   : > { %13309 = vmatprep.subr.bf16.mxu0 %v15943_v62  ;;  %12827 = vmatprep.mubr.msk.f32.mxu0 %vm391_vm1, %v15745_v4  ;;  %v10527_v4 = vld [vmem:[%s21900_s1 + $0x200] sm:$0xff] }
  0x4a   : > { %1575 = vmatprep.mubr.f32.mxu1 %v15428_v7  ;;  %10595 = vmatpush1.msk.msra.mxu1 %vm404_vm0, %v10585_v5  ;;  %v16000_v16 = vpack.c.bf16 %v10532_v12, %v10527_v4  ;;  %v16320_v5 = vld [vmem:[%s15580_s13 + $0x128] sm:$0xff]  ;;  %v3561_v12 = vld [vmem:[%s21900_s1 + $0x30] sm:$0xff] }
  0x4b   : > { %12828 = vmatmul.mubr.msk.f32.gmra.mrb[12].mxu0 %vm391_vm1, %v15784_v20  ;;  %13353 = vmatprep.subr.bf16.mxu1 %v15786_v21  ;;  %v1432_v20 = vld [vmem:[%s21900_s1 + $0xa8] sm:$0x1] }
  0x4c   : > { %13311 = vmatpush1.bf16.msra.mxu0 %v15961_v6  ;;  %10593 = vmatmul.mubr.msk.f32.gmra.mrb[14].mxu1 %vm391_vm1, %v15967_v24  ;;  %v3556_v4 = vld [vmem:[%s21900_s1 + $0x8] sm:$0xff] }
  0x4d   : > { %10538 = vmatprep.subr.msk.mxu0 %vm404_vm0, %v10534_v63  ;;  %1095 = vmatprep.mubr.f32.mxu0 %v15428_v7  ;;  %v10803_v63 = vld [vmem:[%s21900_s1 + $0x138] sm:$0xff] }
  0x4e   : > { %1646 = vmatprep.mubr.f32.mxu1 %v15428_v7 }
  0x50   : > { %10539 = vmatpush1.msk.msra.mxu0 %vm404_vm0, %v10533_v14  ;;  %10596 = vmatmul.mubr.msk.f32.vlgmr.msra.gmra.mrb[16].mxu1 %vm391_vm1, %v15896_v50  ;;  %v2486_v14 = vld [vmem:[%s21900_s1 + $0x18] sm:$0xff] }
  0x51   : > { %10540 = vmatmul.mubr.msk.f32.vlgmr.msra.gmra.mrb[0].mxu0 %vm391_vm1, %v15807_v28  ;;  %13321 = vmatprep.subr.bf16.mxu0 %v15997_v15 }
  0x52   : > { %13323 = vmatpush3.bf16.msra.mxu0 %v15997_v15  ;;  %1101 = vmatprep.mubr.f32.mxu0 %v15428_v7 }
  0x53   : > { %1652 = vmatprep.mubr.f32.mxu1 %v15428_v7  ;;  %13325 = vmatprep.subr.bf16.mxu0 %v16000_v16 }
  0x54   : > { %10597 = vmatmul.mubr.msk.f32.gmra.mrb[18].mxu1 %vm391_vm1, %v15911_v52 }
  0x55   : > { %10541 = vmatmul.mubr.msk.f32.gmra.mrb[2].mxu0 %vm391_vm1, %v15832_v33  ;;  %1658 = vmatprep.mubr.f32.mxu1 %v15428_v7 }
  0x56   : > { %1107 = vmatprep.mubr.f32.mxu0 %v15428_v7  ;;  %13327 = vmatpush3.bf16.msra.mxu0 %v16000_v16 }
  0x57   : > { %13355 = vmatpush1.bf16.msra.mxu1 %v15788_v23  ;;  %12838 = vmatprep.subr.msk.mxu0 %vm404_vm0, %v10537_v19 }
  0x58   : > { %10598 = vmatmul.mubr.msk.f32.gmra.mrb[20].mxu1 %vm391_vm1, %v15941_v61  ;;  %13357 = vmatprep.subr.bf16.mxu1 %v15792_v25 }
  0x59   : > { %10542 = vmatmul.mubr.msk.f32.gmra.mrb[4].mxu0 %vm391_vm1, %v15854_v40  ;;  %1664 = vmatprep.mubr.f32.mxu1 %v15428_v7 }
  0x5a   : > { %1113 = vmatprep.mubr.f32.mxu0 %v15428_v7  ;;  %12839 = vmatpush3.msk.msra.mxu0 %vm404_vm0, %v10537_v19 }
  0x5b   : > { %13359 = vmatpush1.bf16.msra.mxu1 %v15811_v29  ;;  %13345 = vmatprep.subr.bf16.mxu0 %v15692_v54 }
  0x5c   : > { %10599 = vmatmul.mubr.msk.f32.gmra.mrb[22].mxu1 %vm391_vm1, %v15967_v24  ;;  %10605 = vmatprep.subr.msk.mxu1 %vm404_vm0, %v1432_v20  ;;  %v2485_v20 = vld [vmem:[%s21900_s1 + $0x10] sm:$0xff] }
  0x5d   : > { %10543 = vmatmul.mubr.msk.f32.gmra.mrb[6].mxu0 %vm391_vm1, %v15871_v45  ;;  %1847 = vmatprep.mubr.f32.mxu1 %v15428_v7 }
  0x5e   : > { %12840 = vmatprep.mubr.msk.f32.mxu0 %vm391_vm1, %v15807_v28 }
  0x5f   : > { %10606 = vmatpush1.msk.msra.mxu1 %vm404_vm0, %v1431_v26  ;;  %v2490_v26 = vld [vmem:[%s21900_s1 + $0x38] sm:$0xff] }
  0x60   : > { %10607 = vmatmul.mubr.msk.f32.vlgmr.msra.gmra.mrb[8].mxu1 %vm391_vm1, %v15807_v28  ;;  %13361 = vmatprep.subr.bf16.mxu1 %v15610_v35  ;;  %v10587_v35 = vld [vmem:[%s21900_s1 + $0x188] sm:$0x1] }
  0x61   : > { %12841 = vmatmul.mubr.msk.f32.vlgmr.msra.gmra.mrb[10].mxu0 %vm391_vm1, %v15832_v33  ;;  %1853 = vmatprep.mubr.f32.mxu1 %v15428_v7 }
  0x62   : > { %13347 = vmatpush3.bf16.msra.mxu0 %v15692_v54  ;;  %12843 = vmatprep.mubr.msk.f32.mxu0 %vm391_vm1, %v15854_v40 }
  0x63   : > { %13349 = vmatprep.subr.bf16.mxu0 %v15729_v0  ;;  %13363 = vmatpush1.bf16.msra.mxu1 %v15622_v38  ;;  %v1433_v38 = vld [vmem:[%s21900_s1 + $0xb0] sm:$0x1] }
  0x64   : > { %10608 = vmatmul.mubr.msk.f32.gmra.mrb[10].mxu1 %vm391_vm1, %v15832_v33  ;;  %13365 = vmatprep.subr.bf16.mxu1 %v15638_v42  ;;  %v1435_v42 = vld [vmem:[%s21900_s1 + $0xc0] sm:$0x1] }
  0x65   : > { %12844 = vmatmul.mubr.msk.f32.gmra.mrb[12].mxu0 %vm391_vm1, %v15871_v45  ;;  %1859 = vmatprep.mubr.f32.mxu1 %v15428_v7 }
  0x66   : > { %13351 = vmatpush3.bf16.msra.mxu0 %v15729_v0  ;;  %12856 = vmatprep.mubr.msk.f32.mxu0 %vm391_vm1, %v15896_v50 }
  0x67   : > { %12854 = vmatprep.subr.msk.mxu0 %vm404_vm0, %v10587_v35  ;;  %13367 = vmatpush1.bf16.msra.mxu1 %v15645_v43  ;;  %v10650_v43 = vld [vmem:[%s21900_s1 + $0x250] sm:$0x1] }
  0x68   : > { %10609 = vmatmul.mubr.msk.f32.gmra.mrb[12].mxu1 %vm391_vm1, %v15854_v40  ;;  %10611 = vmatprep.subr.msk.mxu1 %vm404_vm0, %v1434_v27  ;;  %v16407_v27 = vld [vmem:[#allocation2 + $0xa0] sm:$0xff] }
  0x69   : > { %1865 = vmatprep.mubr.f32.mxu1 %v15428_v7  ;;  %1406 = vst.msk [vmem:[#allocation2 + $0xc0] sm:$0xff] %vm1385_vm2, %v16407_v27  ;;  %6965 = vst.msk [vmem:[#allocation3 + $0x70] sm:$0xff] %vm1385_vm2, %v16407_v27 }
  0x6a   : > { %12855 = vmatpush3.msk.msra.mxu0 %vm404_vm0, %v10587_v35  ;;  %v2501_v35 = vld [vmem:[%s21900_s1 + $0x90] sm:$0xff] }
  0x6b   : > { %13369 = vmatprep.subr.bf16.mxu0 %v15840_v36  ;;  %12857 = vmatmul.mubr.msk.f32.vlgmr.msra.gmra.mrb[14].mxu0 %vm391_vm1, %v15911_v52  ;;  %v10693_v52 = vld [vmem:[%s21900_s1 + $0x150] sm:$0xff] }
  0x6c   : > { %13371 = vmatpush3.bf16.msra.mxu0 %v15840_v36  ;;  %10610 = vmatmul.mubr.msk.f32.gmra.mrb[14].mxu1 %vm391_vm1, %v15871_v45  ;;  %v10790_v36 = vld [vmem:[%s21900_s1 + $0xd0] sm:$0xff] }
  0x6d   : > { %13373 = vmatprep.subr.bf16.mxu0 %v15857_v41  ;;  %12859 = vmatprep.mubr.msk.f32.mxu0 %vm391_vm1, %v15941_v61  ;;  %v16297_v61 = vld [vmem:[%s15580_s13 + $0x120] sm:$0xff] }
  0x6e   : > { %10612 = vmatpush1.msk.msra.mxu1 %vm404_vm0, %v1433_v38  ;;  %1936 = vmatprep.mubr.f32.mxu1 %v15428_v7  ;;  %v3555_v38 = vld [vmem:[%s21900_s1] sm:$0xff] }
  0x6f   : > { %12860 = vmatmul.mubr.msk.f32.gmra.mrb[16].mxu0 %vm391_vm1, %v15967_v24  ;;  %13377 = vmatprep.subr.bf16.mxu1 %v15900_v51  ;;  %v10688_v51 = vld [vmem:[%s21900_s1 + $0x128] sm:$0xff]  ;;  %v16335_v24 = vld [vmem:[%s15580_s13 + $0x130] sm:$0xff] }
  0x70   : > { %13375 = vmatpush3.bf16.msra.mxu0 %v15857_v41  ;;  %10613 = vmatmul.mubr.msk.f32.vlgmr.msra.gmra.mrb[16].mxu1 %vm391_vm1, %v15807_v28  ;;  %v10683_v41 = vld [vmem:[%s21900_s1 + $0x100] sm:$0xff]  ;;  %v13414_v8 = vpack.c.bf16 %v10693_v52, %v10688_v51  ;;  %v3578_v51 = vld [vmem:[%s21900_s1 + $0xb8] sm:$0x1] }
  0x71   : > { %12870 = vmatprep.subr.msk.mxu0 %vm404_vm0, %v1435_v42  ;;  %1942 = vmatprep.mubr.f32.mxu1 %v15428_v7  ;;  %v16510_v52 = vld [vmem:[%s15580_s13 + $0x100] sm:$0xff] }
  0x72   : > { %12872 = vmatprep.mubr.msk.f32.mxu0 %vm391_vm1, %v15807_v28  ;;  %13379 = vmatpush1.bf16.msra.mxu1 %v15934_v13  ;;  %v16128_v28 = vld [vmem:[%s15580_s13 + $0xa0] sm:$0xff]  ;;  %v10810_v13 = vld [vmem:[%s21900_s1 + $0x170] sm:$0x1] }
  0x73   : > { %13381 = vmatprep.subr.bf16.mxu1 %v15943_v62  ;;  %v10700_v62 = vld [vmem:[%s21900_s1 + $0x188] sm:$0x1] }
  0x74   : > { %12871 = vmatpush3.msk.msra.mxu0 %vm404_vm0, %v1435_v42  ;;  %10614 = vmatmul.mubr.msk.f32.gmra.mrb[18].mxu1 %vm391_vm1, %v15832_v33  ;;  %v3560_v42 = vld [vmem:[%s21900_s1 + $0x28] sm:$0xff] }
  0x75   : > { %13393 = vmatprep.subr.bf16.mxu0 %v15997_v15  ;;  %12873 = vmatmul.mubr.msk.f32.vlgmr.msra.gmra.mrb[14].mxu0 %vm391_vm1, %v15832_v33  ;;  %v16152_v33 = vld [vmem:[%s15580_s13 + $0xb0] sm:$0xff] }
  0x76   : > { %13395 = vmatpush3.bf16.msra.mxu0 %v15997_v15  ;;  %1948 = vmatprep.mubr.f32.mxu1 %v15428_v7  ;;  %v2491_v15 = vld [vmem:[%s21900_s1 + $0x40] sm:$0xff] }
  0x77   : > { %13397 = vmatprep.subr.bf16.mxu0 %v16000_v16  ;;  %12875 = vmatprep.mubr.msk.f32.mxu0 %vm391_vm1, %v15854_v40  ;;  %v16389_v19 = vpack.c.bf16 %v2491_v15, %v2486_v14  ;;  %v10743_v14 = vld [vmem:[%s21900_s1 + $0x1b0] sm:$0xff]  ;;  %v10748_v15 = vld [vmem:[%s21900_s1 + $0x1d8] sm:$0xff] }
  0x78   : > { %10615 = vmatmul.mubr.msk.f32.gmra.mrb[20].mxu1 %vm391_vm1, %v15854_v40  ;;  %v10678_v40 = vld [vmem:[%s21900_s1 + $0xd8] sm:$0xff] }
  0x79   : > { %12876 = vmatmul.mubr.msk.f32.gmra.mrb[16].mxu0 %vm391_vm1, %v15871_v45  ;;  %1954 = vmatprep.mubr.f32.mxu1 %v15428_v7  ;;  %v13410_v49 = vpack.c.bf16 %v10683_v41, %v10678_v40  ;;  %v3576_v40 = vld [vmem:[%s21900_s1 + $0xa8] sm:$0x1]  ;;  %v2506_v41 = vld [vmem:[%s21900_s1 + $0xb8] sm:$0x1] }
  0x7a   : > { %13399 = vmatpush3.bf16.msra.mxu0 %v16000_v16  ;;  %13383 = vmatpush1.bf16.msra.mxu1 %v15961_v6  ;;  %v13488_v6 = vpack.c.bf16 %v10798_v53, %v10793_v18  ;;  %v13496_v16 = vpack.c.bf16 %v3561_v12, %v3556_v4  ;;  %v10749_v18 = vld [vmem:[%s21900_s1 + $0x1e0] sm:$0xff]  ;;  %v10754_v53 = vld [vmem:[%s21900_s1 + $0x208] sm:$0xff]  ;;  %v10751_v4 = vld [vmem:[%s21900_s1 + $0x1f0] sm:$0xff] }
  0x7b   : > { %12886 = vmatprep.subr.msk.mxu0 %vm404_vm0, %v10650_v43  ;;  %12888 = vmatprep.mubr.msk.f32.mxu0 %vm391_vm1, %v16128_v28  ;;  %v10756_v12 = vld [vmem:[%s21900_s1 + $0x218] sm:$0xff] }
  0x7c   : > { %10616 = vmatmul.mubr.msk.f32.gmra.mrb[22].mxu1 %vm391_vm1, %v15871_v45  ;;  %10651 = vmatprep.subr.msk.mxu1 %vm404_vm0, %v10647_v30  ;;  %v10689_v45 = vld [vmem:[%s21900_s1 + $0x130] sm:$0xff] }
  0x7d   : > { %2167 = vmatprep.mubr.f32.mxu1 %v15428_v7  ;;  %v13412_v50 = vpack.c.bf16 %v10694_v46, %v10689_v45  ;;  %v3575_v45 = vld [vmem:[%s21900_s1 + $0xa0] sm:$0x1]  ;;  %v16478_v46 = vld [vmem:[%s15580_s13 + $0xf0] sm:$0xff] }
  0x7e   : > { %12887 = vmatpush3.msk.msra.mxu0 %vm404_vm0, %v10650_v43  ;;  %10652 = vmatpush1.msk.msra.mxu1 %vm404_vm0, %v10646_v31  ;;  %v13434_v43 = vpack.c.bf16 %v2490_v26, %v2485_v20  ;;  %v2495_v31 = vld [vmem:[%s21900_s1 + $0x60] sm:$0xff]  ;;  %v16654_v26 = vpack.c.bf16 %v10748_v15, %v10743_v14  ;;  %v10915_v15 = vld [vmem:[%s21901_s2 + $0x728] sm:$0xff] }
  0x7f   : > { %12889 = vmatmul.mubr.msk.f32.vlgmr.msra.gmra.mrb[14].mxu0 %vm391_vm1, %v16147_v32  ;;  %13385 = vmatprep.subr.bf16.mxu1 %v15696_v55  ;;  %v10649_v55 = vld [vmem:[%s21900_s1 + $0x248] sm:$0x1]  ;;  %v10761_v20 = vld [vmem:[%s21900_s1 + $0x240] sm:$0x1] }
  0x80   : > { %10653 = vmatmul.mubr.msk.f32.vlgmr.msra.gmra.mrb[8].mxu1 %vm391_vm1, %v16128_v28  ;;  %12891 = vmatprep.mubr.msk.f32.mxu0 %vm391_vm1, %v16152_v33 }
  0x81   : > { %2173 = vmatprep.mubr.f32.mxu1 %v15428_v7  ;;  %13387 = vmatpush1.bf16.msra.mxu1 %v15707_v58  ;;  %v13472_v58 = vpack.c.bf16 %v10795_v37, %v10790_v36  ;;  %v13498_v36 = vpack.c.bf16 %v3560_v42, %v3555_v38  ;;  %v3565_v37 = vld [vmem:[%s21900_s1 + $0x50] sm:$0xff]  ;;  %v10753_v38 = vld [vmem:[%s21900_s1 + $0x200] sm:$0xff]  ;;  %v10758_v42 = vld [vmem:[%s21900_s1 + $0x228] sm:$0xff] }
  0x82   : > { %13389 = vmatprep.subr.bf16.mxu1 %v15732_v1  ;;  %13401 = vmatprep.subr.bf16.mxu0 %v15502_v3  ;;  %v10648_v3 = vld [vmem:[%s21900_s1 + $0x240] sm:$0x1]  ;;  %v10697_v1 = vld [vmem:[%s21900_s1 + $0x170] sm:$0x1] }
  0x83   : > { %12892 = vmatmul.mubr.msk.f32.gmra.mrb[16].mxu0 %vm391_vm1, %v16164_v34 }
  0x84   : > { %10654 = vmatmul.mubr.msk.f32.gmra.mrb[10].mxu1 %vm391_vm1, %v16147_v32  ;;  %13403 = vmatpush1.bf16.msra.mxu0 %v15518_v9 }
  0x85   : > { %2179 = vmatprep.mubr.f32.mxu1 %v15428_v7  ;;  %13391 = vmatpush1.bf16.msra.mxu1 %v15737_v2  ;;  %v10679_v2 = vld [vmem:[%s21900_s1 + $0xe0] sm:$0xff] }
  0x86   : > { %10657 = vmatprep.subr.msk.mxu1 %vm404_vm0, %v10649_v55  ;;  %13405 = vmatprep.subr.bf16.mxu0 %v15547_v17  ;;  %v13408_v48 = vpack.c.bf16 %v10684_v39, %v10679_v2  ;;  %v2500_v55 = vld [vmem:[%s21900_s1 + $0x88] sm:$0xff]  ;;  %v2487_v2 = vld [vmem:[%s21900_s1 + $0x20] sm:$0xff] }
  0x87   : > { %2629 = vmatprep.mubr.f32.mxu0 %v15428_v7  ;;  %v2492_v39 = vld [vmem:[%s21900_s1 + $0x48] sm:$0xff] }
  0x88   : > { %10655 = vmatmul.mubr.msk.f32.gmra.mrb[12].mxu1 %vm391_vm1, %v16152_v33  ;;  %13407 = vmatpush1.bf16.msra.mxu0 %v15562_v22 }
  0x89   : > { %2185 = vmatprep.mubr.f32.mxu1 %v15428_v7  ;;  %10658 = vmatpush1.msk.msra.mxu1 %vm404_vm0, %v10648_v3  ;;  %v3570_v3 = vld [vmem:[%s21900_s1 + $0x78] sm:$0xff] }
  0x8a   : > { %10701 = vmatprep.subr.msk.mxu0 %vm404_vm0, %v10697_v1  ;;  %13473 = vmatprep.subr.bf16.mxu1 %v13472_v58  ;;  %v13438_v58 = vpack.c.bf16 %v2500_v55, %v2495_v31  ;;  %v13502_v1 = vpack.c.bf16 %v3570_v3, %v3565_v37  ;;  %v1316_v55 = vlaneseq  ;;  %v10871_v37 = vld [vmem:[%s21900_s1 + $0x248] sm:$0x1]  ;;  %v16696_v3 = vld [vmem:[%s15580_s13 + $0x18] sm:$0xff] }
  0x8c   : > { %10656 = vmatmul.mubr.msk.f32.gmra.mrb[14].mxu1 %vm391_vm1, %v16164_v34  ;;  %10702 = vmatpush1.msk.msra.mxu0 %vm404_vm0, %v10696_v44  ;;  %v16469_v44 = vpack.c.bf16 %v2492_v39, %v2487_v2  ;;  %v10894_v2 = vld [vmem:[%s21901_s2 + $0x680] sm:$0xff] }
  0x8d   : > { %2256 = vmatprep.mubr.f32.mxu1 %v15428_v7  ;;  %10703 = vmatmul.mubr.msk.f32.vlgmr.msra.gmra.mrb[18].mxu0 %vm391_vm1, %v16223_v47  ;;  %v10870_v39 = vld [vmem:[%s21900_s1 + $0x240] sm:$0x1] }
  0x8e   : > { %2635 = vmatprep.mubr.f32.mxu0 %v15428_v7  ;;  %13409 = vmatprep.subr.bf16.mxu0 %v13408_v48 }
  0x8f   : > { %13411 = vmatpush1.bf16.msra.mxu0 %v13410_v49 }
  0x90   : > { %10659 = vmatmul.mubr.msk.f32.vlgmr.msra.gmra.mrb[16].mxu1 %vm391_vm1, %v16128_v28  ;;  %13413 = vmatprep.subr.bf16.mxu0 %v13412_v50 }
  0x91   : > { %2262 = vmatprep.mubr.f32.mxu1 %v15428_v7  ;;  %13475 = vmatpush1.bf16.msra.mxu1 %v15518_v9  ;;  %v10698_v9 = vld [vmem:[%s21900_s1 + $0x178] sm:$0x1] }
  0x92   : > { %10704 = vmatmul.mubr.msk.f32.gmra.mrb[20].mxu0 %vm391_vm1, %v16239_v56  ;;  %13477 = vmatprep.subr.bf16.mxu1 %v15547_v17  ;;  %v10809_v17 = vld [vmem:[%s21900_s1 + $0x168] sm:$0x1] }
  0x93   : > { %2641 = vmatprep.mubr.f32.mxu0 %v15428_v7  ;;  %13415 = vmatpush1.bf16.msra.mxu0 %v13414_v8 }
  0x94   : > { %10660 = vmatmul.mubr.msk.f32.gmra.mrb[18].mxu1 %vm391_vm1, %v16147_v32  ;;  %10707 = vmatprep.subr.msk.mxu0 %vm404_vm0, %v10699_v57  ;;  %v10745_v57 = vld [vmem:[%s21900_s1 + $0x1c0] sm:$0xff] }
  0x95   : > { %2268 = vmatprep.mubr.f32.mxu1 %v15428_v7  ;;  %13479 = vmatpush1.bf16.msra.mxu1 %v15562_v22  ;;  %v16286_v22 = vld [vmem:[%s15580_s13 + $0x118] sm:$0xff] }
  0x96   : > { %10705 = vmatmul.mubr.msk.f32.gmra.mrb[22].mxu0 %vm391_vm1, %v16253_v59  ;;  %10814 = vmatprep.subr.msk.mxu1 %vm404_vm0, %v10810_v13 }
  0x97   : > { %2647 = vmatprep.mubr.f32.mxu0 %v15428_v7  ;;  %10708 = vmatpush1.msk.msra.mxu0 %vm404_vm0, %v10698_v9  ;;  %v10739_v9 = vld [vmem:[%s21900_s1 + $0x190] sm:$0xff] }
  0x98   : > { %10661 = vmatmul.mubr.msk.f32.gmra.mrb[20].mxu1 %vm391_vm1, %v16152_v33  ;;  %13417 = vmatprep.subr.bf16.mxu0 %v15692_v54 }
  0x99   : > { %2274 = vmatprep.mubr.f32.mxu1 %v15428_v7  ;;  %10815 = vmatpush1.msk.msra.mxu1 %vm404_vm0, %v10809_v17  ;;  %v10744_v17 = vld [vmem:[%s21900_s1 + $0x1b8] sm:$0xff] }
  0x9a   : > { %10706 = vmatmul.mubr.msk.f32.gmra.mrb[24].mxu0 %vm391_vm1, %v10675_v60  ;;  %13481 = vmatprep.subr.bf16.mxu1 %v13408_v48  ;;  %v2502_v48 = vld [vmem:[%s21900_s1 + $0x98] sm:$0xff] }
  0x9b   : > { %2718 = vmatprep.mubr.f32.mxu0 %v15428_v7 }
  0x9c   : > { %10662 = vmatmul.mubr.msk.f32.gmra.mrb[22].mxu1 %vm391_vm1, %v16164_v34 }
  0x9d   : > { %3701 = vmatprep.mubr.f32.mxu1 %v15428_v7 }
  0x9e   : > { %10709 = vmatmul.mubr.msk.f32.vlgmr.msra.gmra.mrb[26].mxu0 %vm391_vm1, %v16223_v47 }
  0x9f   : > { %2724 = vmatprep.mubr.f32.mxu0 %v15428_v7  ;;  %13419 = vmatpush3.bf16.msra.mxu0 %v15692_v54  ;;  %v10812_v54 = vld [vmem:[%s21900_s1 + $0x180] sm:$0x1] }
  0xa0   : > { %10816 = vmatmul.mubr.msk.f32.vlgmr.msra.gmra.mrb[24].mxu1 %vm391_vm1, %v16286_v22  ;;  %13421 = vmatprep.subr.bf16.mxu0 %v15729_v0 }
  0xa1   : > { %3707 = vmatprep.mubr.f32.mxu1 %v15428_v7  ;;  %13483 = vmatpush1.bf16.msra.mxu1 %v13410_v49 }
  0xa2   : > { %10710 = vmatmul.mubr.msk.f32.gmra.mrb[28].mxu0 %vm391_vm1, %v16239_v56  ;;  %13485 = vmatprep.subr.bf16.mxu1 %v13412_v50  ;;  %v16498_v50 = vld [vmem:[%s15580_s13 + $0xf8] sm:$0xff] }
  0xa3   : > { %2730 = vmatprep.mubr.f32.mxu0 %v15428_v7  ;;  %13423 = vmatpush3.bf16.msra.mxu0 %v15729_v0  ;;  %v10811_v0 = vld [vmem:[%s21900_s1 + $0x178] sm:$0x1] }
  0xa4   : > { %10817 = vmatmul.mubr.msk.f32.gmra.mrb[26].mxu1 %vm391_vm1, %v16297_v61  ;;  %12902 = vmatprep.subr.msk.mxu0 %vm404_vm0, %v10700_v62 }
  0xa5   : > { %3713 = vmatprep.mubr.f32.mxu1 %v15428_v7  ;;  %13487 = vmatpush1.bf16.msra.mxu1 %v13414_v8  ;;  %v10740_v8 = vld [vmem:[%s21900_s1 + $0x198] sm:$0xff] }
  0xa6   : > { %10711 = vmatmul.mubr.msk.f32.gmra.mrb[30].mxu0 %vm391_vm1, %v16253_v59  ;;  %10820 = vmatprep.subr.msk.mxu1 %vm404_vm0, %v10812_v54  ;;  %v13448_v13 = vpack.c.bf16 %v10745_v57, %v10740_v8 }
  0xa7   : > { %2736 = vmatprep.mubr.f32.mxu0 %v15428_v7  ;;  %12903 = vmatpush3.msk.msra.mxu0 %vm404_vm0, %v10700_v62  ;;  %v13450_v62 = vpack.c.bf16 %v10744_v17, %v10739_v9  ;;  %v10906_v9 = vld [vmem:[%s21901_s2 + $0x6e0] sm:$0xff] }
  0xa8   : > { %10818 = vmatmul.mubr.msk.f32.gmra.mrb[28].mxu1 %vm391_vm1, %v16320_v5  ;;  %13425 = vmatprep.subr.bf16.mxu0 %v15786_v21  ;;  %v10808_v21 = vld [vmem:[%s21900_s1 + $0x160] sm:$0xff] }
  0xa9   : > { %3719 = vmatprep.mubr.f32.mxu1 %v15428_v7  ;;  %10821 = vmatpush1.msk.msra.mxu1 %vm404_vm0, %v10811_v0  ;;  %v13492_v10 = vpack.c.bf16 %v10808_v21, %v10803_v63  ;;  %v10747_v0 = vld [vmem:[%s21900_s1 + $0x1d0] sm:$0xff]  ;;  %v10746_v63 = vld [vmem:[%s21900_s1 + $0x1c8] sm:$0xff]  ;;  %v10752_v21 = vld [vmem:[%s21900_s1 + $0x1f8] sm:$0xff] }
  0xaa   : > { %10712 = vmatmul.mubr.msk.f32.gmra.mrb[32].mxu0 %vm391_vm1, %v10675_v60  ;;  %13489 = vmatprep.subr.bf16.mxu1 %v13488_v6 }
  0xab   : > { %12904 = vmatprep.mubr.msk.f32.mxu0 %vm391_vm1, %v16223_v47  ;;  %v2497_v47 = vld [vmem:[%s21900_s1 + $0x70] sm:$0xff] }
  0xac   : > { %10819 = vmatmul.mubr.msk.f32.gmra.mrb[30].mxu1 %vm391_vm1, %v16335_v24  ;;  %v13444_v49 = vpack.c.bf16 %v2502_v48, %v2497_v47  ;;  %v10897_v47 = vld [vmem:[%s21901_s2 + $0x698] sm:$0xff]  ;;  %v10900_v48 = vld [vmem:[%s21901_s2 + $0x6b0] sm:$0xff] }
  0xad   : > { %3790 = vmatprep.mubr.f32.mxu1 %v15428_v7  ;;  %v13548_v57 = vpack.c.bf16 %v10900_v48, %v10897_v47  ;;  %v11089_v48 = vld [vmem:[%s21901_s2 + $0xc98] sm:$0xff] }
  0xae   : > { %12905 = vmatmul.mubr.msk.f32.vlgmr.msra.gmra.mrb[34].mxu0 %vm391_vm1, %v16239_v56  ;;  %v2507_v56 = vld [vmem:[%s21900_s1 + $0xc0] sm:$0x1] }
  0xaf   : > { %13427 = vmatpush1.bf16.msra.mxu0 %v15788_v23  ;;  %12907 = vmatprep.mubr.msk.f32.mxu0 %vm391_vm1, %v16253_v59  ;;  %v10813_v23 = vld [vmem:[%s21900_s1 + $0x188] sm:$0x1]  ;;  %v3577_v59 = vld [vmem:[%s21900_s1 + $0xb0] sm:$0x1] }
  0xb0   : > { %10822 = vmatmul.mubr.msk.f32.vlgmr.msra.gmra.mrb[32].mxu1 %vm391_vm1, %v16286_v22  ;;  %13429 = vmatprep.subr.bf16.mxu0 %v15792_v25 }
  0xb1   : > { %3796 = vmatprep.mubr.f32.mxu1 %v15428_v7  ;;  %13491 = vmatpush3.bf16.msra.mxu1 %v13488_v6 }
  0xb2   : > { %13493 = vmatprep.subr.bf16.mxu1 %v13492_v10  ;;  %12908 = vmatmul.mubr.msk.f32.gmra.mrb[36].mxu0 %vm391_vm1, %v10675_v60  ;;  %v16540_v60 = vld [vmem:[%s15580_s13 + $0x108] sm:$0xff] }
  0xb3   : > { %13431 = vmatpush1.bf16.msra.mxu0 %v15811_v29  ;;  %2919 = vmatprep.mubr.f32.mxu0 %v15428_v7  ;;  %v2503_v29 = vld [vmem:[%s21900_s1 + $0xa0] sm:$0x1] }
  0xb4   : > { %10823 = vmatmul.mubr.msk.f32.gmra.mrb[34].mxu1 %vm391_vm1, %v16297_v61  ;;  %10718 = vmatprep.subr.msk.mxu0 %vm404_vm0, %v2504_v11 }
  0xb5   : > { %3802 = vmatprep.mubr.f32.mxu1 %v15428_v7  ;;  %13495 = vmatpush3.bf16.msra.mxu1 %v13492_v10  ;;  %v2496_v7 = vld [vmem:[%s21900_s1 + $0x68] sm:$0xff]  ;;  %v10757_v10 = vld [vmem:[%s21900_s1 + $0x220] sm:$0xff] }
  0xb6   : > { %12950 = vmatprep.subr.msk.mxu1 %vm404_vm0, %v10813_v23  ;;  %v13436_v30 = vpack.c.bf16 %v2501_v35, %v2496_v7  ;;  %v10868_v7 = vld [vmem:[%s21900_s1 + $0x230] sm:$0x1]  ;;  %v16663_v35 = vld [vmem:[%s15580_s13 + $0x8] sm:$0xff] }
  0xb7   : > { %10719 = vmatpush1.msk.msra.mxu0 %vm404_vm0, %v2503_v29  ;;  %v13462_v29 = vpack.c.bf16 %v10756_v12, %v10751_v4  ;;  %v10908_v4 = vld [vmem:[%s21901_s2 + $0x6f0] sm:$0xff]  ;;  %v10911_v12 = vld [vmem:[%s21901_s2 + $0x708] sm:$0xff] }
  0xb8   : > { %10824 = vmatmul.mubr.msk.f32.gmra.mrb[36].mxu1 %vm391_vm1, %v16320_v5  ;;  %10720 = vmatmul.mubr.msk.f32.vlgmr.msra.gmra.mrb[18].mxu0 %vm391_vm1, %v16128_v28 }
  0xb9   : > { %3808 = vmatprep.mubr.f32.mxu1 %v16407_v27  ;;  %12951 = vmatpush3.msk.msra.mxu1 %vm404_vm0, %v10813_v23  ;;  %v13460_v23 = vpack.c.bf16 %v10757_v10, %v10752_v21  ;;  %v11086_v21 = vld [vmem:[%s21901_s2 + $0xc80] sm:$0xff] }
  0xba   : > { %13497 = vmatprep.subr.bf16.mxu1 %v13496_v16  ;;  %2925 = vmatprep.mubr.f32.mxu0 %v16407_v27  ;;  %v10869_v16 = vld [vmem:[%s21900_s1 + $0x238] sm:$0x1] }
  0xbb   : > { %13433 = vmatprep.subr.bf16.mxu0 %v16389_v19 }
  0xbc   : > { %10825 = vmatmul.mubr.msk.f32.gmra.mrb[38].mxu1 %vm391_vm1, %v16335_v24  ;;  %10721 = vmatmul.mubr.msk.f32.gmra.mrb[20].mxu0 %vm391_vm1, %v16147_v32 }
  0xbd   : > { %12952 = vmatprep.mubr.msk.f32.mxu1 %vm391_vm1, %v16286_v22  ;;  %2931 = vmatprep.mubr.f32.mxu0 %v16407_v27  ;;  %v10750_v22 = vld [vmem:[%s21900_s1 + $0x1e8] sm:$0xff] }
  0xbe   : > { %13435 = vmatpush1.bf16.msra.mxu0 %v13434_v43 }
  0xbf   : > { %13437 = vmatprep.subr.bf16.mxu0 %v13436_v30 }
  0xc0   : > { %12953 = vmatmul.mubr.msk.f32.vlgmr.msra.gmra.mrb[40].mxu1 %vm391_vm1, %v16297_v61  ;;  %10722 = vmatmul.mubr.msk.f32.gmra.mrb[22].mxu0 %vm391_vm1, %v16152_v33  ;;  %v10755_v61 = vld [vmem:[%s21900_s1 + $0x210] sm:$0xff] }
  0xc1   : > { %13499 = vmatpush1.bf16.msra.mxu1 %v13498_v36  ;;  %12955 = vmatprep.mubr.msk.f32.mxu1 %vm391_vm1, %v16320_v5  ;;  %v13452_v54 = vpack.c.bf16 %v10755_v61, %v10750_v22  ;;  %v10760_v5 = vld [vmem:[%s21900_s1 + $0x238] sm:$0x1] }
  0xc2   : > { %13501 = vmatprep.subr.bf16.mxu1 %v15792_v25  ;;  %2937 = vmatprep.mubr.f32.mxu0 %v16407_v27  ;;  %v2505_v25 = vld [vmem:[%s21900_s1 + $0xb0] sm:$0x1] }
  0xc3   : > { %13439 = vmatpush1.bf16.msra.mxu0 %v13438_v58 }
  0xc4   : > { %12956 = vmatmul.mubr.msk.f32.gmra.mrb[42].mxu1 %vm391_vm1, %v16335_v24  ;;  %10723 = vmatmul.mubr.msk.f32.gmra.mrb[24].mxu0 %vm391_vm1, %v16164_v34  ;;  %v10741_v24 = vld [vmem:[%s21900_s1 + $0x1a0] sm:$0xff] }
  0xc5   : > { %13503 = vmatpush1.bf16.msra.mxu1 %v13502_v1  ;;  %3991 = vmatprep.mubr.f32.mxu1 %v16407_v27  ;;  %v13458_v11 = vpack.c.bf16 %v10746_v63, %v10741_v24  ;;  %v10891_v1 = vld [vmem:[%s21901_s2 + $0x668] sm:$0xff] }
  0xc6   : > { %10831 = vmatprep.subr.msk.mxu1 %vm404_vm0, %v3576_v40  ;;  %10724 = vmatprep.subr.msk.mxu0 %vm404_vm0, %v2506_v41  ;;  %v16715_v40 = vshrl.u32 %v1316_v55, 7  ;;  %v13544_v41 = vpack.c.bf16 %v10894_v2, %v10891_v1  ;;  %v11083_v63 = vld [vmem:[%s21901_s2 + $0xc68] sm:$0xff]  ;;  %v10914_v55 = vld [vmem:[%s21901_s2 + $0x720] sm:$0xff]  ;;  %v10924_v1 = vld [vmem:[%s21901_s2 + $0x770] sm:$0xff] }
  0xc7   : > { %10725 = vmatpush1.msk.msra.mxu0 %vm404_vm0, %v2505_v25  ;;  %3008 = vmatprep.mubr.f32.mxu0 %v16407_v27  ;;  %v10890_v25 = vld [vmem:[%s21901_s2 + $0x660] sm:$0xff] }
  0xc8   : > { %10726 = vmatmul.mubr.msk.f32.vlgmr.msra.gmra.mrb[26].mxu0 %vm391_vm1, %v16128_v28  ;;  %13441 = vmatprep.subr.bf16.mxu0 %v16469_v44 }
  0xc9   : > { %10832 = vmatpush1.msk.msra.mxu1 %vm404_vm0, %v3575_v45  ;;  %3014 = vmatprep.mubr.f32.mxu0 %v16407_v27  ;;  %v16730_v45 = vld [vmem:[%s15580_s13 + $0x20] sm:$0xff] }
  0xca   : > { %10833 = vmatmul.mubr.msk.f32.vlgmr.msra.gmra.mrb[24].mxu1 %vm391_vm1, %v16478_v46  ;;  %13505 = vmatprep.subr.bf16.mxu1 %v16389_v19  ;;  %v10762_v19 = vld [vmem:[%s21900_s1 + $0x248] sm:$0x1] }
  0xcb   : > { %3997 = vmatprep.mubr.f32.mxu1 %v16407_v27  ;;  %13507 = vmatpush1.bf16.msra.mxu1 %v13434_v43  ;;  %v16680_v43 = vpack.c.bf16 %v10758_v42, %v10753_v38  ;;  %v13558_v38 = vpack.c.bf16 %v10911_v12, %v10908_v4  ;;  %v10938_v4 = vld [vmem:[%s21901_s2 + $0x7e0] sm:$0xff]  ;;  %v10941_v12 = vld [vmem:[%s21901_s2 + $0x7f8] sm:$0xff] }
  0xcc   : > { %10727 = vmatmul.mubr.msk.f32.gmra.mrb[28].mxu0 %vm391_vm1, %v16147_v32  ;;  %13509 = vmatprep.subr.bf16.mxu1 %v13436_v30  ;;  %v16684_v30 = vld [vmem:[%s15580_s13 + $0x10] sm:$0xff] }
  0xcd   : > { %13443 = vmatpush3.bf16.msra.mxu0 %v16469_v44  ;;  %3020 = vmatprep.mubr.f32.mxu0 %v16407_v27 }
  0xce   : > { %10834 = vmatmul.mubr.msk.f32.gmra.mrb[26].mxu1 %vm391_vm1, %v16498_v50  ;;  %13445 = vmatprep.subr.bf16.mxu0 %v13444_v49 }
  0xcf   : > { %4003 = vmatprep.mubr.f32.mxu1 %v16407_v27  ;;  %13511 = vmatpush1.bf16.msra.mxu1 %v13438_v58  ;;  %v10763_v58 = vld [vmem:[%s21900_s1 + $0x250] sm:$0x1] }
  0xd0   : > { %10728 = vmatmul.mubr.msk.f32.gmra.mrb[30].mxu0 %vm391_vm1, %v16152_v33  ;;  %10837 = vmatprep.subr.msk.mxu1 %vm404_vm0, %v3578_v51  ;;  %v16748_v51 = vld [vmem:[%s21903_s4] sm:$0x1f] }
  0xd1   : > { %13447 = vmatpush3.bf16.msra.mxu0 %v13444_v49  ;;  %3026 = vmatprep.mubr.f32.mxu0 %v16407_v27 }
  0xd2   : > { %10835 = vmatmul.mubr.msk.f32.gmra.mrb[28].mxu1 %vm391_vm1, %v16510_v52  ;;  %12918 = vmatprep.subr.msk.mxu0 %vm404_vm0, %v2507_v56 }
  0xd3   : > { %4009 = vmatprep.mubr.f32.mxu1 %v16407_v27  ;;  %10838 = vmatpush1.msk.msra.mxu1 %vm404_vm0, %v3577_v59  ;;  %v10896_v59 = vld [vmem:[%s21901_s2 + $0x690] sm:$0xff] }
  0xd4   : > { %10729 = vmatmul.mubr.msk.f32.gmra.mrb[32].mxu0 %vm391_vm1, %v16164_v34  ;;  %13513 = vmatprep.subr.bf16.mxu1 %v16469_v44 }
  0xd5   : > { %12919 = vmatpush3.msk.msra.mxu0 %vm404_vm0, %v2507_v56  ;;  %12920 = vmatprep.mubr.msk.f32.mxu0 %vm391_vm1, %v16128_v28  ;;  %v13454_v28 = vpack.c.bf16 %v10754_v53, %v10749_v18  ;;  %v16751_v56 = vsub.s32 3, %v16715_v40 }
  0xd6   : > { %10836 = vmatmul.mubr.msk.f32.gmra.mrb[30].mxu1 %vm391_vm1, %v16540_v60  ;;  %13449 = vmatprep.subr.bf16.mxu0 %v13448_v13 }
  0xd7   : > { %4080 = vmatprep.mubr.f32.mxu1 %v16407_v27  ;;  %v16779_v61 = vrot.slane %v16748_v51, %v16751_v56 }
  0xd8   : > { %12921 = vmatmul.mubr.msk.f32.vlgmr.msra.gmra.mrb[34].mxu0 %vm391_vm1, %v16147_v32  ;;  %v3579_v32 = vld [vmem:[%s21900_s1 + $0xc0] sm:$0x1] }
  0xd9   : > { %13451 = vmatpush1.bf16.msra.mxu0 %v13450_v62  ;;  %12923 = vmatprep.mubr.msk.f32.mxu0 %vm391_vm1, %v16152_v33  ;;  %v10759_v33 = vld [vmem:[%s21900_s1 + $0x230] sm:$0x1] }
  0xda   : > { %10839 = vmatmul.mubr.msk.f32.vlgmr.msra.gmra.mrb[32].mxu1 %vm391_vm1, %v16478_v46  ;;  %13453 = vmatprep.subr.bf16.mxu0 %v13452_v54 }
  0xdb   : > { %4086 = vmatprep.mubr.f32.mxu1 %v16407_v27  ;;  %13515 = vmatpush3.bf16.msra.mxu1 %v16469_v44  ;;  %v10893_v44 = vld [vmem:[%s21901_s2 + $0x678] sm:$0xff] }
  0xdc   : > { %13517 = vmatprep.subr.bf16.mxu1 %v13444_v49  ;;  %12924 = vmatmul.mubr.msk.f32.gmra.mrb[36].mxu0 %vm391_vm1, %v16164_v34  ;;  %v10742_v34 = vld [vmem:[%s21900_s1 + $0x1a8] sm:$0xff]  ;;  %v13546_v8 = vpack.c.bf16 %v10893_v44, %v10890_v25 }
  0xdd   : > { %13455 = vmatpush1.bf16.msra.mxu0 %v13454_v28  ;;  %3239 = vmatprep.mubr.f32.mxu0 %v16407_v27  ;;  %v13456_v6 = vpack.c.bf16 %v10747_v0, %v10742_v34 }
  0xde   : > { %10840 = vmatmul.mubr.msk.f32.gmra.mrb[34].mxu1 %vm391_vm1, %v16498_v50  ;;  %10764 = vmatprep.subr.msk.mxu0 %vm404_vm0, %v10760_v5 }
  0xdf   : > { %4092 = vmatprep.mubr.f32.mxu1 %v16407_v27  ;;  %13519 = vmatpush3.bf16.msra.mxu1 %v13444_v49  ;;  %v16740_v49 = vsub.s32 2, %v16715_v40 }
  0xe0   : > { %12966 = vmatprep.subr.msk.mxu1 %vm404_vm0, %v3579_v32 }
  0xe1   : > { %10765 = vmatpush1.msk.msra.mxu0 %vm404_vm0, %v10759_v33  ;;  %v16773_v17 = vrot.slane %v16748_v51, %v16740_v49 }
  0xe2   : > { %10841 = vmatmul.mubr.msk.f32.gmra.mrb[36].mxu1 %vm391_vm1, %v16510_v52  ;;  %10766 = vmatmul.mubr.msk.f32.vlgmr.msra.gmra.mrb[18].mxu0 %vm391_vm1, %v16478_v46 }
  0xe3   : > { %4098 = vmatprep.mubr.f32.mxu1 %v16407_v27  ;;  %12967 = vmatpush3.msk.msra.mxu1 %vm404_vm0, %v3579_v32  ;;  %v10912_v32 = vld [vmem:[%s21901_s2 + $0x710] sm:$0xff] }
  0xe4   : > { %13521 = vmatprep.subr.bf16.mxu1 %v13448_v13  ;;  %3245 = vmatprep.mubr.f32.mxu0 %v16407_v27  ;;  %v10899_v13 = vld [vmem:[%s21901_s2 + $0x6a8] sm:$0xff] }
  0xe5   : > { %13457 = vmatprep.subr.bf16.mxu0 %v13456_v6 }
  0xe6   : > { %10842 = vmatmul.mubr.msk.f32.gmra.mrb[38].mxu1 %vm391_vm1, %v16540_v60  ;;  %10767 = vmatmul.mubr.msk.f32.gmra.mrb[20].mxu0 %vm391_vm1, %v16498_v50 }
  0xe7   : > { %12968 = vmatprep.mubr.msk.f32.mxu1 %vm391_vm1, %v16478_v46  ;;  %3251 = vmatprep.mubr.f32.mxu0 %v16407_v27 }
  0xe8   : > { %13459 = vmatpush1.bf16.msra.mxu0 %v13458_v11 }
  0xe9   : > { %13461 = vmatprep.subr.bf16.mxu0 %v13460_v23 }
  0xea   : > { %12969 = vmatmul.mubr.msk.f32.vlgmr.msra.gmra.mrb[40].mxu1 %vm391_vm1, %v16498_v50  ;;  %10768 = vmatmul.mubr.msk.f32.gmra.mrb[22].mxu0 %vm391_vm1, %v16510_v52 }
  0xeb   : > { %13523 = vmatpush1.bf16.msra.mxu1 %v13450_v62  ;;  %12971 = vmatprep.mubr.msk.f32.mxu1 %vm391_vm1, %v16510_v52  ;;  %v13550_v62 = vpack.c.bf16 %v10899_v13, %v10896_v59 }
  0xec   : > { %13525 = vmatprep.subr.bf16.mxu1 %v13452_v54  ;;  %3257 = vmatprep.mubr.f32.mxu0 %v16407_v27 }
  0xed   : > { %13463 = vmatpush1.bf16.msra.mxu0 %v13462_v29 }
  0xee   : > { %12972 = vmatmul.mubr.msk.f32.gmra.mrb[42].mxu1 %vm391_vm1, %v16540_v60  ;;  %10769 = vmatmul.mubr.msk.f32.gmra.mrb[24].mxu0 %vm391_vm1, %v16540_v60 }
  0xef   : > { %13527 = vmatpush1.bf16.msra.mxu1 %v13454_v28  ;;  %4310 = vmatprep.mubr.f32.mxu1 %v16407_v27  ;;  %v10905_v28 = vld [vmem:[%s21901_s2 + $0x6d8] sm:$0xff] }
  0xf0   : > { %10873 = vmatprep.subr.msk.mxu1 %vm404_vm0, %v10869_v16  ;;  %10770 = vmatprep.subr.msk.mxu0 %vm404_vm0, %v10762_v19  ;;  %v10918_v16 = vld [vmem:[%s21901_s2 + $0x740] sm:$0xff] }
  0xf1   : > { %10771 = vmatpush1.msk.msra.mxu0 %vm404_vm0, %v10761_v20  ;;  %3328 = vmatprep.mubr.f32.mxu0 %v16407_v27  ;;  %v13672_v20 = vpack.c.bf16 %v11086_v21, %v11083_v63 }
  0xf2   : > { %10772 = vmatmul.mubr.msk.f32.vlgmr.msra.gmra.mrb[26].mxu0 %vm391_vm1, %v16478_v46  ;;  %13465 = vmatprep.subr.bf16.mxu0 %v16654_v26 }
  0xf3   : > { %10874 = vmatpush1.msk.msra.mxu1 %vm404_vm0, %v10868_v7  ;;  %3334 = vmatprep.mubr.f32.mxu0 %v16407_v27 }
  0xf4   : > { %10875 = vmatmul.mubr.msk.f32.vlgmr.msra.gmra.mrb[24].mxu1 %vm391_vm1, %v16663_v35  ;;  %13529 = vmatprep.subr.bf16.mxu1 %v13456_v6  ;;  %v10872_v6 = vld [vmem:[%s21900_s1 + $0x250] sm:$0x1] }
  0xf5   : > { %4316 = vmatprep.mubr.f32.mxu1 %v16407_v27  ;;  %13531 = vmatpush1.bf16.msra.mxu1 %v13458_v11 }
  0xf6   : > { %v575_v31 = vpop.f32.mrb[8].mxu0  ;;  %10773 = vmatmul.mubr.msk.f32.gmra.mrb[28].mxu0 %vm391_vm1, %v16498_v50  ;;  %13533 = vmatprep.subr.bf16.mxu1 %v13460_v23 }
  0xf7   : > { %v577_v36 = vpop.f32.mrb[9].mxu0  ;;  %3340 = vmatprep.mubr.f32.mxu0 %v16407_v27  ;;  %13467 = vmatpush3.bf16.msra.mxu0 %v16654_v26 }
  0xf8   : > { %10876 = vmatmul.mubr.msk.f32.gmra.mrb[26].mxu1 %vm391_vm1, %v16684_v30  ;;  %13469 = vmatprep.subr.bf16.mxu0 %v16680_v43 }
  0xf9   : > { %4322 = vmatprep.mubr.f32.mxu1 %v16407_v27  ;;  %13535 = vmatpush1.bf16.msra.mxu1 %v13462_v29 }
  0xfa   : > { %10774 = vmatmul.mubr.msk.f32.gmra.mrb[30].mxu0 %vm391_vm1, %v16510_v52  ;;  %10879 = vmatprep.subr.msk.mxu1 %vm404_vm0, %v10871_v37 }
  0xfb   : > { %3346 = vmatprep.mubr.f32.mxu0 %v16407_v27  ;;  %13471 = vmatpush3.bf16.msra.mxu0 %v16680_v43 }
  0xfc   : > { %10877 = vmatmul.mubr.msk.f32.gmra.mrb[28].mxu1 %vm391_vm1, %v16696_v3  ;;  %12934 = vmatprep.subr.msk.mxu0 %vm404_vm0, %v10763_v58 }
  0xfd   : > { %4328 = vmatprep.mubr.f32.mxu1 %v16407_v27  ;;  %10880 = vmatpush1.msk.msra.mxu1 %vm404_vm0, %v10870_v39  ;;  %v11082_v39 = vld [vmem:[%s21901_s2 + $0xc60] sm:$0xff] }
  0xfe   : > { %10775 = vmatmul.mubr.msk.f32.gmra.mrb[32].mxu0 %vm391_vm1, %v16540_v60  ;;  %13537 = vmatprep.subr.bf16.mxu1 %v16654_v26 }
  0xff   : > { %12935 = vmatpush3.msk.msra.mxu0 %vm404_vm0, %v10763_v58  ;;  %12936 = vmatprep.mubr.msk.f32.mxu0 %vm391_vm1, %v16478_v46  ;;  %v10903_v46 = vld [vmem:[%s21901_s2 + $0x6c8] sm:$0xff]  ;;  %v10921_v58 = vld [vmem:[%s21901_s2 + $0x758] sm:$0xff] }
 0x100   : > { %10878 = vmatmul.mubr.msk.f32.gmra.mrb[30].mxu1 %vm391_vm1, %v16730_v45  ;;  %13545 = vmatprep.subr.bf16.mxu0 %v13544_v41  ;;  %v13552_v53 = vpack.c.bf16 %v10906_v9, %v10903_v46  ;;  %v11085_v41 = vld [vmem:[%s21901_s2 + $0xc78] sm:$0xff]  ;;  %v13564_v13 = vpack.c.bf16 %v10924_v1, %v10921_v58  ;;  %v10920_v46 = vld [vmem:[%s21901_s2 + $0x750] sm:$0xff]  ;;  %v10923_v9 = vld [vmem:[%s21901_s2 + $0x768] sm:$0xff] }
 0x101   : > { %4399 = vmatprep.mubr.f32.mxu1 %v16407_v27  ;;  %v10953_v58 = vld [vmem:[%s21901_s2 + $0x858] sm:$0xff] }
 0x102   : > { %12937 = vmatmul.mubr.msk.f32.vlgmr.msra.gmra.mrb[34].mxu0 %vm391_vm1, %v16498_v50  ;;  %v10902_v50 = vld [vmem:[%s21901_s2 + $0x6c0] sm:$0xff] }
 0x103   : > { %v1186_v22 = vpop.f32.mrb[6].mxu1  ;;  %12939 = vmatprep.mubr.msk.f32.mxu0 %vm391_vm1, %v16510_v52  ;;  %13547 = vmatpush1.bf16.msra.mxu0 %v13546_v8  ;;  %v10909_v52 = vld [vmem:[%s21901_s2 + $0x6f8] sm:$0xff]  ;;  %v13554_v24 = vpack.c.bf16 %v10905_v28, %v10902_v50  ;;  %v11092_v8 = vld [vmem:[%s21901_s2 + $0xcb0] sm:$0xff]  ;;  %v13566_v28 = vpack.c.bf16 %v10923_v9, %v10920_v46 }
 0x104   : > { %10881 = vmatmul.mubr.msk.f32.vlgmr.msra.gmra.mrb[32].mxu1 %vm391_vm1, %v16663_v35  ;;  %v15014_v54 = vadd.f32 %v1186_v22, %v575_v31  ;;  %v1188_v18 = vpop.f32.mrb[7].mxu1  ;;  %13549 = vmatprep.subr.bf16.mxu0 %v13548_v57  ;;  %v13556_v23 = vpack.c.bf16 %v10912_v32, %v10909_v52  ;;  %v13560_v31 = vpack.c.bf16 %v10918_v16, %v10915_v15  ;;  %v11088_v50 = vld [vmem:[%s21901_s2 + $0xc90] sm:$0xff]  ;;  %v10943_v52 = vld [vmem:[%s21901_s2 + $0x808] sm:$0xff]  ;;  %v16939_v15 = vsub.s32 1, %v16715_v40 }
 0x105   : > { %v15015_v5 = vadd.f32 %v1188_v18, %v577_v36  ;;  %4405 = vmatprep.mubr.f32.mxu1 %v16407_v27  ;;  %13539 = vmatpush3.bf16.msra.mxu1 %v16654_v26  ;;  %v10917_v36 = vld [vmem:[%s21901_s2 + $0x738] sm:$0xff]  ;;  %v13578_v16 = vpack.c.bf16 %v10941_v12, %v10938_v4 }
 0x106   : > { %v1343_v33 = vadd.f32 %v15014_v54, %v16773_v17  ;;  %12940 = vmatmul.mubr.msk.f32.gmra.mrb[36].mxu0 %vm391_vm1, %v16540_v60  ;;  %13541 = vmatprep.subr.bf16.mxu1 %v16680_v43  ;;  %v13562_v47 = vpack.c.bf16 %v10917_v36, %v10914_v55  ;;  %v13674_v54 = vpack.c.bf16 %v11085_v41, %v11082_v39  ;;  %v10957_v39 = vld [vmem:[%s21901_s2 + $0x878] sm:$0xff]  ;;  %v10960_v41 = vld [vmem:[%s21901_s2 + $0x890] sm:$0xff] }
 0x107   : > { %v1344_v34 = vadd.f32 %v15015_v5, %v16779_v61  ;;  %v1192_v0 = vpop.f32.mrb[0].mxu1  ;;  %13551 = vmatpush1.bf16.msra.mxu0 %v13550_v62  ;;  %v10930_v62 = vld [vmem:[%s21901_s2 + $0x7a0] sm:$0xff]  ;;  %v10940_v5 = vld [vmem:[%s21901_s2 + $0x7f0] sm:$0xff] }
 0x108   : > { %v1363_v60 = vmax.f32 %v1343_v33, 0.0  ;;  %10882 = vmatmul.mubr.msk.f32.gmra.mrb[34].mxu1 %vm391_vm1, %v16684_v30  ;;  %v1348_v10 = vadd.f32 %v16773_v17, %v1192_v0  ;;  %v1194_v11 = vpop.f32.mrb[1].mxu1  ;;  %13553 = vmatprep.subr.bf16.mxu0 %v13552_v53  ;;  %v13676_v53 = vpack.c.bf16 %v11092_v8, %v11089_v48  ;;  %v10926_v33 = vld [vmem:[%s21901_s2 + $0x780] sm:$0xff]  ;;  %v10933_v0 = vld [vmem:[%s21901_s2 + $0x7b8] sm:$0xff] }
 0x109   : > { %v1364_v29 = vmax.f32 %v1344_v34, 0.0  ;;  %v1349_v14 = vadd.f32 %v16779_v61, %v1194_v11  ;;  %4411 = vmatprep.mubr.f32.mxu1 %v16407_v27  ;;  %13543 = vmatpush3.bf16.msra.mxu1 %v16680_v43  ;;  %v10929_v34 = vld [vmem:[%s21901_s2 + $0x798] sm:$0xff]  ;;  %v10942_v11 = vld [vmem:[%s21901_s2 + $0x800] sm:$0xff] }
 0x10a   : > { %1383 = vst [vmem:[#allocation2 + $0x10] sm:$0xff] %v1363_v60  ;;  %v1368_v19 = vmax.f32 %v1348_v10, 0.0  ;;  %12982 = vmatprep.subr.msk.mxu1 %vm404_vm0, %v10872_v6  ;;  %v13570_v63 = vpack.c.bf16 %v10929_v34, %v10926_v33  ;;  %v10935_v60 = vld [vmem:[%s21901_s2 + $0x7c8] sm:$0xff]  ;;  %v10969_v33 = vld [vmem:[%s21901_s2 + $0x8d8] sm:$0xff]  ;;  %v10972_v34 = vld [vmem:[%s21901_s2 + $0x8f0] sm:$0xff] }
 0x10b   : > { %1384 = vst [vmem:[#allocation2 + $0x18] sm:$0xff] %v1364_v29  ;;  %v1369_v26 = vmax.f32 %v1349_v14, 0.0  ;;  %v1198_v7 = vpop.f32.mrb[2].mxu1  ;;  %13555 = vmatpush1.bf16.msra.mxu0 %v13554_v24  ;;  %v13680_v24 = vpack.c.bf16 %v10943_v52, %v10940_v5  ;;  %v10939_v10 = vld [vmem:[%s21901_s2 + $0x7e8] sm:$0xff]  ;;  %v16930_v29 = vsub.s32 0, %v16715_v40  ;;  %v10948_v14 = vld [vmem:[%s21901_s2 + $0x830] sm:$0xff] }
 0x10c   : > { %1389 = vst [vmem:[#allocation2 + $0x38] sm:$0xff] %v1368_v19  ;;  %10883 = vmatmul.mubr.msk.f32.gmra.mrb[36].mxu1 %vm391_vm1, %v16696_v3  ;;  %v1353_v42 = vadd.f32 %v16773_v17, %v1198_v7  ;;  %v1200_v43 = vpop.f32.mrb[3].mxu1  ;;  %13557 = vmatprep.subr.bf16.mxu0 %v13556_v23  ;;  %v13576_v23 = vpack.c.bf16 %v10942_v11, %v10939_v10 }
 0x10d   : > { %1390 = vst [vmem:[#allocation2 + $0x40] sm:$0xff] %v1369_v26  ;;  %v1354_v37 = vadd.f32 %v16779_v61, %v1200_v43  ;;  %4417 = vmatprep.mubr.f32.mxu1 %v16407_v27  ;;  %12983 = vmatpush3.msk.msra.mxu1 %vm404_vm0, %v10872_v6  ;;  %v10947_v26 = vld [vmem:[%s21901_s2 + $0x828] sm:$0xff]  ;;  %v1319_v7 = vrot.slane %v16748_v51, %v16930_v29 }
 0x10e   : > { %v1373_v2 = vmax.f32 %v1353_v42, 0.0  ;;  %13673 = vmatprep.subr.bf16.mxu1 %v13672_v20  ;;  %v10944_v20 = vld [vmem:[%s21901_s2 + $0x810] sm:$0xff]  ;;  %v10954_v42 = vld [vmem:[%s21901_s2 + $0x860] sm:$0xff]  ;;  %v1323_v43 = vrot.slane %v16748_v51, %v16939_v15 }
 0x10f   : > { %v1374_v25 = vmax.f32 %v1354_v37, 0.0  ;;  %v1204_v44 = vpop.f32.mrb[4].mxu1  ;;  %13559 = vmatpush1.bf16.msra.mxu0 %v13558_v38  ;;  %v10951_v38 = vld [vmem:[%s21901_s2 + $0x848] sm:$0xff]  ;;  %v10950_v37 = vld [vmem:[%s21901_s2 + $0x840] sm:$0xff] }
 0x110   : > { %1394 = vst [vmem:[#allocation2 + $0x60] sm:$0xff] %v1373_v2  ;;  %10884 = vmatmul.mubr.msk.f32.gmra.mrb[38].mxu1 %vm391_vm1, %v16730_v45  ;;  %v1358_v57 = vadd.f32 %v16773_v17, %v1204_v44  ;;  %v1206_v59 = vpop.f32.mrb[5].mxu1  ;;  %13561 = vmatprep.subr.bf16.mxu0 %v13560_v31  ;;  %v10927_v17 = vld [vmem:[%s21901_s2 + $0x788] sm:$0xff]  ;;  %v13582_v31 = vpack.c.bf16 %v10947_v26, %v10944_v20  ;;  %v10977_v20 = vld [vmem:[%s21901_s2 + $0x918] sm:$0xff] }
 0x111   : > { %1395 = vst [vmem:[#allocation2 + $0x68] sm:$0xff] %v1374_v25  ;;  %v1359_v22 = vadd.f32 %v16779_v61, %v1206_v59  ;;  %12984 = vmatprep.mubr.msk.f32.mxu1 %vm391_vm1, %v16663_v35  ;;  %v11091_v61 = vld [vmem:[%s21901_s2 + $0xca8] sm:$0xff]  ;;  %v13568_v32 = vpack.c.bf16 %v10930_v62, %v10927_v17  ;;  %v13584_v36 = vpack.c.bf16 %v10954_v42, %v10951_v38  ;;  %v10956_v59 = vld [vmem:[%s21901_s2 + $0x870] sm:$0xff]  ;;  %v10966_v17 = vld [vmem:[%s21901_s2 + $0x8c0] sm:$0xff] }
 0x112   : > { %v1378_v18 = vmax.f32 %v1358_v57, 0.0  ;;  %v13678_v6 = vpack.c.bf16 %v11091_v61, %v11088_v50  ;;  %v13588_v57 = vpack.c.bf16 %v10960_v41, %v10957_v39  ;;  %v10981_v38 = vld [vmem:[%s21901_s2 + $0x938] sm:$0xff]  ;;  %v10984_v42 = vld [vmem:[%s21901_s2 + $0x950] sm:$0xff] }
 0x113   : > { %v1379_v35 = vmax.f32 %v1359_v22, 0.0  ;;  %13563 = vmatpush1.bf16.msra.mxu0 %v13562_v47  ;;  %v13586_v47 = vpack.c.bf16 %v10953_v58, %v10950_v37  ;;  %v10963_v22 = vld [vmem:[%s21901_s2 + $0x8a8] sm:$0xff]  ;;  %v13604_v58 = vpack.c.bf16 %v10984_v42, %v10981_v38  ;;  %v10946_v42 = vld [vmem:[%s21901_s2 + $0x820] sm:$0xff] }
 0x114   : > { %1399 = vst [vmem:[#allocation2 + $0x88] sm:$0xff] %v1378_v18  ;;  %12985 = vmatmul.mubr.msk.f32.vlgmr.msra.gmra.mrb[40].mxu1 %vm391_vm1, %v16684_v30  ;;  %13565 = vmatprep.subr.bf16.mxu0 %v13564_v13  ;;  %v10936_v30 = vld [vmem:[%s21901_s2 + $0x7d0] sm:$0xff]  ;;  %v10959_v13 = vld [vmem:[%s21901_s2 + $0x888] sm:$0xff]  ;;  %v13592_v61 = vpack.c.bf16 %v10966_v17, %v10963_v22 }
 0x115   : > { %1400 = vst [vmem:[#allocation2 + $0x90] sm:$0xff] %v1379_v35  ;;  %12987 = vmatprep.mubr.msk.f32.mxu1 %vm391_vm1, %v16696_v3  ;;  %13675 = vmatpush1.bf16.msra.mxu1 %v13674_v54  ;;  %v13572_v21 = vpack.c.bf16 %v10936_v30, %v10933_v0  ;;  %v10932_v3 = vld [vmem:[%s21901_s2 + $0x7b0] sm:$0xff]  ;;  %v13590_v18 = vpack.c.bf16 %v10959_v13, %v10956_v59  ;;  %v10962_v35 = vld [vmem:[%s21901_s2 + $0x8a0] sm:$0xff] }
 0x116   : > { %13677 = vmatprep.subr.bf16.mxu1 %v13676_v53  ;;  %v17041_v13 = vld [vmem:[%s21903_s4] sm:$0x1f] }
 0x117   : > { %13567 = vmatpush1.bf16.msra.mxu0 %v13566_v28  ;;  %v10965_v28 = vld [vmem:[%s21901_s2 + $0x8b8] sm:$0xff]  ;;  %v17051_v22 = vrot.slane %v17041_v13, %v16939_v15 }
 0x118   : > { %12988 = vmatmul.mubr.msk.f32.gmra.mrb[42].mxu1 %vm391_vm1, %v16730_v45  ;;  %13569 = vmatprep.subr.bf16.mxu0 %v13568_v32  ;;  %v13574_v45 = vpack.c.bf16 %v10935_v60, %v10932_v3  ;;  %v16988_v32 = vsub.s32 4, %v16715_v40  ;;  %v10968_v40 = vld [vmem:[%s21901_s2 + $0x8d0] sm:$0xff]  ;;  %v10971_v3 = vld [vmem:[%s21901_s2 + $0x8e8] sm:$0xff] }
 0x119   : > { %13679 = vmatpush1.bf16.msra.mxu1 %v13678_v6  ;;  %5325 = vmatprep.mubr.f32.mxu1 %v16407_v27  ;;  %v10945_v27 = vld [vmem:[%s21901_s2 + $0x818] sm:$0xff]  ;;  %v13594_v6 = vpack.c.bf16 %v10965_v28, %v10962_v35  ;;  %v10986_v35 = vld [vmem:[%s21901_s2 + $0x960] sm:$0xff] }
 0x11a   : > { %13681 = vmatprep.subr.bf16.mxu1 %v13680_v24  ;;  %v13580_v19 = vpack.c.bf16 %v10948_v14, %v10945_v27  ;;  %v1335_v11 = vrot.slane %v16748_v51, %v16988_v32  ;;  %v13598_v27 = vpack.c.bf16 %v10971_v3, %v10968_v40  ;;  %v10974_v51 = vld [vmem:[%s21901_s2 + $0x900] sm:$0xff]  ;;  %v10989_v28 = vld [vmem:[%s21901_s2 + $0x978] sm:$0xff] }
 0x11b   : > { %13571 = vmatpush1.bf16.msra.mxu0 %v13570_v63  ;;  %v13610_v3 = vpack.c.bf16 %v10989_v28, %v10986_v35 }
 0x11c   : > { %13573 = vmatprep.subr.bf16.mxu0 %v13572_v21  ;;  %v13596_v21 = vpack.c.bf16 %v10972_v34, %v10969_v33  ;;  %v10993_v33 = vld [vmem:[%s21901_s2 + $0x998] sm:$0xff]  ;;  %v10996_v34 = vld [vmem:[%s21901_s2 + $0x9b0] sm:$0xff] }
 0x11f   : > { %13575 = vmatpush1.bf16.msra.mxu0 %v13574_v45  ;;  %v10975_v45 = vld [vmem:[%s21901_s2 + $0x908] sm:$0xff] }
 0x120   : > { %13577 = vmatprep.subr.bf16.mxu0 %v13576_v23  ;;  %v10978_v23 = vld [vmem:[%s21901_s2 + $0x920] sm:$0xff] }
 0x123   : > { %13579 = vmatpush1.bf16.msra.mxu0 %v13578_v16 }
 0x124   : > { %v1097_v55 = vpop.f32.mrb[0].mxu0  ;;  %13581 = vmatprep.subr.bf16.mxu0 %v13580_v19  ;;  %v13600_v19 = vpack.c.bf16 %v10978_v23, %v10975_v45  ;;  %v13612_v45 = vpack.c.bf16 %v10996_v34, %v10993_v33  ;;  %v10992_v23 = vld [vmem:[%s21901_s2 + $0x990] sm:$0xff] }
 0x125   : > { %v1341_v1 = vadd.f32 %v1319_v7, %v1097_v55  ;;  %v1099_v2 = vpop.f32.mrb[1].mxu0  ;;  %v13602_v55 = vpack.c.bf16 %v10977_v20, %v10974_v51  ;;  %v10892_v20 = vld [vmem:[%s21901_s2 + $0x670] sm:$0xff] }
 0x126   : > { %v1342_v25 = vadd.f32 %v1323_v43, %v1099_v2  ;;  %v10983_v2 = vld [vmem:[%s21901_s2 + $0x948] sm:$0xff]  ;;  %v10904_v33 = vld [vmem:[%s21901_s2 + $0x6d0] sm:$0xff] }
 0x127   : > { %v1361_v44 = vmax.f32 %v1341_v1, 0.0  ;;  %13583 = vmatpush1.bf16.msra.mxu0 %v13582_v31  ;;  %v10980_v1 = vld [vmem:[%s21901_s2 + $0x930] sm:$0xff] }
 0x128   : > { %v1362_v48 = vmax.f32 %v1342_v25, 0.0  ;;  %v1103_v8 = vpop.f32.mrb[2].mxu0  ;;  %13585 = vmatprep.subr.bf16.mxu0 %v13584_v36  ;;  %v10987_v25 = vld [vmem:[%s21901_s2 + $0x968] sm:$0xff]  ;;  %v11004_v34 = vld [vmem:[%s21901_s2 + $0x9f0] sm:$0xff] }
 0x129   : > { %1381 = vst [vmem:[#allocation2] sm:$0xff] %v1361_v44  ;;  %v1346_v46 = vadd.f32 %v1319_v7, %v1103_v8  ;;  %v1105_v9 = vpop.f32.mrb[3].mxu0  ;;  %v10990_v44 = vld [vmem:[%s21901_s2 + $0x980] sm:$0xff]  ;;  %v13606_v8 = vpack.c.bf16 %v10983_v2, %v10980_v1 }
 0x12a   : > { %1382 = vst [vmem:[#allocation2 + $0x8] sm:$0xff] %v1362_v48  ;;  %v1347_v62 = vadd.f32 %v1323_v43, %v1105_v9  ;;  %v13608_v59 = vpack.c.bf16 %v10990_v44, %v10987_v25  ;;  %v17047_v9 = vrot.slane %v17041_v13, %v16930_v29  ;;  %v10998_v2 = vld [vmem:[%s21901_s2 + $0x9c0] sm:$0xff] }
 0x12b   : > { %v1366_v54 = vmax.f32 %v1346_v46, 0.0  ;;  %13587 = vmatpush1.bf16.msra.mxu0 %v13586_v47  ;;  %v2407_v46 = vrot.slane %v17041_v13, %v16988_v32  ;;  %v10898_v44 = vld [vmem:[%s21901_s2 + $0x6a0] sm:$0xff] }
 0x12c   : > { %v1367_v53 = vmax.f32 %v1347_v62, 0.0  ;;  %v1109_v50 = vpop.f32.mrb[4].mxu0  ;;  %13589 = vmatprep.subr.bf16.mxu0 %v13588_v57 }
 0x12d   : > { %1387 = vst [vmem:[#allocation2 + $0x28] sm:$0xff] %v1366_v54  ;;  %v1351_v5 = vadd.f32 %v1319_v7, %v1109_v50  ;;  %v1111_v52 = vpop.f32.mrb[5].mxu0 }
 0x12e   : > { %1388 = vst [vmem:[#allocation2 + $0x30] sm:$0xff] %v1367_v53  ;;  %v1352_v0 = vadd.f32 %v1323_v43, %v1111_v52 }
 0x12f   : > { %v1371_v30 = vmax.f32 %v1351_v5, 0.0  ;;  %13591 = vmatpush1.bf16.msra.mxu0 %v13590_v18 }
 0x130   : > { %v1372_v24 = vmax.f32 %v1352_v0, 0.0  ;;  %v1115_v63 = vpop.f32.mrb[6].mxu0  ;;  %13593 = vmatprep.subr.bf16.mxu0 %v13592_v61 }
 0x131   : > { %1392 = vst [vmem:[#allocation2 + $0x50] sm:$0xff] %v1371_v30  ;;  %v1356_v60 = vadd.f32 %v1319_v7, %v1115_v63  ;;  %v1117_v10 = vpop.f32.mrb[7].mxu0 }
 0x132   : > { %1393 = vst [vmem:[#allocation2 + $0x58] sm:$0xff] %v1372_v24  ;;  %v1357_v4 = vadd.f32 %v1323_v43, %v1117_v10 }
 0x133   : > { %v1376_v12 = vmax.f32 %v1356_v60, 0.0  ;;  %13595 = vmatpush1.bf16.msra.mxu0 %v13594_v6 }
 0x134   : > { %v1377_v14 = vmax.f32 %v1357_v4, 0.0  ;;  %v12842_v16 = vpop.f32.mrb[10].mxu0  ;;  %13597 = vmatprep.subr.bf16.mxu0 %v13596_v21  ;;  %v10995_v4 = vld [vmem:[%s21901_s2 + $0x9a8] sm:$0xff] }
 0x135   : > { %1397 = vst [vmem:[#allocation2 + $0x78] sm:$0xff] %v1376_v12  ;;  %v1350_v26 = vadd.f32 %v12842_v16, %v1335_v11  ;;  %v1275_v7 = vpop.f32.mrb[11].mxu0  ;;  %v11002_v16 = vld [vmem:[%s21901_s2 + $0x9e0] sm:$0xff] }
 0x136   : > { %1398 = vst [vmem:[#allocation2 + $0x80] sm:$0xff] %v1377_v14  ;;  %v1345_v43 = vadd.f32 %v1335_v11, %v1275_v7  ;;  %v10999_v14 = vld [vmem:[%s21901_s2 + $0x9c8] sm:$0xff] }
 0x137   : > { %v1370_v31 = vmax.f32 %v1350_v26, 0.0  ;;  %13599 = vmatpush1.bf16.msra.mxu0 %v13598_v27  ;;  %v10895_v26 = vld [vmem:[%s21901_s2 + $0x688] sm:$0xff] }
 0x138   : > { %v1365_v36 = vmax.f32 %v1345_v43, 0.0  ;;  %v12845_v37 = vpop.f32.mrb[12].mxu0  ;;  %13601 = vmatprep.subr.bf16.mxu0 %v13600_v19  ;;  %v10949_v43 = vld [vmem:[%s21901_s2 + $0x838] sm:$0xff]  ;;  %v13682_v1 = vpack.c.bf16 %v10895_v26, %v10892_v20  ;;  %v10910_v20 = vld [vmem:[%s21901_s2 + $0x700] sm:$0xff] }
 0x139   : > { %1391 = vst.msk [vmem:[#allocation2 + $0x48] sm:$0xff] %vm1385_vm2, %v1370_v31  ;;  %v1360_v39 = vadd.f32 %v12845_v37, %v1335_v11  ;;  %v1285_v41 = vpop.f32.mrb[13].mxu0  ;;  %v13614_v31 = vpack.c.bf16 %v10995_v4, %v10992_v23  ;;  %v13616_v37 = vpack.c.bf16 %v11002_v16, %v10999_v14  ;;  %v13684_v25 = vpack.c.bf16 %v10949_v43, %v10946_v42  ;;  %v11014_v23 = vld [vmem:[%s21901_s2 + $0xa40] sm:$0xff] }
 0x13a   : > { %1386 = vst.msk [vmem:[#allocation2 + $0x20] sm:$0xff] %vm1385_vm2, %v1365_v36  ;;  %v1355_v47 = vadd.f32 %v1335_v11, %v1285_v41  ;;  %v11010_v26 = vld [vmem:[%s21901_s2 + $0xa20] sm:$0xff] }
 0x13b   : > { %v1380_v48 = vmax.f32 %v1360_v39, 0.0  ;;  %13603 = vmatpush1.bf16.msra.mxu0 %v13602_v55  ;;  %v11001_v39 = vld [vmem:[%s21901_s2 + $0x9d8] sm:$0xff] }
 0x13c   : > { %v1375_v57 = vmax.f32 %v1355_v47, 0.0  ;;  %13605 = vmatprep.subr.bf16.mxu0 %v13604_v58  ;;  %v10901_v47 = vld [vmem:[%s21901_s2 + $0x6b8] sm:$0xff] }
 0x13d   : > { %1401 = vst.msk [vmem:[#allocation2 + $0x98] sm:$0xff] %vm1385_vm2, %v1380_v48  ;;  %v13686_v28 = vpack.c.bf16 %v10901_v47, %v10898_v44  ;;  %v11017_v44 = vld [vmem:[%s21901_s2 + $0xa58] sm:$0xff]  ;;  %v11020_v47 = vld [vmem:[%s21901_s2 + $0xa70] sm:$0xff] }
 0x13e   : > { %1396 = vst.msk [vmem:[#allocation2 + $0x70] sm:$0xff] %vm1385_vm2, %v1375_v57 }
 0x13f   : > { %13607 = vmatpush1.bf16.msra.mxu0 %v13606_v8 }
 0x140   : > { %13609 = vmatprep.subr.bf16.mxu0 %v13608_v59  ;;  %v10952_v59 = vld [vmem:[%s21901_s2 + $0x850] sm:$0xff] }
 0x152   : > { %v12890_v17 = vpop.f32.mrb[14].mxu0 }
 0x153   : > { %v2422_v62 = vadd.f32 %v12890_v17, %v2407_v46  ;;  %v2347_v54 = vpop.f32.mrb[15].mxu0  ;;  %v2169_v18 = vpop.f32.mrb[8].mxu1 }
 0x154   : > { %v2417_v53 = vadd.f32 %v2407_v46, %v2347_v54  ;;  %v17054_v50 = vadd.f32 %v17047_v9, %v2169_v18  ;;  %v2171_v61 = vpop.f32.mrb[9].mxu1  ;;  %v17152_v54 = vrot.slane %v17041_v13, %v16740_v49  ;;  %v13618_v18 = vpack.c.bf16 %v11001_v39, %v10998_v2 }
 0x155   : > { %v2442_v5 = vmax.f32 %v2422_v62, 0.0  ;;  %v17063_v52 = vadd.f32 %v17051_v22, %v2171_v61  ;;  %v11008_v61 = vld [vmem:[%s21901_s2 + $0xa10] sm:$0xff] }
 0x156   : > { %v2437_v0 = vmax.f32 %v2417_v53, 0.0  ;;  %v2433_v30 = vmax.f32 %v17054_v50, 0.0  ;;  %v12893_v6 = vpop.f32.mrb[16].mxu0  ;;  %v11005_v53 = vld [vmem:[%s21901_s2 + $0x9f8] sm:$0xff]  ;;  %v11000_v50 = vld [vmem:[%s21901_s2 + $0x9d0] sm:$0xff] }
 0x157   : > { %2463 = vst.msk [vmem:[#allocation2 + $0x110] sm:$0xff] %vm1385_vm2, %v2442_v5  ;;  %v2434_v24 = vmax.f32 %v17063_v52, 0.0  ;;  %v2432_v63 = vadd.f32 %v12893_v6, %v2407_v46  ;;  %v2357_v21 = vpop.f32.mrb[17].mxu0  ;;  %v2175_v40 = vpop.f32.mrb[10].mxu1  ;;  %v17165_v5 = vrot.slane %v17041_v13, %v16751_v56  ;;  %v10907_v13 = vld [vmem:[%s21901_s2 + $0x6e8] sm:$0xff] }
 0x158   : > { %2458 = vst.msk [vmem:[#allocation2 + $0xe8] sm:$0xff] %vm1385_vm2, %v2437_v0  ;;  %v2427_v60 = vadd.f32 %v2407_v46, %v2357_v21  ;;  %v17076_v10 = vadd.f32 %v17047_v9, %v2175_v40  ;;  %v2177_v11 = vpop.f32.mrb[11].mxu1  ;;  %v10955_v46 = vld [vmem:[%s21901_s2 + $0x868] sm:$0xff]  ;;  %v10961_v21 = vld [vmem:[%s21901_s2 + $0x898] sm:$0xff] }
 0x159   : > { %v2452_v12 = vmax.f32 %v2432_v63, 0.0  ;;  %v17085_v27 = vadd.f32 %v17051_v22, %v2177_v11  ;;  %5147 = vmatprep.mubr.f32.mxu0 %v2434_v24  ;;  %v13688_v6 = vpack.c.bf16 %v10955_v46, %v10952_v59  ;;  %v10958_v63 = vld [vmem:[%s21901_s2 + $0x880] sm:$0xff]  ;;  %v13620_v11 = vpack.c.bf16 %v11008_v61, %v11005_v53  ;;  %v10916_v53 = vld [vmem:[%s21901_s2 + $0x730] sm:$0xff] }
 0x15a   : > { %v2447_v19 = vmax.f32 %v2427_v60, 0.0  ;;  %v2438_v51 = vmax.f32 %v17076_v10, 0.0  ;;  %5148 = vmatmul.mubr.f32.vlgmr.msra.gmra.mrb[38].mxu0 %v2433_v30  ;;  %v13692_v43 = vpack.c.bf16 %v10961_v21, %v10958_v63  ;;  %v11016_v61 = vld [vmem:[%s21901_s2 + $0xa50] sm:$0xff]  ;;  %v11006_v10 = vld [vmem:[%s21901_s2 + $0xa00] sm:$0xff] }
 0x15b   : > { %2473 = vst.msk [vmem:[#allocation2 + $0x160] sm:$0xff] %vm1385_vm2, %v2452_v12  ;;  %v2439_v7 = vmax.f32 %v17085_v27, 0.0  ;;  %v2181_v38 = vpop.f32.mrb[12].mxu1  ;;  %13611 = vmatpush1.bf16.msra.mxu0 %v13610_v3  ;;  %v11054_v27 = vld [vmem:[%s21901_s2 + $0xb80] sm:$0xff] }
 0x15c   : > { %2468 = vst.msk [vmem:[#allocation2 + $0x138] sm:$0xff] %vm1385_vm2, %v2447_v19  ;;  %v17114_v55 = vadd.f32 %v17047_v9, %v2181_v38  ;;  %v2183_v36 = vpop.f32.mrb[13].mxu1  ;;  %13613 = vmatprep.subr.bf16.mxu0 %v13612_v45  ;;  %v11011_v45 = vld [vmem:[%s21901_s2 + $0xa28] sm:$0xff]  ;;  %v13690_v19 = vpack.c.bf16 %v10907_v13, %v10904_v33  ;;  %v11013_v38 = vld [vmem:[%s21901_s2 + $0xa38] sm:$0xff]  ;;  %v11026_v13 = vld [vmem:[%s21901_s2 + $0xaa0] sm:$0xff] }
 0x15d   : > { %v17117_v58 = vadd.f32 %v17051_v22, %v2183_v36  ;;  %5153 = vmatprep.mubr.f32.mxu0 %v2439_v7  ;;  %v10964_v36 = vld [vmem:[%s21901_s2 + $0x8b0] sm:$0xff]  ;;  %v13626_v46 = vpack.c.bf16 %v11013_v38, %v11010_v26  ;;  %v10922_v26 = vld [vmem:[%s21901_s2 + $0x760] sm:$0xff] }
 0x15e   : > { %v2443_v41 = vmax.f32 %v17114_v55, 0.0  ;;  %5154 = vmatmul.mubr.f32.gmra.mrb[40].mxu0 %v2438_v51  ;;  %v17189_v3 = vld [vmem:[#allocation2 + $0x110] sm:$0xff]  ;;  %v11067_v55 = vld [vmem:[%s21901_s2 + $0xbe8] sm:$0xff] }
 0x15f   : > { %v2444_v48 = vmax.f32 %v17117_v58, 0.0  ;;  %v17137_v8 = vld [vmem:[#allocation2 + $0xe8] sm:$0xff]  ;;  %v2187_v57 = vpop.f32.mrb[14].mxu1  ;;  %13615 = vmatpush1.bf16.msra.mxu0 %v13614_v31  ;;  %v10913_v31 = vld [vmem:[%s21901_s2 + $0x718] sm:$0xff]  ;;  %v11060_v58 = vld [vmem:[%s21901_s2 + $0xbb0] sm:$0xff] }
 0x160   : > { %11094 = vmatmul.mubr.msk.f32.vlgmr.msra.gmra.mrb[44].mxu1 %vm1385_vm2, %v17137_v8  ;;  %v17148_v17 = vadd.f32 %v17047_v9, %v2187_v57  ;;  %v2189_v62 = vpop.f32.mrb[15].mxu1  ;;  %13617 = vmatprep.subr.bf16.mxu0 %v13616_v37  ;;  %v15383_v9 = vld [vmem:[#allocation2 + $0xa0] sm:$0xff]  ;;  %v10967_v37 = vld [vmem:[%s21901_s2 + $0x8c8] sm:$0xff] }
 0x161   : > { %13683 = vmatpush3.bf16.msra.mxu1 %v13682_v1  ;;  %v17161_v35 = vadd.f32 %v17051_v22, %v2189_v62  ;;  %5331 = vmatprep.mubr.f32.mxu1 %v15383_v9  ;;  %v11007_v22 = vld [vmem:[%s21901_s2 + $0xa08] sm:$0xff]  ;;  %v13624_v1 = vpack.c.bf16 %v11014_v23, %v11011_v45  ;;  %v10973_v45 = vld [vmem:[%s21901_s2 + $0x8f8] sm:$0xff] }
 0x162   : > { %v2448_v0 = vmax.f32 %v17148_v17, 0.0  ;;  %13685 = vmatprep.subr.bf16.mxu1 %v13684_v25  ;;  %5159 = vmatprep.mubr.f32.mxu0 %v2444_v48  ;;  %v13622_v14 = vpack.c.bf16 %v11007_v22, %v11004_v34  ;;  %v13696_v34 = vpack.c.bf16 %v10967_v37, %v10964_v36  ;;  %v13628_v22 = vpack.c.bf16 %v11020_v47, %v11017_v44  ;;  %v17267_v21 = vld [vmem:[#allocation2 + $0x160] sm:$0xff]  ;;  %v10925_v36 = vld [vmem:[%s21901_s2 + $0x778] sm:$0xff]  ;;  %v10976_v47 = vld [vmem:[%s21901_s2 + $0x910] sm:$0xff] }
 0x163   : > { %v2449_v40 = vmax.f32 %v17161_v35, 0.0  ;;  %v2258_v60 = vpop.f32.mrb[16].mxu1  ;;  %5160 = vmatmul.mubr.f32.gmra.mrb[42].mxu0 %v2443_v41  ;;  %v17229_v39 = vld [vmem:[#allocation2 + $0x138] sm:$0xff]  ;;  %v11015_v35 = vld [vmem:[%s21901_s2 + $0xa48] sm:$0xff] }
 0x164   : > { %11095 = vmatmul.mubr.msk.f32.gmra.mrb[46].mxu1 %vm1385_vm2, %v17189_v3  ;;  %v17202_v4 = vadd.f32 %v17152_v54, %v2258_v60  ;;  %v2260_v12 = vpop.f32.mrb[17].mxu1  ;;  %13619 = vmatpush1.bf16.msra.mxu0 %v13618_v18  ;;  %v13694_v18 = vpack.c.bf16 %v10913_v31, %v10910_v20  ;;  %v11025_v31 = vld [vmem:[%s21901_s2 + $0xa98] sm:$0xff] }
 0x165   : > { %13687 = vmatpush3.bf16.msra.mxu1 %v13686_v28  ;;  %v17205_v16 = vadd.f32 %v17165_v5, %v2260_v12  ;;  %5337 = vmatprep.mubr.f32.mxu1 %v15383_v9  ;;  %v11019_v28 = vld [vmem:[%s21901_s2 + $0xa68] sm:$0xff]  ;;  %v11029_v37 = vld [vmem:[%s21901_s2 + $0xab8] sm:$0xff] }
 0x166   : > { %v2435_v42 = vmax.f32 %v17202_v4, 0.0  ;;  %13689 = vmatprep.subr.bf16.mxu1 %v13688_v6  ;;  %5165 = vmatprep.mubr.f32.mxu0 %v2449_v40  ;;  %v11023_v6 = vld [vmem:[%s21901_s2 + $0xa88] sm:$0xff]  ;;  %v11073_v17 = vld [vmem:[%s21901_s2 + $0xc18] sm:$0xff] }
 0x167   : > { %v2436_v2 = vmax.f32 %v17205_v16, 0.0  ;;  %v2264_v25 = vpop.f32.mrb[18].mxu1  ;;  %13621 = vmatprep.subr.bf16.mxu0 %v13620_v11  ;;  %5166 = vmatmul.mubr.f32.gmra.mrb[44].mxu0 %v2448_v0  ;;  %v10970_v11 = vld [vmem:[%s21901_s2 + $0x8e0] sm:$0xff]  ;;  %v13632_v38 = vpack.c.bf16 %v11026_v13, %v11023_v6  ;;  %v10931_v13 = vld [vmem:[%s21901_s2 + $0x7a8] sm:$0xff]  ;;  %v11021_v16 = vld [vmem:[%s21901_s2 + $0xa78] sm:$0xff] }
 0x168   : > { %11096 = vmatmul.mubr.msk.f32.gmra.mrb[48].mxu1 %vm1385_vm2, %v17229_v39  ;;  %v17242_v57 = vadd.f32 %v17152_v54, %v2264_v25  ;;  %v2266_v59 = vpop.f32.mrb[19].mxu1  ;;  %13623 = vmatpush1.bf16.msra.mxu0 %v13622_v14  ;;  %v13630_v14 = vpack.c.bf16 %v11019_v28, %v11016_v61  ;;  %v13702_v28 = vpack.c.bf16 %v10925_v36, %v10922_v26 }
 0x169   : > { %13691 = vmatpush3.bf16.msra.mxu1 %v13690_v19  ;;  %v17245_v62 = vadd.f32 %v17165_v5, %v2266_v59  ;;  %5343 = vmatprep.mubr.f32.mxu1 %v15383_v9  ;;  %v10919_v9 = vld [vmem:[%s21901_s2 + $0x748] sm:$0xff] }
 0x16a   : > { %v2440_v33 = vmax.f32 %v17242_v57, 0.0  ;;  %13693 = vmatprep.subr.bf16.mxu1 %v13692_v43  ;;  %13625 = vmatprep.subr.bf16.mxu0 %v13624_v1  ;;  %v13698_v20 = vpack.c.bf16 %v10919_v9, %v10916_v53  ;;  %v11022_v43 = vld [vmem:[%s21901_s2 + $0xa80] sm:$0xff]  ;;  %v11032_v1 = vld [vmem:[%s21901_s2 + $0xad0] sm:$0xff]  ;;  %v10979_v59 = vld [vmem:[%s21901_s2 + $0x928] sm:$0xff] }
 0x16b   : > { %v2441_v63 = vmax.f32 %v17245_v62, 0.0  ;;  %v2270_v60 = vpop.f32.mrb[20].mxu1  ;;  %5236 = vmatprep.mubr.f32.mxu0 %v2436_v2  ;;  %v13634_v53 = vpack.c.bf16 %v11025_v31, %v11022_v43  ;;  %v13636_v9 = vpack.c.bf16 %v11032_v1, %v11029_v37  ;;  %v11034_v31 = vld [vmem:[%s21901_s2 + $0xae0] sm:$0xff]  ;;  %v10937_v37 = vld [vmem:[%s21901_s2 + $0x7d8] sm:$0xff]  ;;  %v4667_v62 = vld [vmem:[%s21901_s2 + $0xc8] sm:$0xff] }
 0x16c   : > { %11097 = vmatmul.mubr.msk.f32.gmra.mrb[50].mxu1 %vm1385_vm2, %v17267_v21  ;;  %v17280_v23 = vadd.f32 %v17152_v54, %v2270_v60  ;;  %v2272_v12 = vpop.f32.mrb[21].mxu1  ;;  %13627 = vmatpush1.bf16.msra.mxu0 %v13626_v46  ;;  %v11035_v60 = vld [vmem:[%s21901_s2 + $0xae8] sm:$0xff]  ;;  %v11041_v1 = vld [vmem:[%s21901_s2 + $0xb18] sm:$0xff] }
 0x16d   : > { %13695 = vmatpush3.bf16.msra.mxu1 %v13694_v18  ;;  %5414 = vmatprep.mubr.f32.mxu1 %v2434_v24  ;;  %v17285_v19 = vadd.f32 %v17165_v5, %v2272_v12  ;;  %v13700_v24 = vpack.c.bf16 %v10973_v45, %v10970_v11  ;;  %v11038_v11 = vld [vmem:[%s21901_s2 + $0xb00] sm:$0xff]  ;;  %v4623_v57 = vld [vmem:[#allocation2 + $0x8] sm:$0xff] }
 0x16e   : > { %v2445_v52 = vmax.f32 %v17280_v23, 0.0  ;;  %13697 = vmatprep.subr.bf16.mxu1 %v13696_v34  ;;  %13629 = vmatprep.subr.bf16.mxu0 %v13628_v22  ;;  %v10928_v34 = vld [vmem:[%s21901_s2 + $0x790] sm:$0xff]  ;;  %v10982_v12 = vld [vmem:[%s21901_s2 + $0x940] sm:$0xff]  ;;  %v13640_v43 = vpack.c.bf16 %v11038_v11, %v11035_v60  ;;  %v11045_v60 = vld [vmem:[%s21901_s2 + $0xb38] sm:$0xff] }
 0x16f   : > { %v2446_v25 = vmax.f32 %v17285_v19, 0.0  ;;  %v2276_v44 = vpop.f32.mrb[22].mxu1  ;;  %v11028_v22 = vld [vmem:[%s21901_s2 + $0xab0] sm:$0xff]  ;;  %v13706_v26 = vpack.c.bf16 %v10931_v13, %v10928_v34  ;;  %v11042_v13 = vld [vmem:[%s21901_s2 + $0xb20] sm:$0xff]  ;;  %v11047_v11 = vld [vmem:[%s21901_s2 + $0xb48] sm:$0xff] }
 0x170   : > { %v17314_v46 = vadd.f32 %v17152_v54, %v2276_v44  ;;  %v2278_v18 = vpop.f32.mrb[23].mxu1  ;;  %13631 = vmatpush1.bf16.msra.mxu0 %v13630_v14  ;;  %v11031_v54 = vld [vmem:[%s21901_s2 + $0xac8] sm:$0xff]  ;;  %v10985_v14 = vld [vmem:[%s21901_s2 + $0x958] sm:$0xff]  ;;  %v11044_v44 = vld [vmem:[%s21901_s2 + $0xb30] sm:$0xff] }
 0x171   : > { %13699 = vmatpush3.bf16.msra.mxu1 %v13698_v20  ;;  %v17317_v61 = vadd.f32 %v17165_v5, %v2278_v18  ;;  %13633 = vmatprep.subr.bf16.mxu0 %v13632_v38  ;;  %v13704_v5 = vpack.c.bf16 %v10979_v59, %v10976_v47  ;;  %v13638_v20 = vpack.c.bf16 %v11031_v54, %v11028_v22  ;;  %v10934_v38 = vld [vmem:[%s21901_s2 + $0x7c0] sm:$0xff]  ;;  %v11036_v47 = vld [vmem:[%s21901_s2 + $0xaf0] sm:$0xff]  ;;  %v11039_v59 = vld [vmem:[%s21901_s2 + $0xb08] sm:$0xff] }
 0x172   : > { %v2450_v6 = vmax.f32 %v17314_v46, 0.0  ;;  %13701 = vmatprep.subr.bf16.mxu1 %v13700_v24  ;;  %v11037_v24 = vld [vmem:[%s21901_s2 + $0xaf8] sm:$0xff]  ;;  %v13708_v36 = vpack.c.bf16 %v10985_v14, %v10982_v12  ;;  %v11040_v34 = vld [vmem:[%s21901_s2 + $0xb10] sm:$0xff]  ;;  %v13712_v22 = vpack.c.bf16 %v11039_v59, %v11036_v47  ;;  %v11050_v12 = vld [vmem:[%s21901_s2 + $0xb60] sm:$0xff] }
 0x173   : > { %v2451_v45 = vmax.f32 %v17317_v61, 0.0  ;;  %v13642_v18 = vpack.c.bf16 %v11037_v24, %v11034_v31  ;;  %v10988_v54 = vld [vmem:[%s21901_s2 + $0x970] sm:$0xff]  ;;  %v10994_v31 = vld [vmem:[%s21901_s2 + $0x9a0] sm:$0xff]  ;;  %v10997_v24 = vld [vmem:[%s21901_s2 + $0x9b8] sm:$0xff] }
 0x174   : > { %13635 = vmatpush1.bf16.msra.mxu0 %v13634_v53  ;;  %v13710_v53 = vpack.c.bf16 %v10937_v37, %v10934_v38  ;;  %v11049_v38 = vld [vmem:[%s21901_s2 + $0xb58] sm:$0xff]  ;;  %v13648_v37 = vpack.c.bf16 %v11050_v12, %v11047_v11  ;;  %v11056_v47 = vld [vmem:[%s21901_s2 + $0xb90] sm:$0xff]  ;;  %v4647_v23 = vld [vmem:[%s21901_s2 + $0x28] sm:$0xff] }
 0x175   : > { %13703 = vmatpush3.bf16.msra.mxu1 %v13702_v28  ;;  %13637 = vmatprep.subr.bf16.mxu0 %v13636_v9  ;;  %v13644_v28 = vpack.c.bf16 %v11044_v44, %v11041_v1  ;;  %v11043_v9 = vld [vmem:[%s21901_s2 + $0xb28] sm:$0xff]  ;;  %v11053_v44 = vld [vmem:[%s21901_s2 + $0xb78] sm:$0xff] }
 0x176   : > { %13705 = vmatprep.subr.bf16.mxu1 %v13704_v5  ;;  %v10991_v5 = vld [vmem:[%s21901_s2 + $0x988] sm:$0xff]  ;;  %v13646_v14 = vpack.c.bf16 %v11043_v9, %v11040_v34  ;;  %v11057_v9 = vld [vmem:[%s21901_s2 + $0xb98] sm:$0xff] }
 0x177   : > { %v11051_v1 = vld [vmem:[%s21901_s2 + $0xb68] sm:$0xff]  ;;  %v11061_v11 = vld [vmem:[%s21901_s2 + $0xbb8] sm:$0xff]  ;;  %v13724_v12 = vpack.c.bf16 %v11057_v9, %v11054_v27  ;;  %v11024_v9 = vld [vmem:[%s21901_s2 + $0xa90] sm:$0xff] }
 0x178   : > { %13639 = vmatpush1.bf16.msra.mxu0 %v13638_v20  ;;  %v13714_v20 = vpack.c.bf16 %v10991_v5, %v10988_v54  ;;  %v11062_v54 = vld [vmem:[%s21901_s2 + $0xbc0] sm:$0xff]  ;;  %v4673_v19 = vld [vmem:[%s21901_s2 + $0xf8] sm:$0xff] }
 0x179   : > { %13707 = vmatpush3.bf16.msra.mxu1 %v13706_v26  ;;  %13641 = vmatprep.subr.bf16.mxu0 %v13640_v43  ;;  %v11046_v26 = vld [vmem:[%s21901_s2 + $0xb40] sm:$0xff]  ;;  %v13716_v43 = vpack.c.bf16 %v11045_v60, %v11042_v13  ;;  %v4701_v61 = vld [vmem:[%s21901_s2 + $0x1d8] sm:$0xff] }
 0x17a   : > { %13709 = vmatprep.subr.bf16.mxu1 %v13708_v36  ;;  %v11048_v36 = vld [vmem:[%s21901_s2 + $0xb50] sm:$0xff]  ;;  %v13650_v59 = vpack.c.bf16 %v11049_v38, %v11046_v26  ;;  %v11058_v60 = vld [vmem:[%s21901_s2 + $0xba0] sm:$0xff]  ;;  %v4653_v46 = vld [vmem:[%s21901_s2 + $0x58] sm:$0xff] }
 0x17b   : > { %v13720_v34 = vpack.c.bf16 %v11051_v1, %v11048_v36  ;;  %v11068_v26 = vld [vmem:[%s21901_s2 + $0xbf0] sm:$0xff]  ;;  %v13658_v38 = vpack.c.bf16 %v11061_v11, %v11058_v60  ;;  %v11071_v36 = vld [vmem:[%s21901_s2 + $0xc08] sm:$0xff]  ;;  %v11066_v1 = vld [vmem:[%s21901_s2 + $0xbe0] sm:$0xff] }
 0x17c   : > { %13643 = vmatpush1.bf16.msra.mxu0 %v13642_v18  ;;  %v13718_v18 = vpack.c.bf16 %v10997_v24, %v10994_v31  ;;  %v11012_v31 = vld [vmem:[%s21901_s2 + $0xa30] sm:$0xff]  ;;  %v11027_v60 = vld [vmem:[%s21901_s2 + $0xaa8] sm:$0xff] }
 0x17d   : > { %13711 = vmatpush3.bf16.msra.mxu1 %v13710_v53  ;;  %13645 = vmatprep.subr.bf16.mxu0 %v13644_v28  ;;  %v11052_v53 = vld [vmem:[%s21901_s2 + $0xb70] sm:$0xff]  ;;  %v11055_v28 = vld [vmem:[%s21901_s2 + $0xb88] sm:$0xff] }
 0x17e   : > { %13713 = vmatprep.subr.bf16.mxu1 %v13712_v22  ;;  %v11059_v22 = vld [vmem:[%s21901_s2 + $0xba8] sm:$0xff]  ;;  %v13654_v5 = vpack.c.bf16 %v11055_v28, %v11052_v53  ;;  %v11064_v24 = vld [vmem:[%s21901_s2 + $0xbd0] sm:$0xff]  ;;  %v11070_v28 = vld [vmem:[%s21901_s2 + $0xc00] sm:$0xff] }
 0x17f   : > { %v13666_v27 = vpack.c.bf16 %v11073_v17, %v11070_v28  ;;  %v4643_v11 = vld [vmem:[%s21901_s2 + $0x8] sm:$0xff]  ;;  %v4658_v28 = vld [vmem:[%s21901_s2 + $0x80] sm:$0xff] }
 0x180   : > { %5415 = vmatmul.mubr.f32.vlgmr.msra.gmra.mrb[52].mxu1 %v2433_v30  ;;  %13647 = vmatpush1.bf16.msra.mxu0 %v13646_v14  ;;  %v11003_v30 = vld [vmem:[%s21901_s2 + $0x9e8] sm:$0xff] }
 0x181   : > { %5419 = vmatprep.mubr.f32.mxu1 %v2439_v7  ;;  %13715 = vmatpush3.bf16.msra.mxu1 %v13714_v20  ;;  %v13652_v7 = vpack.c.bf16 %v11056_v47, %v11053_v44  ;;  %v13722_v13 = vpack.c.bf16 %v11003_v30, %v11000_v50  ;;  %v11063_v14 = vld [vmem:[%s21901_s2 + $0xbc8] sm:$0xff]  ;;  %v11065_v20 = vld [vmem:[%s21901_s2 + $0xbd8] sm:$0xff]  ;;  %v13662_v47 = vpack.c.bf16 %v11067_v55, %v11064_v24  ;;  %v11072_v50 = vld [vmem:[%s21901_s2 + $0xc10] sm:$0xff] }
 0x182   : > { %13717 = vmatprep.subr.bf16.mxu1 %v13716_v43  ;;  %13649 = vmatprep.subr.bf16.mxu0 %v13648_v37  ;;  %v11074_v37 = vld [vmem:[%s21901_s2 + $0xc20] sm:$0xff]  ;;  %v11069_v44 = vld [vmem:[%s21901_s2 + $0xbf8] sm:$0xff]  ;;  %v11075_v30 = vld [vmem:[%s21901_s2 + $0xc28] sm:$0xff] }
 0x183   : > { %v13664_v53 = vpack.c.bf16 %v11074_v37, %v11071_v36  ;;  %v4649_v24 = vld [vmem:[%s21901_s2 + $0x38] sm:$0xff]  ;;  %v4652_v55 = vld [vmem:[%s21901_s2 + $0x50] sm:$0xff] }
 0x184   : > { %5420 = vmatmul.mubr.f32.gmra.mrb[54].mxu1 %v2438_v51  ;;  %13651 = vmatpush1.bf16.msra.mxu0 %v13650_v59  ;;  %v11009_v51 = vld [vmem:[%s21901_s2 + $0xa18] sm:$0xff]  ;;  %v13730_v59 = vpack.c.bf16 %v11015_v35, %v11012_v31  ;;  %v11087_v35 = vld [vmem:[%s21901_s2 + $0xc88] sm:$0xff]  ;;  %v13756_v37 = vpack.c.bf16 %v4652_v55, %v4649_v24  ;;  %v17712_v55 = vld [vmem:[%s21903_s4] sm:$0x1f] }
 0x185   : > { %5424 = vmatprep.mubr.f32.mxu1 %v2444_v48  ;;  %13719 = vmatpush3.bf16.msra.mxu1 %v13718_v18  ;;  %v13656_v48 = vpack.c.bf16 %v11062_v54, %v11059_v22  ;;  %v13726_v43 = vpack.c.bf16 %v11009_v51, %v11006_v10  ;;  %v11018_v18 = vld [vmem:[%s21901_s2 + $0xa60] sm:$0xff]  ;;  %v11076_v54 = vld [vmem:[%s21901_s2 + $0xc30] sm:$0xff]  ;;  %v11081_v51 = vld [vmem:[%s21901_s2 + $0xc58] sm:$0xff] }
 0x186   : > { %13721 = vmatprep.subr.bf16.mxu1 %v13720_v34  ;;  %13653 = vmatprep.subr.bf16.mxu0 %v13652_v7  ;;  %v11080_v34 = vld [vmem:[%s21901_s2 + $0xc50] sm:$0xff]  ;;  %v13734_v7 = vpack.c.bf16 %v11021_v16, %v11018_v18  ;;  %v11078_v10 = vld [vmem:[%s21901_s2 + $0xc40] sm:$0xff]  ;;  %v11033_v31 = vld [vmem:[%s21901_s2 + $0xad8] sm:$0xff] }
 0x187   : > { %v4651_v18 = vld [vmem:[%s21901_s2 + $0x48] sm:$0xff]  ;;  %v4654_v16 = vld [vmem:[%s21901_s2 + $0x60] sm:$0xff] }
 0x188   : > { %5425 = vmatmul.mubr.f32.gmra.mrb[56].mxu1 %v2443_v41  ;;  %13655 = vmatpush1.bf16.msra.mxu0 %v13654_v5  ;;  %v13728_v41 = vpack.c.bf16 %v11063_v14, %v11060_v58  ;;  %v11079_v5 = vld [vmem:[%s21901_s2 + $0xc48] sm:$0xff]  ;;  %v11030_v14 = vld [vmem:[%s21901_s2 + $0xac0] sm:$0xff] }
 0x189   : > { %5429 = vmatprep.mubr.f32.mxu1 %v2449_v40  ;;  %13723 = vmatpush3.bf16.msra.mxu1 %v13722_v13  ;;  %v13660_v40 = vpack.c.bf16 %v11068_v26, %v11065_v20  ;;  %v13736_v13 = vpack.c.bf16 %v11075_v30, %v11072_v50  ;;  %v13670_v58 = vpack.c.bf16 %v11079_v5, %v11076_v54  ;;  %v4642_v26 = vld [vmem:[%s21901_s2] sm:$0xff]  ;;  %v4692_v50 = vld [vmem:[%s21901_s2 + $0x190] sm:$0xff]  ;;  %v4695_v30 = vld [vmem:[%s21901_s2 + $0x1a8] sm:$0xff] }
 0x18a   : > { %13725 = vmatprep.subr.bf16.mxu1 %v13724_v12  ;;  %13657 = vmatprep.subr.bf16.mxu0 %v13656_v48  ;;  %v4646_v12 = vld [vmem:[%s21901_s2 + $0x20] sm:$0xff]  ;;  %v13738_v48 = vpack.c.bf16 %v11027_v60, %v11024_v9  ;;  %v13742_v36 = vpack.c.bf16 %v11033_v31, %v11030_v14  ;;  %v13888_v4 = vpack.c.bf16 %v4695_v30, %v4692_v50  ;;  %v4663_v54 = vld [vmem:[%s21901_s2 + $0xa8] sm:$0xff]  ;;  %v4669_v60 = vld [vmem:[%s21901_s2 + $0xd8] sm:$0xff] }
 0x18b   : > { %v13752_v20 = vpack.c.bf16 %v4646_v12, %v4643_v11  ;;  %v4644_v11 = vld [vmem:[%s21901_s2 + $0x10] sm:$0xff]  ;;  %v4707_v31 = vld [vmem:[%s21901_s2 + $0x208] sm:$0xff]  ;;  %v4662_v50 = vld [vmem:[%s21901_s2 + $0xa0] sm:$0xff] }
 0x18c   : > { %5430 = vmatmul.mubr.f32.gmra.mrb[58].mxu1 %v2448_v0  ;;  %13659 = vmatpush1.bf16.msra.mxu0 %v13658_v38  ;;  %v13732_v0 = vpack.c.bf16 %v11069_v44, %v11066_v1  ;;  %v4645_v38 = vld [vmem:[%s21901_s2 + $0x18] sm:$0xff]  ;;  %v4648_v44 = vld [vmem:[%s21901_s2 + $0x30] sm:$0xff]  ;;  %v13890_v14 = vpack.c.bf16 %v4647_v23, %v4644_v11  ;;  %v4671_v11 = vld [vmem:[%s21901_s2 + $0xe8] sm:$0xff] }
 0x18d   : > { %13727 = vmatpush3.bf16.msra.mxu1 %v13726_v43  ;;  %5499 = vmatprep.mubr.f32.mxu1 %v2436_v2  ;;  %v11077_v2 = vld [vmem:[%s21901_s2 + $0xc38] sm:$0xff]  ;;  %v13740_v43 = vpack.c.bf16 %v11081_v51, %v11078_v10  ;;  %v4672_v12 = vld [vmem:[%s21901_s2 + $0xf0] sm:$0xff]  ;;  %v4698_v10 = vld [vmem:[%s21901_s2 + $0x1c0] sm:$0xff] }
 0x18e   : > { %13729 = vmatprep.subr.bf16.mxu1 %v13728_v41  ;;  %13661 = vmatprep.subr.bf16.mxu0 %v13660_v40  ;;  %v13668_v22 = vpack.c.bf16 %v11080_v34, %v11077_v2  ;;  %v11084_v41 = vld [vmem:[%s21901_s2 + $0xc70] sm:$0xff]  ;;  %v13754_v40 = vpack.c.bf16 %v4645_v38, %v4642_v26  ;;  %v4657_v34 = vld [vmem:[%s21901_s2 + $0x78] sm:$0xff]  ;;  %v4675_v51 = vld [vmem:[%s21901_s2 + $0x108] sm:$0xff]  ;;  %v13892_v26 = vpack.c.bf16 %v4701_v61, %v4698_v10 }
 0x18f   : > { %v13744_v1 = vpack.c.bf16 %v11087_v35, %v11084_v41  ;;  %v13762_v9 = vpack.c.bf16 %v4657_v34, %v4654_v16  ;;  %v4678_v38 = vld [vmem:[%s21901_s2 + $0x120] sm:$0xff]  ;;  %v4685_v41 = vld [vmem:[%s21901_s2 + $0x158] sm:$0xff]  ;;  %v4688_v35 = vld [vmem:[%s21901_s2 + $0x170] sm:$0xff] }
 0x190   : > { %13663 = vmatpush1.bf16.msra.mxu0 %v13662_v47  ;;  %v11090_v47 = vld [vmem:[%s21901_s2 + $0xca0] sm:$0xff]  ;;  %v4696_v10 = vld [vmem:[%s21901_s2 + $0x1b0] sm:$0xff] }
 0x191   : > { %13731 = vmatpush3.bf16.msra.mxu1 %v13730_v59  ;;  %13665 = vmatprep.subr.bf16.mxu0 %v13664_v53  ;;  %v11093_v59 = vld [vmem:[%s21901_s2 + $0xcb8] sm:$0xff]  ;;  %v4655_v53 = vld [vmem:[%s21901_s2 + $0x68] sm:$0xff] }
 0x192   : > { %13733 = vmatprep.subr.bf16.mxu1 %v13732_v0  ;;  %v13748_v17 = vpack.c.bf16 %v11093_v59, %v11090_v47  ;;  %v13758_v0 = vpack.c.bf16 %v4651_v18, %v4648_v44  ;;  %v13760_v2 = vpack.c.bf16 %v4658_v28, %v4655_v53  ;;  %v4710_v47 = vld [vmem:[%s21901_s2 + $0x220] sm:$0xff]  ;;  %v4713_v59 = vld [vmem:[%s21901_s2 + $0x238] sm:$0xff]  ;;  %v17745_v18 = vrot.slane %v17712_v55, %v16939_v15  ;;  %v4687_v28 = vld [vmem:[%s21901_s2 + $0x168] sm:$0xff] }
 0x193   : > { %v13780_v53 = vpack.c.bf16 %v4688_v35, %v4685_v41  ;;  %v13900_v34 = vpack.c.bf16 %v4713_v59, %v4710_v47  ;;  %v4709_v59 = vld [vmem:[%s21901_s2 + $0x218] sm:$0xff] }
 0x194   : > { %13667 = vmatpush1.bf16.msra.mxu0 %v13666_v27  ;;  %v4661_v27 = vld [vmem:[%s21901_s2 + $0x98] sm:$0xff] }
 0x195   : > { %13735 = vmatpush3.bf16.msra.mxu1 %v13734_v7  ;;  %13669 = vmatprep.subr.bf16.mxu0 %v13668_v22  ;;  %v4664_v7 = vld [vmem:[%s21901_s2 + $0xb0] sm:$0xff] }
 0x196   : > { %13737 = vmatprep.subr.bf16.mxu1 %v13736_v13  ;;  %v4660_v22 = vld [vmem:[%s21901_s2 + $0x90] sm:$0xff]  ;;  %v4666_v13 = vld [vmem:[%s21901_s2 + $0xc0] sm:$0xff] }
 0x197   : > { %v13766_v5 = vpack.c.bf16 %v4663_v54, %v4660_v22  ;;  %v4719_v22 = vld [vmem:[%s21901_s2 + $0x268] sm:$0xff] }
 0x198   : > { %13671 = vmatpush1.bf16.msra.mxu0 %v13670_v58  ;;  %v4679_v58 = vld [vmem:[%s21901_s2 + $0x128] sm:$0xff] }
 0x199   : > { %13739 = vmatpush3.bf16.msra.mxu1 %v13738_v48  ;;  %13753 = vmatprep.subr.bf16.mxu0 %v13752_v20  ;;  %v4682_v48 = vld [vmem:[%s21901_s2 + $0x140] sm:$0xff] }
 0x19a   : > { %13741 = vmatprep.subr.bf16.mxu1 %v13740_v43  ;;  %v4650_v20 = vld [vmem:[%s21901_s2 + $0x40] sm:$0xff]  ;;  %v4704_v43 = vld [vmem:[%s21901_s2 + $0x1f0] sm:$0xff]  ;;  %v13776_v24 = vpack.c.bf16 %v4682_v48, %v4679_v58  ;;  %v4699_v48 = vld [vmem:[%s21901_s2 + $0x1c8] sm:$0xff] }
 0x19b   : > { %5237 = vmatmul.mubr.f32.vlgmr.msra.gmra.mrb[38].mxu0 %v2435_v42  ;;  %v13790_v35 = vpack.c.bf16 %v4699_v48, %v4696_v10 }
 0x19c   : > { %5242 = vmatprep.mubr.f32.mxu0 %v2441_v63  ;;  %13755 = vmatpush1.bf16.msra.mxu0 %v13754_v40  ;;  %v13894_v40 = vpack.c.bf16 %v4653_v46, %v4650_v20  ;;  %v4703_v20 = vld [vmem:[%s21901_s2 + $0x1e8] sm:$0xff] }
 0x19d   : > { %13743 = vmatpush3.bf16.msra.mxu1 %v13742_v36  ;;  %13757 = vmatprep.subr.bf16.mxu0 %v13756_v37  ;;  %v13896_v36 = vpack.c.bf16 %v4707_v31, %v4704_v43  ;;  %v4656_v37 = vld [vmem:[%s21901_s2 + $0x70] sm:$0xff]  ;;  %v4677_v31 = vld [vmem:[%s21901_s2 + $0x118] sm:$0xff] }
 0x19e   : > { %13745 = vmatprep.subr.bf16.mxu1 %v13744_v1 }
 0x19f   : > { %5243 = vmatmul.mubr.f32.gmra.mrb[40].mxu0 %v2440_v33 }
 0x1a0   : > { %5500 = vmatmul.mubr.f32.vlgmr.msra.gmra.mrb[60].mxu1 %v2435_v42  ;;  %5248 = vmatprep.mubr.f32.mxu0 %v2446_v25  ;;  %v13764_v42 = vpack.c.bf16 %v4664_v7, %v4661_v27 }
 0x1a1   : > { %5504 = vmatprep.mubr.f32.mxu1 %v2441_v63  ;;  %13747 = vmatpush3.bf16.msra.mxu1 %v13744_v1  ;;  %v4670_v63 = vld [vmem:[%s21901_s2 + $0xe0] sm:$0xff]  ;;  %v17732_v1 = vrot.slane %v17712_v55, %v16930_v29 }
 0x1a2   : > { %13749 = vmatprep.subr.bf16.mxu1 %v13748_v17  ;;  %13759 = vmatpush1.bf16.msra.mxu0 %v13758_v0  ;;  %v4694_v0 = vld [vmem:[%s21901_s2 + $0x1a0] sm:$0xff] }
 0x1a3   : > { %5249 = vmatmul.mubr.f32.gmra.mrb[42].mxu0 %v2445_v52  ;;  %13761 = vmatprep.subr.bf16.mxu0 %v13760_v2 }
 0x1a4   : > { %5505 = vmatmul.mubr.f32.gmra.mrb[62].mxu1 %v2440_v33  ;;  %5254 = vmatprep.mubr.f32.mxu0 %v2451_v45  ;;  %v13768_v33 = vpack.c.bf16 %v4670_v63, %v4667_v62  ;;  %v4693_v62 = vld [vmem:[%s21901_s2 + $0x198] sm:$0xff] }
 0x1a5   : > { %5509 = vmatprep.mubr.f32.mxu1 %v2446_v25  ;;  %13751 = vmatpush3.bf16.msra.mxu1 %v13748_v17  ;;  %v4676_v25 = vld [vmem:[%s21901_s2 + $0x110] sm:$0xff]  ;;  %v4691_v17 = vld [vmem:[%s21901_s2 + $0x188] sm:$0xff] }
 0x1a6   : > { %13763 = vmatpush1.bf16.msra.mxu0 %v13762_v9  ;;  %13889 = vmatprep.subr.bf16.mxu1 %v13888_v4  ;;  %v4690_v9 = vld [vmem:[%s21901_s2 + $0x180] sm:$0xff]  ;;  %v13784_v54 = vpack.c.bf16 %v4694_v0, %v4691_v17 }
 0x1a7   : > { %5255 = vmatmul.mubr.f32.gmra.mrb[44].mxu0 %v2450_v6  ;;  %13765 = vmatprep.subr.bf16.mxu0 %v13764_v42  ;;  %v4716_v42 = vld [vmem:[%s21901_s2 + $0x250] sm:$0xff]  ;;  %v17844_v0 = vld [vmem:[%s21903_s4] sm:$0x1f] }
 0x1a8   : > { %5510 = vmatmul.mubr.f32.gmra.mrb[64].mxu1 %v2445_v52  ;;  %5681 = vmatprep.mubr.f32.mxu0 %v4623_v57  ;;  %v13770_v52 = vpack.c.bf16 %v4669_v60, %v4666_v13 }
 0x1a9   : > { %5514 = vmatprep.mubr.f32.mxu1 %v2451_v45  ;;  %v13772_v45 = vpack.c.bf16 %v4676_v25, %v4673_v19  ;;  %v13904_v19 = vpack.c.bf16 %v4719_v22, %v4716_v42  ;;  %v4668_v25 = vld [vmem:[%s21901_s2 + $0xd0] sm:$0xff]  ;;  %v4734_v22 = vld [vmem:[%s21901_s2 + $0x2e0] sm:$0xff] }
 0x1aa   : > { %13767 = vmatpush1.bf16.msra.mxu0 %v13766_v5  ;;  %v4697_v5 = vld [vmem:[%s21901_s2 + $0x1b8] sm:$0xff]  ;;  %v13906_v46 = vpack.c.bf16 %v4671_v11, %v4668_v25 }
 0x1ab   : > { %13769 = vmatprep.subr.bf16.mxu0 %v13768_v33 }
 0x1ac   : > { %5515 = vmatmul.mubr.f32.gmra.mrb[66].mxu1 %v2450_v6  ;;  %v13774_v6 = vpack.c.bf16 %v4675_v51, %v4672_v12  ;;  %v13786_v12 = vpack.c.bf16 %v4693_v62, %v4690_v9  ;;  %v4725_v51 = vld [vmem:[%s21901_s2 + $0x298] sm:$0xff]  ;;  %v4708_v9 = vld [vmem:[%s21901_s2 + $0x210] sm:$0xff] }
 0x1ad   : > { %12998 = vmatprep.mubr.msk.f32.mxu1 %vm1385_vm2, %v17137_v8  ;;  %v4681_v8 = vld [vmem:[%s21901_s2 + $0x138] sm:$0xff] }
 0x1ae   : > { %13771 = vmatpush1.bf16.msra.mxu0 %v13770_v52  ;;  %v13778_v44 = vpack.c.bf16 %v4681_v8, %v4678_v38  ;;  %v4674_v38 = vld [vmem:[%s21901_s2 + $0x100] sm:$0xff] }
 0x1af   : > { %13773 = vmatprep.subr.bf16.mxu0 %v13772_v45  ;;  %v4722_v45 = vld [vmem:[%s21901_s2 + $0x280] sm:$0xff] }
 0x1b0   : > { %12999 = vmatmul.mubr.msk.f32.vlgmr.msra.gmra.mrb[68].mxu1 %vm1385_vm2, %v17189_v3  ;;  %v4659_v3 = vld [vmem:[%s21901_s2 + $0x88] sm:$0xff]  ;;  %v13908_v43 = vpack.c.bf16 %v4725_v51, %v4722_v45  ;;  %v4714_v51 = vld [vmem:[%s21901_s2 + $0x240] sm:$0xff] }
 0x1b1   : > { %13891 = vmatpush3.bf16.msra.mxu1 %v13890_v14  ;;  %13001 = vmatprep.mubr.msk.f32.mxu1 %vm1385_vm2, %v17229_v39  ;;  %v4684_v39 = vld [vmem:[%s21901_s2 + $0x150] sm:$0xff]  ;;  %v13898_v16 = vpack.c.bf16 %v4659_v3, %v4656_v37 }
 0x1b2   : > { %13893 = vmatprep.subr.bf16.mxu1 %v13892_v26  ;;  %13775 = vmatpush1.bf16.msra.mxu0 %v13774_v6  ;;  %v13782_v7 = vpack.c.bf16 %v4687_v28, %v4684_v39  ;;  %v4706_v26 = vld [vmem:[%s21901_s2 + $0x200] sm:$0xff]  ;;  %v4728_v3 = vld [vmem:[%s21901_s2 + $0x2b0] sm:$0xff]  ;;  %v13910_v28 = vpack.c.bf16 %v4677_v31, %v4674_v38 }
 0x1b3   : > { %13777 = vmatprep.subr.bf16.mxu0 %v13776_v24  ;;  %v13792_v39 = vpack.c.bf16 %v4706_v26, %v4703_v20  ;;  %v4791_v20 = vld [vmem:[%s21901_s2 + $0x4a8] sm:$0xff]  ;;  %v4724_v31 = vld [vmem:[%s21901_s2 + $0x290] sm:$0xff] }
 0x1b4   : > { %13002 = vmatmul.mubr.msk.f32.gmra.mrb[70].mxu1 %vm1385_vm2, %v17267_v21  ;;  %v4665_v21 = vld [vmem:[%s21901_s2 + $0xb8] sm:$0xff] }
 0x1b5   : > { %13895 = vmatpush3.bf16.msra.mxu1 %v13894_v40  ;;  %5948 = vmatprep.mubr.f32.mxu1 %v4623_v57  ;;  %v3241_v2 = vpop.f32.mrb[18].mxu0  ;;  %v4700_v57 = vld [vmem:[%s21901_s2 + $0x1d0] sm:$0xff]  ;;  %v13902_v33 = vpack.c.bf16 %v4665_v21, %v4662_v50  ;;  %v4702_v40 = vld [vmem:[%s21901_s2 + $0x1e0] sm:$0xff]  ;;  %v4683_v21 = vld [vmem:[%s21901_s2 + $0x148] sm:$0xff] }
 0x1b6   : > { %13897 = vmatprep.subr.bf16.mxu1 %v13896_v36  ;;  %v3485_v30 = vadd.f32 %v17732_v1, %v3241_v2  ;;  %13779 = vmatpush1.bf16.msra.mxu0 %v13778_v44  ;;  %v3243_v27 = vpop.f32.mrb[19].mxu0  ;;  %v13788_v58 = vpack.c.bf16 %v4700_v57, %v4697_v5  ;;  %v4705_v36 = vld [vmem:[%s21901_s2 + $0x1f8] sm:$0xff]  ;;  %v4731_v44 = vld [vmem:[%s21901_s2 + $0x2c8] sm:$0xff]  ;;  %v4680_v50 = vld [vmem:[%s21901_s2 + $0x130] sm:$0xff] }
 0x1b7   : > { %v17769_v4 = vadd.f32 %v17745_v18, %v3243_v27  ;;  %13781 = vmatprep.subr.bf16.mxu0 %v13780_v53  ;;  %v4712_v53 = vld [vmem:[%s21901_s2 + $0x230] sm:$0xff]  ;;  %v13794_v2 = vpack.c.bf16 %v4705_v36, %v4702_v40  ;;  %v4715_v57 = vld [vmem:[%s21901_s2 + $0x248] sm:$0xff] }
 0x1b8   : > { %v3505_v63 = vmax.f32 %v3485_v30, 0.0  ;;  %v13796_v62 = vpack.c.bf16 %v4712_v53, %v4709_v59  ;;  %v17926_v53 = vld [vmem:[%s21901_s2 + $0x270] sm:$0xff] }
 0x1b9   : > { %13899 = vmatpush3.bf16.msra.mxu1 %v13898_v16  ;;  %v3506_v13 = vmax.f32 %v17769_v4, 0.0  ;;  %v3247_v60 = vpop.f32.mrb[20].mxu0  ;;  %v11133_v4 = vld [vmem:[%s21901_s2 + $0xd78] sm:$0xff] }
 0x1ba   : > { %13901 = vmatprep.subr.bf16.mxu1 %v13900_v34  ;;  %3526 = vst [vmem:[#allocation2 + $0x190] sm:$0xff] %v3505_v63  ;;  %v3490_v23 = vadd.f32 %v17732_v1, %v3247_v60  ;;  %13783 = vmatpush1.bf16.msra.mxu0 %v13782_v7  ;;  %v3249_v52 = vpop.f32.mrb[21].mxu0  ;;  %v13912_v34 = vpack.c.bf16 %v4731_v44, %v4728_v3  ;;  %v4711_v63 = vld [vmem:[%s21901_s2 + $0x228] sm:$0xff]  ;;  %v4740_v3 = vld [vmem:[%s21901_s2 + $0x310] sm:$0xff] }
 0x1bb   : > { %3527 = vst [vmem:[#allocation2 + $0x198] sm:$0xff] %v3506_v13  ;;  %v3491_v61 = vadd.f32 %v17745_v18, %v3249_v52  ;;  %13785 = vmatprep.subr.bf16.mxu0 %v13784_v54  ;;  %v17855_v7 = vrot.slane %v17712_v55, %v16740_v49  ;;  %v17869_v54 = vrot.slane %v17712_v55, %v16751_v56  ;;  %v4686_v52 = vld [vmem:[%s21901_s2 + $0x160] sm:$0xff]  ;;  %v4743_v44 = vld [vmem:[%s21901_s2 + $0x328] sm:$0xff] }
 0x1bc   : > { %v3510_v14 = vmax.f32 %v3490_v23, 0.0  ;;  %v13914_v60 = vpack.c.bf16 %v4683_v21, %v4680_v50  ;;  %v13798_v45 = vpack.c.bf16 %v4711_v63, %v4708_v9  ;;  %v4723_v21 = vld [vmem:[%s21901_s2 + $0x288] sm:$0xff] }
 0x1bd   : > { %13903 = vmatpush3.bf16.msra.mxu1 %v13902_v33  ;;  %v3511_v6 = vmax.f32 %v3491_v61, 0.0  ;;  %v3253_v8 = vpop.f32.mrb[22].mxu0  ;;  %v4718_v33 = vld [vmem:[%s21901_s2 + $0x260] sm:$0xff] }
 0x1be   : > { %13905 = vmatprep.subr.bf16.mxu1 %v13904_v19  ;;  %3531 = vst [vmem:[#allocation2 + $0x1b8] sm:$0xff] %v3510_v14  ;;  %v3495_v24 = vadd.f32 %v17732_v1, %v3253_v8  ;;  %13787 = vmatpush1.bf16.msra.mxu0 %v13786_v12  ;;  %v3255_v41 = vpop.f32.mrb[23].mxu0  ;;  %v17886_v19 = vrot.slane %v17844_v0, %v16939_v15  ;;  %v4689_v12 = vld [vmem:[%s21901_s2 + $0x178] sm:$0xff]  ;;  %v4788_v14 = vld [vmem:[%s21901_s2 + $0x490] sm:$0xff] }
 0x1bf   : > { %3532 = vst [vmem:[#allocation2 + $0x1c0] sm:$0xff] %v3511_v6  ;;  %v3496_v37 = vadd.f32 %v17745_v18, %v3255_v41  ;;  %13789 = vmatprep.subr.bf16.mxu0 %v13788_v58  ;;  %v13800_v26 = vpack.c.bf16 %v4718_v33, %v4715_v57  ;;  %v13918_v41 = vpack.c.bf16 %v4689_v12, %v4686_v52  ;;  %v17963_v12 = vld [vmem:[%s21901_s2 + $0x2a0] sm:$0xff] }
 0x1c0   : > { %v3515_v47 = vmax.f32 %v3495_v24, 0.0  ;;  %v13806_v52 = vpack.c.bf16 %v4723_v21, %v17926_v53  ;;  %v18011_v53 = vrot.slane %v17712_v55, %v16988_v32  ;;  %v18032_v21 = vld [vmem:[#allocation2 + $0x58] sm:$0xff] }
 0x1c1   : > { %13907 = vmatpush3.bf16.msra.mxu1 %v13906_v46  ;;  %v3516_v17 = vmax.f32 %v3496_v37, 0.0  ;;  %v3259_v16 = vpop.f32.mrb[24].mxu0  ;;  %v4717_v46 = vld [vmem:[%s21901_s2 + $0x258] sm:$0xff]  ;;  %v13920_v37 = vpack.c.bf16 %v4791_v20, %v4788_v14  ;;  %v4803_v14 = vld [vmem:[%s21901_s2 + $0x508] sm:$0xff] }
 0x1c2   : > { %13909 = vmatprep.subr.bf16.mxu1 %v13908_v43  ;;  %3536 = vst [vmem:[#allocation2 + $0x1e0] sm:$0xff] %v3515_v47  ;;  %v3500_v30 = vadd.f32 %v17732_v1, %v3259_v16  ;;  %13791 = vmatpush1.bf16.msra.mxu0 %v13790_v35  ;;  %v3261_v27 = vpop.f32.mrb[25].mxu0  ;;  %v4737_v1 = vld [vmem:[%s21901_s2 + $0x2f8] sm:$0xff]  ;;  %v13802_v59 = vpack.c.bf16 %v4717_v46, %v4714_v51  ;;  %v17982_v46 = vld [vmem:[#allocation2 + $0x30] sm:$0xff] }
 0x1c3   : > { %3537 = vst [vmem:[#allocation2 + $0x1e8] sm:$0xff] %v3516_v17  ;;  %v3501_v42 = vadd.f32 %v17745_v18, %v3261_v27  ;;  %13793 = vmatprep.subr.bf16.mxu0 %v13792_v39  ;;  %v17876_v18 = vrot.slane %v17844_v0, %v16930_v29  ;;  %v13916_v23 = vpack.c.bf16 %v4737_v1, %v4734_v22  ;;  %v4721_v43 = vld [vmem:[%s21901_s2 + $0x278] sm:$0xff]  ;;  %v4730_v22 = vld [vmem:[%s21901_s2 + $0x2c0] sm:$0xff] }
 0x1c4   : > { %v3520_v5 = vmax.f32 %v3500_v30, 0.0  ;;  %v13804_v50 = vpack.c.bf16 %v4724_v31, %v4721_v43  ;;  %v17992_v43 = vld [vmem:[%s21901_s2 + $0x2f0] sm:$0xff] }
 0x1c5   : > { %13911 = vmatpush3.bf16.msra.mxu1 %v13910_v28  ;;  %v3521_v25 = vmax.f32 %v3501_v42, 0.0  ;;  %v3330_v11 = vpop.f32.mrb[26].mxu0  ;;  %v17942_v42 = vld [vmem:[%s21901_s2 + $0x2a8] sm:$0xff] }
 0x1c6   : > { %13913 = vmatprep.subr.bf16.mxu1 %v13912_v34  ;;  %3541 = vst [vmem:[#allocation2 + $0x208] sm:$0xff] %v3520_v5  ;;  %v3487_v10 = vadd.f32 %v17855_v7, %v3330_v11  ;;  %13795 = vmatpush1.bf16.msra.mxu0 %v13794_v2  ;;  %v3332_v61 = vpop.f32.mrb[27].mxu0  ;;  %v4794_v2 = vld [vmem:[%s21901_s2 + $0x4c0] sm:$0xff]  ;;  %v4797_v34 = vld [vmem:[%s21901_s2 + $0x4d8] sm:$0xff]  ;;  %v13808_v20 = vpack.c.bf16 %v4730_v22, %v17942_v42  ;;  %v4739_v42 = vld [vmem:[%s21901_s2 + $0x308] sm:$0xff] }
 0x1c7   : > { %v4312_v58 = vpop.f32.mrb[24].mxu1  ;;  %3542 = vst [vmem:[#allocation2 + $0x210] sm:$0xff] %v3521_v25  ;;  %v3488_v48 = vadd.f32 %v17869_v54, %v3332_v61  ;;  %13797 = vmatprep.subr.bf16.mxu0 %v13796_v62  ;;  %v13922_v62 = vpack.c.bf16 %v4743_v44, %v4740_v3  ;;  %v17951_v5 = vld [vmem:[%s21901_s2 + $0x340] sm:$0xff]  ;;  %v17956_v25 = vld [vmem:[%s21901_s2 + $0x358] sm:$0xff]  ;;  %v4752_v44 = vld [vmem:[%s21901_s2 + $0x370] sm:$0xff] }
 0x1c8   : > { %v4556_v6 = vadd.f32 %v17876_v18, %v4312_v58  ;;  %v4314_v38 = vpop.f32.mrb[25].mxu1  ;;  %v3507_v8 = vmax.f32 %v3487_v10, 0.0  ;;  %v17968_v10 = vld [vmem:[%s21901_s2 + $0x2b8] sm:$0xff]  ;;  %v4742_v22 = vld [vmem:[%s21901_s2 + $0x320] sm:$0xff] }
 0x1c9   : > { %13915 = vmatpush3.bf16.msra.mxu1 %v13914_v60  ;;  %v4557_v24 = vadd.f32 %v17886_v19, %v4314_v38  ;;  %v3508_v35 = vmax.f32 %v3488_v48, 0.0  ;;  %v3336_v40 = vpop.f32.mrb[28].mxu0  ;;  %v13924_v60 = vpack.c.bf16 %v4797_v34, %v4794_v2  ;;  %v4800_v48 = vld [vmem:[%s21901_s2 + $0x4f0] sm:$0xff]  ;;  %v4809_v34 = vld [vmem:[%s21901_s2 + $0x538] sm:$0xff] }
 0x1ca   : > { %v4576_v36 = vmax.f32 %v4556_v6, 0.0  ;;  %13917 = vmatprep.subr.bf16.mxu1 %v13916_v23  ;;  %3528 = vst [vmem:[#allocation2 + $0x1a0] sm:$0xff] %v3507_v8  ;;  %v3492_v39 = vadd.f32 %v17855_v7, %v3336_v40  ;;  %13799 = vmatpush1.bf16.msra.mxu0 %v13798_v45  ;;  %v3338_v47 = vpop.f32.mrb[29].mxu0  ;;  %v17970_v45 = vld [vmem:[#allocation2] sm:$0xff]  ;;  %v17987_v8 = vld [vmem:[%s21901_s2 + $0x2d8] sm:$0xff]  ;;  %v13928_v3 = vpack.c.bf16 %v4803_v14, %v4800_v48 }
 0x1cb   : > { %v4577_v28 = vmax.f32 %v4557_v24, 0.0  ;;  %v4318_v17 = vpop.f32.mrb[26].mxu1  ;;  %3529 = vst [vmem:[#allocation2 + $0x1a8] sm:$0xff] %v3508_v35  ;;  %v3493_v16 = vadd.f32 %v17869_v54, %v3338_v47  ;;  %13801 = vmatprep.subr.bf16.mxu0 %v13800_v26  ;;  %v17996_v24 = vld [vmem:[#allocation2 + $0x28] sm:$0xff]  ;;  %v13812_v55 = vpack.c.bf16 %v17992_v43, %v17987_v8  ;;  %v18069_v14 = vld [vmem:[#allocation2 + $0x80] sm:$0xff] }
 0x1cc   : > { %4597 = vst [vmem:[#allocation2 + $0x258] sm:$0xff] %v4576_v36  ;;  %v4561_v30 = vadd.f32 %v17876_v18, %v4318_v17  ;;  %v4320_v27 = vpop.f32.mrb[27].mxu1  ;;  %v3512_v9 = vmax.f32 %v3492_v39, 0.0  ;;  %v13810_v36 = vpack.c.bf16 %v17968_v10, %v17963_v12  ;;  %v4755_v39 = vld [vmem:[%s21901_s2 + $0x388] sm:$0xff] }
 0x1cd   : > { %4598 = vst [vmem:[#allocation2 + $0x260] sm:$0xff] %v4577_v28  ;;  %13919 = vmatpush3.bf16.msra.mxu1 %v13918_v41  ;;  %v4562_v1 = vadd.f32 %v17886_v19, %v4320_v27  ;;  %v3513_v63 = vmax.f32 %v3493_v16, 0.0  ;;  %v3342_v57 = vpop.f32.mrb[30].mxu0  ;;  %v13926_v41 = vpack.c.bf16 %v17956_v25, %v17951_v5  ;;  %v18016_v28 = vld [vmem:[%s21901_s2 + $0x2d0] sm:$0xff]  ;;  %v18036_v27 = vrot.slane %v17844_v0, %v16740_v49  ;;  %v4761_v25 = vld [vmem:[%s21901_s2 + $0x3b8] sm:$0xff] }
 0x1ce   : > { %v4581_v33 = vmax.f32 %v4561_v30, 0.0  ;;  %13921 = vmatprep.subr.bf16.mxu1 %v13920_v37  ;;  %3533 = vst [vmem:[#allocation2 + $0x1c8] sm:$0xff] %v3512_v9  ;;  %v3497_v11 = vadd.f32 %v17855_v7, %v3342_v57  ;;  %13803 = vmatpush1.bf16.msra.mxu0 %v13802_v59  ;;  %v3344_v23 = vpop.f32.mrb[31].mxu0 }
 0x1cf   : > { %v4582_v61 = vmax.f32 %v4562_v1, 0.0  ;;  %v4324_v51 = vpop.f32.mrb[28].mxu1  ;;  %3534 = vst [vmem:[#allocation2 + $0x1d0] sm:$0xff] %v3513_v63  ;;  %v3498_v58 = vadd.f32 %v17869_v54, %v3344_v23  ;;  %13805 = vmatprep.subr.bf16.mxu0 %v13804_v50  ;;  %v4735_v50 = vld [vmem:[%s21901_s2 + $0x2e8] sm:$0xff]  ;;  %v13930_v1 = vpack.c.bf16 %v4755_v39, %v4752_v44 }
 0x1d0   : > { %4602 = vst [vmem:[#allocation2 + $0x280] sm:$0xff] %v4581_v33  ;;  %5949 = vmatmul.mubr.f32.vlgmr.msra.gmra.mrb[72].mxu1 %v17970_v45  ;;  %v4566_v26 = vadd.f32 %v17876_v18, %v4324_v51  ;;  %v4326_v6 = vpop.f32.mrb[29].mxu1  ;;  %v3517_v38 = vmax.f32 %v3497_v11, 0.0  ;;  %v4815_v51 = vld [vmem:[%s21901_s2 + $0x568] sm:$0xff] }
 0x1d1   : > { %4603 = vst [vmem:[#allocation2 + $0x288] sm:$0xff] %v4582_v61  ;;  %5953 = vmatprep.mubr.f32.mxu1 %v17982_v46  ;;  %13923 = vmatpush3.bf16.msra.mxu1 %v13922_v62  ;;  %v4567_v31 = vadd.f32 %v17886_v19, %v4326_v6  ;;  %v3518_v35 = vmax.f32 %v3498_v58, 0.0  ;;  %v3348_v40 = vpop.f32.mrb[32].mxu0  ;;  %v18048_v62 = vrot.slane %v17844_v0, %v16751_v56  ;;  %v4812_v61 = vld [vmem:[%s21901_s2 + $0x550] sm:$0xff]  ;;  %v4738_v6 = vld [vmem:[%s21901_s2 + $0x300] sm:$0xff]  ;;  %v4767_v44 = vld [vmem:[%s21901_s2 + $0x3e8] sm:$0xff] }
 0x1d2   : > { %v4586_v37 = vmax.f32 %v4566_v26, 0.0  ;;  %13925 = vmatprep.subr.bf16.mxu1 %v13924_v60  ;;  %3538 = vst [vmem:[#allocation2 + $0x1f0] sm:$0xff] %v3517_v38  ;;  %v3502_v47 = vadd.f32 %v17855_v7, %v3348_v40  ;;  %13807 = vmatpush1.bf16.msra.mxu0 %v13806_v52  ;;  %v3350_v59 = vpop.f32.mrb[33].mxu0  ;;  %v4806_v7 = vld [vmem:[%s21901_s2 + $0x520] sm:$0xff]  ;;  %v13814_v56 = vpack.c.bf16 %v4735_v50, %v18016_v28  ;;  %v18058_v52 = vld [vmem:[#allocation2 + $0x50] sm:$0xff]  ;;  %v4741_v38 = vld [vmem:[%s21901_s2 + $0x318] sm:$0xff] }
 0x1d3   : > { %v4587_v17 = vmax.f32 %v4567_v31, 0.0  ;;  %v4330_v16 = vpop.f32.mrb[30].mxu1  ;;  %3539 = vst [vmem:[#allocation2 + $0x1f8] sm:$0xff] %v3518_v35  ;;  %v3503_v2 = vadd.f32 %v17869_v54, %v3350_v59  ;;  %13809 = vmatprep.subr.bf16.mxu0 %v13808_v20  ;;  %v13932_v33 = vpack.c.bf16 %v4809_v34, %v4806_v7  ;;  %v4758_v60 = vld [vmem:[%s21901_s2 + $0x3a0] sm:$0xff]  ;;  %v13816_v58 = vpack.c.bf16 %v4742_v22, %v4739_v42  ;;  %v4745_v35 = vld [vmem:[%s21901_s2 + $0x338] sm:$0xff]  ;;  %v4748_v40 = vld [vmem:[%s21901_s2 + $0x350] sm:$0xff] }
 0x1d4   : > { %4607 = vst [vmem:[#allocation2 + $0x2a8] sm:$0xff] %v4586_v37  ;;  %5954 = vmatmul.mubr.f32.gmra.mrb[74].mxu1 %v17996_v24  ;;  %v4571_v54 = vadd.f32 %v17876_v18, %v4330_v16  ;;  %v4332_v30 = vpop.f32.mrb[31].mxu1  ;;  %v3522_v9 = vmax.f32 %v3502_v47, 0.0  ;;  %v13934_v43 = vpack.c.bf16 %v4761_v25, %v4758_v60  ;;  %v13936_v37 = vpack.c.bf16 %v4815_v51, %v4812_v61  ;;  %v18093_v28 = vld [vmem:[#allocation2 + $0x78] sm:$0xff]  ;;  %v4747_v42 = vld [vmem:[%s21901_s2 + $0x348] sm:$0xff]  ;;  %v4770_v60 = vld [vmem:[%s21901_s2 + $0x400] sm:$0xff] }
 0x1d5   : > { %4608 = vst [vmem:[#allocation2 + $0x2b0] sm:$0xff] %v4587_v17  ;;  %5958 = vmatprep.mubr.f32.mxu1 %v18032_v21  ;;  %13927 = vmatpush3.bf16.msra.mxu1 %v13926_v41  ;;  %v4572_v18 = vadd.f32 %v17886_v19, %v4332_v30  ;;  %v3523_v63 = vmax.f32 %v3503_v2, 0.0  ;;  %v12938_v5 = vpop.f32.mrb[34].mxu0  ;;  %v4818_v2 = vld [vmem:[%s21901_s2 + $0x580] sm:$0xff]  ;;  %v4821_v7 = vld [vmem:[%s21901_s2 + $0x598] sm:$0xff]  ;;  %v13818_v34 = vpack.c.bf16 %v4741_v38, %v4738_v6 }
 0x1d6   : > { %v4591_v57 = vmax.f32 %v4571_v54, 0.0  ;;  %13929 = vmatprep.subr.bf16.mxu1 %v13928_v3  ;;  %3543 = vst [vmem:[#allocation2 + $0x218] sm:$0xff] %v3522_v9  ;;  %v3494_v19 = vadd.f32 %v12938_v5, %v18011_v53  ;;  %13811 = vmatpush1.bf16.msra.mxu0 %v13810_v36  ;;  %v3419_v11 = vpop.f32.mrb[35].mxu0  ;;  %v4764_v3 = vld [vmem:[%s21901_s2 + $0x3d0] sm:$0xff]  ;;  %v18105_v50 = vld [vmem:[#allocation2 + $0x18] sm:$0xff]  ;;  %v4754_v5 = vld [vmem:[%s21901_s2 + $0x380] sm:$0xff] }
 0x1d7   : > { %v4592_v23 = vmax.f32 %v4572_v18, 0.0  ;;  %v4401_v12 = vpop.f32.mrb[32].mxu1  ;;  %3544 = vst [vmem:[#allocation2 + $0x220] sm:$0xff] %v3523_v63  ;;  %v3489_v10 = vadd.f32 %v18011_v53, %v3419_v11  ;;  %13813 = vmatprep.subr.bf16.mxu0 %v13812_v55  ;;  %v4744_v9 = vld [vmem:[%s21901_s2 + $0x330] sm:$0xff]  ;;  %v13938_v18 = vpack.c.bf16 %v4767_v44, %v4764_v3  ;;  %v4751_v63 = vld [vmem:[%s21901_s2 + $0x368] sm:$0xff]  ;;  %v4773_v25 = vld [vmem:[%s21901_s2 + $0x418] sm:$0xff]  ;;  %v4550_v3 = vrot.slane %v17844_v0, %v16988_v32 }
 0x1d8   : > { %4612 = vst [vmem:[#allocation2 + $0x2d0] sm:$0xff] %v4591_v57  ;;  %5959 = vmatmul.mubr.f32.gmra.mrb[76].mxu1 %v18058_v52  ;;  %v4558_v48 = vadd.f32 %v18036_v27, %v4401_v12  ;;  %v4403_v20 = vpop.f32.mrb[33].mxu1  ;;  %v3514_v26 = vmax.f32 %v3494_v19, 0.0  ;;  %v13824_v61 = vpack.c.bf16 %v4754_v5, %v4751_v63  ;;  %v4753_v51 = vld [vmem:[%s21901_s2 + $0x378] sm:$0xff]  ;;  %v4766_v32 = vld [vmem:[%s21901_s2 + $0x3e0] sm:$0xff] }
 0x1d9   : > { %4613 = vst [vmem:[#allocation2 + $0x2d8] sm:$0xff] %v4592_v23  ;;  %5963 = vmatprep.mubr.f32.mxu1 %v18069_v14  ;;  %13931 = vmatpush3.bf16.msra.mxu1 %v13930_v1  ;;  %v4559_v8 = vadd.f32 %v18048_v62, %v4403_v20  ;;  %v3509_v31 = vmax.f32 %v3489_v10, 0.0  ;;  %v12941_v41 = vpop.f32.mrb[36].mxu0  ;;  %v13822_v23 = vpack.c.bf16 %v4747_v42, %v4744_v9  ;;  %v4757_v20 = vld [vmem:[%s21901_s2 + $0x398] sm:$0xff]  ;;  %v4762_v9 = vld [vmem:[%s21901_s2 + $0x3c0] sm:$0xff] }
 0x1da   : > { %v4578_v36 = vmax.f32 %v4558_v48, 0.0  ;;  %13933 = vmatprep.subr.bf16.mxu1 %v13932_v33  ;;  %3535 = vst.msk [vmem:[#allocation2 + $0x1d8] sm:$0xff] %vm1385_vm2, %v3514_v26  ;;  %13815 = vmatpush1.bf16.msra.mxu0 %v13814_v56  ;;  %v3504_v39 = vadd.f32 %v12941_v41, %v18011_v53  ;;  %v3429_v47 = vpop.f32.mrb[37].mxu0  ;;  %v13940_v33 = vpack.c.bf16 %v4821_v7, %v4818_v2  ;;  %v4824_v56 = vld [vmem:[%s21901_s2 + $0x5b0] sm:$0xff] }
 0x1db   : > { %v4579_v59 = vmax.f32 %v4559_v8, 0.0  ;;  %v4407_v17 = vpop.f32.mrb[34].mxu1  ;;  %3530 = vst.msk [vmem:[#allocation2 + $0x1b0] sm:$0xff] %vm1385_vm2, %v3509_v31  ;;  %v3499_v16 = vadd.f32 %v18011_v53, %v3429_v47  ;;  %13817 = vmatprep.subr.bf16.mxu0 %v13816_v58  ;;  %v13820_v53 = vpack.c.bf16 %v4748_v40, %v4745_v35  ;;  %v13942_v48 = vpack.c.bf16 %v4773_v25, %v4770_v60  ;;  %v4760_v26 = vld [vmem:[%s21901_s2 + $0x3b0] sm:$0xff]  ;;  %v4830_v35 = vld [vmem:[%s21901_s2 + $0x5e0] sm:$0xff] }
 0x1dc   : > { %4599 = vst [vmem:[#allocation2 + $0x268] sm:$0xff] %v4578_v36  ;;  %5964 = vmatmul.mubr.f32.gmra.mrb[78].mxu1 %v18093_v28  ;;  %v4563_v55 = vadd.f32 %v18036_v27, %v4407_v17  ;;  %v4409_v54 = vpop.f32.mrb[35].mxu1  ;;  %v3524_v30 = vmax.f32 %v3504_v39, 0.0  ;;  %v4776_v8 = vld [vmem:[%s21901_s2 + $0x430] sm:$0xff]  ;;  %v13828_v44 = vpack.c.bf16 %v4760_v26, %v4757_v20  ;;  %v4759_v39 = vld [vmem:[%s21901_s2 + $0x3a8] sm:$0xff]  ;;  %v4842_v25 = vld [vmem:[%s21901_s2 + $0x640] sm:$0xff] }
 0x1dd   : > { %4600 = vst [vmem:[#allocation2 + $0x270] sm:$0xff] %v4579_v59  ;;  %13935 = vmatpush3.bf16.msra.mxu1 %v13934_v43  ;;  %6033 = vmatprep.mubr.f32.mxu1 %v18105_v50  ;;  %v4564_v22 = vadd.f32 %v18048_v62, %v4409_v54  ;;  %v3519_v1 = vmax.f32 %v3499_v16, 0.0  ;;  %v4779_v43 = vld [vmem:[%s21901_s2 + $0x448] sm:$0xff]  ;;  %v4782_v16 = vld [vmem:[%s21901_s2 + $0x460] sm:$0xff]  ;;  %v11160_v20 = vld [vmem:[%s21901_s2 + $0xe50] sm:$0xff] }
 0x1de   : > { %v4583_v57 = vmax.f32 %v4563_v55, 0.0  ;;  %13937 = vmatprep.subr.bf16.mxu1 %v13936_v37  ;;  %3545 = vst.msk [vmem:[#allocation2 + $0x228] sm:$0xff] %vm1385_vm2, %v3524_v30  ;;  %5682 = vmatmul.mubr.f32.vlgmr.msra.gmra.mrb[46].mxu0 %v17970_v45  ;;  %v4827_v45 = vld [vmem:[%s21901_s2 + $0x5c8] sm:$0xff]  ;;  %v13946_v59 = vpack.c.bf16 %v4779_v43, %v4776_v8  ;;  %v4774_v8 = vld [vmem:[%s21901_s2 + $0x420] sm:$0xff]  ;;  %v4777_v43 = vld [vmem:[%s21901_s2 + $0x438] sm:$0xff] }
 0x1df   : > { %v4584_v19 = vmax.f32 %v4564_v22, 0.0  ;;  %v4413_v11 = vpop.f32.mrb[36].mxu1  ;;  %3540 = vst.msk [vmem:[#allocation2 + $0x200] sm:$0xff] %vm1385_vm2, %v3519_v1  ;;  %5687 = vmatprep.mubr.f32.mxu0 %v17982_v46  ;;  %13819 = vmatpush1.bf16.msra.mxu0 %v13818_v34  ;;  %v4750_v46 = vld [vmem:[%s21901_s2 + $0x360] sm:$0xff]  ;;  %v13944_v38 = vpack.c.bf16 %v4827_v45, %v4824_v56  ;;  %v4836_v34 = vld [vmem:[%s21901_s2 + $0x610] sm:$0xff]  ;;  %v11163_v26 = vld [vmem:[%s21901_s2 + $0xe68] sm:$0xff] }
 0x1e0   : > { %4604 = vst [vmem:[#allocation2 + $0x290] sm:$0xff] %v4583_v57  ;;  %v4568_v12 = vadd.f32 %v18036_v27, %v4413_v11  ;;  %v4415_v10 = vpop.f32.mrb[37].mxu1  ;;  %13821 = vmatprep.subr.bf16.mxu0 %v13820_v53  ;;  %v13826_v40 = vpack.c.bf16 %v4753_v51, %v4750_v46  ;;  %v4772_v1 = vld [vmem:[%s21901_s2 + $0x410] sm:$0xff] }
 0x1e1   : > { %4605 = vst [vmem:[#allocation2 + $0x298] sm:$0xff] %v4584_v19  ;;  %13939 = vmatpush3.bf16.msra.mxu1 %v13938_v18  ;;  %v4569_v58 = vadd.f32 %v18048_v62, %v4415_v10  ;;  %v4769_v18 = vld [vmem:[%s21901_s2 + $0x3f8] sm:$0xff]  ;;  %v4768_v45 = vld [vmem:[%s21901_s2 + $0x3f0] sm:$0xff]  ;;  %v4778_v10 = vld [vmem:[%s21901_s2 + $0x440] sm:$0xff] }
 0x1e2   : > { %v4588_v6 = vmax.f32 %v4568_v12, 0.0  ;;  %13941 = vmatprep.subr.bf16.mxu1 %v13940_v33  ;;  %5688 = vmatmul.mubr.f32.gmra.mrb[48].mxu0 %v17996_v24  ;;  %v4833_v24 = vld [vmem:[%s21901_s2 + $0x5f8] sm:$0xff]  ;;  %v4775_v12 = vld [vmem:[%s21901_s2 + $0x428] sm:$0xff] }
 0x1e3   : > { %v4589_v31 = vmax.f32 %v4569_v58, 0.0  ;;  %v4419_v41 = vpop.f32.mrb[38].mxu1  ;;  %5693 = vmatprep.mubr.f32.mxu0 %v18032_v21  ;;  %13823 = vmatpush1.bf16.msra.mxu0 %v13822_v23  ;;  %v4756_v21 = vld [vmem:[%s21901_s2 + $0x390] sm:$0xff]  ;;  %v13948_v17 = vpack.c.bf16 %v4833_v24, %v4830_v35  ;;  %v4845_v19 = vld [vmem:[%s21901_s2 + $0x658] sm:$0xff]  ;;  %v14096_v35 = vpack.c.bf16 %v11163_v26, %v11160_v20 }
 0x1e4   : > { %4609 = vst [vmem:[#allocation2 + $0x2b8] sm:$0xff] %v4588_v6  ;;  %v4573_v36 = vadd.f32 %v18036_v27, %v4419_v41  ;;  %v4421_v37 = vpop.f32.mrb[39].mxu1  ;;  %13825 = vmatprep.subr.bf16.mxu0 %v13824_v61  ;;  %v4763_v27 = vld [vmem:[%s21901_s2 + $0x3c8] sm:$0xff]  ;;  %v13830_v55 = vpack.c.bf16 %v4759_v39, %v4756_v21  ;;  %v13956_v46 = vpack.c.bf16 %v4845_v19, %v4842_v25  ;;  %v18229_v58 = vld [vmem:[#allocation2 + $0x10] sm:$0xff]  ;;  %v18239_v6 = vld [vmem:[#allocation2 + $0x40] sm:$0xff] }
 0x1e5   : > { %4610 = vst [vmem:[#allocation2 + $0x2c0] sm:$0xff] %v4589_v31  ;;  %13943 = vmatpush3.bf16.msra.mxu1 %v13942_v48  ;;  %v4574_v47 = vadd.f32 %v18048_v62, %v4421_v37  ;;  %v4785_v62 = vld [vmem:[%s21901_s2 + $0x478] sm:$0xff]  ;;  %v13832_v53 = vpack.c.bf16 %v4766_v32, %v4763_v27  ;;  %v4784_v41 = vld [vmem:[%s21901_s2 + $0x470] sm:$0xff]  ;;  %v4787_v21 = vld [vmem:[%s21901_s2 + $0x488] sm:$0xff] }
 0x1e6   : > { %v4593_v0 = vmax.f32 %v4573_v36, 0.0  ;;  %13945 = vmatprep.subr.bf16.mxu1 %v13944_v38  ;;  %5694 = vmatmul.mubr.f32.gmra.mrb[50].mxu0 %v18058_v52  ;;  %v4839_v52 = vld [vmem:[%s21901_s2 + $0x628] sm:$0xff]  ;;  %v13950_v22 = vpack.c.bf16 %v4785_v62, %v4782_v16  ;;  %v13840_v38 = vpack.c.bf16 %v4778_v10, %v4775_v12  ;;  %v4781_v31 = vld [vmem:[%s21901_s2 + $0x458] sm:$0xff]  ;;  %v4790_v39 = vld [vmem:[%s21901_s2 + $0x4a0] sm:$0xff] }
 0x1e7   : > { %v4594_v2 = vmax.f32 %v4574_v47, 0.0  ;;  %v12986_v7 = vpop.f32.mrb[40].mxu1  ;;  %5699 = vmatprep.mubr.f32.mxu0 %v18069_v14  ;;  %13827 = vmatpush1.bf16.msra.mxu0 %v13826_v40  ;;  %v4765_v14 = vld [vmem:[%s21901_s2 + $0x3d8] sm:$0xff]  ;;  %v13952_v5 = vpack.c.bf16 %v4839_v52, %v4836_v34  ;;  %v13842_v40 = vpack.c.bf16 %v4777_v43, %v4774_v8  ;;  %v18258_v36 = vld [vmem:[#allocation2 + $0x68] sm:$0xff]  ;;  %v13844_v37 = vpack.c.bf16 %v4784_v41, %v4781_v31  ;;  %v18273_v47 = vld [vmem:[#allocation2 + $0x60] sm:$0xff] }
 0x1e8   : > { %4614 = vst [vmem:[#allocation2 + $0x2e0] sm:$0xff] %v4593_v0  ;;  %v4565_v54 = vadd.f32 %v12986_v7, %v4550_v3  ;;  %v4490_v30 = vpop.f32.mrb[41].mxu1  ;;  %13829 = vmatprep.subr.bf16.mxu0 %v13828_v44  ;;  %v13834_v60 = vpack.c.bf16 %v4765_v14, %v4762_v9  ;;  %v18255_v24 = vld [vmem:[#allocation2 + $0x38] sm:$0xff]  ;;  %v4783_v44 = vld [vmem:[%s21901_s2 + $0x468] sm:$0xff]  ;;  %v18276_v27 = vld [vmem:[#allocation2 + $0x90] sm:$0xff]  ;;  %v13848_v32 = vpack.c.bf16 %v4790_v39, %v4787_v21 }
 0x1e9   : > { %4615 = vst [vmem:[#allocation2 + $0x2e8] sm:$0xff] %v4594_v2  ;;  %13947 = vmatpush3.bf16.msra.mxu1 %v13946_v59  ;;  %v4560_v42 = vadd.f32 %v4550_v3, %v4490_v30  ;;  %v4786_v0 = vld [vmem:[%s21901_s2 + $0x480] sm:$0xff]  ;;  %v4793_v16 = vld [vmem:[%s21901_s2 + $0x4b8] sm:$0xff]  ;;  %v4796_v62 = vld [vmem:[%s21901_s2 + $0x4d0] sm:$0xff] }
 0x1ea   : > { %v4585_v63 = vmax.f32 %v4565_v54, 0.0  ;;  %13949 = vmatprep.subr.bf16.mxu1 %v13948_v17  ;;  %5700 = vmatmul.mubr.f32.gmra.mrb[52].mxu0 %v18093_v28  ;;  %v13836_v28 = vpack.c.bf16 %v4772_v1, %v4769_v18  ;;  %v4789_v17 = vld [vmem:[%s21901_s2 + $0x498] sm:$0xff]  ;;  %v11112_v2 = vld [vmem:[%s21901_s2 + $0xcd0] sm:$0xff]  ;;  %v11115_v7 = vld [vmem:[%s21901_s2 + $0xce8] sm:$0xff] }
 0x1eb   : > { %v4580_v57 = vmax.f32 %v4560_v42, 0.0  ;;  %v12989_v33 = vpop.f32.mrb[42].mxu1  ;;  %13831 = vmatpush1.bf16.msra.mxu0 %v13830_v55  ;;  %5770 = vmatprep.mubr.f32.mxu0 %v18105_v50  ;;  %v4771_v50 = vld [vmem:[%s21901_s2 + $0x408] sm:$0xff]  ;;  %v11166_v52 = vld [vmem:[%s21901_s2 + $0xe80] sm:$0xff]  ;;  %v11169_v55 = vld [vmem:[%s21901_s2 + $0xe98] sm:$0xff]  ;;  %v13850_v54 = vpack.c.bf16 %v4789_v17, %v4786_v0  ;;  %v14098_v42 = vpack.c.bf16 %v11115_v7, %v11112_v2 }
 0x1ec   : > { %4606 = vst.msk [vmem:[#allocation2 + $0x2a0] sm:$0xff] %vm1385_vm2, %v4585_v63  ;;  %v4575_v11 = vadd.f32 %v12989_v33, %v4550_v3  ;;  %v4500_v56 = vpop.f32.mrb[43].mxu1  ;;  %13833 = vmatprep.subr.bf16.mxu0 %v13832_v53  ;;  %v13838_v48 = vpack.c.bf16 %v4771_v50, %v4768_v45  ;;  %v18297_v34 = vld [vmem:[#allocation2 + $0x88] sm:$0xff]  ;;  %v18306_v30 = vld [vmem:[#allocation2 + $0x20] sm:$0xff]  ;;  %v13852_v53 = vpack.c.bf16 %v4796_v62, %v4793_v16  ;;  %v4792_v9 = vld [vmem:[%s21901_s2 + $0x4b0] sm:$0xff] }
 0x1ed   : > { %4601 = vst.msk [vmem:[#allocation2 + $0x278] sm:$0xff] %vm1385_vm2, %v4580_v57  ;;  %13951 = vmatpush3.bf16.msra.mxu1 %v13950_v22  ;;  %v4570_v23 = vadd.f32 %v4550_v3, %v4500_v56  ;;  %v4780_v3 = vld [vmem:[%s21901_s2 + $0x450] sm:$0xff]  ;;  %v4795_v14 = vld [vmem:[%s21901_s2 + $0x4c8] sm:$0xff]  ;;  %v4802_v18 = vld [vmem:[%s21901_s2 + $0x500] sm:$0xff]  ;;  %v14100_v1 = vpack.c.bf16 %v11169_v55, %v11166_v52 }
 0x1ee   : > { %v4595_v61 = vmax.f32 %v4575_v11, 0.0  ;;  %13953 = vmatprep.subr.bf16.mxu1 %v13952_v5  ;;  %v13846_v59 = vpack.c.bf16 %v4783_v44, %v4780_v3  ;;  %v4799_v22 = vld [vmem:[%s21901_s2 + $0x4e8] sm:$0xff]  ;;  %v11118_v63 = vld [vmem:[%s21901_s2 + $0xd00] sm:$0xff]  ;;  %v11172_v33 = vld [vmem:[%s21901_s2 + $0xeb0] sm:$0xff]  ;;  %v13854_v25 = vpack.c.bf16 %v4795_v14, %v4792_v9 }
 0x1ef   : > { %v4590_v51 = vmax.f32 %v4570_v23, 0.0  ;;  %13835 = vmatpush1.bf16.msra.mxu0 %v13834_v60  ;;  %v18328_v57 = vld [vmem:[#allocation2 + $0x48] sm:$0xff]  ;;  %v18338_v19 = vld [vmem:[#allocation2 + $0x70] sm:$0xff]  ;;  %v13856_v11 = vpack.c.bf16 %v4802_v18, %v4799_v22  ;;  %v4798_v56 = vld [vmem:[%s21901_s2 + $0x4e0] sm:$0xff] }
 0x1f0   : > { %4616 = vst.msk [vmem:[#allocation2 + $0x2f0] sm:$0xff] %vm1385_vm2, %v4595_v61  ;;  %6034 = vmatmul.mubr.f32.vlgmr.msra.gmra.mrb[80].mxu1 %v18229_v58  ;;  %13837 = vmatprep.subr.bf16.mxu0 %v13836_v28  ;;  %v11175_v60 = vld [vmem:[%s21901_s2 + $0xec8] sm:$0xff]  ;;  %v4801_v28 = vld [vmem:[%s21901_s2 + $0x4f8] sm:$0xff]  ;;  %v4808_v23 = vld [vmem:[%s21901_s2 + $0x530] sm:$0xff] }
 0x1f1   : > { %4611 = vst.msk [vmem:[#allocation2 + $0x2c8] sm:$0xff] %vm1385_vm2, %v4590_v51  ;;  %6038 = vmatprep.mubr.f32.mxu1 %v18239_v6  ;;  %13955 = vmatpush3.bf16.msra.mxu1 %v13952_v5  ;;  %v11121_v5 = vld [vmem:[%s21901_s2 + $0xd18] sm:$0xff]  ;;  %v14104_v12 = vpack.c.bf16 %v11175_v60, %v11172_v33  ;;  %v11124_v10 = vld [vmem:[%s21901_s2 + $0xd30] sm:$0xff]  ;;  %v11127_v61 = vld [vmem:[%s21901_s2 + $0xd48] sm:$0xff]  ;;  %v13858_v20 = vpack.c.bf16 %v4801_v28, %v4798_v56 }
 0x1f2   : > { %13957 = vmatprep.subr.bf16.mxu1 %v13956_v46  ;;  %v14102_v45 = vpack.c.bf16 %v11121_v5, %v11118_v63  ;;  %v4805_v50 = vld [vmem:[%s21901_s2 + $0x518] sm:$0xff]  ;;  %v11178_v51 = vld [vmem:[%s21901_s2 + $0xee0] sm:$0xff]  ;;  %v4807_v8 = vld [vmem:[%s21901_s2 + $0x528] sm:$0xff]  ;;  %v14106_v43 = vpack.c.bf16 %v11127_v61, %v11124_v10 }
 0x1f3   : > { %13839 = vmatpush1.bf16.msra.mxu0 %v13838_v48  ;;  %v11181_v48 = vld [vmem:[%s21901_s2 + $0xef8] sm:$0xff]  ;;  %v13860_v26 = vpack.c.bf16 %v4808_v23, %v4805_v50  ;;  %v4811_v31 = vld [vmem:[%s21901_s2 + $0x548] sm:$0xff]  ;;  %v4814_v41 = vld [vmem:[%s21901_s2 + $0x560] sm:$0xff] }
 0x1f4   : > { %6039 = vmatmul.mubr.f32.gmra.mrb[82].mxu1 %v18255_v24  ;;  %13841 = vmatprep.subr.bf16.mxu0 %v13840_v38  ;;  %v4804_v38 = vld [vmem:[%s21901_s2 + $0x510] sm:$0xff]  ;;  %v13864_v44 = vpack.c.bf16 %v4814_v41, %v4811_v31  ;;  %v4810_v21 = vld [vmem:[%s21901_s2 + $0x540] sm:$0xff]  ;;  %v4813_v39 = vld [vmem:[%s21901_s2 + $0x558] sm:$0xff] }
 0x1f5   : > { %6043 = vmatprep.mubr.f32.mxu1 %v18258_v36  ;;  %13959 = vmatpush3.bf16.msra.mxu1 %v13956_v46  ;;  %v18360_v46 = vld [vmem:[#allocation2 + $0x98] sm:$0xff]  ;;  %v13862_v3 = vpack.c.bf16 %v4807_v8, %v4804_v38  ;;  %v4820_v0 = vld [vmem:[%s21901_s2 + $0x590] sm:$0xff]  ;;  %v11139_v62 = vld [vmem:[%s21901_s2 + $0xda8] sm:$0xff]  ;;  %v13866_v52 = vpack.c.bf16 %v4813_v39, %v4810_v21 }
 0x1f6   : > { %14097 = vmatprep.subr.bf16.mxu1 %v14096_v35  ;;  %v14108_v35 = vpack.c.bf16 %v11181_v48, %v11178_v51  ;;  %v11136_v16 = vld [vmem:[%s21901_s2 + $0xd90] sm:$0xff]  ;;  %v11190_v2 = vld [vmem:[%s21901_s2 + $0xf40] sm:$0xff]  ;;  %v11193_v7 = vld [vmem:[%s21901_s2 + $0xf58] sm:$0xff] }
 0x1f7   : > { %13843 = vmatpush1.bf16.msra.mxu0 %v13842_v40  ;;  %v11130_v40 = vld [vmem:[%s21901_s2 + $0xd60] sm:$0xff]  ;;  %v14114_v9 = vpack.c.bf16 %v11139_v62, %v11136_v16  ;;  %v4823_v14 = vld [vmem:[%s21901_s2 + $0x5a8] sm:$0xff]  ;;  %v14116_v22 = vpack.c.bf16 %v11193_v7, %v11190_v2  ;;  %v11196_v63 = vld [vmem:[%s21901_s2 + $0xf70] sm:$0xff] }
 0x1f8   : > { %6044 = vmatmul.mubr.f32.gmra.mrb[84].mxu1 %v18273_v47  ;;  %13845 = vmatprep.subr.bf16.mxu0 %v13844_v37  ;;  %v11187_v37 = vld [vmem:[%s21901_s2 + $0xf28] sm:$0xff]  ;;  %v11142_v18 = vld [vmem:[%s21901_s2 + $0xdc0] sm:$0xff]  ;;  %v4829_v28 = vld [vmem:[%s21901_s2 + $0x5d8] sm:$0xff] }
 0x1f9   : > { %6048 = vmatprep.mubr.f32.mxu1 %v18276_v27  ;;  %v11199_v5 = vld [vmem:[%s21901_s2 + $0xf88] sm:$0xff]  ;;  %v11148_v23 = vld [vmem:[%s21901_s2 + $0xdf0] sm:$0xff]  ;;  %v11202_v10 = vld [vmem:[%s21901_s2 + $0xfa0] sm:$0xff] }
 0x1fa   : > { %v14120_v50 = vpack.c.bf16 %v11199_v5, %v11196_v63  ;;  %v11205_v61 = vld [vmem:[%s21901_s2 + $0xfb8] sm:$0xff]  ;;  %v4835_v8 = vld [vmem:[%s21901_s2 + $0x608] sm:$0xff]  ;;  %v11154_v41 = vld [vmem:[%s21901_s2 + $0xe20] sm:$0xff] }
 0x1fb   : > { %13847 = vmatpush1.bf16.msra.mxu0 %v13846_v59  ;;  %v14110_v59 = vpack.c.bf16 %v11133_v4, %v11130_v40  ;;  %v14124_v31 = vpack.c.bf16 %v11205_v61, %v11202_v10  ;;  %v11256_v40 = vld [vmem:[%s21901_s2 + $0x1150] sm:$0xff]  ;;  %v11259_v4 = vld [vmem:[%s21901_s2 + $0x1168] sm:$0xff]  ;;  %v4841_v39 = vld [vmem:[%s21901_s2 + $0x638] sm:$0xff] }
 0x1fc   : > { %6049 = vmatmul.mubr.f32.gmra.mrb[86].mxu1 %v18297_v34  ;;  %13849 = vmatprep.subr.bf16.mxu0 %v13848_v32  ;;  %v4817_v32 = vld [vmem:[%s21901_s2 + $0x578] sm:$0xff]  ;;  %v11262_v16 = vld [vmem:[%s21901_s2 + $0x1180] sm:$0xff]  ;;  %v11271_v63 = vld [vmem:[%s21901_s2 + $0x11c8] sm:$0xff] }
 0x1fd   : > { %13012 = vmatprep.mubr.msk.f32.mxu1 %vm1385_vm2, %v18306_v30  ;;  %v13868_v55 = vpack.c.bf16 %v4820_v0, %v4817_v32  ;;  %v14128_v32 = vpack.c.bf16 %v11259_v4, %v11256_v40  ;;  %v11208_v0 = vld [vmem:[%s21901_s2 + $0xfd0] sm:$0xff]  ;;  %v11265_v62 = vld [vmem:[%s21901_s2 + $0x1198] sm:$0xff]  ;;  %v18575_v10 = vld [vmem:[#allocation2 + $0x1e0] sm:$0xff] }
 0x1fe   : > { %v11280_v61 = vld [vmem:[%s21901_s2 + $0x1210] sm:$0xff]  ;;  %v11289_v40 = vld [vmem:[%s21901_s2 + $0x1258] sm:$0xff]  ;;  %v15384_v4 = vld [vmem:[#allocation2 + $0xa0] sm:$0xff] }
 0x1ff   : > { %13851 = vmatpush1.bf16.msra.mxu0 %v13850_v54  ;;  %v4816_v54 = vld [vmem:[%s21901_s2 + $0x570] sm:$0xff] }
 0x200   : > { %13013 = vmatmul.mubr.msk.f32.vlgmr.msra.gmra.mrb[68].mxu1 %vm1385_vm2, %v18328_v57  ;;  %13853 = vmatprep.subr.bf16.mxu0 %v13852_v53  ;;  %v4819_v53 = vld [vmem:[%s21901_s2 + $0x588] sm:$0xff] }
 0x201   : > { %14099 = vmatpush3.bf16.msra.mxu1 %v14098_v42  ;;  %13015 = vmatprep.mubr.msk.f32.mxu1 %vm1385_vm2, %v18338_v19  ;;  %v4826_v42 = vld [vmem:[%s21901_s2 + $0x5c0] sm:$0xff]  ;;  %v13870_v33 = vpack.c.bf16 %v4819_v53, %v4816_v54  ;;  %v11111_v53 = vld [vmem:[%s21901_s2 + $0xcc8] sm:$0xff] }
 0x202   : > { %14101 = vmatprep.subr.bf16.mxu1 %v14100_v1  ;;  %v11145_v1 = vld [vmem:[%s21901_s2 + $0xdd8] sm:$0xff]  ;;  %v13872_v60 = vpack.c.bf16 %v4826_v42, %v4823_v14  ;;  %v14132_v14 = vpack.c.bf16 %v11265_v62, %v11262_v16  ;;  %v11214_v42 = vld [vmem:[%s21901_s2 + $0x1000] sm:$0xff]  ;;  %v11292_v16 = vld [vmem:[%s21901_s2 + $0x1270] sm:$0xff] }
 0x203   : > { %13855 = vmatpush1.bf16.msra.mxu0 %v13854_v25  ;;  %v4822_v25 = vld [vmem:[%s21901_s2 + $0x5a0] sm:$0xff]  ;;  %v14118_v56 = vpack.c.bf16 %v11145_v1, %v11142_v18  ;;  %v18535_v18 = vld [vmem:[#allocation2 + $0x190] sm:$0xff]  ;;  %v11295_v62 = vld [vmem:[%s21901_s2 + $0x1288] sm:$0xff] }
 0x204   : > { %13016 = vmatmul.mubr.msk.f32.gmra.mrb[70].mxu1 %vm1385_vm2, %v18360_v46  ;;  %13857 = vmatprep.subr.bf16.mxu0 %v13856_v11  ;;  %v4825_v11 = vld [vmem:[%s21901_s2 + $0x5b8] sm:$0xff]  ;;  %v11268_v1 = vld [vmem:[%s21901_s2 + $0x11b0] sm:$0xff] }
 0x205   : > { %14103 = vmatpush3.bf16.msra.mxu1 %v14102_v45  ;;  %6707 = vmatprep.mubr.f32.mxu1 %v3506_v13  ;;  %v11184_v13 = vld [vmem:[%s21901_s2 + $0xf10] sm:$0xff]  ;;  %v13874_v51 = vpack.c.bf16 %v4825_v11, %v4822_v25  ;;  %v11223_v11 = vld [vmem:[%s21901_s2 + $0x1048] sm:$0xff] }
 0x206   : > { %14105 = vmatprep.subr.bf16.mxu1 %v14104_v12  ;;  %v14112_v17 = vpack.c.bf16 %v11187_v37, %v11184_v13  ;;  %v4832_v45 = vld [vmem:[%s21901_s2 + $0x5f0] sm:$0xff]  ;;  %v11151_v12 = vld [vmem:[%s21901_s2 + $0xe08] sm:$0xff] }
 0x207   : > { %13859 = vmatpush1.bf16.msra.mxu0 %v13858_v20  ;;  %v13876_v48 = vpack.c.bf16 %v4832_v45, %v4829_v28  ;;  %v4828_v20 = vld [vmem:[%s21901_s2 + $0x5d0] sm:$0xff]  ;;  %v14122_v38 = vpack.c.bf16 %v11151_v12, %v11148_v23  ;;  %v11274_v28 = vld [vmem:[%s21901_s2 + $0x11e0] sm:$0xff]  ;;  %v11277_v45 = vld [vmem:[%s21901_s2 + $0x11f8] sm:$0xff] }
 0x208   : > { %13861 = vmatprep.subr.bf16.mxu0 %v13860_v26  ;;  %v4831_v26 = vld [vmem:[%s21901_s2 + $0x5e8] sm:$0xff]  ;;  %v11220_v25 = vld [vmem:[%s21901_s2 + $0x1030] sm:$0xff]  ;;  %v11226_v23 = vld [vmem:[%s21901_s2 + $0x1060] sm:$0xff] }
 0x209   : > { %14107 = vmatpush3.bf16.msra.mxu1 %v14106_v43  ;;  %v4838_v43 = vld [vmem:[%s21901_s2 + $0x620] sm:$0xff]  ;;  %v13878_v13 = vpack.c.bf16 %v4831_v26, %v4828_v20  ;;  %v11229_v12 = vld [vmem:[%s21901_s2 + $0x1078] sm:$0xff] }
 0x20a   : > { %14109 = vmatprep.subr.bf16.mxu1 %v14108_v35  ;;  %v11157_v35 = vld [vmem:[%s21901_s2 + $0xe38] sm:$0xff]  ;;  %v13880_v37 = vpack.c.bf16 %v4838_v43, %v4835_v8  ;;  %v14142_v20 = vpack.c.bf16 %v11229_v12, %v11226_v23  ;;  %v11232_v43 = vld [vmem:[%s21901_s2 + $0x1090] sm:$0xff] }
 0x20b   : > { %13863 = vmatpush1.bf16.msra.mxu0 %v13862_v3  ;;  %v4834_v3 = vld [vmem:[%s21901_s2 + $0x600] sm:$0xff]  ;;  %v14126_v21 = vpack.c.bf16 %v11157_v35, %v11154_v41  ;;  %v11117_v26 = vld [vmem:[%s21901_s2 + $0xcf8] sm:$0xff]  ;;  %v18607_v41 = vld [vmem:[#allocation2 + $0x208] sm:$0xff] }
 0x20c   : > { %13865 = vmatprep.subr.bf16.mxu0 %v13864_v44  ;;  %v4837_v44 = vld [vmem:[%s21901_s2 + $0x618] sm:$0xff]  ;;  %v11286_v35 = vld [vmem:[%s21901_s2 + $0x1240] sm:$0xff]  ;;  %v11304_v12 = vld [vmem:[%s21901_s2 + $0x12d0] sm:$0xff] }
 0x20d   : > { %14111 = vmatpush3.bf16.msra.mxu1 %v14110_v59  ;;  %v4844_v59 = vld [vmem:[%s21901_s2 + $0x650] sm:$0xff]  ;;  %v13882_v2 = vpack.c.bf16 %v4837_v44, %v4834_v3  ;;  %v11119_v44 = vld [vmem:[%s21901_s2 + $0xd08] sm:$0xff] }
 0x20e   : > { %14113 = vmatprep.subr.bf16.mxu1 %v14112_v17  ;;  %v11211_v17 = vld [vmem:[%s21901_s2 + $0xfe8] sm:$0xff]  ;;  %v13884_v7 = vpack.c.bf16 %v4844_v59, %v4841_v39  ;;  %v11126_v59 = vld [vmem:[%s21901_s2 + $0xd40] sm:$0xff] }
 0x20f   : > { %13867 = vmatpush1.bf16.msra.mxu0 %v13866_v52  ;;  %v4840_v52 = vld [vmem:[%s21901_s2 + $0x630] sm:$0xff]  ;;  %v14130_v54 = vpack.c.bf16 %v11211_v17, %v11208_v0  ;;  %v11123_v39 = vld [vmem:[%s21901_s2 + $0xd28] sm:$0xff]  ;;  %v11238_v0 = vld [vmem:[%s21901_s2 + $0x10c0] sm:$0xff] }
 0x210   : > { %13869 = vmatprep.subr.bf16.mxu0 %v13868_v55  ;;  %v4843_v55 = vld [vmem:[%s21901_s2 + $0x648] sm:$0xff]  ;;  %v11241_v17 = vld [vmem:[%s21901_s2 + $0x10d8] sm:$0xff] }
 0x211   : > { %14115 = vmatpush3.bf16.msra.mxu1 %v14114_v9  ;;  %v11114_v9 = vld [vmem:[%s21901_s2 + $0xce0] sm:$0xff]  ;;  %v13886_v5 = vpack.c.bf16 %v4843_v55, %v4840_v52  ;;  %v14150_v55 = vpack.c.bf16 %v11241_v17, %v11238_v0 }
 0x212   : > { %14117 = vmatprep.subr.bf16.mxu1 %v14116_v22  ;;  %v11217_v22 = vld [vmem:[%s21901_s2 + $0x1018] sm:$0xff]  ;;  %v11122_v52 = vld [vmem:[%s21901_s2 + $0xd20] sm:$0xff] }
 0x213   : > { %13871 = vmatpush1.bf16.msra.mxu0 %v13870_v33  ;;  %v18545_v33 = vld [vmem:[#allocation2 + $0x1c0] sm:$0xff] }
 0x214   : > { %13873 = vmatprep.subr.bf16.mxu0 %v13872_v60  ;;  %v14136_v60 = vpack.c.bf16 %v11271_v63, %v11268_v1  ;;  %v11298_v1 = vld [vmem:[%s21901_s2 + $0x12a0] sm:$0xff]  ;;  %v11301_v63 = vld [vmem:[%s21901_s2 + $0x12b8] sm:$0xff] }
 0x215   : > { %14119 = vmatpush3.bf16.msra.mxu1 %v14118_v56  ;;  %v18555_v56 = vld [vmem:[#allocation2 + $0x1b8] sm:$0xff] }
 0x216   : > { %14121 = vmatprep.subr.bf16.mxu1 %v14120_v50  ;;  %v18565_v50 = vld [vmem:[#allocation2 + $0x1e8] sm:$0xff] }
 0x217   : > { %13875 = vmatpush1.bf16.msra.mxu0 %v13874_v51  ;;  %v11283_v51 = vld [vmem:[%s21901_s2 + $0x1228] sm:$0xff] }
 0x218   : > { %13877 = vmatprep.subr.bf16.mxu0 %v13876_v48  ;;  %v18585_v48 = vld [vmem:[#allocation2 + $0x210] sm:$0xff]  ;;  %v14144_v8 = vpack.c.bf16 %v11283_v51, %v11280_v61  ;;  %v11307_v61 = vld [vmem:[%s21901_s2 + $0x12e8] sm:$0xff] }
 0x219   : > { %14123 = vmatpush3.bf16.msra.mxu1 %v14122_v38  ;;  %v11120_v38 = vld [vmem:[%s21901_s2 + $0xd10] sm:$0xff] }
 0x21a   : > { %14125 = vmatprep.subr.bf16.mxu1 %v14124_v31  ;;  %v11235_v31 = vld [vmem:[%s21901_s2 + $0x10a8] sm:$0xff]  ;;  %v13964_v3 = vpack.c.bf16 %v11120_v38, %v11117_v26  ;;  %v11141_v38 = vld [vmem:[%s21901_s2 + $0xdb8] sm:$0xff] }
 0x21b   : > { %13879 = vmatpush1.bf16.msra.mxu0 %v13878_v13 }
 0x21c   : > { %13881 = vmatprep.subr.bf16.mxu0 %v13880_v37  ;;  %v18616_v37 = vld [vmem:[#allocation2 + $0x1a8] sm:$0xff] }
 0x21d   : > { %14127 = vmatpush3.bf16.msra.mxu1 %v14126_v21  ;;  %v14146_v21 = vpack.c.bf16 %v11235_v31, %v11232_v43  ;;  %v14160_v43 = vpack.c.bf16 %v11307_v61, %v11304_v12  ;;  %v11165_v12 = vld [vmem:[%s21901_s2 + $0xe78] sm:$0xff]  ;;  %v11168_v61 = vld [vmem:[%s21901_s2 + $0xe90] sm:$0xff] }
 0x21e   : > { %14129 = vmatprep.subr.bf16.mxu1 %v14128_v32  ;;  %5771 = vmatmul.mubr.f32.vlgmr.msra.gmra.mrb[46].mxu0 %v18229_v58  ;;  %v13960_v58 = vpack.c.bf16 %v11114_v9, %v11111_v53  ;;  %v14148_v32 = vpack.c.bf16 %v11289_v40, %v11286_v35  ;;  %v11132_v53 = vld [vmem:[%s21901_s2 + $0xd70] sm:$0xff]  ;;  %v14152_v9 = vpack.c.bf16 %v11295_v62, %v11292_v16  ;;  %v15385_v35 = vld [vmem:[#allocation2 + $0x198] sm:$0xff]  ;;  %v11323_v16 = vld [vmem:[%s21901_s2 + $0x668] sm:$0xff] }
 0x21f   : > { %5776 = vmatprep.mubr.f32.mxu0 %v18239_v6  ;;  %13883 = vmatpush1.bf16.msra.mxu0 %v13882_v2  ;;  %v14134_v6 = vpack.c.bf16 %v11217_v22, %v11214_v42  ;;  %v11247_v42 = vld [vmem:[%s21901_s2 + $0x1108] sm:$0xff]  ;;  %v11326_v62 = vld [vmem:[%s21901_s2 + $0x680] sm:$0xff] }
 0x220   : > { %6708 = vmatmul.mubr.f32.vlgmr.msra.gmra.mrb[88].mxu1 %v18535_v18  ;;  %13885 = vmatprep.subr.bf16.mxu0 %v13884_v7  ;;  %v13968_v7 = vpack.c.bf16 %v11126_v59, %v11123_v39  ;;  %v11150_v39 = vld [vmem:[%s21901_s2 + $0xe00] sm:$0xff] }
 0x221   : > { %6712 = vmatprep.mubr.f32.mxu1 %v18545_v33  ;;  %14131 = vmatpush3.bf16.msra.mxu1 %v14130_v54  ;;  %v11129_v54 = vld [vmem:[%s21901_s2 + $0xd58] sm:$0xff] }
 0x222   : > { %14133 = vmatprep.subr.bf16.mxu1 %v14132_v14  ;;  %5777 = vmatmul.mubr.f32.gmra.mrb[48].mxu0 %v18255_v24  ;;  %v14138_v24 = vpack.c.bf16 %v11223_v11, %v11220_v25  ;;  %v11244_v14 = vld [vmem:[%s21901_s2 + $0x10f0] sm:$0xff]  ;;  %v11135_v11 = vld [vmem:[%s21901_s2 + $0xd88] sm:$0xff] }
 0x223   : > { %5782 = vmatprep.mubr.f32.mxu0 %v18258_v36  ;;  %13887 = vmatpush1.bf16.msra.mxu0 %v13886_v5  ;;  %v14140_v36 = vpack.c.bf16 %v11277_v45, %v11274_v28  ;;  %v14154_v25 = vpack.c.bf16 %v11247_v42, %v11244_v14  ;;  %v11138_v28 = vld [vmem:[%s21901_s2 + $0xda0] sm:$0xff]  ;;  %v14156_v45 = vpack.c.bf16 %v11301_v63, %v11298_v1  ;;  %v6146_v14 = vld [vmem:[#allocation2 + $0x1c8] sm:$0xff]  ;;  %v6152_v1 = vld [vmem:[#allocation2 + $0x1f8] sm:$0xff] }
 0x224   : > { %6713 = vmatmul.mubr.f32.gmra.mrb[90].mxu1 %v18555_v56  ;;  %13961 = vmatprep.subr.bf16.mxu0 %v13960_v58 }
 0x225   : > { %6717 = vmatprep.mubr.f32.mxu1 %v18565_v50  ;;  %14135 = vmatpush3.bf16.msra.mxu1 %v14134_v6  ;;  %v13972_v6 = vpack.c.bf16 %v11132_v53, %v11129_v54  ;;  %v11153_v54 = vld [vmem:[%s21901_s2 + $0xe18] sm:$0xff]  ;;  %v11156_v53 = vld [vmem:[%s21901_s2 + $0xe30] sm:$0xff] }
 0x226   : > { %14137 = vmatprep.subr.bf16.mxu1 %v14136_v60  ;;  %5783 = vmatmul.mubr.f32.gmra.mrb[50].mxu0 %v18273_v47  ;;  %v11110_v47 = vld [vmem:[%s21901_s2 + $0xcc0] sm:$0xff]  ;;  %v11131_v60 = vld [vmem:[%s21901_s2 + $0xd68] sm:$0xff]  ;;  %v13988_v63 = vpack.c.bf16 %v11156_v53, %v11153_v54  ;;  %v11180_v54 = vld [vmem:[%s21901_s2 + $0xef0] sm:$0xff] }
 0x227   : > { %5788 = vmatprep.mubr.f32.mxu0 %v18276_v27  ;;  %v11113_v27 = vld [vmem:[%s21901_s2 + $0xcd8] sm:$0xff] }
 0x228   : > { %6718 = vmatmul.mubr.f32.gmra.mrb[92].mxu1 %v18575_v10  ;;  %v13962_v13 = vpack.c.bf16 %v11113_v27, %v11110_v47  ;;  %v13976_v27 = vpack.c.bf16 %v11138_v28, %v11135_v11  ;;  %v6157_v28 = vld [vmem:[#allocation2 + $0x220] sm:$0xff] }
 0x229   : > { %6722 = vmatprep.mubr.f32.mxu1 %v18585_v48  ;;  %14139 = vmatpush3.bf16.msra.mxu1 %v14138_v24  ;;  %v11250_v24 = vld [vmem:[%s21901_s2 + $0x1120] sm:$0xff] }
 0x22a   : > { %14141 = vmatprep.subr.bf16.mxu1 %v14140_v36  ;;  %5789 = vmatmul.mubr.f32.gmra.mrb[52].mxu0 %v18297_v34  ;;  %v11116_v34 = vld [vmem:[%s21901_s2 + $0xcf0] sm:$0xff]  ;;  %v11253_v36 = vld [vmem:[%s21901_s2 + $0x1138] sm:$0xff] }
 0x22b   : > { %5859 = vmatprep.mubr.f32.mxu0 %v15384_v4  ;;  %v13966_v2 = vpack.c.bf16 %v11119_v44, %v11116_v34  ;;  %v14158_v26 = vpack.c.bf16 %v11253_v36, %v11250_v24  ;;  %v11143_v44 = vld [vmem:[%s21901_s2 + $0xdc8] sm:$0xff]  ;;  %v11158_v24 = vld [vmem:[%s21901_s2 + $0xe40] sm:$0xff]  ;;  %v11161_v36 = vld [vmem:[%s21901_s2 + $0xe58] sm:$0xff] }
 0x22c   : > { %6723 = vmatmul.mubr.f32.gmra.mrb[94].mxu1 %v18607_v41 }
 0x22d   : > { %14143 = vmatpush3.bf16.msra.mxu1 %v14142_v20  ;;  %6792 = vmatprep.mubr.f32.mxu1 %v18616_v37  ;;  %v11137_v20 = vld [vmem:[%s21901_s2 + $0xd98] sm:$0xff] }
 0x22e   : > { %14145 = vmatprep.subr.bf16.mxu1 %v14144_v8  ;;  %11102 = vmatmul.mubr.msk.f32.vlgmr.msra.gmra.mrb[46].mxu0 %vm1385_vm2, %v18306_v30  ;;  %v11125_v30 = vld [vmem:[%s21901_s2 + $0xd38] sm:$0xff]  ;;  %v11144_v8 = vld [vmem:[%s21901_s2 + $0xdd0] sm:$0xff] }
 0x22f   : > { %13963 = vmatpush1.bf16.msra.mxu0 %v13962_v13  ;;  %5865 = vmatprep.mubr.f32.mxu0 %v15384_v4  ;;  %v13970_v5 = vpack.c.bf16 %v11125_v30, %v11122_v52  ;;  %v11313_v13 = vld [vmem:[%s21901_s2 + $0x1318] sm:$0xff]  ;;  %v13980_v34 = vpack.c.bf16 %v11144_v8, %v11141_v38  ;;  %v11146_v30 = vld [vmem:[%s21901_s2 + $0xde0] sm:$0xff]  ;;  %v13994_v38 = vpack.c.bf16 %v11161_v36, %v11158_v24  ;;  %v6143_v8 = vld [vmem:[#allocation2 + $0x1b0] sm:$0xff] }
 0x230   : > { %13965 = vmatprep.subr.bf16.mxu0 %v13964_v3  ;;  %v11183_v36 = vld [vmem:[%s21901_s2 + $0xf08] sm:$0xff] }
 0x231   : > { %14147 = vmatpush3.bf16.msra.mxu1 %v14146_v21  ;;  %v11147_v21 = vld [vmem:[%s21901_s2 + $0xde8] sm:$0xff] }
 0x232   : > { %14149 = vmatprep.subr.bf16.mxu1 %v14148_v32  ;;  %11103 = vmatmul.mubr.msk.f32.gmra.mrb[48].mxu0 %vm1385_vm2, %v18328_v57  ;;  %v11128_v57 = vld [vmem:[%s21901_s2 + $0xd50] sm:$0xff]  ;;  %v6141_v32 = vld [vmem:[#allocation2 + $0x1a0] sm:$0xff]  ;;  %v13984_v52 = vpack.c.bf16 %v11150_v39, %v11147_v21  ;;  %v11331_v21 = vld [vmem:[%s21901_s2 + $0x6a8] sm:$0xff] }
 0x233   : > { %v18665_v22 = vpop.f32.mrb[44].mxu1  ;;  %13967 = vmatpush1.bf16.msra.mxu0 %v13966_v2  ;;  %5871 = vmatprep.mubr.f32.mxu0 %v15384_v4  ;;  %v13974_v51 = vpack.c.bf16 %v11131_v60, %v11128_v57  ;;  %v6147_v2 = vld [vmem:[#allocation2 + $0x1d0] sm:$0xff]  ;;  %v11159_v57 = vld [vmem:[%s21901_s2 + $0xe48] sm:$0xff]  ;;  %v11162_v60 = vld [vmem:[%s21901_s2 + $0xe60] sm:$0xff] }
 0x234   : > { %v18673_v58 = vpop.f32.mrb[45].mxu1  ;;  %13969 = vmatprep.subr.bf16.mxu0 %v13968_v7  ;;  %v6148_v39 = vld [vmem:[#allocation2 + $0x1d8] sm:$0xff] }
 0x235   : > { %14151 = vmatpush3.bf16.msra.mxu1 %v14150_v55  ;;  %v11149_v55 = vld [vmem:[%s21901_s2 + $0xdf8] sm:$0xff] }
 0x236   : > { %14153 = vmatprep.subr.bf16.mxu1 %v14152_v9  ;;  %11104 = vmatmul.mubr.msk.f32.gmra.mrb[50].mxu0 %vm1385_vm2, %v18338_v19  ;;  %v11134_v19 = vld [vmem:[%s21901_s2 + $0xd80] sm:$0xff]  ;;  %v14168_v9 = vpack.c.bf16 %v11326_v62, %v11323_v16  ;;  %v13986_v42 = vpack.c.bf16 %v11149_v55, %v11146_v30  ;;  %v11177_v55 = vld [vmem:[%s21901_s2 + $0xed8] sm:$0xff] }
 0x237   : > { %v18695_v23 = vpop.f32.mrb[46].mxu1  ;;  %13971 = vmatpush1.bf16.msra.mxu0 %v13970_v5  ;;  %5877 = vmatprep.mubr.f32.mxu0 %v15384_v4  ;;  %v13978_v40 = vpack.c.bf16 %v11137_v20, %v11134_v19  ;;  %v11310_v4 = vld [vmem:[%s21901_s2 + $0x1300] sm:$0xff]  ;;  %v11152_v5 = vld [vmem:[%s21901_s2 + $0xe10] sm:$0xff]  ;;  %v6156_v19 = vld [vmem:[#allocation2 + $0x218] sm:$0xff] }
 0x238   : > { %v18703_v47 = vpop.f32.mrb[47].mxu1  ;;  %13973 = vmatprep.subr.bf16.mxu0 %v13972_v6  ;;  %v14164_v59 = vpack.c.bf16 %v11313_v13, %v11310_v4  ;;  %v11155_v6 = vld [vmem:[%s21901_s2 + $0xe28] sm:$0xff]  ;;  %v11329_v20 = vld [vmem:[%s21901_s2 + $0x698] sm:$0xff]  ;;  %v6153_v16 = vld [vmem:[#allocation2 + $0x200] sm:$0xff] }
 0x239   : > { %14155 = vmatpush3.bf16.msra.mxu1 %v14154_v25  ;;  %v6151_v25 = vld [vmem:[#allocation2 + $0x1f0] sm:$0xff]  ;;  %v13990_v11 = vpack.c.bf16 %v11155_v6, %v11152_v5  ;;  %v11171_v13 = vld [vmem:[%s21901_s2 + $0xea8] sm:$0xff] }
 0x23a   : > { %14157 = vmatprep.subr.bf16.mxu1 %v14156_v45  ;;  %11105 = vmatmul.mubr.msk.f32.gmra.mrb[52].mxu0 %vm1385_vm2, %v18360_v46  ;;  %v11140_v46 = vld [vmem:[%s21901_s2 + $0xdb0] sm:$0xff]  ;;  %v13992_v45 = vpack.c.bf16 %v11162_v60, %v11159_v57  ;;  %v7191_v57 = vld [vmem:[#allocation2 + $0x260] sm:$0xff] }
 0x23b   : > { %v18719_v31 = vpop.f32.mrb[48].mxu1  ;;  %13975 = vmatpush1.bf16.msra.mxu0 %v13974_v51  ;;  %6440 = vmatprep.mubr.f32.mxu0 %v15385_v35  ;;  %v13982_v17 = vpack.c.bf16 %v11143_v44, %v11140_v46  ;;  %v11322_v51 = vld [vmem:[%s21901_s2 + $0x660] sm:$0xff]  ;;  %v11164_v35 = vld [vmem:[%s21901_s2 + $0xe70] sm:$0xff] }
 0x23c   : > { %v18727_v3 = vpop.f32.mrb[49].mxu1  ;;  %13977 = vmatprep.subr.bf16.mxu0 %v13976_v27  ;;  %v11325_v27 = vld [vmem:[%s21901_s2 + $0x678] sm:$0xff]  ;;  %v11328_v44 = vld [vmem:[%s21901_s2 + $0x690] sm:$0xff] }
 0x23d   : > { %14159 = vmatpush3.bf16.msra.mxu1 %v14158_v26  ;;  %v11332_v26 = vld [vmem:[%s21901_s2 + $0x6b0] sm:$0xff]  ;;  %v14170_v4 = vpack.c.bf16 %v11325_v27, %v11322_v51  ;;  %v14174_v30 = vpack.c.bf16 %v11331_v21, %v11328_v44  ;;  %v11343_v27 = vld [vmem:[%s21901_s2 + $0x708] sm:$0xff]  ;;  %v11346_v21 = vld [vmem:[%s21901_s2 + $0x720] sm:$0xff] }
 0x23e   : > { %14161 = vmatprep.subr.bf16.mxu1 %v14160_v43  ;;  %v14172_v46 = vpack.c.bf16 %v11332_v26, %v11329_v20  ;;  %v11344_v5 = vld [vmem:[%s21901_s2 + $0x710] sm:$0xff]  ;;  %v11347_v20 = vld [vmem:[%s21901_s2 + $0x728] sm:$0xff]  ;;  %v11350_v26 = vld [vmem:[%s21901_s2 + $0x740] sm:$0xff] }
 0x23f   : > { %v18741_v0 = vpop.f32.mrb[50].mxu1  ;;  %13979 = vmatpush1.bf16.msra.mxu0 %v13978_v40  ;;  %v11167_v40 = vld [vmem:[%s21901_s2 + $0xe88] sm:$0xff]  ;;  %v11340_v51 = vld [vmem:[%s21901_s2 + $0x6f0] sm:$0xff]  ;;  %v14184_v44 = vpack.c.bf16 %v11350_v26, %v11347_v20  ;;  %v11365_v20 = vld [vmem:[%s21901_s2 + $0x7b8] sm:$0xff] }
 0x240   : > { %6793 = vmatmul.mubr.f32.vlgmr.msra.gmra.mrb[96].mxu1 %v6141_v32  ;;  %v18749_v7 = vpop.f32.mrb[51].mxu1  ;;  %13981 = vmatprep.subr.bf16.mxu0 %v13980_v34  ;;  %v11174_v34 = vld [vmem:[%s21901_s2 + $0xec0] sm:$0xff]  ;;  %v11368_v26 = vld [vmem:[%s21901_s2 + $0x7d0] sm:$0xff] }
 0x241   : > { %6797 = vmatprep.mubr.f32.mxu1 %v6147_v2  ;;  %14163 = vmatpush3.bf16.msra.mxu1 %v14160_v43  ;;  %v13996_v43 = vpack.c.bf16 %v11168_v61, %v11165_v12  ;;  %v11338_v32 = vld [vmem:[%s21901_s2 + $0x6e0] sm:$0xff]  ;;  %v14000_v62 = vpack.c.bf16 %v11174_v34, %v11171_v13  ;;  %v14182_v13 = vpack.c.bf16 %v11343_v27, %v11340_v51  ;;  %v11189_v34 = vld [vmem:[%s21901_s2 + $0xf38] sm:$0xff] }
 0x242   : > { %14165 = vmatprep.subr.bf16.mxu1 %v14164_v59  ;;  %v11170_v2 = vld [vmem:[%s21901_s2 + $0xea0] sm:$0xff] }
 0x243   : > { %13983 = vmatpush1.bf16.msra.mxu0 %v13982_v17  ;;  %v13998_v17 = vpack.c.bf16 %v11167_v40, %v11164_v35  ;;  %v11186_v12 = vld [vmem:[%s21901_s2 + $0xf20] sm:$0xff]  ;;  %v11185_v40 = vld [vmem:[%s21901_s2 + $0xf18] sm:$0xff] }
 0x244   : > { %6798 = vmatmul.mubr.f32.gmra.mrb[98].mxu1 %v6146_v14  ;;  %13985 = vmatprep.subr.bf16.mxu0 %v13984_v52  ;;  %v11173_v52 = vld [vmem:[%s21901_s2 + $0xeb8] sm:$0xff]  ;;  %v11182_v35 = vld [vmem:[%s21901_s2 + $0xf00] sm:$0xff] }
 0x245   : > { %6802 = vmatprep.mubr.f32.mxu1 %v6152_v1  ;;  %14167 = vmatpush3.bf16.msra.mxu1 %v14164_v59  ;;  %v11335_v59 = vld [vmem:[%s21901_s2 + $0x6c8] sm:$0xff]  ;;  %v11337_v14 = vld [vmem:[%s21901_s2 + $0x6d8] sm:$0xff]  ;;  %v14002_v6 = vpack.c.bf16 %v11173_v52, %v11170_v2  ;;  %v11188_v52 = vld [vmem:[%s21901_s2 + $0xf30] sm:$0xff] }
 0x246   : > { %14169 = vmatprep.subr.bf16.mxu1 %v14168_v9  ;;  %v14176_v53 = vpack.c.bf16 %v11338_v32, %v11335_v59  ;;  %v11334_v9 = vld [vmem:[%s21901_s2 + $0x6c0] sm:$0xff]  ;;  %v11353_v32 = vld [vmem:[%s21901_s2 + $0x758] sm:$0xff] }
 0x247   : > { %13987 = vmatpush1.bf16.msra.mxu0 %v13986_v42  ;;  %v6158_v42 = vld [vmem:[#allocation2 + $0x228] sm:$0xff]  ;;  %v14178_v24 = vpack.c.bf16 %v11337_v14, %v11334_v9  ;;  %v11198_v9 = vld [vmem:[%s21901_s2 + $0xf80] sm:$0xff] }
 0x248   : > { %6803 = vmatmul.mubr.f32.gmra.mrb[100].mxu1 %v6151_v25  ;;  %13989 = vmatprep.subr.bf16.mxu0 %v13988_v63  ;;  %v11341_v63 = vld [vmem:[%s21901_s2 + $0x6f8] sm:$0xff]  ;;  %v14004_v25 = vpack.c.bf16 %v11180_v54, %v11177_v55  ;;  %v11358_v27 = vld [vmem:[%s21901_s2 + $0x780] sm:$0xff] }
 0x249   : > { %6807 = vmatprep.mubr.f32.mxu1 %v6157_v28  ;;  %v11179_v28 = vld [vmem:[%s21901_s2 + $0xee8] sm:$0xff]  ;;  %v14180_v61 = vpack.c.bf16 %v11344_v5, %v11341_v63 }
 0x24a   : > { %v11359_v5 = vld [vmem:[%s21901_s2 + $0x788] sm:$0xff] }
 0x24b   : > { %13991 = vmatpush1.bf16.msra.mxu0 %v13990_v11  ;;  %v11176_v11 = vld [vmem:[%s21901_s2 + $0xed0] sm:$0xff] }
 0x24c   : > { %6808 = vmatmul.mubr.f32.gmra.mrb[102].mxu1 %v6156_v19  ;;  %13993 = vmatprep.subr.bf16.mxu0 %v13992_v45 }
 0x24d   : > { %13026 = vmatprep.mubr.msk.f32.mxu1 %vm1385_vm2, %v6143_v8 }
 0x24f   : > { %13995 = vmatpush1.bf16.msra.mxu0 %v13994_v38  ;;  %v14006_v38 = vpack.c.bf16 %v11179_v28, %v11176_v11  ;;  %v11194_v11 = vld [vmem:[%s21901_s2 + $0xf60] sm:$0xff]  ;;  %v11197_v28 = vld [vmem:[%s21901_s2 + $0xf78] sm:$0xff] }
 0x250   : > { %13027 = vmatmul.mubr.msk.f32.vlgmr.msra.gmra.mrb[68].mxu1 %vm1385_vm2, %v6148_v39  ;;  %13997 = vmatprep.subr.bf16.mxu0 %v13996_v43  ;;  %v14008_v43 = vpack.c.bf16 %v11186_v12, %v11183_v36  ;;  %v11349_v39 = vld [vmem:[%s21901_s2 + $0x738] sm:$0xff] }
 0x251   : > { %14171 = vmatpush1.bf16.msra.mxu1 %v14170_v4  ;;  %13029 = vmatprep.mubr.msk.f32.mxu1 %vm1385_vm2, %v6153_v16  ;;  %v14010_v16 = vpack.c.bf16 %v11185_v40, %v11182_v35  ;;  %v14186_v54 = vpack.c.bf16 %v11349_v39, %v11346_v21  ;;  %v11201_v12 = vld [vmem:[%s21901_s2 + $0xf98] sm:$0xff]  ;;  %v11203_v35 = vld [vmem:[%s21901_s2 + $0xfa8] sm:$0xff] }
 0x252   : > { %14173 = vmatprep.subr.bf16.mxu1 %v14172_v46  ;;  %v11192_v46 = vld [vmem:[%s21901_s2 + $0xf50] sm:$0xff]  ;;  %v11367_v21 = vld [vmem:[%s21901_s2 + $0x7c8] sm:$0xff] }
 0x253   : > { %v12030_v1 = vpop.f32.mrb[52].mxu1  ;;  %13999 = vmatpush1.bf16.msra.mxu0 %v13998_v17  ;;  %v11356_v17 = vld [vmem:[%s21901_s2 + $0x770] sm:$0xff]  ;;  %v14012_v2 = vpack.c.bf16 %v11192_v46, %v11189_v34  ;;  %v11210_v34 = vld [vmem:[%s21901_s2 + $0xfe0] sm:$0xff]  ;;  %v14196_v46 = vpack.c.bf16 %v11368_v26, %v11365_v20  ;;  %v11371_v39 = vld [vmem:[%s21901_s2 + $0x7e8] sm:$0xff] }
 0x254   : > { %13030 = vmatmul.mubr.msk.f32.gmra.mrb[70].mxu1 %vm1385_vm2, %v6158_v42  ;;  %v12031_v60 = vpop.f32.mrb[53].mxu1  ;;  %14001 = vmatprep.subr.bf16.mxu0 %v14000_v62  ;;  %v14188_v14 = vpack.c.bf16 %v11356_v17, %v11353_v32  ;;  %v11352_v42 = vld [vmem:[%s21901_s2 + $0x750] sm:$0xff] }
 0x255   : > { %14175 = vmatpush1.bf16.msra.mxu1 %v14174_v30  ;;  %7490 = vmatprep.mubr.f32.mxu1 %v7191_v57  ;;  %v18857_v45 = vadd.f32 %v12031_v60, %v12030_v1  ;;  %v11191_v30 = vld [vmem:[%s21901_s2 + $0xf48] sm:$0xff] }
 0x256   : > { %14177 = vmatprep.subr.bf16.mxu1 %v14176_v53  ;;  %v11195_v53 = vld [vmem:[%s21901_s2 + $0xf68] sm:$0xff]  ;;  %v14014_v57 = vpack.c.bf16 %v11191_v30, %v11188_v52  ;;  %v11213_v52 = vld [vmem:[%s21901_s2 + $0xff8] sm:$0xff]  ;;  %v11216_v30 = vld [vmem:[%s21901_s2 + $0x1010] sm:$0xff] }
 0x257   : > { %v12033_v19 = vpop.f32.mrb[54].mxu1  ;;  %14003 = vmatpush1.bf16.msra.mxu0 %v14002_v6  ;;  %v11355_v1 = vld [vmem:[%s21901_s2 + $0x768] sm:$0xff]  ;;  %v11362_v6 = vld [vmem:[%s21901_s2 + $0x7a0] sm:$0xff] }
 0x258   : > { %v12034_v8 = vpop.f32.mrb[55].mxu1  ;;  %14005 = vmatprep.subr.bf16.mxu0 %v14004_v25  ;;  %v14016_v25 = vpack.c.bf16 %v11198_v9, %v11195_v53  ;;  %v14190_v36 = vpack.c.bf16 %v11355_v1, %v11352_v42  ;;  %v14192_v51 = vpack.c.bf16 %v11362_v6, %v11359_v5  ;;  %v11370_v53 = vld [vmem:[%s21901_s2 + $0x7e0] sm:$0xff]  ;;  %v11373_v9 = vld [vmem:[%s21901_s2 + $0x7f8] sm:$0xff]  ;;  %v11380_v42 = vld [vmem:[%s21901_s2 + $0x830] sm:$0xff] }
 0x259   : > { %14179 = vmatpush1.bf16.msra.mxu1 %v14178_v24  ;;  %v18883_v4 = vadd.f32 %v12034_v8, %v12033_v19  ;;  %v11361_v19 = vld [vmem:[%s21901_s2 + $0x798] sm:$0xff]  ;;  %v11212_v5 = vld [vmem:[%s21901_s2 + $0xff0] sm:$0xff]  ;;  %v11215_v6 = vld [vmem:[%s21901_s2 + $0x1008] sm:$0xff] }
 0x25a   : > { %14181 = vmatprep.subr.bf16.mxu1 %v14180_v61  ;;  %v11204_v61 = vld [vmem:[%s21901_s2 + $0xfb0] sm:$0xff]  ;;  %v14194_v40 = vpack.c.bf16 %v11361_v19, %v11358_v27  ;;  %v14030_v20 = vpack.c.bf16 %v11215_v6, %v11212_v5 }
 0x25b   : > { %v12036_v59 = vpop.f32.mrb[56].mxu1  ;;  %14007 = vmatpush1.bf16.msra.mxu0 %v14006_v38  ;;  %v14018_v38 = vpack.c.bf16 %v11197_v28, %v11194_v11  ;;  %v14020_v8 = vpack.c.bf16 %v11204_v61, %v11201_v12  ;;  %v11376_v28 = vld [vmem:[%s21901_s2 + $0x810] sm:$0xff]  ;;  %v11383_v61 = vld [vmem:[%s21901_s2 + $0x848] sm:$0xff] }
 0x25c   : > { %v12037_v62 = vpop.f32.mrb[57].mxu1  ;;  %14009 = vmatprep.subr.bf16.mxu0 %v14008_v43  ;;  %v11200_v43 = vld [vmem:[%s21901_s2 + $0xf90] sm:$0xff] }
 0x25d   : > { %14183 = vmatpush1.bf16.msra.mxu1 %v14182_v13  ;;  %v18909_v55 = vadd.f32 %v12037_v62, %v12036_v59  ;;  %v11207_v13 = vld [vmem:[%s21901_s2 + $0xfc8] sm:$0xff]  ;;  %v11374_v59 = vld [vmem:[%s21901_s2 + $0x800] sm:$0xff]  ;;  %v14022_v32 = vpack.c.bf16 %v11203_v35, %v11200_v43  ;;  %v11209_v62 = vld [vmem:[%s21901_s2 + $0xfd8] sm:$0xff] }
 0x25e   : > { %14185 = vmatprep.subr.bf16.mxu1 %v14184_v44  ;;  %v11364_v44 = vld [vmem:[%s21901_s2 + $0x7b0] sm:$0xff]  ;;  %v14024_v17 = vpack.c.bf16 %v11210_v34, %v11207_v13  ;;  %v11382_v35 = vld [vmem:[%s21901_s2 + $0x840] sm:$0xff] }
 0x25f   : > { %v12039_v63 = vpop.f32.mrb[58].mxu1  ;;  %14011 = vmatpush1.bf16.msra.mxu0 %v14010_v16  ;;  %v11206_v16 = vld [vmem:[%s21901_s2 + $0xfc0] sm:$0xff] }
 0x260   : > { %v12040_v60 = vpop.f32.mrb[59].mxu1  ;;  %14013 = vmatprep.subr.bf16.mxu0 %v14012_v2  ;;  %v14198_v2 = vpack.c.bf16 %v11367_v21, %v11364_v44  ;;  %v14026_v1 = vpack.c.bf16 %v11209_v62, %v11206_v16  ;;  %v11392_v44 = vld [vmem:[%s21901_s2 + $0x890] sm:$0xff]  ;;  %v11227_v16 = vld [vmem:[%s21901_s2 + $0x1068] sm:$0xff] }
 0x261   : > { %14187 = vmatpush1.bf16.msra.mxu1 %v14186_v54  ;;  %v18935_v24 = vadd.f32 %v12040_v60, %v12039_v63  ;;  %v14200_v54 = vpack.c.bf16 %v11374_v59, %v11371_v39  ;;  %v14028_v63 = vpack.c.bf16 %v11216_v30, %v11213_v52  ;;  %v11219_v60 = vld [vmem:[%s21901_s2 + $0x1028] sm:$0xff]  ;;  %v11388_v30 = vld [vmem:[%s21901_s2 + $0x870] sm:$0xff] }
 0x262   : > { %14189 = vmatprep.subr.bf16.mxu1 %v14188_v14  ;;  %v11377_v14 = vld [vmem:[%s21901_s2 + $0x818] sm:$0xff] }
 0x263   : > { %14015 = vmatpush1.bf16.msra.mxu0 %v14014_v57  ;;  %v14202_v57 = vpack.c.bf16 %v11373_v9, %v11370_v53  ;;  %v14204_v11 = vpack.c.bf16 %v11380_v42, %v11377_v14  ;;  %v11395_v42 = vld [vmem:[%s21901_s2 + $0x8a8] sm:$0xff] }
 0x264   : > { %14017 = vmatprep.subr.bf16.mxu0 %v14016_v25  ;;  %v11222_v25 = vld [vmem:[%s21901_s2 + $0x1040] sm:$0xff] }
 0x265   : > { %14191 = vmatpush1.bf16.msra.mxu1 %v14190_v36  ;;  %v11379_v36 = vld [vmem:[%s21901_s2 + $0x828] sm:$0xff]  ;;  %v14032_v26 = vpack.c.bf16 %v11222_v25, %v11219_v60  ;;  %v11233_v60 = vld [vmem:[%s21901_s2 + $0x1098] sm:$0xff] }
 0x266   : > { %14193 = vmatprep.subr.bf16.mxu1 %v14192_v51  ;;  %v11386_v51 = vld [vmem:[%s21901_s2 + $0x860] sm:$0xff] }
 0x267   : > { %14019 = vmatpush1.bf16.msra.mxu0 %v14018_v38  ;;  %v11221_v38 = vld [vmem:[%s21901_s2 + $0x1038] sm:$0xff]  ;;  %v14208_v43 = vpack.c.bf16 %v11386_v51, %v11383_v61 }
 0x268   : > { %14021 = vmatprep.subr.bf16.mxu0 %v14020_v8  ;;  %v14206_v8 = vpack.c.bf16 %v11379_v36, %v11376_v28  ;;  %v11394_v36 = vld [vmem:[%s21901_s2 + $0x8a0] sm:$0xff] }
 0x269   : > { %14195 = vmatpush1.bf16.msra.mxu1 %v14194_v40  ;;  %v11385_v40 = vld [vmem:[%s21901_s2 + $0x858] sm:$0xff] }
 0x26a   : > { %14197 = vmatprep.subr.bf16.mxu1 %v14196_v46  ;;  %v11389_v46 = vld [vmem:[%s21901_s2 + $0x878] sm:$0xff] }
 0x26b   : > { %14023 = vmatpush1.bf16.msra.mxu0 %v14022_v32  ;;  %v14212_v52 = vpack.c.bf16 %v11392_v44, %v11389_v46 }
 0x26c   : > { %14025 = vmatprep.subr.bf16.mxu0 %v14024_v17  ;;  %v11224_v17 = vld [vmem:[%s21901_s2 + $0x1050] sm:$0xff] }
 0x26d   : > { %14199 = vmatpush1.bf16.msra.mxu1 %v14198_v2  ;;  %v11231_v2 = vld [vmem:[%s21901_s2 + $0x1088] sm:$0xff]  ;;  %v14038_v5 = vpack.c.bf16 %v11227_v16, %v11224_v17  ;;  %v11242_v16 = vld [vmem:[%s21901_s2 + $0x10e0] sm:$0xff] }
 0x26e   : > { %14201 = vmatprep.subr.bf16.mxu1 %v14200_v54  ;;  %6441 = vmatmul.mubr.f32.vlgmr.msra.gmra.mrb[46].mxu0 %v18535_v18  ;;  %v5238_v12 = vpop.f32.mrb[38].mxu0  ;;  %v11391_v54 = vld [vmem:[%s21901_s2 + $0x888] sm:$0xff] }
 0x26f   : > { %6446 = vmatprep.mubr.f32.mxu0 %v18545_v33  ;;  %14027 = vmatpush1.bf16.msra.mxu0 %v14026_v1  ;;  %v19030_v27 = vadd.f32 %v18665_v22, %v5238_v12  ;;  %v5240_v19 = vpop.f32.mrb[39].mxu0  ;;  %v11218_v33 = vld [vmem:[%s21901_s2 + $0x1020] sm:$0xff]  ;;  %v11225_v22 = vld [vmem:[%s21901_s2 + $0x1058] sm:$0xff] }
 0x270   : > { %14029 = vmatprep.subr.bf16.mxu0 %v14028_v63  ;;  %v19033_v18 = vadd.f32 %v18673_v58, %v5240_v19  ;;  %v11228_v58 = vld [vmem:[%s21901_s2 + $0x1070] sm:$0xff]  ;;  %v14034_v59 = vpack.c.bf16 %v11221_v38, %v11218_v33  ;;  %v11398_v1 = vld [vmem:[%s21901_s2 + $0x8c0] sm:$0xff]  ;;  %v11397_v12 = vld [vmem:[%s21901_s2 + $0x8b8] sm:$0xff] }
 0x271   : > { %14203 = vmatpush1.bf16.msra.mxu1 %v14202_v57  ;;  %v11230_v57 = vld [vmem:[%s21901_s2 + $0x1080] sm:$0xff]  ;;  %v14216_v28 = vpack.c.bf16 %v11398_v1, %v11395_v42  ;;  %v11416_v42 = vld [vmem:[%s21901_s2 + $0x950] sm:$0xff] }
 0x272   : > { %14205 = vmatprep.subr.bf16.mxu1 %v14204_v11  ;;  %6447 = vmatmul.mubr.f32.gmra.mrb[48].mxu0 %v18555_v56  ;;  %v5244_v13 = vpop.f32.mrb[40].mxu0  ;;  %v11237_v11 = vld [vmem:[%s21901_s2 + $0x10b8] sm:$0xff]  ;;  %v14042_v38 = vpack.c.bf16 %v11233_v60, %v11230_v57  ;;  %v11258_v57 = vld [vmem:[%s21901_s2 + $0x1160] sm:$0xff] }
 0x273   : > { %v12074_v34 = vpop.f32.mrb[60].mxu1  ;;  %6452 = vmatprep.mubr.f32.mxu0 %v18565_v50  ;;  %14031 = vmatpush1.bf16.msra.mxu0 %v14030_v20  ;;  %v19062_v21 = vadd.f32 %v18695_v23, %v5244_v13  ;;  %v5246_v39 = vpop.f32.mrb[41].mxu0  ;;  %v14036_v50 = vpack.c.bf16 %v11228_v58, %v11225_v22  ;;  %v14210_v23 = vpack.c.bf16 %v11385_v40, %v11382_v35  ;;  %v11401_v20 = vld [vmem:[%s21901_s2 + $0x8d8] sm:$0xff]  ;;  %v11239_v58 = vld [vmem:[%s21901_s2 + $0x10c8] sm:$0xff]  ;;  %v11400_v13 = vld [vmem:[%s21901_s2 + $0x8d0] sm:$0xff] }
 0x274   : > { %v12075_v32 = vpop.f32.mrb[61].mxu1  ;;  %14033 = vmatprep.subr.bf16.mxu0 %v14032_v26  ;;  %v19065_v56 = vadd.f32 %v18703_v47, %v5246_v39  ;;  %v11234_v47 = vld [vmem:[%s21901_s2 + $0x10a0] sm:$0xff]  ;;  %v11404_v26 = vld [vmem:[%s21901_s2 + $0x8f0] sm:$0xff]  ;;  %v11243_v35 = vld [vmem:[%s21901_s2 + $0x10e8] sm:$0xff] }
 0x275   : > { %14207 = vmatpush1.bf16.msra.mxu1 %v14206_v8  ;;  %v12076_v62 = vadd.f32 %v12075_v32, %v12074_v34  ;;  %v14220_v40 = vpack.c.bf16 %v11404_v26, %v11401_v20  ;;  %v11403_v34 = vld [vmem:[%s21901_s2 + $0x8e8] sm:$0xff]  ;;  %v11261_v20 = vld [vmem:[%s21901_s2 + $0x1178] sm:$0xff]  ;;  %v11264_v26 = vld [vmem:[%s21901_s2 + $0x1190] sm:$0xff] }
 0x276   : > { %14209 = vmatprep.subr.bf16.mxu1 %v14208_v43  ;;  %6453 = vmatmul.mubr.f32.gmra.mrb[50].mxu0 %v18575_v10  ;;  %v5250_v53 = vpop.f32.mrb[42].mxu0  ;;  %v11407_v39 = vld [vmem:[%s21901_s2 + $0x908] sm:$0xff] }
 0x277   : > { %v19087_v9 = vadd.f32 %v12076_v62, %v18857_v45  ;;  %v12077_v14 = vpop.f32.mrb[62].mxu1  ;;  %6458 = vmatprep.mubr.f32.mxu0 %v18585_v48  ;;  %14035 = vmatpush1.bf16.msra.mxu0 %v14034_v59  ;;  %v19097_v63 = vadd.f32 %v18719_v31, %v5250_v53  ;;  %v5252_v10 = vpop.f32.mrb[43].mxu0  ;;  %v14040_v48 = vpack.c.bf16 %v11234_v47, %v11231_v2  ;;  %v11410_v59 = vld [vmem:[%s21901_s2 + $0x920] sm:$0xff]  ;;  %v11249_v2 = vld [vmem:[%s21901_s2 + $0x1118] sm:$0xff]  ;;  %v11252_v47 = vld [vmem:[%s21901_s2 + $0x1130] sm:$0xff] }
 0x278   : > { %v12078_v6 = vpop.f32.mrb[63].mxu1  ;;  %14037 = vmatprep.subr.bf16.mxu0 %v14036_v50  ;;  %v19100_v45 = vadd.f32 %v18727_v3, %v5252_v10  ;;  %v14214_v31 = vpack.c.bf16 %v11391_v54, %v11388_v30  ;;  %v11240_v3 = vld [vmem:[%s21901_s2 + $0x10d0] sm:$0xff]  ;;  %v11406_v30 = vld [vmem:[%s21901_s2 + $0x900] sm:$0xff]  ;;  %v11409_v54 = vld [vmem:[%s21901_s2 + $0x918] sm:$0xff]  ;;  %v14052_v10 = vpack.c.bf16 %v11252_v47, %v11249_v2 }
 0x279   : > { %14211 = vmatpush1.bf16.msra.mxu1 %v14210_v23  ;;  %v12079_v25 = vadd.f32 %v12078_v6, %v12077_v14  ;;  %v14044_v22 = vpack.c.bf16 %v11240_v3, %v11237_v11  ;;  %v14222_v23 = vpack.c.bf16 %v11403_v34, %v11400_v13  ;;  %v11413_v14 = vld [vmem:[%s21901_s2 + $0x938] sm:$0xff]  ;;  %v14226_v6 = vpack.c.bf16 %v11409_v54, %v11406_v30  ;;  %v11419_v11 = vld [vmem:[%s21901_s2 + $0x968] sm:$0xff]  ;;  %v11422_v3 = vld [vmem:[%s21901_s2 + $0x980] sm:$0xff] }
 0x27a   : > { %14213 = vmatprep.subr.bf16.mxu1 %v14212_v52  ;;  %6459 = vmatmul.mubr.f32.gmra.mrb[52].mxu0 %v18607_v41  ;;  %v5256_v61 = vpop.f32.mrb[44].mxu0  ;;  %v14224_v52 = vpack.c.bf16 %v11410_v59, %v11407_v39  ;;  %v14228_v60 = vpack.c.bf16 %v11416_v42, %v11413_v14  ;;  %v11270_v13 = vld [vmem:[%s21901_s2 + $0x11c0] sm:$0xff]  ;;  %v11427_v39 = vld [vmem:[%s21901_s2 + $0x9a8] sm:$0xff]  ;;  %v7190_v59 = vld [vmem:[#allocation2 + $0x258] sm:$0xff] }
 0x27b   : > { %v19122_v51 = vadd.f32 %v12079_v25, %v18883_v4  ;;  %v12080_v19 = vpop.f32.mrb[64].mxu1  ;;  %14039 = vmatpush1.bf16.msra.mxu0 %v14038_v5  ;;  %6529 = vmatprep.mubr.f32.mxu0 %v18616_v37  ;;  %v19132_v33 = vadd.f32 %v18741_v0, %v5256_v61  ;;  %v5258_v41 = vpop.f32.mrb[45].mxu0  ;;  %v11236_v37 = vld [vmem:[%s21901_s2 + $0x10b0] sm:$0xff]  ;;  %v14218_v0 = vpack.c.bf16 %v11397_v12, %v11394_v36  ;;  %v11254_v12 = vld [vmem:[%s21901_s2 + $0x1140] sm:$0xff]  ;;  %v11257_v61 = vld [vmem:[%s21901_s2 + $0x1158] sm:$0xff] }
 0x27c   : > { %v12081_v8 = vpop.f32.mrb[65].mxu1  ;;  %14041 = vmatprep.subr.bf16.mxu0 %v14040_v48  ;;  %v19135_v4 = vadd.f32 %v18749_v7, %v5258_v41  ;;  %v11246_v7 = vld [vmem:[%s21901_s2 + $0x1100] sm:$0xff]  ;;  %v14046_v32 = vpack.c.bf16 %v11239_v58, %v11236_v37  ;;  %v11248_v5 = vld [vmem:[%s21901_s2 + $0x1110] sm:$0xff]  ;;  %v11255_v48 = vld [vmem:[%s21901_s2 + $0x1148] sm:$0xff]  ;;  %v14232_v41 = vpack.c.bf16 %v11422_v3, %v11419_v11  ;;  %v14058_v58 = vpack.c.bf16 %v11257_v61, %v11254_v12 }
 0x27d   : > { %14215 = vmatpush1.bf16.msra.mxu1 %v14214_v31  ;;  %v12082_v43 = vadd.f32 %v12081_v8, %v12080_v19  ;;  %v14048_v17 = vpack.c.bf16 %v11246_v7, %v11243_v35  ;;  %v11412_v25 = vld [vmem:[%s21901_s2 + $0x930] sm:$0xff]  ;;  %v11415_v31 = vld [vmem:[%s21901_s2 + $0x948] sm:$0xff]  ;;  %v14056_v36 = vpack.c.bf16 %v11258_v57, %v11255_v48  ;;  %v11421_v8 = vld [vmem:[%s21901_s2 + $0x978] sm:$0xff] }
 0x27e   : > { %14217 = vmatprep.subr.bf16.mxu1 %v14216_v28  ;;  %v14230_v19 = vpack.c.bf16 %v11415_v31, %v11412_v25  ;;  %v11428_v37 = vld [vmem:[%s21901_s2 + $0x9b0] sm:$0xff]  ;;  %v11263_v35 = vld [vmem:[%s21901_s2 + $0x1188] sm:$0xff]  ;;  %v11273_v47 = vld [vmem:[%s21901_s2 + $0x11d8] sm:$0xff] }
 0x27f   : > { %v19156_v46 = vadd.f32 %v12082_v43, %v18909_v55  ;;  %v12083_v44 = vpop.f32.mrb[66].mxu1  ;;  %14043 = vmatpush1.bf16.msra.mxu0 %v14042_v38  ;;  %v11245_v55 = vld [vmem:[%s21901_s2 + $0x10f8] sm:$0xff]  ;;  %v11418_v38 = vld [vmem:[%s21901_s2 + $0x960] sm:$0xff]  ;;  %v14060_v43 = vpack.c.bf16 %v11264_v26, %v11261_v20  ;;  %v11272_v48 = vld [vmem:[%s21901_s2 + $0x11d0] sm:$0xff] }
 0x280   : > { %v12084_v50 = vpop.f32.mrb[67].mxu1  ;;  %14045 = vmatprep.subr.bf16.mxu0 %v14044_v22  ;;  %v14050_v1 = vpack.c.bf16 %v11245_v55, %v11242_v16  ;;  %v11425_v22 = vld [vmem:[%s21901_s2 + $0x998] sm:$0xff]  ;;  %v14234_v7 = vpack.c.bf16 %v11421_v8, %v11418_v38  ;;  %v7196_v16 = vld [vmem:[#allocation2 + $0x288] sm:$0xff]  ;;  %v11430_v54 = vld [vmem:[%s21901_s2 + $0x9c0] sm:$0xff] }
 0x281   : > { %14219 = vmatpush1.bf16.msra.mxu1 %v14218_v0  ;;  %v12085_v62 = vadd.f32 %v12084_v50, %v12083_v44  ;;  %v11260_v0 = vld [vmem:[%s21901_s2 + $0x1170] sm:$0xff]  ;;  %v14236_v34 = vpack.c.bf16 %v11428_v37, %v11425_v22  ;;  %v11434_v50 = vld [vmem:[%s21901_s2 + $0x9e0] sm:$0xff]  ;;  %v11433_v14 = vld [vmem:[%s21901_s2 + $0x9d8] sm:$0xff] }
 0x282   : > { %14221 = vmatprep.subr.bf16.mxu1 %v14220_v40  ;;  %v11267_v40 = vld [vmem:[%s21901_s2 + $0x11a8] sm:$0xff]  ;;  %v11424_v44 = vld [vmem:[%s21901_s2 + $0x990] sm:$0xff]  ;;  %v7195_v42 = vld [vmem:[#allocation2 + $0x280] sm:$0xff] }
 0x283   : > { %v19183_v53 = vadd.f32 %v12085_v62, %v18935_v24  ;;  %14047 = vmatpush1.bf16.msra.mxu0 %v14046_v32  ;;  %v11251_v24 = vld [vmem:[%s21901_s2 + $0x1128] sm:$0xff]  ;;  %v14064_v55 = vpack.c.bf16 %v11270_v13, %v11267_v40  ;;  %v11266_v62 = vld [vmem:[%s21901_s2 + $0x11a0] sm:$0xff]  ;;  %v14238_v2 = vpack.c.bf16 %v11427_v39, %v11424_v44  ;;  %v11436_v3 = vld [vmem:[%s21901_s2 + $0x9f0] sm:$0xff] }
 0x284   : > { %14049 = vmatprep.subr.bf16.mxu0 %v14048_v17  ;;  %v14054_v28 = vpack.c.bf16 %v11251_v24, %v11248_v5  ;;  %v11431_v32 = vld [vmem:[%s21901_s2 + $0x9c8] sm:$0xff]  ;;  %v14062_v17 = vpack.c.bf16 %v11263_v35, %v11260_v0  ;;  %v7201_v24 = vld [vmem:[#allocation2 + $0x2b0] sm:$0xff]  ;;  %v11282_v31 = vld [vmem:[%s21901_s2 + $0x1220] sm:$0xff] }
 0x285   : > { %14223 = vmatpush1.bf16.msra.mxu1 %v14222_v23  ;;  %v11269_v23 = vld [vmem:[%s21901_s2 + $0x11b8] sm:$0xff]  ;;  %v14240_v30 = vpack.c.bf16 %v11434_v50, %v11431_v32  ;;  %v11275_v57 = vld [vmem:[%s21901_s2 + $0x11e8] sm:$0xff]  ;;  %v11446_v61 = vld [vmem:[%s21901_s2 + $0xa40] sm:$0xff] }
 0x286   : > { %14225 = vmatprep.subr.bf16.mxu1 %v14224_v52  ;;  %v11276_v52 = vld [vmem:[%s21901_s2 + $0x11f0] sm:$0xff]  ;;  %v14066_v5 = vpack.c.bf16 %v11269_v23, %v11266_v62  ;;  %v11279_v25 = vld [vmem:[%s21901_s2 + $0x1208] sm:$0xff]  ;;  %v7206_v20 = vld [vmem:[#allocation2 + $0x2d8] sm:$0xff] }
 0x287   : > { %14051 = vmatpush1.bf16.msra.mxu0 %v14050_v1  ;;  %v11437_v1 = vld [vmem:[%s21901_s2 + $0x9f8] sm:$0xff]  ;;  %v11443_v12 = vld [vmem:[%s21901_s2 + $0xa28] sm:$0xff]  ;;  %v14072_v26 = vpack.c.bf16 %v11282_v31, %v11279_v25  ;;  %v11288_v37 = vld [vmem:[%s21901_s2 + $0x1250] sm:$0xff] }
 0x288   : > { %14053 = vmatprep.subr.bf16.mxu0 %v14052_v10  ;;  %v11440_v10 = vld [vmem:[%s21901_s2 + $0xa10] sm:$0xff]  ;;  %v11281_v38 = vld [vmem:[%s21901_s2 + $0x1218] sm:$0xff]  ;;  %v11291_v50 = vld [vmem:[%s21901_s2 + $0x1268] sm:$0xff] }
 0x289   : > { %14227 = vmatpush1.bf16.msra.mxu1 %v14226_v6  ;;  %v14068_v6 = vpack.c.bf16 %v11276_v52, %v11273_v47  ;;  %v14244_v11 = vpack.c.bf16 %v11440_v10, %v11437_v1  ;;  %v11285_v22 = vld [vmem:[%s21901_s2 + $0x1238] sm:$0xff]  ;;  %v7205_v35 = vld [vmem:[#allocation2 + $0x2d0] sm:$0xff]  ;;  %v11451_v62 = vld [vmem:[%s21901_s2 + $0xa68] sm:$0xff] }
 0x28a   : > { %14229 = vmatprep.subr.bf16.mxu1 %v14228_v60  ;;  %v14242_v60 = vpack.c.bf16 %v11433_v14, %v11430_v54  ;;  %v11445_v0 = vld [vmem:[%s21901_s2 + $0xa38] sm:$0xff]  ;;  %v11452_v40 = vld [vmem:[%s21901_s2 + $0xa70] sm:$0xff]  ;;  %v14076_v44 = vpack.c.bf16 %v11288_v37, %v11285_v22  ;;  %v11455_v23 = vld [vmem:[%s21901_s2 + $0xa88] sm:$0xff] }
 0x28b   : > { %14055 = vmatpush1.bf16.msra.mxu0 %v14054_v28  ;;  %v11439_v28 = vld [vmem:[%s21901_s2 + $0xa08] sm:$0xff]  ;;  %v11284_v39 = vld [vmem:[%s21901_s2 + $0x1230] sm:$0xff]  ;;  %v11293_v54 = vld [vmem:[%s21901_s2 + $0x1278] sm:$0xff] }
 0x28c   : > { %14057 = vmatprep.subr.bf16.mxu0 %v14056_v36  ;;  %v7200_v36 = vld [vmem:[#allocation2 + $0x2a8] sm:$0xff]  ;;  %v14246_v8 = vpack.c.bf16 %v11439_v28, %v11436_v3  ;;  %v11300_v1 = vld [vmem:[%s21901_s2 + $0x12b0] sm:$0xff]  ;;  %v11470_v22 = vld [vmem:[%s21901_s2 + $0xb00] sm:$0xff] }
 0x28d   : > { %14231 = vmatpush1.bf16.msra.mxu1 %v14230_v19  ;;  %v14070_v19 = vpack.c.bf16 %v11275_v57, %v11272_v48  ;;  %v11461_v48 = vld [vmem:[%s21901_s2 + $0xab8] sm:$0xff]  ;;  %v11464_v57 = vld [vmem:[%s21901_s2 + $0xad0] sm:$0xff]  ;;  %v11299_v3 = vld [vmem:[%s21901_s2 + $0x12a8] sm:$0xff] }
 0x28e   : > { %14233 = vmatprep.subr.bf16.mxu1 %v14232_v41  ;;  %v11278_v41 = vld [vmem:[%s21901_s2 + $0x1200] sm:$0xff] }
 0x28f   : > { %14059 = vmatpush1.bf16.msra.mxu0 %v14058_v58  ;;  %v14248_v58 = vpack.c.bf16 %v11446_v61, %v11443_v12  ;;  %v14074_v13 = vpack.c.bf16 %v11281_v38, %v11278_v41  ;;  %v11303_v12 = vld [vmem:[%s21901_s2 + $0x12c8] sm:$0xff]  ;;  %v11306_v61 = vld [vmem:[%s21901_s2 + $0x12e0] sm:$0xff] }
 0x290   : > { %7491 = vmatmul.mubr.f32.vlgmr.msra.gmra.mrb[104].mxu1 %v7190_v59  ;;  %14061 = vmatprep.subr.bf16.mxu0 %v14060_v43  ;;  %v11442_v43 = vld [vmem:[%s21901_s2 + $0xa20] sm:$0xff]  ;;  %v11287_v59 = vld [vmem:[%s21901_s2 + $0x1248] sm:$0xff] }
 0x291   : > { %7496 = vmatprep.mubr.f32.mxu1 %v7196_v16  ;;  %14235 = vmatpush1.bf16.msra.mxu1 %v14234_v7  ;;  %v11449_v7 = vld [vmem:[%s21901_s2 + $0xa58] sm:$0xff]  ;;  %v14250_v32 = vpack.c.bf16 %v11445_v0, %v11442_v43  ;;  %v14078_v47 = vpack.c.bf16 %v11287_v59, %v11284_v39  ;;  %v14088_v43 = vpack.c.bf16 %v11306_v61, %v11303_v12  ;;  %v11302_v0 = vld [vmem:[%s21901_s2 + $0x12c0] sm:$0xff]  ;;  %v15388_v12 = vld [vmem:[#allocation2 + $0x1c8] sm:$0xff] }
 0x292   : > { %14237 = vmatprep.subr.bf16.mxu1 %v14236_v34  ;;  %v19335_v34 = vld [vmem:[#allocation2 + $0x270] sm:$0xff]  ;;  %v14252_v16 = vpack.c.bf16 %v11452_v40, %v11449_v7  ;;  %v11309_v40 = vld [vmem:[%s21901_s2 + $0x12f8] sm:$0xff]  ;;  %v11466_v39 = vld [vmem:[%s21901_s2 + $0xae0] sm:$0xff] }
 0x293   : > { %14063 = vmatpush1.bf16.msra.mxu0 %v14062_v17  ;;  %v11294_v17 = vld [vmem:[%s21901_s2 + $0x1280] sm:$0xff]  ;;  %v11469_v59 = vld [vmem:[%s21901_s2 + $0xaf8] sm:$0xff] }
 0x294   : > { %7497 = vmatmul.mubr.f32.gmra.mrb[106].mxu1 %v7195_v42  ;;  %14065 = vmatprep.subr.bf16.mxu0 %v14064_v55  ;;  %v11448_v55 = vld [vmem:[%s21901_s2 + $0xa50] sm:$0xff]  ;;  %v14080_v52 = vpack.c.bf16 %v11294_v17, %v11291_v50  ;;  %v11297_v42 = vld [vmem:[%s21901_s2 + $0x1298] sm:$0xff] }
 0x295   : > { %7502 = vmatprep.mubr.f32.mxu1 %v7201_v24  ;;  %14239 = vmatpush1.bf16.msra.mxu1 %v14238_v2  ;;  %v11458_v2 = vld [vmem:[%s21901_s2 + $0xaa0] sm:$0xff]  ;;  %v14254_v14 = vpack.c.bf16 %v11451_v62, %v11448_v55  ;;  %v11457_v24 = vld [vmem:[%s21901_s2 + $0xa98] sm:$0xff]  ;;  %v14084_v31 = vpack.c.bf16 %v11300_v1, %v11297_v42  ;;  %v11472_v42 = vld [vmem:[%s21901_s2 + $0xb10] sm:$0xff] }
 0x296   : > { %14241 = vmatprep.subr.bf16.mxu1 %v14240_v30  ;;  %v11290_v30 = vld [vmem:[%s21901_s2 + $0x1260] sm:$0xff]  ;;  %v14256_v10 = vpack.c.bf16 %v11458_v2, %v11455_v23  ;;  %v11473_v17 = vld [vmem:[%s21901_s2 + $0xb18] sm:$0xff]  ;;  %v11308_v2 = vld [vmem:[%s21901_s2 + $0x12f0] sm:$0xff] }
 0x297   : > { %14067 = vmatpush1.bf16.msra.mxu0 %v14066_v5  ;;  %v11454_v5 = vld [vmem:[%s21901_s2 + $0xa80] sm:$0xff]  ;;  %v11475_v1 = vld [vmem:[%s21901_s2 + $0xb28] sm:$0xff] }
 0x298   : > { %7503 = vmatmul.mubr.f32.gmra.mrb[108].mxu1 %v7200_v36  ;;  %14069 = vmatprep.subr.bf16.mxu0 %v14068_v6  ;;  %v14258_v36 = vpack.c.bf16 %v11457_v24, %v11454_v5 }
 0x299   : > { %7508 = vmatprep.mubr.f32.mxu1 %v7206_v20  ;;  %14243 = vmatpush1.bf16.msra.mxu1 %v14242_v60  ;;  %v14082_v60 = vpack.c.bf16 %v11293_v54, %v11290_v30  ;;  %v11460_v20 = vld [vmem:[%s21901_s2 + $0xab0] sm:$0xff]  ;;  %v11471_v54 = vld [vmem:[%s21901_s2 + $0xb08] sm:$0xff] }
 0x29a   : > { %14245 = vmatprep.subr.bf16.mxu1 %v14244_v11  ;;  %v11296_v11 = vld [vmem:[%s21901_s2 + $0x1290] sm:$0xff] }
 0x29b   : > { %14071 = vmatpush1.bf16.msra.mxu0 %v14070_v19  ;;  %v14260_v19 = vpack.c.bf16 %v11464_v57, %v11461_v48  ;;  %v14086_v37 = vpack.c.bf16 %v11299_v3, %v11296_v11  ;;  %v11468_v30 = vld [vmem:[%s21901_s2 + $0xaf0] sm:$0xff]  ;;  %v11479_v48 = vld [vmem:[%s21901_s2 + $0xb48] sm:$0xff]  ;;  %v11482_v57 = vld [vmem:[%s21901_s2 + $0xb60] sm:$0xff] }
 0x29c   : > { %7509 = vmatmul.mubr.f32.gmra.mrb[110].mxu1 %v7205_v35  ;;  %14073 = vmatprep.subr.bf16.mxu0 %v14072_v26  ;;  %v11463_v26 = vld [vmem:[%s21901_s2 + $0xac8] sm:$0xff]  ;;  %v14272_v3 = vpack.c.bf16 %v11482_v57, %v11479_v48  ;;  %v11432_v57 = vld [vmem:[%s21901_s2 + $0x9d0] sm:$0xff] }
 0x29d   : > { %14247 = vmatpush1.bf16.msra.mxu1 %v14246_v8  ;;  %7579 = vmatprep.mubr.f32.mxu1 %v19335_v34  ;;  %v11467_v8 = vld [vmem:[%s21901_s2 + $0xae8] sm:$0xff]  ;;  %v14262_v7 = vpack.c.bf16 %v11463_v26, %v11460_v20  ;;  %v11485_v20 = vld [vmem:[%s21901_s2 + $0xb78] sm:$0xff]  ;;  %v11488_v26 = vld [vmem:[%s21901_s2 + $0xb90] sm:$0xff] }
 0x29e   : > { %14249 = vmatprep.subr.bf16.mxu1 %v14248_v58 }
 0x29f   : > { %14075 = vmatpush1.bf16.msra.mxu0 %v14074_v13  ;;  %v11312_v13 = vld [vmem:[%s21901_s2 + $0x1310] sm:$0xff] }
 0x2a0   : > { %14077 = vmatprep.subr.bf16.mxu0 %v14076_v44  ;;  %v14264_v44 = vpack.c.bf16 %v11470_v22, %v11467_v8  ;;  %v14092_v23 = vpack.c.bf16 %v11312_v13, %v11309_v40  ;;  %v14276_v8 = vpack.c.bf16 %v11488_v26, %v11485_v20  ;;  %v11487_v22 = vld [vmem:[%s21901_s2 + $0xb88] sm:$0xff]  ;;  %v11474_v40 = vld [vmem:[%s21901_s2 + $0xb20] sm:$0xff]  ;;  %v11477_v13 = vld [vmem:[%s21901_s2 + $0xb38] sm:$0xff] }
 0x2a1   : > { %14251 = vmatpush1.bf16.msra.mxu1 %v14250_v32  ;;  %v11512_v20 = vld [vmem:[%s21901_s2 + $0xc50] sm:$0xff] }
 0x2a2   : > { %14253 = vmatprep.subr.bf16.mxu1 %v14252_v16  ;;  %v11476_v16 = vld [vmem:[%s21901_s2 + $0xb30] sm:$0xff] }
 0x2a3   : > { %v12126_v6 = vpop.f32.mrb[72].mxu1  ;;  %14079 = vmatpush1.bf16.msra.mxu0 %v14078_v47 }
 0x2a4   : > { %v12127_v25 = vpop.f32.mrb[73].mxu1  ;;  %14081 = vmatprep.subr.bf16.mxu0 %v14080_v52  ;;  %v14266_v52 = vpack.c.bf16 %v11469_v59, %v11466_v39  ;;  %v11490_v39 = vld [vmem:[%s21901_s2 + $0xba0] sm:$0xff]  ;;  %v11493_v59 = vld [vmem:[%s21901_s2 + $0xbb8] sm:$0xff] }
 0x2a5   : > { %14255 = vmatpush1.bf16.msra.mxu1 %v14254_v14  ;;  %v12128_v28 = vadd.f32 %v12127_v25, %v12126_v6  ;;  %v14268_v14 = vpack.c.bf16 %v11476_v16, %v11473_v17  ;;  %v15387_v6 = vld [vmem:[#allocation2 + $0x1d0] sm:$0xff]  ;;  %v11497_v17 = vld [vmem:[%s21901_s2 + $0xbd8] sm:$0xff] }
 0x2a6   : > { %14257 = vmatprep.subr.bf16.mxu1 %v14256_v10  ;;  %v15386_v10 = vld [vmem:[#allocation2 + $0x1a0] sm:$0xff]  ;;  %v11500_v16 = vld [vmem:[%s21901_s2 + $0xbf0] sm:$0xff] }
 0x2a7   : > { %v19405_v41 = vadd.f32 %v12128_v28, %v19087_v9  ;;  %v12129_v38 = vpop.f32.mrb[74].mxu1  ;;  %14083 = vmatpush1.bf16.msra.mxu0 %v14082_v60  ;;  %v11305_v9 = vld [vmem:[%s21901_s2 + $0x12d8] sm:$0xff]  ;;  %v11478_v28 = vld [vmem:[%s21901_s2 + $0xb40] sm:$0xff] }
 0x2a8   : > { %v12130_v58 = vpop.f32.mrb[75].mxu1  ;;  %14085 = vmatprep.subr.bf16.mxu0 %v14084_v31  ;;  %v14090_v55 = vpack.c.bf16 %v11305_v9, %v11302_v0  ;;  %v14336_v31 = vpack.c.bf16 %v11471_v54, %v11468_v30  ;;  %v11494_v0 = vld [vmem:[%s21901_s2 + $0xbc0] sm:$0xff]  ;;  %v11420_v9 = vld [vmem:[%s21901_s2 + $0x970] sm:$0xff]  ;;  %v11483_v30 = vld [vmem:[%s21901_s2 + $0xb68] sm:$0xff]  ;;  %v14284_v54 = vpack.c.bf16 %v11500_v16, %v11497_v17 }
 0x2a9   : > { %14259 = vmatpush1.bf16.msra.mxu1 %v14258_v36  ;;  %v12131_v35 = vadd.f32 %v12130_v58, %v12129_v38  ;;  %v11481_v36 = vld [vmem:[%s21901_s2 + $0xb58] sm:$0xff]  ;;  %v15391_v58 = vld [vmem:[#allocation2 + $0x220] sm:$0xff] }
 0x2aa   : > { %14261 = vmatprep.subr.bf16.mxu1 %v14260_v19  ;;  %v15389_v19 = vld [vmem:[#allocation2 + $0x1f8] sm:$0xff]  ;;  %v14274_v38 = vpack.c.bf16 %v11481_v36, %v11478_v28 }
 0x2ab   : > { %v19432_v32 = vadd.f32 %v12131_v35, %v19122_v51  ;;  %v12132_v50 = vpop.f32.mrb[76].mxu1  ;;  %14087 = vmatpush1.bf16.msra.mxu0 %v14086_v37  ;;  %v11311_v51 = vld [vmem:[%s21901_s2 + $0x1308] sm:$0xff]  ;;  %v15390_v37 = vld [vmem:[#allocation2 + $0x1f0] sm:$0xff]  ;;  %v11505_v28 = vld [vmem:[%s21901_s2 + $0xc18] sm:$0xff] }
 0x2ac   : > { %v12133_v62 = vpop.f32.mrb[77].mxu1  ;;  %14089 = vmatprep.subr.bf16.mxu0 %v14088_v43  ;;  %v14094_v60 = vpack.c.bf16 %v11311_v51, %v11308_v2  ;;  %v11491_v43 = vld [vmem:[%s21901_s2 + $0xba8] sm:$0xff]  ;;  %v11426_v2 = vld [vmem:[%s21901_s2 + $0x9a0] sm:$0xff]  ;;  %v11429_v51 = vld [vmem:[%s21901_s2 + $0x9b8] sm:$0xff] }
 0x2ad   : > { %14263 = vmatpush1.bf16.msra.mxu1 %v14262_v7  ;;  %v12134_v47 = vadd.f32 %v12133_v62, %v12132_v50  ;;  %v11423_v35 = vld [vmem:[%s21901_s2 + $0x988] sm:$0xff]  ;;  %v15392_v50 = vld [vmem:[#allocation2 + $0x218] sm:$0xff] }
 0x2ae   : > { %14265 = vmatprep.subr.bf16.mxu1 %v14264_v44  ;;  %6530 = vmatmul.mubr.f32.vlgmr.msra.gmra.mrb[46].mxu0 %v15386_v10  ;;  %v14280_v44 = vpack.c.bf16 %v11494_v0, %v11491_v43  ;;  %v14338_v62 = vpack.c.bf16 %v11423_v35, %v11420_v9  ;;  %v11503_v10 = vld [vmem:[%s21901_s2 + $0xc08] sm:$0xff]  ;;  %v15395_v36 = vld [vmem:[#allocation2 + $0x1d8] sm:$0xff]  ;;  %v11492_v43 = vld [vmem:[%s21901_s2 + $0xbb0] sm:$0xff] }
 0x2af   : > { %v19459_v5 = vadd.f32 %v12134_v47, %v19156_v46  ;;  %v12135_v24 = vpop.f32.mrb[78].mxu1  ;;  %6535 = vmatprep.mubr.f32.mxu0 %v15387_v6  ;;  %14091 = vmatpush1.bf16.msra.mxu0 %v14090_v55  ;;  %v14270_v46 = vpack.c.bf16 %v11475_v1, %v11472_v42  ;;  %v19518_v55 = vld [vmem:[#allocation2 + $0xa0] sm:$0xff]  ;;  %v14282_v47 = vpack.c.bf16 %v11493_v59, %v11490_v39  ;;  %v11499_v42 = vld [vmem:[%s21901_s2 + $0xbe8] sm:$0xff]  ;;  %v15394_v1 = vld [vmem:[#allocation2 + $0x1b0] sm:$0xff] }
 0x2b0   : > { %v12136_v25 = vpop.f32.mrb[79].mxu1  ;;  %14093 = vmatprep.subr.bf16.mxu0 %v14092_v23  ;;  %v14340_v23 = vpack.c.bf16 %v11477_v13, %v11474_v40  ;;  %v14342_v6 = vpack.c.bf16 %v11429_v51, %v11426_v2  ;;  %v11495_v0 = vld [vmem:[%s21901_s2 + $0xbc8] sm:$0xff]  ;;  %v11508_v35 = vld [vmem:[%s21901_s2 + $0xc30] sm:$0xff]  ;;  %v15396_v40 = vld [vmem:[#allocation2 + $0x200] sm:$0xff] }
 0x2b1   : > { %14267 = vmatpush1.bf16.msra.mxu1 %v14266_v52  ;;  %v12137_v11 = vadd.f32 %v12136_v25, %v12135_v24  ;;  %v11480_v52 = vld [vmem:[%s21901_s2 + $0xb50] sm:$0xff]  ;;  %v11506_v24 = vld [vmem:[%s21901_s2 + $0xc20] sm:$0xff]  ;;  %v11515_v39 = vld [vmem:[%s21901_s2 + $0xc68] sm:$0xff]  ;;  %v14352_v16 = vpack.c.bf16 %v11495_v0, %v11492_v43 }
 0x2b2   : > { %14269 = vmatprep.subr.bf16.mxu1 %v14268_v14  ;;  %6536 = vmatmul.mubr.f32.gmra.mrb[48].mxu0 %v15388_v12  ;;  %v11496_v14 = vld [vmem:[%s21901_s2 + $0xbd0] sm:$0xff]  ;;  %v14344_v48 = vpack.c.bf16 %v11483_v30, %v11480_v52  ;;  %v11518_v59 = vld [vmem:[%s21901_s2 + $0xc80] sm:$0xff] }
 0x2b3   : > { %v19474_v61 = vadd.f32 %v12137_v11, %v19183_v53  ;;  %6541 = vmatprep.mubr.f32.mxu0 %v15389_v19  ;;  %14095 = vmatpush1.bf16.msra.mxu0 %v14094_v60  ;;  %v11484_v53 = vld [vmem:[%s21901_s2 + $0xb70] sm:$0xff]  ;;  %v11435_v60 = vld [vmem:[%s21901_s2 + $0x9e8] sm:$0xff]  ;;  %v14286_v25 = vpack.c.bf16 %v11499_v42, %v11496_v14  ;;  %v11489_v11 = vld [vmem:[%s21901_s2 + $0xb98] sm:$0xff]  ;;  %v14296_v52 = vpack.c.bf16 %v11518_v59, %v11515_v39 }
 0x2b4   : > { %14337 = vmatprep.subr.bf16.mxu0 %v14336_v31  ;;  %v14278_v7 = vpack.c.bf16 %v11487_v22, %v11484_v53  ;;  %v11486_v31 = vld [vmem:[%s21901_s2 + $0xb80] sm:$0xff]  ;;  %v11509_v19 = vld [vmem:[%s21901_s2 + $0xc38] sm:$0xff]  ;;  %v14346_v26 = vpack.c.bf16 %v11435_v60, %v11432_v57  ;;  %v15397_v14 = vld [vmem:[#allocation2 + $0x228] sm:$0xff] }
 0x2b5   : > { %14271 = vmatpush1.bf16.msra.mxu1 %v14270_v46  ;;  %v14288_v46 = vpack.c.bf16 %v11506_v24, %v11503_v10  ;;  %v11438_v53 = vld [vmem:[%s21901_s2 + $0xa00] sm:$0xff]  ;;  %v11441_v22 = vld [vmem:[%s21901_s2 + $0xa18] sm:$0xff]  ;;  %v14292_v9 = vpack.c.bf16 %v11512_v20, %v11509_v19 }
 0x2b6   : > { %14273 = vmatprep.subr.bf16.mxu1 %v14272_v3  ;;  %6542 = vmatmul.mubr.f32.gmra.mrb[50].mxu0 %v15390_v37  ;;  %v11502_v3 = vld [vmem:[%s21901_s2 + $0xc00] sm:$0xff]  ;;  %v11521_v24 = vld [vmem:[%s21901_s2 + $0xc98] sm:$0xff] }
 0x2b7   : > { %6547 = vmatprep.mubr.f32.mxu0 %v15391_v58  ;;  %v14290_v58 = vpack.c.bf16 %v11505_v28, %v11502_v3  ;;  %v11498_v51 = vld [vmem:[%s21901_s2 + $0xbe0] sm:$0xff]  ;;  %v11520_v3 = vld [vmem:[%s21901_s2 + $0xc90] sm:$0xff]  ;;  %v11523_v28 = vld [vmem:[%s21901_s2 + $0xca8] sm:$0xff] }
 0x2b8   : > { %v11514_v30 = vld [vmem:[%s21901_s2 + $0xc60] sm:$0xff]  ;;  %v14302_v43 = vpack.c.bf16 %v11523_v28, %v11520_v3  ;;  %v19747_v3 = vld [vmem:[#allocation2 + $0x278] sm:$0xff]  ;;  %v11384_v28 = vld [vmem:[%s21901_s2 + $0x850] sm:$0xff] }
 0x2b9   : > { %14275 = vmatpush1.bf16.msra.mxu1 %v14274_v38  ;;  %v11510_v0 = vld [vmem:[%s21901_s2 + $0xc40] sm:$0xff] }
 0x2ba   : > { %14277 = vmatprep.subr.bf16.mxu1 %v14276_v8  ;;  %6548 = vmatmul.mubr.f32.gmra.mrb[52].mxu0 %v15392_v50  ;;  %v14348_v8 = vpack.c.bf16 %v11489_v11, %v11486_v31  ;;  %v14350_v50 = vpack.c.bf16 %v11441_v22, %v11438_v53  ;;  %v11504_v31 = vld [vmem:[%s21901_s2 + $0xc10] sm:$0xff]  ;;  %v11507_v11 = vld [vmem:[%s21901_s2 + $0xc28] sm:$0xff]  ;;  %v19679_v39 = vld [vmem:[#allocation2 + $0x2c0] sm:$0xff] }
 0x2bb   : > { %6618 = vmatprep.mubr.f32.mxu0 %v19518_v55  ;;  %v11456_v22 = vld [vmem:[%s21901_s2 + $0xa90] sm:$0xff] }
 0x2bd   : > { %14279 = vmatpush1.bf16.msra.mxu1 %v14278_v7  ;;  %v11511_v7 = vld [vmem:[%s21901_s2 + $0xc48] sm:$0xff] }
 0x2be   : > { %14281 = vmatprep.subr.bf16.mxu1 %v14280_v44  ;;  %11314 = vmatmul.mubr.msk.f32.vlgmr.msra.gmra.mrb[46].mxu0 %vm1385_vm2, %v15394_v1  ;;  %v14294_v2 = vpack.c.bf16 %v11511_v7, %v11508_v35 }
 0x2bf   : > { %14339 = vmatpush3.bf16.msra.mxu0 %v14338_v62  ;;  %6624 = vmatprep.mubr.f32.mxu0 %v19518_v55  ;;  %v11447_v62 = vld [vmem:[%s21901_s2 + $0xa48] sm:$0xff] }
 0x2c0   : > { %14341 = vmatprep.subr.bf16.mxu0 %v14340_v23 }
 0x2c1   : > { %14283 = vmatpush1.bf16.msra.mxu1 %v14282_v47  ;;  %v11501_v47 = vld [vmem:[%s21901_s2 + $0xbf8] sm:$0xff] }
 0x2c2   : > { %14285 = vmatprep.subr.bf16.mxu1 %v14284_v54  ;;  %11315 = vmatmul.mubr.msk.f32.gmra.mrb[48].mxu0 %vm1385_vm2, %v15395_v36  ;;  %v11517_v54 = vld [vmem:[%s21901_s2 + $0xc78] sm:$0xff]  ;;  %v14356_v57 = vpack.c.bf16 %v11501_v47, %v11498_v51  ;;  %v6988_v51 = vld [vmem:[%s21901_s2 + $0x10] sm:$0xff]  ;;  %v6991_v47 = vld [vmem:[%s21901_s2 + $0x28] sm:$0xff] }
 0x2c3   : > { %v12170_v12 = vpop.f32.mrb[80].mxu1  ;;  %14343 = vmatpush3.bf16.msra.mxu0 %v14342_v6  ;;  %6630 = vmatprep.mubr.f32.mxu0 %v19518_v55  ;;  %v11524_v6 = vld [vmem:[%s21901_s2 + $0xcb0] sm:$0xff] }
 0x2c4   : > { %v12171_v38 = vpop.f32.mrb[81].mxu1  ;;  %14345 = vmatprep.subr.bf16.mxu0 %v14344_v48 }
 0x2c5   : > { %14287 = vmatpush1.bf16.msra.mxu1 %v14286_v25  ;;  %v12172_v37 = vadd.f32 %v12171_v38, %v12170_v12  ;;  %v14298_v25 = vpack.c.bf16 %v11517_v54, %v11514_v30  ;;  %v19652_v12 = vld [vmem:[#allocation2 + $0x268] sm:$0xff]  ;;  %v7045_v30 = vld [vmem:[%s21901_s2 + $0x1d8] sm:$0xff]  ;;  %v11324_v54 = vld [vmem:[%s21901_s2 + $0x670] sm:$0xff] }
 0x2c6   : > { %14289 = vmatprep.subr.bf16.mxu1 %v14288_v46  ;;  %11316 = vmatmul.mubr.msk.f32.gmra.mrb[50].mxu0 %vm1385_vm2, %v15396_v40  ;;  %v14300_v46 = vpack.c.bf16 %v11524_v6, %v11521_v24  ;;  %v11375_v38 = vld [vmem:[%s21901_s2 + $0x808] sm:$0xff]  ;;  %v19676_v40 = vld [vmem:[#allocation2 + $0x290] sm:$0xff]  ;;  %v11381_v24 = vld [vmem:[%s21901_s2 + $0x838] sm:$0xff]  ;;  %v14514_v6 = vpack.c.bf16 %v6991_v47, %v6988_v51 }
 0x2c7   : > { %v19593_v13 = vadd.f32 %v19405_v41, %v12172_v37  ;;  %v12173_v44 = vpop.f32.mrb[82].mxu1  ;;  %14347 = vmatpush3.bf16.msra.mxu0 %v14346_v26  ;;  %6636 = vmatprep.mubr.f32.mxu0 %v19518_v55  ;;  %v11444_v41 = vld [vmem:[%s21901_s2 + $0xa30] sm:$0xff]  ;;  %v11459_v37 = vld [vmem:[%s21901_s2 + $0xaa8] sm:$0xff] }
 0x2c8   : > { %v12174_v17 = vpop.f32.mrb[83].mxu1  ;;  %14349 = vmatprep.subr.bf16.mxu0 %v14348_v8  ;;  %v14354_v10 = vpack.c.bf16 %v11447_v62, %v11444_v41  ;;  %v11372_v26 = vld [vmem:[%s21901_s2 + $0x7f0] sm:$0xff]  ;;  %v7198_v8 = vld [vmem:[#allocation2 + $0x298] sm:$0xff]  ;;  %v11399_v47 = vld [vmem:[%s21901_s2 + $0x8c8] sm:$0xff] }
 0x2c9   : > { %14291 = vmatpush1.bf16.msra.mxu1 %v14290_v58  ;;  %v12175_v23 = vadd.f32 %v12174_v17, %v12173_v44  ;;  %v14304_v35 = vpack.c.bf16 %v11375_v38, %v11372_v26  ;;  %v14362_v44 = vpack.c.bf16 %v11459_v37, %v11456_v22  ;;  %v11465_v17 = vld [vmem:[%s21901_s2 + $0xad8] sm:$0xff]  ;;  %v7003_v38 = vld [vmem:[%s21901_s2 + $0x88] sm:$0xff]  ;;  %v11336_v37 = vld [vmem:[%s21901_s2 + $0x6d0] sm:$0xff] }
 0x2ca   : > { %14293 = vmatprep.subr.bf16.mxu1 %v14292_v9  ;;  %11317 = vmatmul.mubr.msk.f32.gmra.mrb[52].mxu0 %vm1385_vm2, %v15397_v14  ;;  %v11513_v9 = vld [vmem:[%s21901_s2 + $0xc58] sm:$0xff]  ;;  %v11327_v14 = vld [vmem:[%s21901_s2 + $0x688] sm:$0xff]  ;;  %v11396_v51 = vld [vmem:[%s21901_s2 + $0x8b0] sm:$0xff] }
 0x2cb   : > { %v19622_v42 = vadd.f32 %v19432_v32, %v12175_v23  ;;  %v12176_v1 = vpop.f32.mrb[84].mxu1  ;;  %14351 = vmatpush3.bf16.msra.mxu0 %v14350_v50  ;;  %7842 = vmatprep.mubr.f32.mxu0 %v19335_v34  ;;  %v11450_v32 = vld [vmem:[%s21901_s2 + $0xa60] sm:$0xff]  ;;  %v11453_v34 = vld [vmem:[%s21901_s2 + $0xa78] sm:$0xff]  ;;  %v14364_v59 = vpack.c.bf16 %v11513_v9, %v11510_v0  ;;  %v19697_v23 = vld [vmem:[#allocation2 + $0x2e8] sm:$0xff] }
 0x2cc   : > { %v12177_v48 = vpop.f32.mrb[85].mxu1  ;;  %14353 = vmatprep.subr.bf16.mxu0 %v14352_v16  ;;  %v14358_v20 = vpack.c.bf16 %v11453_v34, %v11450_v32  ;;  %v11462_v50 = vld [vmem:[%s21901_s2 + $0xac0] sm:$0xff]  ;;  %v7039_v16 = vld [vmem:[%s21901_s2 + $0x1a8] sm:$0xff]  ;;  %v19694_v41 = vld [vmem:[#allocation2 + $0x2b8] sm:$0xff]  ;;  %v14306_v34 = vpack.c.bf16 %v11327_v14, %v11324_v54 }
 0x2cd   : > { %14295 = vmatpush1.bf16.msra.mxu1 %v14294_v2  ;;  %v12178_v60 = vadd.f32 %v12177_v48, %v12176_v1  ;;  %v14366_v62 = vpack.c.bf16 %v11465_v17, %v11462_v50  ;;  %v19718_v1 = vld [vmem:[#allocation2 + $0x2e0] sm:$0xff]  ;;  %v6997_v32 = vld [vmem:[%s21901_s2 + $0x58] sm:$0xff]  ;;  %v7060_v50 = vld [vmem:[%s21901_s2 + $0x250] sm:$0xff] }
 0x2ce   : > { %14297 = vmatprep.subr.bf16.mxu1 %v14296_v52  ;;  %v7042_v52 = vld [vmem:[%s21901_s2 + $0x1c0] sm:$0xff]  ;;  %v11393_v9 = vld [vmem:[%s21901_s2 + $0x898] sm:$0xff]  ;;  %v7063_v17 = vld [vmem:[%s21901_s2 + $0x268] sm:$0xff] }
 0x2cf   : > { %v19650_v36 = vadd.f32 %v19459_v5, %v12178_v60  ;;  %v12179_v19 = vpop.f32.mrb[86].mxu1  ;;  %14355 = vmatpush3.bf16.msra.mxu0 %v14354_v10  ;;  %v14360_v5 = vpack.c.bf16 %v11507_v11, %v11504_v31  ;;  %v11378_v10 = vld [vmem:[%s21901_s2 + $0x820] sm:$0xff]  ;;  %v14516_v48 = vpack.c.bf16 %v7045_v30, %v7042_v52  ;;  %v7048_v60 = vld [vmem:[%s21901_s2 + $0x1f0] sm:$0xff]  ;;  %v14528_v30 = vpack.c.bf16 %v7063_v17, %v7060_v50  ;;  %v11417_v50 = vld [vmem:[%s21901_s2 + $0x958] sm:$0xff] }
 0x2d0   : > { %7580 = vmatmul.mubr.f32.vlgmr.msra.gmra.mrb[104].mxu1 %v19652_v12  ;;  %v12180_v53 = vpop.f32.mrb[87].mxu1  ;;  %14357 = vmatprep.subr.bf16.mxu0 %v14356_v57  ;;  %v6994_v57 = vld [vmem:[%s21901_s2 + $0x40] sm:$0xff]  ;;  %v14308_v31 = vpack.c.bf16 %v11381_v24, %v11378_v10  ;;  %v7069_v10 = vld [vmem:[%s21901_s2 + $0x298] sm:$0xff]  ;;  %v14320_v24 = vpack.c.bf16 %v11399_v47, %v11396_v51 }
 0x2d1   : > { %7585 = vmatprep.mubr.f32.mxu1 %v7198_v8  ;;  %14299 = vmatpush1.bf16.msra.mxu1 %v14298_v25  ;;  %v12181_v58 = vadd.f32 %v12180_v53, %v12179_v19  ;;  %v7051_v25 = vld [vmem:[%s21901_s2 + $0x208] sm:$0xff]  ;;  %v11330_v11 = vld [vmem:[%s21901_s2 + $0x6a0] sm:$0xff]  ;;  %v7033_v51 = vld [vmem:[%s21901_s2 + $0x178] sm:$0xff] }
 0x2d2   : > { %14301 = vmatprep.subr.bf16.mxu1 %v14300_v46  ;;  %v11333_v46 = vld [vmem:[%s21901_s2 + $0x6b8] sm:$0xff]  ;;  %v11387_v19 = vld [vmem:[%s21901_s2 + $0x868] sm:$0xff]  ;;  %v14520_v26 = vpack.c.bf16 %v7051_v25, %v7048_v60  ;;  %v7054_v53 = vld [vmem:[%s21901_s2 + $0x220] sm:$0xff] }
 0x2d3   : > { %v19674_v7 = vadd.f32 %v19474_v61, %v12181_v58  ;;  %14359 = vmatpush3.bf16.msra.mxu0 %v14358_v20  ;;  %v7036_v61 = vld [vmem:[%s21901_s2 + $0x190] sm:$0xff]  ;;  %v14518_v20 = vpack.c.bf16 %v6997_v32, %v6994_v57  ;;  %v14312_v22 = vpack.c.bf16 %v11387_v19, %v11384_v28  ;;  %v11339_v58 = vld [vmem:[%s21901_s2 + $0x6e8] sm:$0xff]  ;;  %v11390_v0 = vld [vmem:[%s21901_s2 + $0x880] sm:$0xff] }
 0x2d4   : > { %7586 = vmatmul.mubr.f32.gmra.mrb[106].mxu1 %v19676_v40  ;;  %14361 = vmatprep.subr.bf16.mxu0 %v14360_v5  ;;  %v14512_v2 = vpack.c.bf16 %v7039_v16, %v7036_v61  ;;  %v7057_v5 = vld [vmem:[%s21901_s2 + $0x238] sm:$0xff]  ;;  %v14316_v61 = vpack.c.bf16 %v11393_v9, %v11390_v0  ;;  %v11342_v16 = vld [vmem:[%s21901_s2 + $0x700] sm:$0xff]  ;;  %v19841_v57 = vld [vmem:[#allocation2 + $0x2f0] sm:$0xff] }
 0x2d5   : > { %7591 = vmatprep.mubr.f32.mxu1 %v19679_v39  ;;  %14303 = vmatpush1.bf16.msra.mxu1 %v14302_v43  ;;  %v19777_v43 = vld [vmem:[#allocation2 + $0x2a0] sm:$0xff]  ;;  %v7072_v28 = vld [vmem:[%s21901_s2 + $0x2b0] sm:$0xff]  ;;  %v7075_v19 = vld [vmem:[%s21901_s2 + $0x2c8] sm:$0xff] }
 0x2d6   : > { %14305 = vmatprep.subr.bf16.mxu1 %v14304_v35  ;;  %v7066_v14 = vld [vmem:[%s21901_s2 + $0x280] sm:$0xff]  ;;  %v7081_v9 = vld [vmem:[%s21901_s2 + $0x2f8] sm:$0xff] }
 0x2d7   : > { %14363 = vmatpush3.bf16.msra.mxu0 %v14362_v44  ;;  %v14524_v44 = vpack.c.bf16 %v7057_v5, %v7054_v53  ;;  %v11402_v32 = vld [vmem:[%s21901_s2 + $0x8e0] sm:$0xff]  ;;  %v14536_v5 = vpack.c.bf16 %v7075_v19, %v7072_v28 }
 0x2d8   : > { %7592 = vmatmul.mubr.f32.gmra.mrb[108].mxu1 %v19694_v41  ;;  %14365 = vmatprep.subr.bf16.mxu0 %v14364_v59  ;;  %v14314_v59 = vpack.c.bf16 %v11339_v58, %v11336_v37  ;;  %v7018_v25 = vld [vmem:[%s21901_s2 + $0x100] sm:$0xff]  ;;  %v7027_v37 = vld [vmem:[%s21901_s2 + $0x148] sm:$0xff] }
 0x2d9   : > { %7597 = vmatprep.mubr.f32.mxu1 %v19697_v23  ;;  %v7078_v0 = vld [vmem:[%s21901_s2 + $0x2e0] sm:$0xff] }
 0x2db   : > { %14367 = vmatpush3.bf16.msra.mxu0 %v14366_v62  ;;  %v11345_v62 = vld [vmem:[%s21901_s2 + $0x718] sm:$0xff] }
 0x2dc   : > { %7598 = vmatmul.mubr.f32.gmra.mrb[110].mxu1 %v19718_v1  ;;  %14513 = vmatprep.subr.bf16.mxu0 %v14512_v2  ;;  %v19808_v2 = vld [vmem:[#allocation2 + $0x2c8] sm:$0xff]  ;;  %v14318_v54 = vpack.c.bf16 %v11345_v62, %v11342_v16  ;;  %v14540_v16 = vpack.c.bf16 %v7081_v9, %v7078_v0  ;;  %v7030_v62 = vld [vmem:[%s21901_s2 + $0x160] sm:$0xff] }
 0x2dd   : > { %7668 = vmatprep.mubr.f32.mxu1 %v19518_v55  ;;  %v7147_v0 = vld [vmem:[%s21901_s2 + $0x508] sm:$0xff]  ;;  %v19963_v9 = vld [vmem:[#allocation2 + $0x1c0] sm:$0xff] }
 0x2de   : > { %7843 = vmatmul.mubr.f32.vlgmr.msra.gmra.mrb[54].mxu0 %v19652_v12  ;;  %v7000_v12 = vld [vmem:[%s21901_s2 + $0x70] sm:$0xff] }
 0x2df   : > { %7847 = vmatprep.mubr.f32.mxu0 %v7198_v8  ;;  %14515 = vmatpush3.bf16.msra.mxu0 %v14514_v6  ;;  %v14310_v8 = vpack.c.bf16 %v11333_v46, %v11330_v11  ;;  %v14522_v35 = vpack.c.bf16 %v7003_v38, %v7000_v12  ;;  %v11348_v6 = vld [vmem:[%s21901_s2 + $0x730] sm:$0xff]  ;;  %v15398_v11 = vld [vmem:[#allocation2 + $0x260] sm:$0xff]  ;;  %v11357_v12 = vld [vmem:[%s21901_s2 + $0x778] sm:$0xff] }
 0x2e0   : > { %11526 = vmatmul.mubr.msk.f32.vlgmr.msra.gmra.mrb[104].mxu1 %vm1385_vm2, %v19747_v3  ;;  %14517 = vmatprep.subr.bf16.mxu0 %v14516_v48  ;;  %v11351_v48 = vld [vmem:[%s21901_s2 + $0x748] sm:$0xff]  ;;  %v11408_v38 = vld [vmem:[%s21901_s2 + $0x910] sm:$0xff] }
 0x2e1   : > { %14307 = vmatpush3.bf16.msra.mxu1 %v14306_v34  ;;  %7674 = vmatprep.mubr.f32.mxu1 %v19518_v55  ;;  %v11405_v34 = vld [vmem:[%s21901_s2 + $0x8f8] sm:$0xff]  ;;  %v14322_v46 = vpack.c.bf16 %v11351_v48, %v11348_v6  ;;  %v11519_v6 = vld [vmem:[%s21901_s2 + $0xc88] sm:$0xff]  ;;  %v14542_v48 = vpack.c.bf16 %v7033_v51, %v7030_v62 }
 0x2e2   : > { %14309 = vmatprep.subr.bf16.mxu1 %v14308_v31  ;;  %7848 = vmatmul.mubr.f32.gmra.mrb[56].mxu0 %v19676_v40  ;;  %v7006_v40 = vld [vmem:[%s21901_s2 + $0xa0] sm:$0xff]  ;;  %v7021_v31 = vld [vmem:[%s21901_s2 + $0x118] sm:$0xff]  ;;  %v7099_v62 = vld [vmem:[%s21901_s2 + $0x388] sm:$0xff] }
 0x2e3   : > { %7852 = vmatprep.mubr.f32.mxu0 %v19679_v39  ;;  %14519 = vmatpush3.bf16.msra.mxu0 %v14518_v20  ;;  %v7009_v39 = vld [vmem:[%s21901_s2 + $0xb8] sm:$0xff]  ;;  %v14324_v20 = vpack.c.bf16 %v11405_v34, %v11402_v32  ;;  %v14534_v53 = vpack.c.bf16 %v7021_v31, %v7018_v25  ;;  %v15400_v51 = vld [vmem:[#allocation2 + $0x288] sm:$0xff] }
 0x2e4   : > { %11527 = vmatmul.mubr.msk.f32.gmra.mrb[106].mxu1 %vm1385_vm2, %v19777_v43  ;;  %14521 = vmatprep.subr.bf16.mxu0 %v14520_v26  ;;  %v14526_v52 = vpack.c.bf16 %v7009_v39, %v7006_v40  ;;  %v11354_v26 = vld [vmem:[%s21901_s2 + $0x760] sm:$0xff]  ;;  %v11363_v40 = vld [vmem:[%s21901_s2 + $0x7a8] sm:$0xff] }
 0x2e5   : > { %14311 = vmatpush3.bf16.msra.mxu1 %v14310_v8  ;;  %7680 = vmatprep.mubr.f32.mxu1 %v19518_v55  ;;  %v11411_v8 = vld [vmem:[%s21901_s2 + $0x928] sm:$0xff]  ;;  %v14326_v58 = vpack.c.bf16 %v11357_v12, %v11354_v26  ;;  %v11522_v26 = vld [vmem:[%s21901_s2 + $0xca0] sm:$0xff]  ;;  %v11525_v12 = vld [vmem:[%s21901_s2 + $0xcb8] sm:$0xff] }
 0x2e6   : > { %14313 = vmatprep.subr.bf16.mxu1 %v14312_v22  ;;  %7853 = vmatmul.mubr.f32.gmra.mrb[58].mxu0 %v19694_v41  ;;  %v7012_v41 = vld [vmem:[%s21901_s2 + $0xd0] sm:$0xff] }
 0x2e7   : > { %7857 = vmatprep.mubr.f32.mxu0 %v19697_v23  ;;  %14523 = vmatpush3.bf16.msra.mxu0 %v14522_v35  ;;  %v7015_v23 = vld [vmem:[%s21901_s2 + $0xe8] sm:$0xff]  ;;  %v7024_v22 = vld [vmem:[%s21901_s2 + $0x130] sm:$0xff]  ;;  %v14328_v35 = vpack.c.bf16 %v11411_v8, %v11408_v38 }
 0x2e8   : > { %11528 = vmatmul.mubr.msk.f32.gmra.mrb[108].mxu1 %vm1385_vm2, %v19808_v2  ;;  %14525 = vmatprep.subr.bf16.mxu0 %v14524_v44  ;;  %v14530_v60 = vpack.c.bf16 %v7015_v23, %v7012_v41  ;;  %v11360_v44 = vld [vmem:[%s21901_s2 + $0x790] sm:$0xff]  ;;  %v14538_v17 = vpack.c.bf16 %v7027_v37, %v7024_v22  ;;  %v7135_v41 = vld [vmem:[%s21901_s2 + $0x4a8] sm:$0xff] }
 0x2e9   : > { %14315 = vmatpush3.bf16.msra.mxu1 %v14314_v59  ;;  %7686 = vmatprep.mubr.f32.mxu1 %v19518_v55  ;;  %v19839_v55 = vld [vmem:[#allocation2 + $0x198] sm:$0xff]  ;;  %v11414_v59 = vld [vmem:[%s21901_s2 + $0x940] sm:$0xff]  ;;  %v19954_v37 = vld [vmem:[#allocation2 + $0x190] sm:$0xff] }
 0x2ea   : > { %14317 = vmatprep.subr.bf16.mxu1 %v14316_v61  ;;  %7858 = vmatmul.mubr.f32.gmra.mrb[60].mxu0 %v19718_v1  ;;  %v14532_v1 = vpack.c.bf16 %v7069_v10, %v7066_v14  ;;  %v14332_v23 = vpack.c.bf16 %v11417_v50, %v11414_v59  ;;  %v11369_v14 = vld [vmem:[%s21901_s2 + $0x7d8] sm:$0xff]  ;;  %v6990_v59 = vld [vmem:[%s21901_s2 + $0x20] sm:$0xff] }
 0x2eb   : > { %14527 = vmatpush3.bf16.msra.mxu0 %v14526_v52  ;;  %8291 = vmatprep.mubr.f32.mxu0 %v19839_v55  ;;  %v14330_v52 = vpack.c.bf16 %v11363_v40, %v11360_v44  ;;  %v15399_v50 = vld [vmem:[#allocation2 + $0x258] sm:$0xff] }
 0x2ec   : > { %11529 = vmatmul.mubr.msk.f32.gmra.mrb[110].mxu1 %vm1385_vm2, %v19841_v57  ;;  %14529 = vmatprep.subr.bf16.mxu0 %v14528_v30  ;;  %v7132_v30 = vld [vmem:[%s21901_s2 + $0x490] sm:$0xff] }
 0x2ed   : > { %14319 = vmatpush3.bf16.msra.mxu1 %v14318_v54  ;;  %7757 = vmatprep.mubr.f32.mxu1 %v15398_v11  ;;  %v11366_v54 = vld [vmem:[%s21901_s2 + $0x7c0] sm:$0xff]  ;;  %v14544_v34 = vpack.c.bf16 %v7135_v41, %v7132_v30  ;;  %v19980_v30 = vld [vmem:[#allocation2 + $0x1b8] sm:$0xff] }
 0x2ee   : > { %14321 = vmatprep.subr.bf16.mxu1 %v14320_v24  ;;  %v11516_v24 = vld [vmem:[%s21901_s2 + $0xc70] sm:$0xff]  ;;  %v14334_v31 = vpack.c.bf16 %v11369_v14, %v11366_v54  ;;  %v7138_v11 = vld [vmem:[%s21901_s2 + $0x4c0] sm:$0xff]  ;;  %v19989_v54 = vld [vmem:[#allocation2 + $0x1e8] sm:$0xff] }
 0x2ef   : > { %14531 = vmatpush3.bf16.msra.mxu0 %v14530_v60  ;;  %v7084_v60 = vld [vmem:[%s21901_s2 + $0x310] sm:$0xff]  ;;  %v14368_v28 = vpack.c.bf16 %v11519_v6, %v11516_v24  ;;  %v7150_v41 = vld [vmem:[%s21901_s2 + $0x520] sm:$0xff] }
 0x2f0   : > { %14533 = vmatprep.subr.bf16.mxu0 %v14532_v1  ;;  %v7087_v1 = vld [vmem:[%s21901_s2 + $0x328] sm:$0xff]  ;;  %v15401_v24 = vld [vmem:[#allocation2 + $0x280] sm:$0xff] }
 0x2f1   : > { %14323 = vmatpush3.bf16.msra.mxu1 %v14322_v46  ;;  %v7141_v46 = vld [vmem:[%s21901_s2 + $0x4d8] sm:$0xff] }
 0x2f2   : > { %14325 = vmatprep.subr.bf16.mxu1 %v14324_v20  ;;  %v14546_v20 = vpack.c.bf16 %v7087_v1, %v7084_v60  ;;  %v14548_v8 = vpack.c.bf16 %v7141_v46, %v7138_v11  ;;  %v19998_v60 = vld [vmem:[#allocation2 + $0x1e0] sm:$0xff]  ;;  %v7156_v1 = vld [vmem:[%s21901_s2 + $0x550] sm:$0xff] }
 0x2f3   : > { %v12222_v39 = vpop.f32.mrb[88].mxu1  ;;  %14535 = vmatpush3.bf16.msra.mxu0 %v14534_v53  ;;  %v7090_v53 = vld [vmem:[%s21901_s2 + $0x340] sm:$0xff]  ;;  %v20007_v11 = vld [vmem:[#allocation2 + $0x210] sm:$0xff] }
 0x2f4   : > { %v12223_v61 = vpop.f32.mrb[89].mxu1  ;;  %14537 = vmatprep.subr.bf16.mxu0 %v14536_v5  ;;  %v7093_v5 = vld [vmem:[%s21901_s2 + $0x358] sm:$0xff] }
 0x2f5   : > { %14327 = vmatpush3.bf16.msra.mxu1 %v14326_v58  ;;  %v19906_v47 = vadd.f32 %v12223_v61, %v12222_v39  ;;  %v7144_v58 = vld [vmem:[%s21901_s2 + $0x4f0] sm:$0xff]  ;;  %v14550_v40 = vpack.c.bf16 %v7093_v5, %v7090_v53  ;;  %v6987_v39 = vld [vmem:[%s21901_s2 + $0x8] sm:$0xff]  ;;  %v7165_v53 = vld [vmem:[%s21901_s2 + $0x598] sm:$0xff] }
 0x2f6   : > { %14329 = vmatprep.subr.bf16.mxu1 %v14328_v35  ;;  %v14372_v35 = vpack.c.bf16 %v11525_v12, %v11522_v26  ;;  %v14552_v61 = vpack.c.bf16 %v7147_v0, %v7144_v58  ;;  %v14376_v14 = vpack.c.bf16 %v6990_v59, %v6987_v39  ;;  %v7111_v26 = vld [vmem:[%s21901_s2 + $0x3e8] sm:$0xff]  ;;  %v15404_v12 = vld [vmem:[#allocation2 + $0x2d8] sm:$0xff]  ;;  %v6986_v5 = vld [vmem:[%s21901_s2] sm:$0xff] }
 0x2f7   : > { %v12225_v10 = vpop.f32.mrb[90].mxu1  ;;  %14539 = vmatpush3.bf16.msra.mxu0 %v14538_v17  ;;  %v6989_v58 = vld [vmem:[%s21901_s2 + $0x18] sm:$0xff]  ;;  %v20031_v0 = vld [vmem:[#allocation2 + $0x1a8] sm:$0xff]  ;;  %v15405_v39 = vld [vmem:[#allocation2 + $0x2d0] sm:$0xff] }
 0x2f8   : > { %v12226_v32 = vpop.f32.mrb[91].mxu1  ;;  %14541 = vmatprep.subr.bf16.mxu0 %v14540_v16  ;;  %v7096_v16 = vld [vmem:[%s21901_s2 + $0x370] sm:$0xff] }
 0x2f9   : > { %14331 = vmatpush3.bf16.msra.mxu1 %v14330_v52  ;;  %v19932_v25 = vadd.f32 %v12226_v32, %v12225_v10  ;;  %v14554_v10 = vpack.c.bf16 %v7099_v62, %v7096_v16  ;;  %v7105_v32 = vld [vmem:[%s21901_s2 + $0x3b8] sm:$0xff]  ;;  %v7168_v16 = vld [vmem:[%s21901_s2 + $0x5b0] sm:$0xff]  ;;  %v7171_v62 = vld [vmem:[%s21901_s2 + $0x5c8] sm:$0xff] }
 0x2fa   : > { %14333 = vmatprep.subr.bf16.mxu1 %v14332_v23  ;;  %v7153_v23 = vld [vmem:[%s21901_s2 + $0x538] sm:$0xff] }
 0x2fb   : > { %v12228_v19 = vpop.f32.mrb[92].mxu1  ;;  %14543 = vmatpush3.bf16.msra.mxu0 %v14542_v48  ;;  %v14556_v6 = vpack.c.bf16 %v7153_v23, %v7150_v41  ;;  %v7102_v48 = vld [vmem:[%s21901_s2 + $0x3a0] sm:$0xff]  ;;  %v6992_v41 = vld [vmem:[%s21901_s2 + $0x30] sm:$0xff]  ;;  %v6995_v23 = vld [vmem:[%s21901_s2 + $0x48] sm:$0xff] }
 0x2fc   : > { %v12229_v38 = vpop.f32.mrb[93].mxu1  ;;  %14545 = vmatprep.subr.bf16.mxu0 %v14544_v34  ;;  %v15402_v34 = vld [vmem:[#allocation2 + $0x2b0] sm:$0xff]  ;;  %v14558_v46 = vpack.c.bf16 %v7105_v32, %v7102_v48  ;;  %v7123_v48 = vld [vmem:[%s21901_s2 + $0x448] sm:$0xff]  ;;  %v14382_v32 = vpack.c.bf16 %v6995_v23, %v6992_v41 }
 0x2fd   : > { %14335 = vmatpush3.bf16.msra.mxu1 %v14334_v31  ;;  %v19952_v22 = vadd.f32 %v12229_v38, %v12228_v19  ;;  %v7159_v31 = vld [vmem:[%s21901_s2 + $0x568] sm:$0xff] }
 0x2fe   : > { %14369 = vmatprep.subr.bf16.mxu1 %v14368_v28  ;;  %8292 = vmatmul.mubr.f32.vlgmr.msra.gmra.mrb[62].mxu0 %v19954_v37  ;;  %v14560_v19 = vpack.c.bf16 %v7159_v31, %v7156_v1  ;;  %v20016_v38 = vld [vmem:[#allocation2 + $0x208] sm:$0xff]  ;;  %v6998_v31 = vld [vmem:[%s21901_s2 + $0x60] sm:$0xff] }
 0x2ff   : > { %v12231_v44 = vpop.f32.mrb[94].mxu1  ;;  %8296 = vmatprep.mubr.f32.mxu0 %v19963_v9  ;;  %14547 = vmatpush3.bf16.msra.mxu0 %v14546_v20  ;;  %v7108_v20 = vld [vmem:[%s21901_s2 + $0x3d0] sm:$0xff] }
 0x300   : > { %7758 = vmatmul.mubr.f32.vlgmr.msra.gmra.mrb[112].mxu1 %v15399_v50  ;;  %v12232_v17 = vpop.f32.mrb[95].mxu1  ;;  %14549 = vmatprep.subr.bf16.mxu0 %v14548_v8  ;;  %v7162_v8 = vld [vmem:[%s21901_s2 + $0x580] sm:$0xff] }
 0x301   : > { %7762 = vmatprep.mubr.f32.mxu1 %v15400_v51  ;;  %14371 = vmatpush3.bf16.msra.mxu1 %v14368_v28  ;;  %v19978_v52 = vadd.f32 %v12232_v17, %v12231_v44  ;;  %v15403_v28 = vld [vmem:[#allocation2 + $0x2a8] sm:$0xff]  ;;  %v6996_v44 = vld [vmem:[%s21901_s2 + $0x50] sm:$0xff]  ;;  %v14564_v59 = vpack.c.bf16 %v7165_v53, %v7162_v8  ;;  %v7114_v50 = vld [vmem:[%s21901_s2 + $0x400] sm:$0xff] }
 0x302   : > { %14373 = vmatprep.subr.bf16.mxu1 %v14372_v35  ;;  %8297 = vmatmul.mubr.f32.gmra.mrb[64].mxu0 %v19980_v30  ;;  %v7117_v17 = vld [vmem:[%s21901_s2 + $0x418] sm:$0xff]  ;;  %v7126_v8 = vld [vmem:[%s21901_s2 + $0x460] sm:$0xff] }
 0x303   : > { %8301 = vmatprep.mubr.f32.mxu0 %v19989_v54  ;;  %14551 = vmatpush3.bf16.msra.mxu0 %v14550_v40  ;;  %v14562_v40 = vpack.c.bf16 %v7111_v26, %v7108_v20  ;;  %v7129_v53 = vld [vmem:[%s21901_s2 + $0x478] sm:$0xff] }
 0x304   : > { %7763 = vmatmul.mubr.f32.gmra.mrb[114].mxu1 %v15401_v24  ;;  %14553 = vmatprep.subr.bf16.mxu0 %v14552_v61  ;;  %v14378_v61 = vpack.c.bf16 %v6989_v58, %v6986_v5  ;;  %v14568_v24 = vpack.c.bf16 %v7171_v62, %v7168_v16 }
 0x305   : > { %7767 = vmatprep.mubr.f32.mxu1 %v15402_v34  ;;  %14375 = vmatpush3.bf16.msra.mxu1 %v14372_v35  ;;  %v6993_v35 = vld [vmem:[%s21901_s2 + $0x38] sm:$0xff]  ;;  %v7174_v34 = vld [vmem:[%s21901_s2 + $0x5e0] sm:$0xff] }
 0x306   : > { %8302 = vmatmul.mubr.f32.gmra.mrb[66].mxu0 %v19998_v60  ;;  %14377 = vmatprep.subr.bf16.mxu1 %v14376_v14  ;;  %v14380_v51 = vpack.c.bf16 %v6996_v44, %v6993_v35  ;;  %v7002_v14 = vld [vmem:[%s21901_s2 + $0x80] sm:$0xff]  ;;  %v11595_v35 = vld [vmem:[%s21901_s2 + $0xe68] sm:$0xff] }
 0x307   : > { %8306 = vmatprep.mubr.f32.mxu0 %v20007_v11  ;;  %14555 = vmatpush3.bf16.msra.mxu0 %v14554_v10  ;;  %v14566_v10 = vpack.c.bf16 %v7117_v17, %v7114_v50  ;;  %v7011_v50 = vld [vmem:[%s21901_s2 + $0xc8] sm:$0xff]  ;;  %v7014_v17 = vld [vmem:[%s21901_s2 + $0xe0] sm:$0xff] }
 0x308   : > { %7768 = vmatmul.mubr.f32.gmra.mrb[116].mxu1 %v15403_v28  ;;  %14557 = vmatprep.subr.bf16.mxu0 %v14556_v6  ;;  %v7120_v6 = vld [vmem:[%s21901_s2 + $0x430] sm:$0xff]  ;;  %v7005_v28 = vld [vmem:[%s21901_s2 + $0x98] sm:$0xff] }
 0x309   : > { %7772 = vmatprep.mubr.f32.mxu1 %v15404_v12  ;;  %v14570_v20 = vpack.c.bf16 %v7123_v48, %v7120_v6  ;;  %v7010_v6 = vld [vmem:[%s21901_s2 + $0xc0] sm:$0xff]  ;;  %v7013_v48 = vld [vmem:[%s21901_s2 + $0xd8] sm:$0xff] }
 0x30a   : > { %8307 = vmatmul.mubr.f32.gmra.mrb[68].mxu0 %v20016_v38 }
 0x30b   : > { %14559 = vmatpush3.bf16.msra.mxu0 %v14558_v46  ;;  %8376 = vmatprep.mubr.f32.mxu0 %v20031_v0  ;;  %v7001_v46 = vld [vmem:[%s21901_s2 + $0x78] sm:$0xff] }
 0x30c   : > { %7773 = vmatmul.mubr.f32.gmra.mrb[118].mxu1 %v15405_v39  ;;  %14561 = vmatprep.subr.bf16.mxu0 %v14560_v19  ;;  %v7008_v19 = vld [vmem:[%s21901_s2 + $0xb0] sm:$0xff]  ;;  %v14386_v58 = vpack.c.bf16 %v7001_v46, %v6998_v31 }
 0x30d   : > { %13040 = vmatprep.mubr.msk.f32.mxu1 %vm1385_vm2, %v19747_v3  ;;  %v6999_v3 = vld [vmem:[%s21901_s2 + $0x68] sm:$0xff]  ;;  %v14388_v44 = vpack.c.bf16 %v7008_v19, %v7005_v28  ;;  %v14394_v19 = vpack.c.bf16 %v7013_v48, %v7010_v6 }
 0x30e   : > { %v14384_v1 = vpack.c.bf16 %v7002_v14, %v6999_v3  ;;  %v11598_v14 = vld [vmem:[%s21901_s2 + $0xe80] sm:$0xff] }
 0x30f   : > { %14563 = vmatpush3.bf16.msra.mxu0 %v14562_v40  ;;  %v7004_v40 = vld [vmem:[%s21901_s2 + $0x90] sm:$0xff] }
 0x310   : > { %13041 = vmatmul.mubr.msk.f32.vlgmr.msra.gmra.mrb[120].mxu1 %vm1385_vm2, %v19777_v43  ;;  %14565 = vmatprep.subr.bf16.mxu0 %v14564_v59  ;;  %v7177_v43 = vld [vmem:[%s21901_s2 + $0x5f8] sm:$0xff] }
 0x311   : > { %14379 = vmatpush1.bf16.msra.mxu1 %v14378_v61  ;;  %13043 = vmatprep.mubr.msk.f32.mxu1 %vm1385_vm2, %v19808_v2  ;;  %v14572_v12 = vpack.c.bf16 %v7177_v43, %v7174_v34  ;;  %v14574_v61 = vpack.c.bf16 %v7129_v53, %v7126_v8  ;;  %v7017_v34 = vld [vmem:[%s21901_s2 + $0xf8] sm:$0xff]  ;;  %v7020_v43 = vld [vmem:[%s21901_s2 + $0x110] sm:$0xff]  ;;  %v11607_v8 = vld [vmem:[%s21901_s2 + $0xec8] sm:$0xff] }
 0x312   : > { %14381 = vmatprep.subr.bf16.mxu1 %v14380_v51  ;;  %v11544_v51 = vld [vmem:[%s21901_s2 + $0xcd0] sm:$0xff]  ;;  %v14396_v53 = vpack.c.bf16 %v7020_v43, %v7017_v34 }
 0x313   : > { %v12266_v2 = vpop.f32.mrb[96].mxu1  ;;  %14567 = vmatpush3.bf16.msra.mxu0 %v14566_v10  ;;  %v11601_v10 = vld [vmem:[%s21901_s2 + $0xe98] sm:$0xff] }
 0x314   : > { %13044 = vmatmul.mubr.msk.f32.gmra.mrb[122].mxu1 %vm1385_vm2, %v19841_v57  ;;  %v12267_v26 = vpop.f32.mrb[97].mxu1  ;;  %14569 = vmatprep.subr.bf16.mxu0 %v14568_v24  ;;  %v11592_v57 = vld [vmem:[%s21901_s2 + $0xe50] sm:$0xff]  ;;  %v14392_v24 = vpack.c.bf16 %v7014_v17, %v7011_v50  ;;  %v14724_v46 = vpack.c.bf16 %v11601_v10, %v11598_v14  ;;  %v11559_v17 = vld [vmem:[%s21901_s2 + $0xd48] sm:$0xff]  ;;  %v7025_v10 = vld [vmem:[%s21901_s2 + $0x138] sm:$0xff] }
 0x315   : > { %14383 = vmatpush1.bf16.msra.mxu1 %v14382_v32  ;;  %8024 = vmatprep.mubr.f32.mxu1 %v19839_v55  ;;  %v12268_v5 = vadd.f32 %v12267_v26, %v12266_v2  ;;  %v7007_v55 = vld [vmem:[%s21901_s2 + $0xa8] sm:$0xff]  ;;  %v14720_v62 = vpack.c.bf16 %v11595_v35, %v11592_v57  ;;  %v11550_v2 = vld [vmem:[%s21901_s2 + $0xd00] sm:$0xff]  ;;  %v11556_v50 = vld [vmem:[%s21901_s2 + $0xd30] sm:$0xff] }
 0x316   : > { %14385 = vmatprep.subr.bf16.mxu1 %v14384_v1  ;;  %v14390_v23 = vpack.c.bf16 %v7007_v55, %v7004_v40  ;;  %v20157_v26 = vld [vmem:[#allocation2 + $0x1a0] sm:$0xff]  ;;  %v7023_v40 = vld [vmem:[%s21901_s2 + $0x128] sm:$0xff]  ;;  %v14730_v34 = vpack.c.bf16 %v11559_v17, %v11556_v50  ;;  %v11568_v17 = vld [vmem:[%s21901_s2 + $0xd90] sm:$0xff] }
 0x317   : > { %v6795_v39 = vadd.f32 %v12268_v5, %v19906_v47  ;;  %v12269_v59 = vpop.f32.mrb[98].mxu1  ;;  %14571 = vmatpush3.bf16.msra.mxu0 %v14570_v20  ;;  %v11547_v47 = vld [vmem:[%s21901_s2 + $0xce8] sm:$0xff]  ;;  %v7016_v5 = vld [vmem:[%s21901_s2 + $0xf0] sm:$0xff]  ;;  %v7026_v55 = vld [vmem:[%s21901_s2 + $0x140] sm:$0xff] }
 0x318   : > { %v12270_v16 = vpop.f32.mrb[99].mxu1  ;;  %14573 = vmatprep.subr.bf16.mxu0 %v14572_v12  ;;  %v14722_v1 = vpack.c.bf16 %v11547_v47, %v11544_v51  ;;  %v11604_v12 = vld [vmem:[%s21901_s2 + $0xeb0] sm:$0xff]  ;;  %v20194_v51 = vld [vmem:[#allocation2 + $0x1c8] sm:$0xff]  ;;  %v11610_v47 = vld [vmem:[%s21901_s2 + $0xee0] sm:$0xff]  ;;  %v14400_v14 = vpack.c.bf16 %v7026_v55, %v7023_v40 }
 0x319   : > { %14387 = vmatpush1.bf16.msra.mxu1 %v14386_v58  ;;  %v12271_v41 = vadd.f32 %v12270_v16, %v12269_v59  ;;  %v20129_v3 = vadd.f32 %v19593_v13, %v6795_v39  ;;  %v20172_v58 = vld [vmem:[#allocation2 + $0x1d0] sm:$0xff]  ;;  %v7038_v40 = vld [vmem:[%s21901_s2 + $0x1a0] sm:$0xff] }
 0x31a   : > { %14389 = vmatprep.subr.bf16.mxu1 %v14388_v44  ;;  %v20178_v44 = vld [vmem:[%s21904_s5] sm:$0x7] }
 0x31b   : > { %v6800_v13 = vadd.f32 %v12271_v41, %v19932_v25  ;;  %v12272_v32 = vpop.f32.mrb[100].mxu1  ;;  %14575 = vmatpush3.bf16.msra.mxu0 %v14574_v61  ;;  %v11553_v25 = vld [vmem:[%s21901_s2 + $0xd18] sm:$0xff] }
 0x31c   : > { %v12273_v31 = vpop.f32.mrb[101].mxu1  ;;  %14721 = vmatprep.subr.bf16.mxu0 %v14720_v62  ;;  %v14726_v39 = vpack.c.bf16 %v11553_v25, %v11550_v2  ;;  %v11613_v41 = vld [vmem:[%s21901_s2 + $0xef8] sm:$0xff] }
 0x31d   : > { %14391 = vmatpush1.bf16.msra.mxu1 %v14390_v23  ;;  %v12274_v28 = vadd.f32 %v12273_v31, %v12272_v32  ;;  %v15034_v20 = vadd.f32 %v19622_v42, %v6800_v13  ;;  %v7019_v42 = vld [vmem:[%s21901_s2 + $0x108] sm:$0xff]  ;;  %v20204_v23 = vrot.slane %v20178_v44, %v16740_v49  ;;  %v7029_v13 = vld [vmem:[%s21901_s2 + $0x158] sm:$0xff]  ;;  %v7032_v32 = vld [vmem:[%s21901_s2 + $0x170] sm:$0xff]  ;;  %v14732_v31 = vpack.c.bf16 %v11613_v41, %v11610_v47 }
 0x31e   : > { %14393 = vmatprep.subr.bf16.mxu1 %v14392_v24  ;;  %8377 = vmatmul.mubr.f32.vlgmr.msra.gmra.mrb[70].mxu0 %v20157_v26  ;;  %v14398_v16 = vpack.c.bf16 %v7019_v42, %v7016_v5  ;;  %v20213_v24 = vld [vmem:[#allocation2 + $0x1f8] sm:$0xff]  ;;  %v20247_v5 = vld [vmem:[#allocation2 + $0x220] sm:$0xff] }
 0x31f   : > { %v6805_v57 = vadd.f32 %v12274_v28, %v19952_v22  ;;  %v12275_v35 = vpop.f32.mrb[102].mxu1  ;;  %8381 = vmatprep.mubr.f32.mxu0 %v20172_v58  ;;  %14723 = vmatpush3.bf16.msra.mxu0 %v14722_v1  ;;  %v14728_v22 = vpack.c.bf16 %v11607_v8, %v11604_v12  ;;  %v11619_v12 = vld [vmem:[%s21901_s2 + $0xf28] sm:$0xff] }
 0x320   : > { %v12276_v59 = vpop.f32.mrb[103].mxu1  ;;  %14725 = vmatprep.subr.bf16.mxu0 %v14724_v46  ;;  %v11565_v46 = vld [vmem:[%s21901_s2 + $0xd78] sm:$0xff] }
 0x321   : > { %14395 = vmatpush1.bf16.msra.mxu1 %v14394_v19  ;;  %v12277_v61 = vadd.f32 %v12276_v59, %v12275_v35  ;;  %v15046_v62 = vadd.f32 %v19650_v36, %v6805_v57  ;;  %v7022_v36 = vld [vmem:[%s21901_s2 + $0x120] sm:$0xff]  ;;  %v20231_v19 = vld [vmem:[#allocation2 + $0x1f0] sm:$0xff]  ;;  %v7035_v35 = vld [vmem:[%s21901_s2 + $0x188] sm:$0xff] }
 0x322   : > { %14397 = vmatprep.subr.bf16.mxu1 %v14396_v53  ;;  %8382 = vmatmul.mubr.f32.gmra.mrb[72].mxu0 %v20194_v51  ;;  %v14402_v25 = vpack.c.bf16 %v7025_v10, %v7022_v36  ;;  %v14404_v53 = vpack.c.bf16 %v7032_v32, %v7029_v13  ;;  %v11622_v36 = vld [vmem:[%s21901_s2 + $0xf40] sm:$0xff]  ;;  %v11625_v10 = vld [vmem:[%s21901_s2 + $0xf58] sm:$0xff]  ;;  %v20280_v32 = vld [vmem:[#allocation2 + $0x30] sm:$0xff] }
 0x323   : > { %v6810_v6 = vadd.f32 %v12277_v61, %v19978_v52  ;;  %v13028_v48 = vpop.f32.mrb[68].mxu1  ;;  %8386 = vmatprep.mubr.f32.mxu0 %v20213_v24  ;;  %14727 = vmatpush3.bf16.msra.mxu0 %v14726_v39  ;;  %v11562_v52 = vld [vmem:[%s21901_s2 + $0xd60] sm:$0xff]  ;;  %v11571_v61 = vld [vmem:[%s21901_s2 + $0xda8] sm:$0xff]  ;;  %v7037_v13 = vld [vmem:[%s21901_s2 + $0x198] sm:$0xff] }
 0x324   : > { %v15035_v43 = vadd.f32 %v15034_v20, %v13028_v48  ;;  %v6879_v1 = vpop.f32.mrb[69].mxu1  ;;  %14729 = vmatprep.subr.bf16.mxu0 %v14728_v22  ;;  %v11616_v20 = vld [vmem:[%s21901_s2 + $0xf10] sm:$0xff]  ;;  %v14734_v55 = vpack.c.bf16 %v11565_v46, %v11562_v52  ;;  %v14408_v48 = vpack.c.bf16 %v7038_v40, %v7035_v35  ;;  %v14740_v46 = vpack.c.bf16 %v11625_v10, %v11622_v36  ;;  %v11586_v10 = vld [vmem:[%s21901_s2 + $0xe20] sm:$0xff] }
 0x325   : > { %14399 = vmatpush1.bf16.msra.mxu1 %v14398_v16  ;;  %v15039_v2 = vadd.f32 %v20129_v3, %v6879_v1  ;;  %v15042_v28 = vadd.f32 %v19674_v7, %v6810_v6  ;;  %v7028_v3 = vld [vmem:[%s21901_s2 + $0x150] sm:$0xff]  ;;  %v7031_v7 = vld [vmem:[%s21901_s2 + $0x168] sm:$0xff]  ;;  %v14736_v50 = vpack.c.bf16 %v11619_v12, %v11616_v20 }
 0x326   : > { %v6932_v8 = vadd.f32 %v15035_v43, %v20204_v23  ;;  %14401 = vmatprep.subr.bf16.mxu1 %v14400_v14  ;;  %8387 = vmatmul.mubr.f32.gmra.mrb[74].mxu0 %v20231_v19  ;;  %v14406_v41 = vpack.c.bf16 %v7031_v7, %v7028_v3  ;;  %v20263_v14 = vld [vmem:[#allocation2 + $0x218] sm:$0xff]  ;;  %v7044_v1 = vld [vmem:[%s21901_s2 + $0x1d0] sm:$0xff]  ;;  %v11631_v12 = vld [vmem:[%s21901_s2 + $0xf88] sm:$0xff] }
 0x327   : > { %v6929_v42 = vadd.f32 %v15039_v2, %v20204_v23  ;;  %v13031_v57 = vpop.f32.mrb[70].mxu1  ;;  %8391 = vmatprep.mubr.f32.mxu0 %v20247_v5  ;;  %14731 = vmatpush3.bf16.msra.mxu0 %v14730_v34  ;;  %v7041_v43 = vld [vmem:[%s21901_s2 + $0x1b8] sm:$0xff]  ;;  %v11574_v2 = vld [vmem:[%s21901_s2 + $0xdc0] sm:$0xff]  ;;  %v11628_v20 = vld [vmem:[%s21901_s2 + $0xf70] sm:$0xff] }
 0x328   : > { %v6944_v39 = vmax.f32 %v6932_v8, 0.0  ;;  %v15043_v59 = vadd.f32 %v15042_v28, %v13031_v57  ;;  %v6889_v22 = vpop.f32.mrb[71].mxu1  ;;  %14733 = vmatprep.subr.bf16.mxu0 %v14732_v31  ;;  %v14738_v31 = vpack.c.bf16 %v11571_v61, %v11568_v17  ;;  %v14412_v8 = vpack.c.bf16 %v7044_v1, %v7041_v43  ;;  %v7043_v3 = vld [vmem:[%s21901_s2 + $0x1c8] sm:$0xff]  ;;  %v11580_v40 = vld [vmem:[%s21901_s2 + $0xdf0] sm:$0xff]  ;;  %v7046_v17 = vld [vmem:[%s21901_s2 + $0x1e0] sm:$0xff] }
 0x329   : > { %v6941_v16 = vmax.f32 %v6929_v42, 0.0  ;;  %14403 = vmatpush1.bf16.msra.mxu1 %v14402_v25  ;;  %v15047_v47 = vadd.f32 %v15046_v62, %v6889_v22  ;;  %v7034_v62 = vld [vmem:[%s21901_s2 + $0x180] sm:$0xff]  ;;  %v7047_v7 = vld [vmem:[%s21901_s2 + $0x1e8] sm:$0xff]  ;;  %v14744_v35 = vpack.c.bf16 %v11631_v12, %v11628_v20  ;;  %v11637_v22 = vld [vmem:[%s21901_s2 + $0xfb8] sm:$0xff] }
 0x32a   : > { %6956 = vst.msk [vmem:[#allocation3 + $0x28] sm:$0xff] %vm1385_vm2, %v6944_v39  ;;  %v6938_v6 = vadd.f32 %v15043_v59, %v20204_v23  ;;  %14405 = vmatprep.subr.bf16.mxu1 %v14404_v53  ;;  %8392 = vmatmul.mubr.f32.gmra.mrb[76].mxu0 %v20263_v14  ;;  %v14410_v28 = vpack.c.bf16 %v7037_v13, %v7034_v62  ;;  %v7040_v53 = vld [vmem:[%s21901_s2 + $0x1b0] sm:$0xff]  ;;  %v7050_v42 = vld [vmem:[%s21901_s2 + $0x200] sm:$0xff]  ;;  %v7049_v61 = vld [vmem:[%s21901_s2 + $0x1f8] sm:$0xff] }
 0x32b   : > { %6953 = vst.msk [vmem:[#allocation3 + $0x10] sm:$0xff] %vm1385_vm2, %v6941_v16  ;;  %v6935_v34 = vadd.f32 %v15047_v47, %v20204_v23  ;;  %14735 = vmatpush3.bf16.msra.mxu0 %v14734_v55  ;;  %9049 = vmatprep.mubr.f32.mxu0 %v20280_v32  ;;  %v11577_v23 = vld [vmem:[%s21901_s2 + $0xdd8] sm:$0xff]  ;;  %v11583_v55 = vld [vmem:[%s21901_s2 + $0xe08] sm:$0xff]  ;;  %v14414_v39 = vpack.c.bf16 %v7043_v3, %v7040_v53  ;;  %v11634_v59 = vld [vmem:[%s21901_s2 + $0xfa0] sm:$0xff] }
 0x32c   : > { %v6950_v52 = vmax.f32 %v6938_v6, 0.0  ;;  %14737 = vmatprep.subr.bf16.mxu0 %v14736_v50  ;;  %v14742_v57 = vpack.c.bf16 %v11577_v23, %v11574_v2  ;;  %v14416_v50 = vpack.c.bf16 %v7050_v42, %v7047_v7  ;;  %v7053_v16 = vld [vmem:[%s21901_s2 + $0x218] sm:$0xff]  ;;  %v7056_v47 = vld [vmem:[%s21901_s2 + $0x230] sm:$0xff]  ;;  %v14748_v36 = vpack.c.bf16 %v11637_v22, %v11634_v59  ;;  %v11691_v13 = vld [vmem:[%s21901_s2 + $0x1168] sm:$0xff] }
 0x32d   : > { %v6947_v25 = vmax.f32 %v6935_v34, 0.0  ;;  %14407 = vmatpush1.bf16.msra.mxu1 %v14406_v41  ;;  %v14746_v41 = vpack.c.bf16 %v11583_v55, %v11580_v40  ;;  %v11589_v6 = vld [vmem:[%s21901_s2 + $0xe38] sm:$0xff]  ;;  %v11688_v62 = vld [vmem:[%s21901_s2 + $0x1150] sm:$0xff]  ;;  %v14420_v34 = vpack.c.bf16 %v7056_v47, %v7053_v16  ;;  %v7055_v1 = vld [vmem:[%s21901_s2 + $0x228] sm:$0xff] }
 0x32e   : > { %6962 = vst.msk [vmem:[#allocation3 + $0x58] sm:$0xff] %vm1385_vm2, %v6950_v52  ;;  %14409 = vmatprep.subr.bf16.mxu1 %v14408_v48  ;;  %v14418_v48 = vpack.c.bf16 %v7049_v61, %v7046_v17  ;;  %v7052_v43 = vld [vmem:[%s21901_s2 + $0x210] sm:$0xff]  ;;  %v7062_v52 = vld [vmem:[%s21901_s2 + $0x260] sm:$0xff]  ;;  %v14752_v2 = vpack.c.bf16 %v11691_v13, %v11688_v62  ;;  %v11697_v12 = vld [vmem:[%s21901_s2 + $0x1198] sm:$0xff] }
 0x32f   : > { %6959 = vst.msk [vmem:[#allocation3 + $0x40] sm:$0xff] %vm1385_vm2, %v6947_v25  ;;  %14739 = vmatpush3.bf16.msra.mxu0 %v14738_v31  ;;  %v7059_v31 = vld [vmem:[%s21901_s2 + $0x248] sm:$0xff]  ;;  %v11640_v23 = vld [vmem:[%s21901_s2 + $0xfd0] sm:$0xff]  ;;  %v11694_v20 = vld [vmem:[%s21901_s2 + $0x1180] sm:$0xff] }
 0x330   : > { %14741 = vmatprep.subr.bf16.mxu0 %v14740_v46  ;;  %v14750_v46 = vpack.c.bf16 %v11589_v6, %v11586_v10  ;;  %v11643_v25 = vld [vmem:[%s21901_s2 + $0xfe8] sm:$0xff]  ;;  %v7058_v53 = vld [vmem:[%s21901_s2 + $0x240] sm:$0xff]  ;;  %v7061_v3 = vld [vmem:[%s21901_s2 + $0x258] sm:$0xff] }
 0x331   : > { %14411 = vmatpush1.bf16.msra.mxu1 %v14410_v28  ;;  %v14422_v28 = vpack.c.bf16 %v7055_v1, %v7052_v43  ;;  %v7065_v7 = vld [vmem:[%s21901_s2 + $0x278] sm:$0xff]  ;;  %v7068_v42 = vld [vmem:[%s21901_s2 + $0x290] sm:$0xff]  ;;  %v11646_v40 = vld [vmem:[%s21901_s2 + $0x1000] sm:$0xff] }
 0x332   : > { %14413 = vmatprep.subr.bf16.mxu1 %v14412_v8  ;;  %v14424_v8 = vpack.c.bf16 %v7062_v52, %v7059_v31  ;;  %v11649_v55 = vld [vmem:[%s21901_s2 + $0x1018] sm:$0xff]  ;;  %v8482_v59 = vld [vmem:[#allocation2 + $0x28] sm:$0xff]  ;;  %v11700_v22 = vld [vmem:[%s21901_s2 + $0x11b0] sm:$0xff]  ;;  %v14428_v17 = vpack.c.bf16 %v7068_v42, %v7065_v7 }
 0x333   : > { %14743 = vmatpush3.bf16.msra.mxu0 %v14742_v57  ;;  %v14754_v57 = vpack.c.bf16 %v11643_v25, %v11640_v23  ;;  %v7064_v61 = vld [vmem:[%s21901_s2 + $0x270] sm:$0xff]  ;;  %v7067_v16 = vld [vmem:[%s21901_s2 + $0x288] sm:$0xff]  ;;  %v8488_v47 = vld [vmem:[#allocation2 + $0x58] sm:$0xff]  ;;  %v14758_v10 = vpack.c.bf16 %v11649_v55, %v11646_v40 }
 0x334   : > { %14745 = vmatprep.subr.bf16.mxu0 %v14744_v35  ;;  %v14756_v35 = vpack.c.bf16 %v11697_v12, %v11694_v20  ;;  %v11655_v62 = vld [vmem:[%s21901_s2 + $0x1048] sm:$0xff]  ;;  %v14430_v13 = vpack.c.bf16 %v7067_v16, %v7064_v61  ;;  %v11706_v43 = vld [vmem:[%s21901_s2 + $0x11e0] sm:$0xff]  ;;  %v11709_v1 = vld [vmem:[%s21901_s2 + $0x11f8] sm:$0xff] }
 0x335   : > { %14415 = vmatpush1.bf16.msra.mxu1 %v14414_v39  ;;  %v14426_v39 = vpack.c.bf16 %v7061_v3, %v7058_v53  ;;  %v7070_v52 = vld [vmem:[%s21901_s2 + $0x2a0] sm:$0xff]  ;;  %v7077_v23 = vld [vmem:[%s21901_s2 + $0x2d8] sm:$0xff]  ;;  %v7080_v25 = vld [vmem:[%s21901_s2 + $0x2f0] sm:$0xff]  ;;  %v14764_v20 = vpack.c.bf16 %v11709_v1, %v11706_v43 }
 0x336   : > { %14417 = vmatprep.subr.bf16.mxu1 %v14416_v50  ;;  %v11703_v50 = vld [vmem:[%s21901_s2 + $0x11c8] sm:$0xff]  ;;  %v11658_v12 = vld [vmem:[%s21901_s2 + $0x1060] sm:$0xff]  ;;  %v8492_v3 = vld [vmem:[#allocation2 + $0x78] sm:$0xff] }
 0x337   : > { %14747 = vmatpush3.bf16.msra.mxu0 %v14746_v41  ;;  %v7071_v41 = vld [vmem:[%s21901_s2 + $0x2a8] sm:$0xff]  ;;  %v14760_v6 = vpack.c.bf16 %v11703_v50, %v11700_v22  ;;  %v11712_v7 = vld [vmem:[%s21901_s2 + $0x1210] sm:$0xff]  ;;  %v11670_v1 = vld [vmem:[%s21901_s2 + $0x10c0] sm:$0xff] }
 0x338   : > { %14749 = vmatprep.subr.bf16.mxu0 %v14748_v36  ;;  %v7074_v36 = vld [vmem:[%s21901_s2 + $0x2c0] sm:$0xff]  ;;  %v11715_v42 = vld [vmem:[%s21901_s2 + $0x1228] sm:$0xff] }
 0x339   : > { %14419 = vmatpush1.bf16.msra.mxu1 %v14418_v48  ;;  %v11652_v48 = vld [vmem:[%s21901_s2 + $0x1030] sm:$0xff]  ;;  %v14432_v31 = vpack.c.bf16 %v7074_v36, %v7071_v41  ;;  %v7079_v40 = vld [vmem:[%s21901_s2 + $0x2e8] sm:$0xff]  ;;  %v14768_v50 = vpack.c.bf16 %v11715_v42, %v11712_v7  ;;  %v11721_v41 = vld [vmem:[%s21901_s2 + $0x1258] sm:$0xff] }
 0x33a   : > { %14421 = vmatprep.subr.bf16.mxu1 %v14420_v34  ;;  %v8487_v34 = vld [vmem:[#allocation2 + $0x50] sm:$0xff]  ;;  %v7083_v55 = vld [vmem:[%s21901_s2 + $0x308] sm:$0xff] }
 0x33b   : > { %14751 = vmatpush3.bf16.msra.mxu0 %v14750_v46  ;;  %v7073_v46 = vld [vmem:[%s21901_s2 + $0x2b8] sm:$0xff]  ;;  %v11667_v61 = vld [vmem:[%s21901_s2 + $0x10a8] sm:$0xff] }
 0x33c   : > { %14753 = vmatprep.subr.bf16.mxu0 %v14752_v2  ;;  %v8493_v2 = vld [vmem:[#allocation2 + $0x80] sm:$0xff]  ;;  %v14434_v53 = vpack.c.bf16 %v7073_v46, %v7070_v52  ;;  %v11724_v46 = vld [vmem:[%s21901_s2 + $0x1270] sm:$0xff]  ;;  %v11679_v7 = vld [vmem:[%s21901_s2 + $0x1108] sm:$0xff] }
 0x33d   : > { %14423 = vmatpush1.bf16.msra.mxu1 %v14422_v28  ;;  %v14762_v28 = vpack.c.bf16 %v11655_v62, %v11652_v48  ;;  %v8485_v48 = vld [vmem:[#allocation2 + $0x40] sm:$0xff]  ;;  %v7089_v62 = vld [vmem:[%s21901_s2 + $0x338] sm:$0xff] }
 0x33e   : > { %14425 = vmatprep.subr.bf16.mxu1 %v14424_v8  ;;  %9050 = vmatmul.mubr.f32.vlgmr.msra.gmra.mrb[78].mxu0 %v8482_v59  ;;  %v11661_v8 = vld [vmem:[%s21901_s2 + $0x1078] sm:$0xff]  ;;  %v20461_v59 = vld [vmem:[#allocation2 + $0xa0] sm:$0xff] }
 0x33f   : > { %9054 = vmatprep.mubr.f32.mxu0 %v8488_v47  ;;  %14755 = vmatpush3.bf16.msra.mxu0 %v14754_v57  ;;  %v14436_v57 = vpack.c.bf16 %v7080_v25, %v7077_v23  ;;  %v14766_v22 = vpack.c.bf16 %v11661_v8, %v11658_v12  ;;  %v11718_v47 = vld [vmem:[%s21901_s2 + $0x1240] sm:$0xff]  ;;  %v7088_v25 = vld [vmem:[%s21901_s2 + $0x330] sm:$0xff] }
 0x340   : > { %14757 = vmatprep.subr.bf16.mxu0 %v14756_v35  ;;  %v7076_v35 = vld [vmem:[%s21901_s2 + $0x2d0] sm:$0xff]  ;;  %v14772_v43 = vpack.c.bf16 %v11721_v41, %v11718_v47  ;;  %v7098_v12 = vld [vmem:[%s21901_s2 + $0x380] sm:$0xff]  ;;  %v7103_v41 = vld [vmem:[%s21901_s2 + $0x3a8] sm:$0xff] }
 0x341   : > { %14427 = vmatpush1.bf16.msra.mxu1 %v14426_v39  ;;  %v7086_v39 = vld [vmem:[%s21901_s2 + $0x320] sm:$0xff]  ;;  %v14438_v16 = vpack.c.bf16 %v7079_v40, %v7076_v35 }
 0x342   : > { %14429 = vmatprep.subr.bf16.mxu1 %v14428_v17  ;;  %9055 = vmatmul.mubr.f32.gmra.mrb[80].mxu0 %v8487_v34  ;;  %v11664_v17 = vld [vmem:[%s21901_s2 + $0x1090] sm:$0xff]  ;;  %v14440_v36 = vpack.c.bf16 %v7086_v39, %v7083_v55  ;;  %v7094_v40 = vld [vmem:[%s21901_s2 + $0x360] sm:$0xff]  ;;  %v7101_v55 = vld [vmem:[%s21901_s2 + $0x398] sm:$0xff] }
 0x343   : > { %9059 = vmatprep.mubr.f32.mxu0 %v8493_v2  ;;  %14759 = vmatpush3.bf16.msra.mxu0 %v14758_v10  ;;  %v7082_v10 = vld [vmem:[%s21901_s2 + $0x300] sm:$0xff]  ;;  %v14770_v34 = vpack.c.bf16 %v11667_v61, %v11664_v17  ;;  %v11727_v2 = vld [vmem:[%s21901_s2 + $0x1288] sm:$0xff]  ;;  %v7104_v39 = vld [vmem:[%s21901_s2 + $0x3b0] sm:$0xff] }
 0x344   : > { %14761 = vmatprep.subr.bf16.mxu0 %v14760_v6  ;;  %v7085_v6 = vld [vmem:[%s21901_s2 + $0x318] sm:$0xff]  ;;  %v11682_v17 = vld [vmem:[%s21901_s2 + $0x1120] sm:$0xff]  ;;  %v14452_v47 = vpack.c.bf16 %v7104_v39, %v7101_v55 }
 0x345   : > { %14431 = vmatpush1.bf16.msra.mxu1 %v14430_v13  ;;  %v7092_v13 = vld [vmem:[%s21901_s2 + $0x350] sm:$0xff]  ;;  %v14442_v52 = vpack.c.bf16 %v7085_v6, %v7082_v10  ;;  %v11685_v61 = vld [vmem:[%s21901_s2 + $0x1138] sm:$0xff]  ;;  %v7130_v39 = vld [vmem:[%s21901_s2 + $0x480] sm:$0xff] }
 0x346   : > { %14433 = vmatprep.subr.bf16.mxu1 %v14432_v31  ;;  %9060 = vmatmul.mubr.f32.gmra.mrb[82].mxu0 %v8492_v3  ;;  %v11673_v31 = vld [vmem:[%s21901_s2 + $0x10d8] sm:$0xff]  ;;  %v14444_v23 = vpack.c.bf16 %v7092_v13, %v7089_v62  ;;  %v11676_v3 = vld [vmem:[%s21901_s2 + $0x10f0] sm:$0xff]  ;;  %v14782_v10 = vpack.c.bf16 %v11685_v61, %v11682_v17  ;;  %v7106_v62 = vld [vmem:[%s21901_s2 + $0x3c0] sm:$0xff] }
 0x347   : > { %14763 = vmatpush3.bf16.msra.mxu0 %v14762_v28  ;;  %9064 = vmatprep.mubr.f32.mxu0 %v20461_v59  ;;  %v7091_v28 = vld [vmem:[%s21901_s2 + $0x348] sm:$0xff]  ;;  %v14774_v8 = vpack.c.bf16 %v11673_v31, %v11670_v1  ;;  %v7109_v13 = vld [vmem:[%s21901_s2 + $0x3d8] sm:$0xff]  ;;  %v7112_v31 = vld [vmem:[%s21901_s2 + $0x3f0] sm:$0xff] }
 0x348   : > { %14765 = vmatprep.subr.bf16.mxu0 %v14764_v20  ;;  %v7095_v20 = vld [vmem:[%s21901_s2 + $0x368] sm:$0xff]  ;;  %v14446_v42 = vpack.c.bf16 %v7091_v28, %v7088_v25  ;;  %v7118_v28 = vld [vmem:[%s21901_s2 + $0x420] sm:$0xff]  ;;  %v7140_v17 = vld [vmem:[%s21901_s2 + $0x4d0] sm:$0xff] }
 0x349   : > { %14435 = vmatpush1.bf16.msra.mxu1 %v14434_v53  ;;  %v14776_v53 = vpack.c.bf16 %v11727_v2, %v11724_v46  ;;  %v14448_v35 = vpack.c.bf16 %v7098_v12, %v7095_v20  ;;  %v8490_v46 = vld [vmem:[#allocation2 + $0x68] sm:$0xff]  ;;  %v7121_v20 = vld [vmem:[%s21901_s2 + $0x438] sm:$0xff]  ;;  %v8495_v12 = vld [vmem:[#allocation2 + $0x90] sm:$0xff] }
 0x34a   : > { %14437 = vmatprep.subr.bf16.mxu1 %v14436_v57  ;;  %9065 = vmatmul.mubr.f32.gmra.mrb[84].mxu0 %v20461_v59  ;;  %v11730_v57 = vld [vmem:[%s21901_s2 + $0x12a0] sm:$0xff] }
 0x34b   : > { %14767 = vmatpush3.bf16.msra.mxu0 %v14766_v22  ;;  %9134 = vmatprep.mubr.f32.mxu0 %v8485_v48  ;;  %v14778_v22 = vpack.c.bf16 %v11679_v7, %v11676_v3  ;;  %v14466_v3 = vpack.c.bf16 %v7121_v20, %v7118_v28  ;;  %v8494_v7 = vld [vmem:[#allocation2 + $0x88] sm:$0xff]  ;;  %v7160_v20 = vld [vmem:[%s21901_s2 + $0x570] sm:$0xff] }
 0x34c   : > { %14769 = vmatprep.subr.bf16.mxu0 %v14768_v50 }
 0x34d   : > { %14439 = vmatpush1.bf16.msra.mxu1 %v14438_v16 }
 0x34e   : > { %14441 = vmatprep.subr.bf16.mxu1 %v14440_v36  ;;  %v7107_v36 = vld [vmem:[%s21901_s2 + $0x3c8] sm:$0xff] }
 0x34f   : > { %14771 = vmatpush3.bf16.msra.mxu0 %v14770_v34  ;;  %v7113_v34 = vld [vmem:[%s21901_s2 + $0x3f8] sm:$0xff] }
 0x350   : > { %8025 = vmatmul.mubr.f32.vlgmr.msra.gmra.mrb[104].mxu1 %v19954_v37  ;;  %14773 = vmatprep.subr.bf16.mxu0 %v14772_v43  ;;  %v11733_v37 = vld [vmem:[%s21901_s2 + $0x12b8] sm:$0xff] }
 0x351   : > { %8030 = vmatprep.mubr.f32.mxu1 %v19963_v9  ;;  %14443 = vmatpush1.bf16.msra.mxu1 %v14442_v52  ;;  %v7097_v9 = vld [vmem:[%s21901_s2 + $0x378] sm:$0xff]  ;;  %v14780_v50 = vpack.c.bf16 %v11733_v37, %v11730_v57  ;;  %v7115_v52 = vld [vmem:[%s21901_s2 + $0x408] sm:$0xff]  ;;  %v7124_v57 = vld [vmem:[%s21901_s2 + $0x450] sm:$0xff] }
 0x352   : > { %14445 = vmatprep.subr.bf16.mxu1 %v14444_v23  ;;  %v14450_v16 = vpack.c.bf16 %v7097_v9, %v7094_v40  ;;  %v8484_v43 = vld [vmem:[#allocation2 + $0x38] sm:$0xff]  ;;  %v14462_v2 = vpack.c.bf16 %v7115_v52, %v7112_v31  ;;  %v8489_v23 = vld [vmem:[#allocation2 + $0x60] sm:$0xff]  ;;  %v7127_v37 = vld [vmem:[%s21901_s2 + $0x468] sm:$0xff] }
 0x353   : > { %14775 = vmatpush3.bf16.msra.mxu0 %v14774_v8  ;;  %v7125_v8 = vld [vmem:[%s21901_s2 + $0x458] sm:$0xff]  ;;  %v7134_v40 = vld [vmem:[%s21901_s2 + $0x4a0] sm:$0xff]  ;;  %v14470_v9 = vpack.c.bf16 %v7127_v37, %v7124_v57 }
 0x354   : > { %8031 = vmatmul.mubr.f32.gmra.mrb[106].mxu1 %v19980_v30  ;;  %14777 = vmatprep.subr.bf16.mxu0 %v14776_v53  ;;  %v7100_v30 = vld [vmem:[%s21901_s2 + $0x390] sm:$0xff]  ;;  %v7158_v31 = vld [vmem:[%s21901_s2 + $0x560] sm:$0xff]  ;;  %v7169_v57 = vld [vmem:[%s21901_s2 + $0x5b8] sm:$0xff] }
 0x355   : > { %8036 = vmatprep.mubr.f32.mxu1 %v19989_v54  ;;  %14447 = vmatpush1.bf16.msra.mxu1 %v14446_v42  ;;  %v7110_v54 = vld [vmem:[%s21901_s2 + $0x3e0] sm:$0xff]  ;;  %v14454_v6 = vpack.c.bf16 %v7103_v41, %v7100_v30  ;;  %v7128_v53 = vld [vmem:[%s21901_s2 + $0x470] sm:$0xff]  ;;  %v7139_v30 = vld [vmem:[%s21901_s2 + $0x4c8] sm:$0xff] }
 0x356   : > { %14449 = vmatprep.subr.bf16.mxu1 %v14448_v35  ;;  %v14456_v48 = vpack.c.bf16 %v7110_v54, %v7107_v36  ;;  %v14468_v42 = vpack.c.bf16 %v7128_v53, %v7125_v8  ;;  %v7131_v35 = vld [vmem:[%s21901_s2 + $0x488] sm:$0xff]  ;;  %v7146_v36 = vld [vmem:[%s21901_s2 + $0x500] sm:$0xff]  ;;  %v7173_v37 = vld [vmem:[%s21901_s2 + $0x5d8] sm:$0xff] }
 0x357   : > { %14779 = vmatpush3.bf16.msra.mxu0 %v14778_v22  ;;  %v14472_v55 = vpack.c.bf16 %v7134_v40, %v7131_v35  ;;  %v7133_v22 = vld [vmem:[%s21901_s2 + $0x498] sm:$0xff]  ;;  %v7143_v41 = vld [vmem:[%s21901_s2 + $0x4e8] sm:$0xff]  ;;  %v7170_v53 = vld [vmem:[%s21901_s2 + $0x5c0] sm:$0xff] }
 0x358   : > { %8037 = vmatmul.mubr.f32.gmra.mrb[108].mxu1 %v19998_v60  ;;  %14781 = vmatprep.subr.bf16.mxu0 %v14780_v50  ;;  %v7116_v60 = vld [vmem:[%s21901_s2 + $0x410] sm:$0xff]  ;;  %v7137_v50 = vld [vmem:[%s21901_s2 + $0x4b8] sm:$0xff]  ;;  %v14474_v61 = vpack.c.bf16 %v7133_v22, %v7130_v39  ;;  %v7167_v8 = vld [vmem:[%s21901_s2 + $0x5a8] sm:$0xff] }
 0x359   : > { %8042 = vmatprep.mubr.f32.mxu1 %v20007_v11  ;;  %14451 = vmatpush1.bf16.msra.mxu1 %v14450_v16  ;;  %v14458_v11 = vpack.c.bf16 %v7109_v13, %v7106_v62  ;;  %v14460_v1 = vpack.c.bf16 %v7116_v60, %v7113_v34  ;;  %v14476_v16 = vpack.c.bf16 %v7140_v17, %v7137_v50  ;;  %v7149_v62 = vld [vmem:[%s21901_s2 + $0x518] sm:$0xff]  ;;  %v7152_v13 = vld [vmem:[%s21901_s2 + $0x530] sm:$0xff]  ;;  %v7175_v39 = vld [vmem:[%s21901_s2 + $0x5e8] sm:$0xff] }
 0x35a   : > { %14453 = vmatprep.subr.bf16.mxu1 %v14452_v47  ;;  %v7136_v47 = vld [vmem:[%s21901_s2 + $0x4b0] sm:$0xff]  ;;  %v14484_v60 = vpack.c.bf16 %v7152_v13, %v7149_v62  ;;  %v7179_v22 = vld [vmem:[%s21901_s2 + $0x608] sm:$0xff]  ;;  %v7182_v50 = vld [vmem:[%s21901_s2 + $0x620] sm:$0xff]  ;;  %v6915_v13 = vrot.slane %v20178_v44, %v16930_v29 }
 0x35b   : > { %14783 = vmatpush3.bf16.msra.mxu0 %v14782_v10  ;;  %v14478_v54 = vpack.c.bf16 %v7139_v30, %v7136_v47  ;;  %v14480_v10 = vpack.c.bf16 %v7146_v36, %v7143_v41  ;;  %v7176_v35 = vld [vmem:[%s21901_s2 + $0x5f0] sm:$0xff]  ;;  %v7181_v47 = vld [vmem:[%s21901_s2 + $0x618] sm:$0xff]  ;;  %v7183_v62 = vld [vmem:[%s21901_s2 + $0x628] sm:$0xff] }
 0x35c   : > { %8043 = vmatmul.mubr.f32.gmra.mrb[110].mxu1 %v20016_v38  ;;  %v7119_v38 = vld [vmem:[%s21901_s2 + $0x428] sm:$0xff]  ;;  %v7185_v30 = vld [vmem:[%s21901_s2 + $0x638] sm:$0xff]  ;;  %v7188_v41 = vld [vmem:[%s21901_s2 + $0x650] sm:$0xff] }
 0x35d   : > { %14455 = vmatpush1.bf16.msra.mxu1 %v14454_v6  ;;  %8113 = vmatprep.mubr.f32.mxu1 %v20031_v0  ;;  %v7122_v0 = vld [vmem:[%s21901_s2 + $0x440] sm:$0xff] }
 0x35e   : > { %14457 = vmatprep.subr.bf16.mxu1 %v14456_v48  ;;  %9135 = vmatmul.mubr.f32.vlgmr.msra.gmra.mrb[86].mxu0 %v8484_v43  ;;  %v14464_v25 = vpack.c.bf16 %v7122_v0, %v7119_v38  ;;  %v7142_v6 = vld [vmem:[%s21901_s2 + $0x4e0] sm:$0xff]  ;;  %v7145_v48 = vld [vmem:[%s21901_s2 + $0x4f8] sm:$0xff]  ;;  %v7151_v43 = vld [vmem:[%s21901_s2 + $0x528] sm:$0xff] }
 0x35f   : > { %9139 = vmatprep.mubr.f32.mxu0 %v8490_v46  ;;  %v14482_v34 = vpack.c.bf16 %v7145_v48, %v7142_v6  ;;  %v7154_v38 = vld [vmem:[%s21901_s2 + $0x540] sm:$0xff]  ;;  %v7157_v0 = vld [vmem:[%s21901_s2 + $0x558] sm:$0xff]  ;;  %v7187_v6 = vld [vmem:[%s21901_s2 + $0x648] sm:$0xff] }
 0x360   : > { %v7180_v48 = vld [vmem:[%s21901_s2 + $0x610] sm:$0xff] }
 0x361   : > { %14459 = vmatpush1.bf16.msra.mxu1 %v14458_v11  ;;  %v7148_v11 = vld [vmem:[%s21901_s2 + $0x510] sm:$0xff] }
 0x362   : > { %14461 = vmatprep.subr.bf16.mxu1 %v14460_v1  ;;  %9140 = vmatmul.mubr.f32.gmra.mrb[88].mxu0 %v8489_v23  ;;  %v7155_v1 = vld [vmem:[%s21901_s2 + $0x548] sm:$0xff]  ;;  %v14486_v52 = vpack.c.bf16 %v7151_v43, %v7148_v11  ;;  %v7164_v23 = vld [vmem:[%s21901_s2 + $0x590] sm:$0xff]  ;;  %v6919_v11 = vrot.slane %v20178_v44, %v16939_v15 }
 0x363   : > { %9144 = vmatprep.mubr.f32.mxu0 %v8495_v12  ;;  %v14488_v46 = vpack.c.bf16 %v7158_v31, %v7155_v1  ;;  %v7163_v12 = vld [vmem:[%s21901_s2 + $0x588] sm:$0xff]  ;;  %v14576_v31 = vpack.c.bf16 %v7183_v62, %v7180_v48  ;;  %v11554_v62 = vld [vmem:[%s21901_s2 + $0xd20] sm:$0xff] }
 0x365   : > { %14463 = vmatpush1.bf16.msra.mxu1 %v14462_v2  ;;  %v7161_v2 = vld [vmem:[%s21901_s2 + $0x578] sm:$0xff] }
 0x366   : > { %14465 = vmatprep.subr.bf16.mxu1 %v14464_v25  ;;  %9145 = vmatmul.mubr.f32.gmra.mrb[90].mxu0 %v8494_v7  ;;  %v14490_v25 = vpack.c.bf16 %v7157_v0, %v7154_v38  ;;  %v14492_v28 = vpack.c.bf16 %v7164_v23, %v7161_v2  ;;  %v14496_v7 = vpack.c.bf16 %v7170_v53, %v7167_v8 }
 0x367   : > { %9149 = vmatprep.mubr.f32.mxu0 %v20461_v59 }
 0x369   : > { %14467 = vmatpush1.bf16.msra.mxu1 %v14466_v3  ;;  %v14494_v3 = vpack.c.bf16 %v7163_v12, %v7160_v20 }
 0x36a   : > { %14469 = vmatprep.subr.bf16.mxu1 %v14468_v42  ;;  %9150 = vmatmul.mubr.f32.gmra.mrb[92].mxu0 %v20461_v59  ;;  %v7166_v42 = vld [vmem:[%s21901_s2 + $0x5a0] sm:$0xff] }
 0x36b   : > { %v14498_v40 = vpack.c.bf16 %v7169_v57, %v7166_v42 }
 0x36d   : > { %14471 = vmatpush1.bf16.msra.mxu1 %v14470_v9  ;;  %v14500_v9 = vpack.c.bf16 %v7176_v35, %v7173_v37  ;;  %v11546_v37 = vld [vmem:[%s21901_s2 + $0xce0] sm:$0xff] }
 0x36e   : > { %14473 = vmatprep.subr.bf16.mxu1 %v14472_v55  ;;  %v7172_v55 = vld [vmem:[%s21901_s2 + $0x5d0] sm:$0xff] }
 0x36f   : > { %v14502_v17 = vpack.c.bf16 %v7175_v39, %v7172_v55  ;;  %v6980_v39 = vld [vmem:[#allocation2 + $0x200] sm:$0xff] }
 0x371   : > { %14475 = vmatpush1.bf16.msra.mxu1 %v14474_v61  ;;  %v14504_v61 = vpack.c.bf16 %v7182_v50, %v7179_v22  ;;  %v11542_v22 = vld [vmem:[%s21901_s2 + $0xcc0] sm:$0xff]  ;;  %v11545_v50 = vld [vmem:[%s21901_s2 + $0xcd8] sm:$0xff] }
 0x372   : > { %14477 = vmatprep.subr.bf16.mxu1 %v14476_v16  ;;  %v7178_v16 = vld [vmem:[%s21901_s2 + $0x600] sm:$0xff] }
 0x373   : > { %v14506_v36 = vpack.c.bf16 %v7181_v47, %v7178_v16  ;;  %v11552_v16 = vld [vmem:[%s21901_s2 + $0xd10] sm:$0xff] }
 0x375   : > { %14479 = vmatpush1.bf16.msra.mxu1 %v14478_v54  ;;  %v14508_v54 = vpack.c.bf16 %v7188_v41, %v7185_v30  ;;  %v11548_v30 = vld [vmem:[%s21901_s2 + $0xcf0] sm:$0xff]  ;;  %v11551_v41 = vld [vmem:[%s21901_s2 + $0xd08] sm:$0xff] }
 0x376   : > { %14481 = vmatprep.subr.bf16.mxu1 %v14480_v10  ;;  %v7184_v10 = vld [vmem:[%s21901_s2 + $0x630] sm:$0xff] }
 0x379   : > { %14483 = vmatpush1.bf16.msra.mxu1 %v14482_v34  ;;  %v14510_v34 = vpack.c.bf16 %v7187_v6, %v7184_v10  ;;  %v14590_v10 = vpack.c.bf16 %v11551_v41, %v11548_v30  ;;  %v11599_v30 = vld [vmem:[%s21901_s2 + $0xe88] sm:$0xff] }
 0x37a   : > { %14485 = vmatprep.subr.bf16.mxu1 %v14484_v60  ;;  %v11603_v41 = vld [vmem:[%s21901_s2 + $0xea8] sm:$0xff] }
 0x37d   : > { %14487 = vmatpush1.bf16.msra.mxu1 %v14486_v52 }
 0x37e   : > { %14489 = vmatprep.subr.bf16.mxu1 %v14488_v46 }
 0x381   : > { %14491 = vmatpush1.bf16.msra.mxu1 %v14490_v25 }
 0x382   : > { %14493 = vmatprep.subr.bf16.mxu1 %v14492_v28 }
 0x385   : > { %14495 = vmatpush1.bf16.msra.mxu1 %v14494_v3 }
 0x386   : > { %14497 = vmatprep.subr.bf16.mxu1 %v14496_v7  ;;  %v6970_v7 = vld [vmem:[#allocation2 + $0x1b0] sm:$0xff] }
 0x389   : > { %14499 = vmatpush1.bf16.msra.mxu1 %v14498_v40 }
 0x38a   : > { %14501 = vmatprep.subr.bf16.mxu1 %v14500_v9  ;;  %v6975_v9 = vld [vmem:[#allocation2 + $0x1d8] sm:$0xff] }
 0x38d   : > { %14503 = vmatpush1.bf16.msra.mxu1 %v14502_v17  ;;  %v6985_v17 = vld [vmem:[#allocation2 + $0x228] sm:$0xff] }
 0x38e   : > { %14505 = vmatprep.subr.bf16.mxu1 %v14504_v61  ;;  %v11549_v61 = vld [vmem:[%s21901_s2 + $0xcf8] sm:$0xff] }
 0x38f   : > { %v14588_v47 = vpack.c.bf16 %v11552_v16, %v11549_v61  ;;  %v11600_v61 = vld [vmem:[%s21901_s2 + $0xe90] sm:$0xff] }
 0x390   : > { %8114 = vmatmul.mubr.f32.vlgmr.msra.gmra.mrb[104].mxu1 %v20157_v26 }
 0x391   : > { %8119 = vmatprep.mubr.f32.mxu1 %v20172_v58  ;;  %14507 = vmatpush1.bf16.msra.mxu1 %v14506_v36  ;;  %v6620_v60 = vpop.f32.mrb[46].mxu0  ;;  %v11555_v36 = vld [vmem:[%s21901_s2 + $0xd28] sm:$0xff] }
 0x392   : > { %14509 = vmatprep.subr.bf16.mxu1 %v14508_v54  ;;  %v15017_v43 = vadd.f32 %v19030_v27, %v6620_v60  ;;  %v6622_v1 = vpop.f32.mrb[47].mxu0  ;;  %v11558_v54 = vld [vmem:[%s21901_s2 + $0xd40] sm:$0xff] }
 0x393   : > { %v15019_v52 = vadd.f32 %v19033_v18, %v6622_v1  ;;  %v14592_v48 = vpack.c.bf16 %v11558_v54, %v11555_v36  ;;  %v11606_v36 = vld [vmem:[%s21901_s2 + $0xec0] sm:$0xff] }
 0x394   : > { %8120 = vmatmul.mubr.f32.gmra.mrb[106].mxu1 %v20194_v51  ;;  %v6927_v26 = vadd.f32 %v15017_v43, %v6915_v13  ;;  %v11564_v43 = vld [vmem:[%s21901_s2 + $0xd70] sm:$0xff] }
 0x395   : > { %8125 = vmatprep.mubr.f32.mxu1 %v20213_v24  ;;  %14511 = vmatpush1.bf16.msra.mxu1 %v14510_v34  ;;  %v6928_v58 = vadd.f32 %v15019_v52, %v6919_v11  ;;  %v6626_v46 = vpop.f32.mrb[48].mxu0 }
 0x396   : > { %v6939_v38 = vmax.f32 %v6927_v26, 0.0  ;;  %v15021_v0 = vadd.f32 %v19062_v21, %v6626_v46  ;;  %v6628_v2 = vpop.f32.mrb[49].mxu0  ;;  %14577 = vmatprep.subr.bf16.mxu1 %v14576_v31  ;;  %v11560_v26 = vld [vmem:[%s21901_s2 + $0xd50] sm:$0xff] }
 0x397   : > { %v6940_v44 = vmax.f32 %v6928_v58, 0.0  ;;  %v15023_v27 = vadd.f32 %v19065_v56, %v6628_v2  ;;  %v7186_v56 = vld [vmem:[%s21901_s2 + $0x640] sm:$0xff]  ;;  %v11563_v58 = vld [vmem:[%s21901_s2 + $0xd68] sm:$0xff] }
 0x398   : > { %8126 = vmatmul.mubr.f32.gmra.mrb[108].mxu1 %v20231_v19  ;;  %6951 = vst [vmem:[#allocation3] sm:$0xff] %v6939_v38  ;;  %v6930_v18 = vadd.f32 %v15021_v0, %v6915_v13  ;;  %v7189_v19 = vld [vmem:[%s21901_s2 + $0x658] sm:$0xff]  ;;  %v11567_v0 = vld [vmem:[%s21901_s2 + $0xd88] sm:$0xff]  ;;  %v14598_v2 = vpack.c.bf16 %v11563_v58, %v11560_v26  ;;  %v11770_v58 = vld [vmem:[%s21902_s3 + $0x1a0] sm:$0xff] }
 0x399   : > { %8131 = vmatprep.mubr.f32.mxu1 %v20247_v5  ;;  %6952 = vst [vmem:[#allocation3 + $0x8] sm:$0xff] %v6940_v44  ;;  %v6931_v51 = vadd.f32 %v15023_v27, %v6919_v11  ;;  %v6632_v24 = vpop.f32.mrb[50].mxu0  ;;  %v14580_v3 = vpack.c.bf16 %v7189_v19, %v7186_v56  ;;  %v11572_v19 = vld [vmem:[%s21901_s2 + $0xdb0] sm:$0xff] }
 0x39a   : > { %v6942_v23 = vmax.f32 %v6930_v18, 0.0  ;;  %v15025_v25 = vadd.f32 %v19097_v63, %v6632_v24  ;;  %v6634_v28 = vpop.f32.mrb[51].mxu0  ;;  %v11566_v18 = vld [vmem:[%s21901_s2 + $0xd80] sm:$0xff] }
 0x39b   : > { %v6943_v20 = vmax.f32 %v6931_v51, 0.0  ;;  %v15027_v21 = vadd.f32 %v19100_v45, %v6634_v28  ;;  %v11569_v51 = vld [vmem:[%s21901_s2 + $0xd98] sm:$0xff]  ;;  %v11576_v28 = vld [vmem:[%s21901_s2 + $0xdd0] sm:$0xff] }
 0x39c   : > { %8132 = vmatmul.mubr.f32.gmra.mrb[110].mxu1 %v20263_v14  ;;  %6954 = vst [vmem:[#allocation3 + $0x18] sm:$0xff] %v6942_v23  ;;  %v6933_v5 = vadd.f32 %v15025_v25, %v6915_v13  ;;  %v11543_v14 = vld [vmem:[%s21901_s2 + $0xcc8] sm:$0xff]  ;;  %v11573_v25 = vld [vmem:[%s21901_s2 + $0xdb8] sm:$0xff] }
 0x39d   : > { %8202 = vmatprep.mubr.f32.mxu1 %v20461_v59  ;;  %6955 = vst [vmem:[#allocation3 + $0x20] sm:$0xff] %v6943_v20  ;;  %v6934_v63 = vadd.f32 %v15027_v21, %v6919_v11  ;;  %v6638_v12 = vpop.f32.mrb[52].mxu0  ;;  %v14602_v20 = vpack.c.bf16 %v11569_v51, %v11566_v18  ;;  %v14604_v56 = vpack.c.bf16 %v11576_v28, %v11573_v25  ;;  %v11755_v18 = vld [vmem:[%s21902_s3 + $0x128] sm:$0xff]  ;;  %v11772_v51 = vld [vmem:[%s21902_s3 + $0x1b0] sm:$0xff] }
 0x39e   : > { %v6945_v8 = vmax.f32 %v6933_v5, 0.0  ;;  %v15029_v45 = vadd.f32 %v19132_v33, %v6638_v12  ;;  %v6640_v53 = vpop.f32.mrb[53].mxu0  ;;  %v11575_v5 = vld [vmem:[%s21901_s2 + $0xdc8] sm:$0xff] }
 0x39f   : > { %v6946_v42 = vmax.f32 %v6934_v63, 0.0  ;;  %v15031_v57 = vadd.f32 %v19135_v4, %v6640_v53  ;;  %v14584_v4 = vpack.c.bf16 %v11546_v37, %v11543_v14  ;;  %v14606_v53 = vpack.c.bf16 %v11575_v5, %v11572_v19  ;;  %v11588_v14 = vld [vmem:[%s21901_s2 + $0xe30] sm:$0xff]  ;;  %v11757_v19 = vld [vmem:[%s21902_s3 + $0x138] sm:$0xff]  ;;  %v11774_v5 = vld [vmem:[%s21902_s3 + $0x1c0] sm:$0xff] }
 0x3a0   : > { %11534 = vmatmul.mubr.msk.f32.vlgmr.msra.gmra.mrb[104].mxu1 %vm1385_vm2, %v6970_v7  ;;  %6957 = vst [vmem:[#allocation3 + $0x30] sm:$0xff] %v6945_v8  ;;  %v6936_v35 = vadd.f32 %v15029_v45, %v6915_v13  ;;  %v11557_v13 = vld [vmem:[%s21901_s2 + $0xd38] sm:$0xff]  ;;  %v11579_v8 = vld [vmem:[%s21901_s2 + $0xde8] sm:$0xff]  ;;  %v11582_v45 = vld [vmem:[%s21901_s2 + $0xe00] sm:$0xff] }
 0x3a1   : > { %14579 = vmatpush3.bf16.msra.mxu1 %v14576_v31  ;;  %8208 = vmatprep.mubr.f32.mxu1 %v20461_v59  ;;  %6958 = vst [vmem:[#allocation3 + $0x38] sm:$0xff] %v6946_v42  ;;  %v6937_v33 = vadd.f32 %v15031_v57, %v6919_v11  ;;  %v11561_v11 = vld [vmem:[%s21901_s2 + $0xd58] sm:$0xff]  ;;  %v14594_v1 = vpack.c.bf16 %v11557_v13, %v11554_v62 }
 0x3a2   : > { %v6948_v40 = vmax.f32 %v6936_v35, 0.0  ;;  %14581 = vmatprep.subr.bf16.mxu1 %v14580_v3  ;;  %v14596_v52 = vpack.c.bf16 %v11564_v43, %v11561_v11  ;;  %v11581_v42 = vld [vmem:[%s21901_s2 + $0xdf8] sm:$0xff] }
 0x3a3   : > { %v6949_v55 = vmax.f32 %v6937_v33, 0.0  ;;  %v11585_v57 = vld [vmem:[%s21901_s2 + $0xe18] sm:$0xff]  ;;  %v11584_v33 = vld [vmem:[%s21901_s2 + $0xe10] sm:$0xff] }
 0x3a4   : > { %11535 = vmatmul.mubr.msk.f32.gmra.mrb[106].mxu1 %vm1385_vm2, %v6975_v9  ;;  %6960 = vst [vmem:[#allocation3 + $0x48] sm:$0xff] %v6948_v40  ;;  %v14612_v35 = vpack.c.bf16 %v11588_v14, %v11585_v57  ;;  %v11587_v40 = vld [vmem:[%s21901_s2 + $0xe28] sm:$0xff]  ;;  %v11605_v62 = vld [vmem:[%s21901_s2 + $0xeb8] sm:$0xff] }
 0x3a5   : > { %8214 = vmatprep.mubr.f32.mxu1 %v20461_v59  ;;  %6961 = vst [vmem:[#allocation3 + $0x50] sm:$0xff] %v6949_v55  ;;  %14583 = vmatpush3.bf16.msra.mxu1 %v14580_v3  ;;  %v14608_v3 = vpack.c.bf16 %v11582_v45, %v11579_v8  ;;  %v14614_v55 = vpack.c.bf16 %v11587_v40, %v11584_v33  ;;  %v11617_v33 = vld [vmem:[%s21901_s2 + $0xf18] sm:$0xff] }
 0x3a6   : > { %14585 = vmatprep.subr.bf16.mxu1 %v14584_v4  ;;  %v11591_v4 = vld [vmem:[%s21901_s2 + $0xe48] sm:$0xff] }
 0x3a8   : > { %11536 = vmatmul.mubr.msk.f32.gmra.mrb[108].mxu1 %vm1385_vm2, %v6980_v39 }
 0x3a9   : > { %8220 = vmatprep.mubr.f32.mxu1 %v20461_v59  ;;  %v14586_v59 = vpack.c.bf16 %v11545_v50, %v11542_v22  ;;  %v11590_v22 = vld [vmem:[%s21901_s2 + $0xe40] sm:$0xff]  ;;  %v11593_v50 = vld [vmem:[%s21901_s2 + $0xe58] sm:$0xff] }
 0x3aa   : > { %v14618_v16 = vpack.c.bf16 %v11593_v50, %v11590_v22  ;;  %v11776_v50 = vld [vmem:[%s21902_s3 + $0x1d0] sm:$0xff] }
 0x3ac   : > { %11537 = vmatmul.mubr.msk.f32.gmra.mrb[110].mxu1 %vm1385_vm2, %v6985_v17 }
 0x3ad   : > { %13054 = vmatprep.mubr.msk.f32.mxu1 %vm1385_vm2, %v6970_v7  ;;  %v11578_v7 = vld [vmem:[%s21901_s2 + $0xde0] sm:$0xff] }
 0x3ae   : > { %v14610_v37 = vpack.c.bf16 %v11581_v42, %v11578_v7  ;;  %v11775_v7 = vld [vmem:[%s21902_s3 + $0x1c8] sm:$0xff] }
 0x3b0   : > { %13055 = vmatmul.mubr.msk.f32.vlgmr.msra.gmra.mrb[120].mxu1 %vm1385_vm2, %v6975_v9  ;;  %v11594_v9 = vld [vmem:[%s21901_s2 + $0xe60] sm:$0xff] }
 0x3b1   : > { %14587 = vmatpush1.bf16.msra.mxu1 %v14586_v59  ;;  %13057 = vmatprep.mubr.msk.f32.mxu1 %vm1385_vm2, %v6980_v39  ;;  %v12362_v6 = vpop.f32.mrb[54].mxu0  ;;  %v14616_v39 = vpack.c.bf16 %v11594_v9, %v11591_v4  ;;  %v14800_v4 = vpack.c.bf16 %v11775_v7, %v11774_v5  ;;  %v11758_v9 = vld [vmem:[%s21902_s3 + $0x140] sm:$0xff] }
 0x3b2   : > { %14589 = vmatprep.subr.bf16.mxu1 %v14588_v47  ;;  %v12363_v34 = vpop.f32.mrb[55].mxu0  ;;  %v11596_v47 = vld [vmem:[%s21901_s2 + $0xe70] sm:$0xff] }
 0x3b3   : > { %v20805_v60 = vadd.f32 %v12363_v34, %v12362_v6  ;;  %v14622_v54 = vpack.c.bf16 %v11599_v30, %v11596_v47  ;;  %v14624_v6 = vpack.c.bf16 %v11606_v36, %v11603_v41  ;;  %v11609_v34 = vld [vmem:[%s21901_s2 + $0xed8] sm:$0xff]  ;;  %v11624_v30 = vld [vmem:[%s21901_s2 + $0xf50] sm:$0xff] }
 0x3b4   : > { %13058 = vmatmul.mubr.msk.f32.gmra.mrb[122].mxu1 %vm1385_vm2, %v6985_v17  ;;  %v11597_v17 = vld [vmem:[%s21901_s2 + $0xe78] sm:$0xff] }
 0x3b5   : > { %14591 = vmatpush1.bf16.msra.mxu1 %v14590_v10  ;;  %8782 = vmatprep.mubr.f32.mxu1 %v20280_v32  ;;  %v12365_v31 = vpop.f32.mrb[56].mxu0  ;;  %v11570_v32 = vld [vmem:[%s21901_s2 + $0xda0] sm:$0xff]  ;;  %v14620_v59 = vpack.c.bf16 %v11600_v61, %v11597_v17  ;;  %v11777_v17 = vld [vmem:[%s21902_s3 + $0x1d8] sm:$0xff] }
 0x3b6   : > { %14593 = vmatprep.subr.bf16.mxu1 %v14592_v48  ;;  %v12366_v46 = vpop.f32.mrb[57].mxu0  ;;  %v14600_v27 = vpack.c.bf16 %v11570_v32, %v11567_v0  ;;  %v11602_v48 = vld [vmem:[%s21901_s2 + $0xea0] sm:$0xff]  ;;  %v11621_v47 = vld [vmem:[%s21901_s2 + $0xf38] sm:$0xff] }
 0x3b7   : > { %v20821_v38 = vadd.f32 %v12366_v46, %v12365_v31  ;;  %v11608_v31 = vld [vmem:[%s21901_s2 + $0xed0] sm:$0xff]  ;;  %v11771_v46 = vld [vmem:[%s21902_s3 + $0x1a8] sm:$0xff]  ;;  %v11754_v0 = vld [vmem:[%s21902_s3 + $0x120] sm:$0xff] }
 0x3b9   : > { %14595 = vmatpush1.bf16.msra.mxu1 %v14594_v1  ;;  %v12368_v44 = vpop.f32.mrb[58].mxu0  ;;  %v11612_v1 = vld [vmem:[%s21901_s2 + $0xef0] sm:$0xff] }
 0x3ba   : > { %14597 = vmatprep.subr.bf16.mxu1 %v14596_v52  ;;  %v12369_v24 = vpop.f32.mrb[59].mxu0  ;;  %v11611_v52 = vld [vmem:[%s21901_s2 + $0xee8] sm:$0xff]  ;;  %v14628_v25 = vpack.c.bf16 %v11612_v1, %v11609_v34  ;;  %v11760_v34 = vld [vmem:[%s21902_s3 + $0x150] sm:$0xff] }
 0x3bb   : > { %v20835_v23 = vadd.f32 %v12369_v24, %v12368_v44  ;;  %v11773_v24 = vld [vmem:[%s21902_s3 + $0x1b8] sm:$0xff]  ;;  %v14630_v57 = vpack.c.bf16 %v11611_v52, %v11608_v31  ;;  %v11778_v31 = vld [vmem:[%s21902_s3 + $0x1e0] sm:$0xff]  ;;  %v11779_v52 = vld [vmem:[%s21902_s3 + $0x1e8] sm:$0xff] }
 0x3bd   : > { %14599 = vmatpush1.bf16.msra.mxu1 %v14598_v2  ;;  %v12371_v21 = vpop.f32.mrb[60].mxu0  ;;  %v14626_v2 = vpack.c.bf16 %v11605_v62, %v11602_v48  ;;  %v11623_v48 = vld [vmem:[%s21901_s2 + $0xf48] sm:$0xff] }
 0x3be   : > { %14601 = vmatprep.subr.bf16.mxu1 %v14600_v27  ;;  %v12372_v63 = vpop.f32.mrb[61].mxu0  ;;  %v14792_v27 = vpack.c.bf16 %v11771_v46, %v11770_v58 }
 0x3bf   : > { %v20849_v12 = vadd.f32 %v12372_v63, %v12371_v21  ;;  %v14796_v21 = vpack.c.bf16 %v11773_v24, %v11772_v51 }
 0x3c0   : > { %14793 = vmatprep.subr.bf16.mxu0 %v14792_v27 }
 0x3c1   : > { %14603 = vmatpush1.bf16.msra.mxu1 %v14602_v20  ;;  %v14794_v20 = vpack.c.bf16 %v11755_v18, %v11754_v0  ;;  %v11627_v0 = vld [vmem:[%s21901_s2 + $0xf68] sm:$0xff] }
 0x3c2   : > { %14605 = vmatprep.subr.bf16.mxu1 %v14604_v56  ;;  %v11756_v56 = vld [vmem:[%s21902_s3 + $0x130] sm:$0xff] }
 0x3c3   : > { %14795 = vmatpush3.bf16.msra.mxu0 %v14794_v20  ;;  %v14798_v14 = vpack.c.bf16 %v11757_v19, %v11756_v56  ;;  %v11636_v56 = vld [vmem:[%s21901_s2 + $0xfb0] sm:$0xff] }
 0x3c4   : > { %14797 = vmatprep.subr.bf16.mxu0 %v14796_v21  ;;  %v11633_v21 = vld [vmem:[%s21901_s2 + $0xf98] sm:$0xff] }
 0x3c5   : > { %14607 = vmatpush1.bf16.msra.mxu1 %v14606_v53  ;;  %v11615_v53 = vld [vmem:[%s21901_s2 + $0xf08] sm:$0xff] }
 0x3c6   : > { %14609 = vmatprep.subr.bf16.mxu1 %v14608_v3  ;;  %v11618_v3 = vld [vmem:[%s21901_s2 + $0xf20] sm:$0xff] }
 0x3c7   : > { %14799 = vmatpush3.bf16.msra.mxu0 %v14798_v14  ;;  %v11648_v14 = vld [vmem:[%s21901_s2 + $0x1010] sm:$0xff] }
 0x3c8   : > { %14801 = vmatprep.subr.bf16.mxu0 %v14800_v4  ;;  %v11647_v4 = vld [vmem:[%s21901_s2 + $0x1008] sm:$0xff] }
 0x3c9   : > { %14611 = vmatpush1.bf16.msra.mxu1 %v14610_v37 }
 0x3ca   : > { %14613 = vmatprep.subr.bf16.mxu1 %v14612_v35 }
 0x3cd   : > { %14615 = vmatpush1.bf16.msra.mxu1 %v14614_v55  ;;  %v11759_v55 = vld [vmem:[%s21902_s3 + $0x148] sm:$0xff] }
 0x3ce   : > { %14617 = vmatprep.subr.bf16.mxu1 %v14616_v39  ;;  %v14632_v39 = vpack.c.bf16 %v11618_v3, %v11615_v53  ;;  %v11642_v53 = vld [vmem:[%s21901_s2 + $0xfe0] sm:$0xff] }
 0x3d1   : > { %14619 = vmatpush1.bf16.msra.mxu1 %v14618_v16  ;;  %v12414_v10 = vpop.f32.mrb[62].mxu0 }
 0x3d2   : > { %14621 = vmatprep.subr.bf16.mxu1 %v14620_v59  ;;  %v12415_v13 = vpop.f32.mrb[63].mxu0 }
 0x3d3   : > { %v12318_v11 = vpop.f32.mrb[112].mxu1  ;;  %v12416_v43 = vadd.f32 %v12415_v13, %v12414_v10  ;;  %v14802_v10 = vpack.c.bf16 %v11759_v55, %v11758_v9  ;;  %v14804_v13 = vpack.c.bf16 %v11777_v17, %v11776_v50  ;;  %v11651_v9 = vld [vmem:[%s21901_s2 + $0x1028] sm:$0xff]  ;;  %v11654_v55 = vld [vmem:[%s21901_s2 + $0x1040] sm:$0xff] }
 0x3d4   : > { %v12319_v26 = vpop.f32.mrb[113].mxu1 }
 0x3d5   : > { %14623 = vmatpush1.bf16.msra.mxu1 %v14622_v54  ;;  %v12320_v32 = vadd.f32 %v12319_v26, %v12318_v11  ;;  %v12417_v44 = vpop.f32.mrb[64].mxu0  ;;  %v11620_v54 = vld [vmem:[%s21901_s2 + $0xf30] sm:$0xff]  ;;  %v11761_v11 = vld [vmem:[%s21902_s3 + $0x158] sm:$0xff]  ;;  %14803 = vmatpush3.bf16.msra.mxu0 %v14802_v10  ;;  %v15410_v10 = vld [vmem:[#allocation2 + $0x80] sm:$0xff] }
 0x3d6   : > { %14625 = vmatprep.subr.bf16.mxu1 %v14624_v6  ;;  %v12418_v28 = vpop.f32.mrb[65].mxu0  ;;  %v14806_v27 = vpack.c.bf16 %v11761_v11, %v11760_v34  ;;  %14805 = vmatprep.subr.bf16.mxu0 %v14804_v13  ;;  %v11656_v34 = vld [vmem:[%s21901_s2 + $0x1050] sm:$0xff]  ;;  %v11659_v11 = vld [vmem:[%s21901_s2 + $0x1068] sm:$0xff] }
 0x3d7   : > { %v7845_v63 = vadd.f32 %v20805_v60, %v12320_v32  ;;  %v12321_v8 = vpop.f32.mrb[114].mxu1  ;;  %v12419_v45 = vadd.f32 %v12418_v28, %v12417_v44  ;;  %v11614_v60 = vld [vmem:[%s21901_s2 + $0xf00] sm:$0xff]  ;;  %v14638_v44 = vpack.c.bf16 %v11623_v48, %v11620_v54  ;;  %v11629_v28 = vld [vmem:[%s21901_s2 + $0xf78] sm:$0xff]  ;;  %v15409_v54 = vld [vmem:[#allocation2 + $0x50] sm:$0xff] }
 0x3d8   : > { %v12322_v42 = vpop.f32.mrb[115].mxu1  ;;  %v14634_v36 = vpack.c.bf16 %v11617_v33, %v11614_v60  ;;  %v11630_v32 = vld [vmem:[%s21901_s2 + $0xf80] sm:$0xff]  ;;  %v11645_v60 = vld [vmem:[%s21901_s2 + $0xff8] sm:$0xff] }
 0x3d9   : > { %14627 = vmatpush1.bf16.msra.mxu1 %v14626_v2  ;;  %v12323_v37 = vadd.f32 %v12322_v42, %v12321_v8  ;;  %v20963_v35 = vadd.f32 %v12416_v43, %v7845_v63  ;;  %v12420_v40 = vpop.f32.mrb[66].mxu0  ;;  %v14636_v43 = vpack.c.bf16 %v11624_v30, %v11621_v47  ;;  %v14640_v24 = vpack.c.bf16 %v11630_v32, %v11627_v0  ;;  %v11635_v8 = vld [vmem:[%s21901_s2 + $0xfa8] sm:$0xff]  ;;  %v11638_v42 = vld [vmem:[%s21901_s2 + $0xfc0] sm:$0xff] }
 0x3da   : > { %14629 = vmatprep.subr.bf16.mxu1 %v14628_v25  ;;  %v12421_v22 = vpop.f32.mrb[67].mxu0  ;;  %v11626_v25 = vld [vmem:[%s21901_s2 + $0xf60] sm:$0xff]  ;;  %14807 = vmatpush3.bf16.msra.mxu0 %v14806_v27  ;;  %v14644_v63 = vpack.c.bf16 %v11636_v56, %v11633_v21  ;;  %v14652_v33 = vpack.c.bf16 %v11648_v14, %v11645_v60  ;;  %v11668_v56 = vld [vmem:[%s21901_s2 + $0x10b0] sm:$0xff] }
 0x3db   : > { %v7850_v61 = vadd.f32 %v20821_v38, %v12323_v37  ;;  %v12324_v16 = vpop.f32.mrb[116].mxu1  ;;  %v12422_v59 = vadd.f32 %v12421_v22, %v12420_v40  ;;  %v14642_v5 = vpack.c.bf16 %v11629_v28, %v11626_v25  ;;  %v11644_v40 = vld [vmem:[%s21901_s2 + $0xff0] sm:$0xff]  ;;  %v15408_v22 = vld [vmem:[#allocation2 + $0x58] sm:$0xff] }
 0x3dc   : > { %v12325_v41 = vpop.f32.mrb[117].mxu1  ;;  %v14654_v50 = vpack.c.bf16 %v11647_v4, %v11644_v40  ;;  %v11684_v60 = vld [vmem:[%s21901_s2 + $0x1130] sm:$0xff]  ;;  %v11687_v40 = vld [vmem:[%s21901_s2 + $0x1148] sm:$0xff]  ;;  %v11690_v4 = vld [vmem:[%s21901_s2 + $0x1160] sm:$0xff] }
 0x3dd   : > { %14631 = vmatpush1.bf16.msra.mxu1 %v14630_v57  ;;  %v12326_v38 = vadd.f32 %v12325_v41, %v12324_v16  ;;  %v20990_v6 = vadd.f32 %v12419_v45, %v7850_v61  ;;  %v12423_v62 = vpop.f32.mrb[68].mxu0  ;;  %v11639_v45 = vld [vmem:[%s21901_s2 + $0xfc8] sm:$0xff]  ;;  %v11641_v57 = vld [vmem:[%s21901_s2 + $0xfd8] sm:$0xff]  ;;  %v14656_v61 = vpack.c.bf16 %v11654_v55, %v11651_v9  ;;  %v11650_v16 = vld [vmem:[%s21901_s2 + $0x1020] sm:$0xff]  ;;  %v14680_v55 = vpack.c.bf16 %v11690_v4, %v11687_v40 }
 0x3de   : > { %14633 = vmatprep.subr.bf16.mxu1 %v14632_v39  ;;  %v12424_v1 = vpop.f32.mrb[69].mxu0  ;;  %v14648_v7 = vpack.c.bf16 %v11642_v53, %v11639_v45  ;;  %v14650_v37 = vpack.c.bf16 %v11641_v57, %v11638_v42  ;;  %v15407_v39 = vld [vmem:[#allocation2 + $0x28] sm:$0xff]  ;;  %v11657_v41 = vld [vmem:[%s21901_s2 + $0x1058] sm:$0xff] }
 0x3df   : > { %v7855_v26 = vadd.f32 %v20835_v23, %v12326_v38  ;;  %v12327_v58 = vpop.f32.mrb[118].mxu1  ;;  %v12425_v46 = vadd.f32 %v12424_v1, %v12423_v62  ;;  %v14808_v23 = vpack.c.bf16 %v11779_v52, %v11778_v31  ;;  %v11663_v31 = vld [vmem:[%s21901_s2 + $0x1088] sm:$0xff]  ;;  %v15411_v52 = vld [vmem:[#allocation2 + $0x78] sm:$0xff] }
 0x3e0   : > { %v12328_v2 = vpop.f32.mrb[119].mxu1  ;;  %v11677_v42 = vld [vmem:[%s21901_s2 + $0x10f8] sm:$0xff] }
 0x3e1   : > { %14635 = vmatpush1.bf16.msra.mxu1 %v14634_v36  ;;  %v12329_v18 = vadd.f32 %v12328_v2, %v12327_v58  ;;  %v21014_v51 = vadd.f32 %v12422_v59, %v7855_v26  ;;  %14809 = vmatprep.subr.bf16.mxu0 %v14808_v23  ;;  %v11653_v59 = vld [vmem:[%s21901_s2 + $0x1038] sm:$0xff]  ;;  %v11660_v36 = vld [vmem:[%s21901_s2 + $0x1070] sm:$0xff]  ;;  %v21094_v26 = vld [vmem:[#allocation2 + $0xa0] sm:$0xff]  ;;  %v14662_v58 = vpack.c.bf16 %v11659_v11, %v11656_v34 }
 0x3e2   : > { %14637 = vmatprep.subr.bf16.mxu1 %v14636_v43  ;;  %v14658_v38 = vpack.c.bf16 %v11653_v59, %v11650_v16  ;;  %v14660_v13 = vpack.c.bf16 %v11660_v36, %v11657_v41  ;;  %v11662_v2 = vld [vmem:[%s21901_s2 + $0x1080] sm:$0xff]  ;;  %v11669_v23 = vld [vmem:[%s21901_s2 + $0x10b8] sm:$0xff]  ;;  %v11692_v59 = vld [vmem:[%s21901_s2 + $0x1170] sm:$0xff] }
 0x3e3   : > { %v7860_v20 = vadd.f32 %v20849_v12, %v12329_v18  ;;  %v11632_v12 = vld [vmem:[%s21901_s2 + $0xf90] sm:$0xff]  ;;  %v11681_v57 = vld [vmem:[%s21901_s2 + $0x1118] sm:$0xff]  ;;  %v11702_v41 = vld [vmem:[%s21901_s2 + $0x11c0] sm:$0xff] }
 0x3e4   : > { %v14646_v3 = vpack.c.bf16 %v11635_v8, %v11632_v12  ;;  %v11675_v8 = vld [vmem:[%s21901_s2 + $0x10e8] sm:$0xff]  ;;  %v14676_v14 = vpack.c.bf16 %v11684_v60, %v11681_v57  ;;  %v11705_v34 = vld [vmem:[%s21901_s2 + $0x11d8] sm:$0xff]  ;;  %v11708_v11 = vld [vmem:[%s21901_s2 + $0x11f0] sm:$0xff] }
 0x3e5   : > { %14639 = vmatpush1.bf16.msra.mxu1 %v14638_v44  ;;  %v21029_v19 = vadd.f32 %v12425_v46, %v7860_v20  ;;  %v11665_v44 = vld [vmem:[%s21901_s2 + $0x1098] sm:$0xff] }
 0x3e6   : > { %14641 = vmatprep.subr.bf16.mxu1 %v14640_v24  ;;  %v15413_v24 = vld [vmem:[#allocation2 + $0x40] sm:$0xff]  ;;  %v14666_v25 = vpack.c.bf16 %v11665_v44, %v11662_v2 }
 0x3e7   : > { %v11714_v2 = vld [vmem:[%s21901_s2 + $0x1220] sm:$0xff] }
 0x3e9   : > { %14643 = vmatpush1.bf16.msra.mxu1 %v14642_v5  ;;  %v11671_v5 = vld [vmem:[%s21901_s2 + $0x10c8] sm:$0xff] }
 0x3ea   : > { %14645 = vmatprep.subr.bf16.mxu1 %v14644_v63  ;;  %v14670_v45 = vpack.c.bf16 %v11671_v5, %v11668_v56 }
 0x3ed   : > { %14647 = vmatpush1.bf16.msra.mxu1 %v14646_v3 }
 0x3ee   : > { %14649 = vmatprep.subr.bf16.mxu1 %v14648_v7  ;;  %v11674_v7 = vld [vmem:[%s21901_s2 + $0x10e0] sm:$0xff] }
 0x3f0   : > { %8783 = vmatmul.mubr.f32.vlgmr.msra.gmra.mrb[104].mxu1 %v15407_v39  ;;  %v11686_v39 = vld [vmem:[%s21901_s2 + $0x1140] sm:$0xff] }
 0x3f1   : > { %8788 = vmatprep.mubr.f32.mxu1 %v15408_v22  ;;  %14651 = vmatpush1.bf16.msra.mxu1 %v14650_v37  ;;  %v12458_v17 = vpop.f32.mrb[70].mxu0  ;;  %v11680_v37 = vld [vmem:[%s21901_s2 + $0x1110] sm:$0xff]  ;;  %v11689_v22 = vld [vmem:[%s21901_s2 + $0x1158] sm:$0xff] }
 0x3f2   : > { %14653 = vmatprep.subr.bf16.mxu1 %v14652_v33  ;;  %v12459_v47 = vpop.f32.mrb[71].mxu0  ;;  %v11683_v33 = vld [vmem:[%s21901_s2 + $0x1128] sm:$0xff] }
 0x3f3   : > { %v12460_v30 = vadd.f32 %v12459_v47, %v12458_v17  ;;  %v14678_v9 = vpack.c.bf16 %v11683_v33, %v11680_v37  ;;  %v11696_v17 = vld [vmem:[%s21901_s2 + $0x1190] sm:$0xff]  ;;  %v11695_v47 = vld [vmem:[%s21901_s2 + $0x1188] sm:$0xff]  ;;  %v11729_v37 = vld [vmem:[%s21901_s2 + $0x1298] sm:$0xff] }
 0x3f4   : > { %8789 = vmatmul.mubr.f32.gmra.mrb[106].mxu1 %v15409_v54  ;;  %v14686_v36 = vpack.c.bf16 %v11695_v47, %v11692_v59  ;;  %v11732_v33 = vld [vmem:[%s21901_s2 + $0x12b0] sm:$0xff]  ;;  %v11741_v59 = vld [vmem:[%s21901_s2 + $0x12f8] sm:$0xff] }
 0x3f5   : > { %8794 = vmatprep.mubr.f32.mxu1 %v15410_v10  ;;  %14655 = vmatpush1.bf16.msra.mxu1 %v14654_v50  ;;  %v21080_v48 = vadd.f32 %v20963_v35, %v12460_v30  ;;  %v12461_v62 = vpop.f32.mrb[72].mxu0  ;;  %v11666_v35 = vld [vmem:[%s21901_s2 + $0x10a0] sm:$0xff]  ;;  %v11693_v50 = vld [vmem:[%s21901_s2 + $0x1178] sm:$0xff]  ;;  %v11699_v30 = vld [vmem:[%s21901_s2 + $0x11a8] sm:$0xff]  ;;  %v14708_v4 = vpack.c.bf16 %v11732_v33, %v11729_v37 }
 0x3f6   : > { %14657 = vmatprep.subr.bf16.mxu1 %v14656_v61  ;;  %v12462_v43 = vpop.f32.mrb[73].mxu0  ;;  %v14664_v32 = vpack.c.bf16 %v11666_v35, %v11663_v31  ;;  %v14682_v61 = vpack.c.bf16 %v11689_v22, %v11686_v39  ;;  %v14684_v16 = vpack.c.bf16 %v11696_v17, %v11693_v50  ;;  %v14688_v10 = vpack.c.bf16 %v11702_v41, %v11699_v30  ;;  %v11735_v39 = vld [vmem:[%s21901_s2 + $0x12c8] sm:$0xff]  ;;  %v11738_v22 = vld [vmem:[%s21901_s2 + $0x12e0] sm:$0xff]  ;;  %v11744_v47 = vld [vmem:[%s21901_s2 + $0x1310] sm:$0xff] }
 0x3f7   : > { %v12463_v1 = vadd.f32 %v12462_v43, %v12461_v62  ;;  %v11701_v62 = vld [vmem:[%s21901_s2 + $0x11b8] sm:$0xff]  ;;  %v14692_v35 = vpack.c.bf16 %v11708_v11, %v11705_v34  ;;  %v14712_v17 = vpack.c.bf16 %v11738_v22, %v11735_v39  ;;  %v14716_v41 = vpack.c.bf16 %v11744_v47, %v11741_v59  ;;  %v11764_v37 = vld [vmem:[%s21902_s3 + $0x170] sm:$0xff]  ;;  %v11766_v39 = vld [vmem:[%s21902_s3 + $0x180] sm:$0xff] }
 0x3f8   : > { %8795 = vmatmul.mubr.f32.gmra.mrb[108].mxu1 %v15411_v52  ;;  %v11704_v52 = vld [vmem:[%s21901_s2 + $0x11d0] sm:$0xff]  ;;  %v11765_v33 = vld [vmem:[%s21902_s3 + $0x178] sm:$0xff]  ;;  %v11767_v22 = vld [vmem:[%s21902_s3 + $0x188] sm:$0xff] }
 0x3f9   : > { %14659 = vmatpush1.bf16.msra.mxu1 %v14658_v38  ;;  %8800 = vmatprep.mubr.f32.mxu1 %v21094_v26  ;;  %v21098_v46 = vadd.f32 %v20990_v6, %v12463_v1  ;;  %v12464_v0 = vpop.f32.mrb[74].mxu0  ;;  %v11672_v6 = vld [vmem:[%s21901_s2 + $0x10d0] sm:$0xff]  ;;  %v11698_v38 = vld [vmem:[%s21901_s2 + $0x11a0] sm:$0xff]  ;;  %v11769_v47 = vld [vmem:[%s21902_s3 + $0x198] sm:$0xff] }
 0x3fa   : > { %14661 = vmatprep.subr.bf16.mxu1 %v14660_v13  ;;  %v12465_v27 = vpop.f32.mrb[75].mxu0  ;;  %v14668_v21 = vpack.c.bf16 %v11672_v6, %v11669_v23  ;;  %v14690_v1 = vpack.c.bf16 %v11701_v62, %v11698_v38  ;;  %v11710_v6 = vld [vmem:[%s21901_s2 + $0x1200] sm:$0xff]  ;;  %v11739_v38 = vld [vmem:[%s21901_s2 + $0x12e8] sm:$0xff]  ;;  %v15414_v62 = vld [vmem:[#allocation2 + $0x38] sm:$0xff] }
 0x3fb   : > { %v12466_v18 = vadd.f32 %v12465_v27, %v12464_v0  ;;  %v11768_v59 = vld [vmem:[%s21902_s3 + $0x190] sm:$0xff] }
 0x3fc   : > { %8801 = vmatmul.mubr.f32.gmra.mrb[110].mxu1 %v21094_v26 }
 0x3fd   : > { %14663 = vmatpush1.bf16.msra.mxu1 %v14662_v58  ;;  %8871 = vmatprep.mubr.f32.mxu1 %v15413_v24  ;;  %v21114_v28 = vadd.f32 %v21014_v51, %v12466_v18  ;;  %v12467_v20 = vpop.f32.mrb[76].mxu0  ;;  %v11678_v51 = vld [vmem:[%s21901_s2 + $0x1100] sm:$0xff]  ;;  %v11707_v58 = vld [vmem:[%s21901_s2 + $0x11e8] sm:$0xff]  ;;  %v11713_v24 = vld [vmem:[%s21901_s2 + $0x1218] sm:$0xff] }
 0x3fe   : > { %14665 = vmatprep.subr.bf16.mxu1 %v14664_v32  ;;  %v12468_v63 = vpop.f32.mrb[77].mxu0  ;;  %v14672_v3 = vpack.c.bf16 %v11678_v51, %v11675_v8  ;;  %v11711_v32 = vld [vmem:[%s21901_s2 + $0x1208] sm:$0xff]  ;;  %v14694_v27 = vpack.c.bf16 %v11707_v58, %v11704_v52  ;;  %v14698_v5 = vpack.c.bf16 %v11713_v24, %v11710_v6  ;;  %v11716_v8 = vld [vmem:[%s21901_s2 + $0x1230] sm:$0xff]  ;;  %v15416_v52 = vld [vmem:[#allocation2 + $0x60] sm:$0xff] }
 0x3ff   : > { %v12469_v12 = vadd.f32 %v12468_v63, %v12467_v20  ;;  %v14696_v23 = vpack.c.bf16 %v11714_v2, %v11711_v32  ;;  %v11717_v20 = vld [vmem:[%s21901_s2 + $0x1238] sm:$0xff]  ;;  %v11719_v51 = vld [vmem:[%s21901_s2 + $0x1248] sm:$0xff]  ;;  %v15417_v58 = vld [vmem:[#allocation2 + $0x90] sm:$0xff] }
 0x400   : > { %v14702_v57 = vpack.c.bf16 %v11719_v51, %v11716_v8  ;;  %v8486_v8 = vld [vmem:[#allocation2 + $0x48] sm:$0xff] }
 0x401   : > { %14667 = vmatpush1.bf16.msra.mxu1 %v14666_v25  ;;  %v21129_v53 = vadd.f32 %v21029_v19, %v12469_v12  ;;  %v14674_v19 = vpack.c.bf16 %v11677_v42, %v11674_v7  ;;  %v11726_v7 = vld [vmem:[%s21901_s2 + $0x1280] sm:$0xff] }
 0x402   : > { %14669 = vmatprep.subr.bf16.mxu1 %v14668_v21  ;;  %v11720_v21 = vld [vmem:[%s21901_s2 + $0x1250] sm:$0xff] }
 0x403   : > { %v14700_v12 = vpack.c.bf16 %v11720_v21, %v11717_v20  ;;  %v11745_v21 = vld [vmem:[%s21901_s2 + $0x1318] sm:$0xff] }
 0x405   : > { %14671 = vmatpush1.bf16.msra.mxu1 %v14670_v45 }
 0x406   : > { %14673 = vmatprep.subr.bf16.mxu1 %v14672_v3  ;;  %v11723_v3 = vld [vmem:[%s21901_s2 + $0x1268] sm:$0xff] }
 0x407   : > { %v14704_v60 = vpack.c.bf16 %v11726_v7, %v11723_v3  ;;  %v8491_v3 = vld [vmem:[#allocation2 + $0x70] sm:$0xff] }
 0x409   : > { %14675 = vmatpush1.bf16.msra.mxu1 %v14674_v19  ;;  %v11722_v19 = vld [vmem:[%s21901_s2 + $0x1260] sm:$0xff] }
 0x40a   : > { %14677 = vmatprep.subr.bf16.mxu1 %v14676_v14  ;;  %v11725_v14 = vld [vmem:[%s21901_s2 + $0x1278] sm:$0xff] }
 0x40b   : > { %v14706_v40 = vpack.c.bf16 %v11725_v14, %v11722_v19  ;;  %v11781_v19 = vld [vmem:[%s21902_s3 + $0x1f8] sm:$0xff] }
 0x40d   : > { %14679 = vmatpush1.bf16.msra.mxu1 %v14678_v9  ;;  %v11728_v9 = vld [vmem:[%s21901_s2 + $0x1290] sm:$0xff] }
 0x40e   : > { %14681 = vmatprep.subr.bf16.mxu1 %v14680_v55  ;;  %v11731_v55 = vld [vmem:[%s21901_s2 + $0x12a8] sm:$0xff] }
 0x40f   : > { %v14710_v50 = vpack.c.bf16 %v11731_v55, %v11728_v9  ;;  %v11783_v9 = vld [vmem:[%s21902_s3 + $0x208] sm:$0xff] }
 0x411   : > { %14683 = vmatpush1.bf16.msra.mxu1 %v14682_v61  ;;  %v12510_v54 = vpop.f32.mrb[78].mxu0  ;;  %v11734_v61 = vld [vmem:[%s21901_s2 + $0x12c0] sm:$0xff] }
 0x412   : > { %14685 = vmatprep.subr.bf16.mxu1 %v14684_v16  ;;  %v12511_v13 = vpop.f32.mrb[79].mxu0  ;;  %v11737_v16 = vld [vmem:[%s21901_s2 + $0x12d8] sm:$0xff] }
 0x413   : > { %v21191_v43 = vadd.f32 %v12511_v13, %v12510_v54  ;;  %v14714_v30 = vpack.c.bf16 %v11737_v16, %v11734_v61  ;;  %v11743_v54 = vld [vmem:[%s21901_s2 + $0x1308] sm:$0xff]  ;;  %v11785_v61 = vld [vmem:[%s21902_s3 + $0x218] sm:$0xff] }
 0x414   : > { %v15415_v13 = vld [vmem:[#allocation2 + $0x68] sm:$0xff] }
 0x415   : > { %14687 = vmatpush1.bf16.msra.mxu1 %v14686_v36  ;;  %v12513_v31 = vpop.f32.mrb[80].mxu0  ;;  %v11740_v36 = vld [vmem:[%s21901_s2 + $0x12f0] sm:$0xff] }
 0x416   : > { %14689 = vmatprep.subr.bf16.mxu1 %v14688_v10  ;;  %v12514_v0 = vpop.f32.mrb[81].mxu0  ;;  %v11736_v10 = vld [vmem:[%s21901_s2 + $0x12d0] sm:$0xff]  ;;  %v14718_v34 = vpack.c.bf16 %v11743_v54, %v11740_v36  ;;  %v11787_v36 = vld [vmem:[%s21902_s3 + $0x228] sm:$0xff] }
 0x417   : > { %v21205_v44 = vadd.f32 %v12514_v0, %v12513_v31  ;;  %v14784_v31 = vpack.c.bf16 %v11739_v38, %v11736_v10  ;;  %v9252_v10 = vld [vmem:[%s21904_s5] sm:$0x7] }
 0x418   : > { %v9257_v38 = vrot.slane %v9252_v10, %v16930_v29 }
 0x419   : > { %14691 = vmatpush1.bf16.msra.mxu1 %v14690_v1  ;;  %v12516_v18 = vpop.f32.mrb[82].mxu0 }
 0x41a   : > { %14693 = vmatprep.subr.bf16.mxu1 %v14692_v35  ;;  %v12517_v25 = vpop.f32.mrb[83].mxu0 }
 0x41b   : > { %v21219_v56 = vadd.f32 %v12517_v25, %v12516_v18 }
 0x41d   : > { %14695 = vmatpush1.bf16.msra.mxu1 %v14694_v27  ;;  %v12519_v63 = vpop.f32.mrb[84].mxu0 }
 0x41e   : > { %14697 = vmatprep.subr.bf16.mxu1 %v14696_v23  ;;  %v12520_v45 = vpop.f32.mrb[85].mxu0  ;;  %v15418_v23 = vld [vmem:[#allocation2 + $0x88] sm:$0xff] }
 0x41f   : > { %v21233_v42 = vadd.f32 %v12520_v45, %v12519_v63 }
 0x421   : > { %14699 = vmatpush1.bf16.msra.mxu1 %v14698_v5 }
 0x422   : > { %14701 = vmatprep.subr.bf16.mxu1 %v14700_v12 }
 0x425   : > { %14703 = vmatpush1.bf16.msra.mxu1 %v14702_v57 }
 0x426   : > { %14705 = vmatprep.subr.bf16.mxu1 %v14704_v60  ;;  %v11780_v60 = vld [vmem:[%s21902_s3 + $0x1f0] sm:$0xff] }
 0x427   : > { %v14812_v14 = vpack.c.bf16 %v11781_v19, %v11780_v60 }
 0x429   : > { %14707 = vmatpush1.bf16.msra.mxu1 %v14706_v40  ;;  %v14814_v40 = vpack.c.bf16 %v11765_v33, %v11764_v37 }
 0x42a   : > { %14709 = vmatprep.subr.bf16.mxu1 %v14708_v4  ;;  %v11782_v4 = vld [vmem:[%s21902_s3 + $0x200] sm:$0xff] }
 0x42b   : > { %v14816_v55 = vpack.c.bf16 %v11783_v9, %v11782_v4 }
 0x42d   : > { %14711 = vmatpush1.bf16.msra.mxu1 %v14710_v50  ;;  %v14818_v50 = vpack.c.bf16 %v11767_v22, %v11766_v39  ;;  %v9321_v22 = vld [vmem:[%s21902_s3] sm:$0xff] }
 0x42e   : > { %14713 = vmatprep.subr.bf16.mxu1 %v14712_v17  ;;  %v11784_v17 = vld [vmem:[%s21902_s3 + $0x210] sm:$0xff] }
 0x42f   : > { %v14820_v16 = vpack.c.bf16 %v11785_v61, %v11784_v17 }
 0x430   : > { %8872 = vmatmul.mubr.f32.vlgmr.msra.gmra.mrb[104].mxu1 %v15414_v62  ;;  %v9261_v62 = vrot.slane %v9252_v10, %v16939_v15  ;;  %v9337_v15 = vld [vmem:[%s21902_s3 + $0x80] sm:$0xff] }
 0x431   : > { %8877 = vmatprep.mubr.f32.mxu1 %v15415_v13  ;;  %14715 = vmatpush1.bf16.msra.mxu1 %v14714_v30  ;;  %v12554_v11 = vpop.f32.mrb[86].mxu0  ;;  %v14822_v30 = vpack.c.bf16 %v11769_v47, %v11768_v59  ;;  %v9323_v59 = vld [vmem:[%s21902_s3 + $0x10] sm:$0xff]  ;;  %v9324_v47 = vld [vmem:[%s21902_s3 + $0x18] sm:$0xff] }
 0x432   : > { %14717 = vmatprep.subr.bf16.mxu1 %v14716_v41  ;;  %v12555_v1 = vpop.f32.mrb[87].mxu0  ;;  %v11786_v41 = vld [vmem:[%s21902_s3 + $0x220] sm:$0xff] }
 0x433   : > { %v12556_v35 = vadd.f32 %v12555_v1, %v12554_v11  ;;  %v14824_v54 = vpack.c.bf16 %v11787_v36, %v11786_v41  ;;  %v9341_v41 = vld [vmem:[%s21902_s3 + $0xa0] sm:$0xff]  ;;  %v9342_v36 = vld [vmem:[%s21902_s3 + $0xa8] sm:$0xff] }
 0x434   : > { %8878 = vmatmul.mubr.f32.gmra.mrb[106].mxu1 %v15416_v52 }
 0x435   : > { %8883 = vmatprep.mubr.f32.mxu1 %v15417_v58  ;;  %14719 = vmatpush1.bf16.msra.mxu1 %v14718_v34  ;;  %v9137_v0 = vadd.f32 %v12556_v35, %v21191_v43  ;;  %v12557_v32 = vpop.f32.mrb[88].mxu0  ;;  %v11742_v43 = vld [vmem:[%s21901_s2 + $0x1300] sm:$0xff]  ;;  %v11789_v35 = vld [vmem:[%s21902_s3 + $0x238] sm:$0xff] }
 0x436   : > { %v12558_v2 = vpop.f32.mrb[89].mxu0  ;;  %14785 = vmatprep.subr.bf16.mxu1 %v14784_v31  ;;  %v14788_v12 = vpack.c.bf16 %v11745_v21, %v11742_v43 }
 0x437   : > { %v12559_v27 = vadd.f32 %v12558_v2, %v12557_v32  ;;  %v21285_v18 = vadd.f32 %v21080_v48, %v9137_v0 }
 0x438   : > { %8884 = vmatmul.mubr.f32.gmra.mrb[108].mxu1 %v15418_v23  ;;  %v9338_v23 = vld [vmem:[%s21902_s3 + $0x88] sm:$0xff] }
 0x439   : > { %8889 = vmatprep.mubr.f32.mxu1 %v21094_v26  ;;  %v9142_v6 = vadd.f32 %v12559_v27, %v21205_v44  ;;  %v12560_v24 = vpop.f32.mrb[90].mxu0  ;;  %v14832_v21 = vpack.c.bf16 %v9338_v23, %v9337_v15  ;;  %v9329_v15 = vld [vmem:[%s21902_s3 + $0x40] sm:$0xff]  ;;  %v9330_v23 = vld [vmem:[%s21902_s3 + $0x48] sm:$0xff] }
 0x43a   : > { %v12561_v25 = vpop.f32.mrb[91].mxu0 }
 0x43b   : > { %v12562_v20 = vadd.f32 %v12561_v25, %v12560_v24  ;;  %v21296_v48 = vadd.f32 %v21098_v46, %v9142_v6 }
 0x43c   : > { %8890 = vmatmul.mubr.f32.gmra.mrb[110].mxu1 %v21094_v26 }
 0x43d   : > { %8960 = vmatprep.mubr.f32.mxu1 %v21094_v26  ;;  %v9147_v44 = vadd.f32 %v12562_v20, %v21219_v56  ;;  %v12563_v5 = vpop.f32.mrb[92].mxu0  ;;  %v8496_v56 = vld [vmem:[#allocation2 + $0x98] sm:$0xff] }
 0x43e   : > { %v12564_v63 = vpop.f32.mrb[93].mxu0 }
 0x43f   : > { %v12565_v51 = vadd.f32 %v12564_v63, %v12563_v5  ;;  %v21302_v45 = vadd.f32 %v21114_v28, %v9147_v44  ;;  %v8501_v28 = vld [vmem:[#allocation2 + $0xc0] sm:$0xff] }
 0x440   : > { %11746 = vmatmul.mubr.msk.f32.vlgmr.msra.gmra.mrb[104].mxu1 %vm1385_vm2, %v8486_v8 }
 0x441   : > { %14787 = vmatpush3.bf16.msra.mxu1 %v14784_v31  ;;  %8966 = vmatprep.mubr.f32.mxu1 %v21094_v26  ;;  %v9152_v46 = vadd.f32 %v12565_v51, %v21233_v42  ;;  %v11763_v42 = vld [vmem:[%s21902_s3 + $0x168] sm:$0xff]  ;;  %v11788_v31 = vld [vmem:[%s21902_s3 + $0x230] sm:$0xff] }
 0x442   : > { %14789 = vmatprep.subr.bf16.mxu1 %v14788_v12  ;;  %v14828_v29 = vpack.c.bf16 %v11789_v35, %v11788_v31  ;;  %v9310_v31 = vld [vmem:[#allocation3 + $0x8] sm:$0xff] }
 0x443   : > { %v21308_v7 = vadd.f32 %v21129_v53, %v9152_v46  ;;  %v11762_v53 = vld [vmem:[%s21902_s3 + $0x160] sm:$0xff] }
 0x444   : > { %11747 = vmatmul.mubr.msk.f32.gmra.mrb[106].mxu1 %vm1385_vm2, %v8491_v3  ;;  %v14810_v57 = vpack.c.bf16 %v11763_v42, %v11762_v53 }
 0x445   : > { %8972 = vmatprep.mubr.f32.mxu1 %v21094_v26  ;;  %14791 = vmatpush3.bf16.msra.mxu1 %v14788_v12 }
 0x446   : > { %14811 = vmatpush3.bf16.msra.mxu0 %v14810_v57 }
 0x447   : > { %14813 = vmatprep.subr.bf16.mxu0 %v14812_v14 }
 0x448   : > { %11748 = vmatmul.mubr.msk.f32.gmra.mrb[108].mxu1 %vm1385_vm2, %v8496_v56 }
 0x449   : > { %8978 = vmatprep.mubr.f32.mxu1 %v21094_v26 }
 0x44a   : > { %14815 = vmatpush3.bf16.msra.mxu0 %v14814_v40 }
 0x44b   : > { %14817 = vmatprep.subr.bf16.mxu0 %v14816_v55 }
 0x44c   : > { %11749 = vmatmul.mubr.msk.f32.gmra.mrb[110].mxu1 %vm1385_vm2, %v8501_v28 }
 0x44d   : > { %13068 = vmatprep.mubr.msk.f32.mxu1 %vm1385_vm2, %v8486_v8 }
 0x44e   : > { %14819 = vmatpush3.bf16.msra.mxu0 %v14818_v50  ;;  %v9340_v50 = vld [vmem:[%s21902_s3 + $0x98] sm:$0xff] }
 0x44f   : > { %14821 = vmatprep.subr.bf16.mxu0 %v14820_v16 }
 0x450   : > { %13069 = vmatmul.mubr.msk.f32.vlgmr.msra.gmra.mrb[120].mxu1 %vm1385_vm2, %v8491_v3 }
 0x451   : > { %13071 = vmatprep.mubr.msk.f32.mxu1 %vm1385_vm2, %v8496_v56  ;;  %v9265_v56 = vrot.slane %v9252_v10, %v16740_v49 }
 0x452   : > { %14823 = vmatpush3.bf16.msra.mxu0 %v14822_v30 }
 0x453   : > { %14825 = vmatprep.subr.bf16.mxu0 %v14824_v54 }
 0x454   : > { %13072 = vmatmul.mubr.msk.f32.gmra.mrb[122].mxu1 %vm1385_vm2, %v8501_v28 }
 0x513   : > { %v8962_v13 = vpop.f32.mrb[104].mxu1 }
 0x514   : > { %v9269_v34 = vadd.f32 %v9257_v38, %v8962_v13  ;;  %v8964_v11 = vpop.f32.mrb[105].mxu1  ;;  %v9326_v13 = vld [vmem:[%s21902_s3 + $0x28] sm:$0xff] }
 0x515   : > { %v9270_v1 = vadd.f32 %v9261_v62, %v8964_v11  ;;  %v9343_v11 = vld [vmem:[%s21902_s3 + $0xb0] sm:$0xff] }
 0x516   : > { %v9281_v52 = vmax.f32 %v9269_v34, 0.0 }
 0x517   : > { %v9282_v58 = vmax.f32 %v9270_v1, 0.0  ;;  %v8968_v0 = vpop.f32.mrb[106].mxu1  ;;  %v9344_v1 = vld [vmem:[%s21902_s3 + $0xb8] sm:$0xff] }
 0x518   : > { %v9272_v32 = vadd.f32 %v9257_v38, %v8968_v0  ;;  %v8970_v2 = vpop.f32.mrb[107].mxu1  ;;  %v9328_v0 = vld [vmem:[%s21902_s3 + $0x38] sm:$0xff] }
 0x519   : > { %v9273_v27 = vadd.f32 %v9261_v62, %v8970_v2  ;;  %9482 = vmatprep.mubr.f32.mxu0 %v9282_v58  ;;  %v9327_v58 = vld [vmem:[%s21902_s3 + $0x30] sm:$0xff]  ;;  %v9346_v2 = vld [vmem:[%s21902_s3 + $0xc8] sm:$0xff] }
 0x51a   : > { %v9284_v6 = vmax.f32 %v9272_v32, 0.0  ;;  %9483 = vmatmul.mubr.f32.vlgmr.msra.gmra.mrb[94].mxu0 %v9281_v52  ;;  %v14844_v52 = vpack.c.bf16 %v9344_v1, %v9343_v11  ;;  %v9345_v32 = vld [vmem:[%s21902_s3 + $0xc0] sm:$0xff]  ;;  %v11803_v1 = vld [vmem:[%s21902_s3 + $0x268] sm:$0xff] }
 0x51b   : > { %v9285_v24 = vmax.f32 %v9273_v27, 0.0  ;;  %v8974_v25 = vpop.f32.mrb[108].mxu1  ;;  %14827 = vmatpush3.bf16.msra.mxu0 %v14824_v54  ;;  %v14838_v54 = vpack.c.bf16 %v9324_v47, %v9323_v59  ;;  %v14848_v27 = vpack.c.bf16 %v9346_v2, %v9345_v32  ;;  %v9311_v59 = vld [vmem:[#allocation3 + $0x10] sm:$0xff]  ;;  %v11802_v11 = vld [vmem:[%s21902_s3 + $0x260] sm:$0xff]  ;;  %v11805_v2 = vld [vmem:[%s21902_s3 + $0x278] sm:$0xff] }
 0x51c   : > { %v9275_v20 = vadd.f32 %v9257_v38, %v8974_v25  ;;  %v8976_v43 = vpop.f32.mrb[109].mxu1  ;;  %14829 = vmatprep.subr.bf16.mxu0 %v14828_v29  ;;  %v14850_v25 = vpack.c.bf16 %v9330_v23, %v9329_v15  ;;  %v11804_v32 = vld [vmem:[%s21902_s3 + $0x270] sm:$0xff] }
 0x51d   : > { %v9276_v44 = vadd.f32 %v9261_v62, %v8976_v43  ;;  %9487 = vmatprep.mubr.f32.mxu0 %v9285_v24  ;;  %v9348_v24 = vld [vmem:[%s21902_s3 + $0xd8] sm:$0xff]  ;;  %v9331_v43 = vld [vmem:[%s21902_s3 + $0x50] sm:$0xff]  ;;  %v14886_v15 = vpack.c.bf16 %v11805_v2, %v11804_v32  ;;  %v11863_v2 = vld [vmem:[%s21906_s7 + $0x140] sm:$0xff] }
 0x51e   : > { %v9287_v5 = vmax.f32 %v9275_v20, 0.0  ;;  %9488 = vmatmul.mubr.f32.gmra.mrb[96].mxu0 %v9284_v6  ;;  %v9347_v6 = vld [vmem:[%s21902_s3 + $0xd0] sm:$0xff] }
 0x51f   : > { %v9288_v63 = vmax.f32 %v9276_v44, 0.0  ;;  %v8980_v12 = vpop.f32.mrb[110].mxu1  ;;  %14831 = vmatpush3.bf16.msra.mxu0 %v14828_v29  ;;  %v14846_v29 = vpack.c.bf16 %v9328_v0, %v9327_v58  ;;  %v14852_v20 = vpack.c.bf16 %v9348_v24, %v9347_v6  ;;  %v9349_v44 = vld [vmem:[%s21902_s3 + $0xe0] sm:$0xff]  ;;  %v14882_v58 = vpack.c.bf16 %v11803_v1, %v11802_v11  ;;  %v11807_v24 = vld [vmem:[%s21902_s3 + $0x288] sm:$0xff] }
 0x520   : > { %v9278_v8 = vadd.f32 %v9257_v38, %v8980_v12  ;;  %v8982_v51 = vpop.f32.mrb[111].mxu1  ;;  %14833 = vmatprep.subr.bf16.mxu0 %v14832_v21  ;;  %v14840_v38 = vpack.c.bf16 %v9342_v36, %v9341_v41  ;;  %v9332_v21 = vld [vmem:[%s21902_s3 + $0x58] sm:$0xff]  ;;  %v11800_v41 = vld [vmem:[%s21902_s3 + $0x250] sm:$0xff]  ;;  %v11806_v6 = vld [vmem:[%s21902_s3 + $0x280] sm:$0xff] }
 0x521   : > { %v9279_v46 = vadd.f32 %v9261_v62, %v8982_v51  ;;  %9492 = vmatprep.mubr.f32.mxu0 %v9288_v63  ;;  %v9325_v62 = vld [vmem:[%s21902_s3 + $0x20] sm:$0xff]  ;;  %v14854_v63 = vpack.c.bf16 %v9332_v21, %v9331_v43  ;;  %v9334_v51 = vld [vmem:[%s21902_s3 + $0x68] sm:$0xff]  ;;  %v11801_v36 = vld [vmem:[%s21902_s3 + $0x258] sm:$0xff]  ;;  %v14890_v43 = vpack.c.bf16 %v11807_v24, %v11806_v6 }
 0x522   : > { %v9290_v3 = vmax.f32 %v9278_v8, 0.0  ;;  %9493 = vmatmul.mubr.f32.gmra.mrb[98].mxu0 %v9287_v5  ;;  %v14842_v35 = vpack.c.bf16 %v9326_v13, %v9325_v62  ;;  %v9350_v5 = vld [vmem:[%s21902_s3 + $0xe8] sm:$0xff]  ;;  %v9333_v8 = vld [vmem:[%s21902_s3 + $0x60] sm:$0xff]  ;;  %v14878_v13 = vpack.c.bf16 %v11801_v36, %v11800_v41  ;;  %v11845_v41 = vld [vmem:[%s21906_s7 + $0xb0] sm:$0xff] }
 0x523   : > { %v9291_v28 = vmax.f32 %v9279_v46, 0.0  ;;  %v13070_v53 = vpop.f32.mrb[120].mxu1  ;;  %v14856_v12 = vpack.c.bf16 %v9350_v5, %v9349_v44  ;;  %v9351_v46 = vld [vmem:[%s21902_s3 + $0xf0] sm:$0xff]  ;;  %v21549_v62 = vld [vmem:[#allocation3 + $0x40] sm:$0xff]  ;;  %v11809_v5 = vld [vmem:[%s21902_s3 + $0x298] sm:$0xff] }
 0x524   : > { %v15051_v42 = vadd.f32 %v21296_v48, %v13070_v53  ;;  %v9221_v57 = vpop.f32.mrb[121].mxu1  ;;  %v9335_v53 = vld [vmem:[%s21902_s3 + $0x70] sm:$0xff]  ;;  %v11848_v11 = vld [vmem:[%s21906_s7 + $0xc8] sm:$0xff] }
 0x525   : > { %v15055_v60 = vadd.f32 %v21285_v18, %v9221_v57  ;;  %9497 = vmatprep.mubr.f32.mxu0 %v9291_v28  ;;  %v9353_v57 = vld [vmem:[%s21902_s3 + $0x100] sm:$0xff]  ;;  %v11808_v44 = vld [vmem:[%s21902_s3 + $0x290] sm:$0xff] }
 0x526   : > { %v9274_v19 = vadd.f32 %v15051_v42, %v9265_v56  ;;  %9498 = vmatmul.mubr.f32.gmra.mrb[100].mxu0 %v9290_v3  ;;  %v9352_v3 = vld [vmem:[%s21902_s3 + $0xf8] sm:$0xff]  ;;  %v11865_v24 = vld [vmem:[%s21906_s7 + $0x150] sm:$0xff] }
 0x527   : > { %v9271_v14 = vadd.f32 %v15055_v60, %v9265_v56  ;;  %v13073_v37 = vpop.f32.mrb[122].mxu1  ;;  %v14860_v28 = vpack.c.bf16 %v9352_v3, %v9351_v46  ;;  %v9336_v42 = vld [vmem:[%s21902_s3 + $0x78] sm:$0xff]  ;;  %v9354_v60 = vld [vmem:[%s21902_s3 + $0x108] sm:$0xff]  ;;  %v11810_v46 = vld [vmem:[%s21902_s3 + $0x2a0] sm:$0xff] }
 0x528   : > { %v9286_v33 = vmax.f32 %v9274_v19, 0.0  ;;  %v15059_v40 = vadd.f32 %v21308_v7, %v13073_v37  ;;  %v9231_v4 = vpop.f32.mrb[123].mxu1  ;;  %v9322_v7 = vld [vmem:[%s21902_s3 + $0x8] sm:$0xff]  ;;  %v14862_v19 = vpack.c.bf16 %v9336_v42, %v9335_v53  ;;  %v9355_v37 = vld [vmem:[%s21902_s3 + $0x110] sm:$0xff] }
 0x529   : > { %v9283_v9 = vmax.f32 %v9271_v14, 0.0  ;;  %v15063_v49 = vadd.f32 %v21302_v45, %v9231_v4  ;;  %v9339_v45 = vld [vmem:[%s21902_s3 + $0x90] sm:$0xff]  ;;  %v14834_v17 = vpack.c.bf16 %v9322_v7, %v9321_v22  ;;  %v14864_v14 = vpack.c.bf16 %v9354_v60, %v9353_v57  ;;  %v9309_v4 = vld [vmem:[#allocation3] sm:$0xff]  ;;  %v11811_v3 = vld [vmem:[%s21902_s3 + $0x2a8] sm:$0xff] }
 0x52a   : > { %9299 = vst.msk [vmem:[#allocation3 + $0xa0] sm:$0xff] %vm1385_vm2, %v9286_v33  ;;  %v9280_v55 = vadd.f32 %v15059_v40, %v9265_v56  ;;  %v14836_v16 = vpack.c.bf16 %v9340_v50, %v9339_v45  ;;  %v9356_v33 = vld [vmem:[%s21902_s3 + $0x118] sm:$0xff]  ;;  %v21511_v22 = vld [vmem:[#allocation3 + $0x30] sm:$0xff]  ;;  %v11798_v45 = vld [vmem:[%s21902_s3 + $0x240] sm:$0xff]  ;;  %v14898_v53 = vpack.c.bf16 %v11811_v3, %v11810_v46 }
 0x52b   : > { %9296 = vst.msk [vmem:[#allocation3 + $0x88] sm:$0xff] %vm1385_vm2, %v9283_v9  ;;  %v9277_v48 = vadd.f32 %v15063_v49, %v9265_v56  ;;  %v14858_v56 = vpack.c.bf16 %v9334_v51, %v9333_v8  ;;  %v14868_v40 = vpack.c.bf16 %v9356_v33, %v9355_v37  ;;  %v11814_v9 = vld [vmem:[%s21902_s3 + $0x2c0] sm:$0xff]  ;;  %v11815_v49 = vld [vmem:[%s21902_s3 + $0x2c8] sm:$0xff]  ;;  %v21514_v7 = vld [vmem:[#allocation3 + $0x50] sm:$0xff]  ;;  %v14894_v8 = vpack.c.bf16 %v11809_v5, %v11808_v44 }
 0x52c   : > { %v9292_v39 = vmax.f32 %v9280_v55, 0.0  ;;  %v9313_v55 = vld [vmem:[#allocation3 + $0x20] sm:$0xff]  ;;  %v11799_v50 = vld [vmem:[%s21902_s3 + $0x248] sm:$0xff]  ;;  %v11812_v57 = vld [vmem:[%s21902_s3 + $0x2b0] sm:$0xff] }
 0x52d   : > { %v9289_v18 = vmax.f32 %v9277_v48, 0.0  ;;  %v14872_v48 = vpack.c.bf16 %v11815_v49, %v11814_v9  ;;  %v14874_v47 = vpack.c.bf16 %v11799_v50, %v11798_v45  ;;  %v11813_v60 = vld [vmem:[%s21902_s3 + $0x2b8] sm:$0xff]  ;;  %v9781_v49 = vld [vmem:[#allocation3 + $0x70] sm:$0xff]  ;;  %v11856_v45 = vld [vmem:[%s21906_s7 + $0x108] sm:$0xff] }
 0x52e   : > { %9305 = vst.msk [vmem:[#allocation3 + $0xd0] sm:$0xff] %vm1385_vm2, %v9292_v39  ;;  %v21505_v39 = vld [vmem:[#allocation3 + $0x18] sm:$0xff]  ;;  %v14902_v37 = vpack.c.bf16 %v11813_v60, %v11812_v57 }
 0x52f   : > { %9302 = vst.msk [vmem:[#allocation3 + $0xb8] sm:$0xff] %vm1385_vm2, %v9289_v18  ;;  %v21508_v18 = vld [vmem:[#allocation3 + $0x38] sm:$0xff] }
 0x530   : > { %v11854_v44 = vld [vmem:[%s21906_s7 + $0xf8] sm:$0xff] }
 0x531   : > { %v9362_v30 = vld [vmem:[#allocation3 + $0xa0] sm:$0xff] }
 0x532   : > { %v9359_v61 = vld [vmem:[#allocation3 + $0x88] sm:$0xff] }
 0x533   : > { %13082 = vmatprep.mubr.msk.f32.mxu0 %vm1385_vm2, %v9359_v61  ;;  %v11816_v61 = vld [vmem:[%s21902_s3 + $0x2d0] sm:$0xff] }
 0x534   : > { %13083 = vmatmul.mubr.msk.f32.vlgmr.msra.gmra.mrb[102].mxu0 %vm1385_vm2, %v9362_v30 }
 0x535   : > { %14835 = vmatpush3.bf16.msra.mxu0 %v14834_v17  ;;  %v9368_v34 = vld [vmem:[#allocation3 + $0xd0] sm:$0xff]  ;;  %v21523_v17 = vld [vmem:[#allocation3 + $0x48] sm:$0xff] }
 0x536   : > { %v9365_v10 = vld [vmem:[#allocation3 + $0xb8] sm:$0xff]  ;;  %14837 = vmatprep.subr.bf16.mxu0 %v14836_v16 }
 0x537   : > { %13085 = vmatprep.mubr.msk.f32.mxu0 %vm1385_vm2, %v9365_v10  ;;  %v11817_v16 = vld [vmem:[%s21902_s3 + $0x2d8] sm:$0xff]  ;;  %v11818_v10 = vld [vmem:[%s21902_s3 + $0x2e0] sm:$0xff] }
 0x538   : > { %13086 = vmatmul.mubr.msk.f32.gmra.mrb[104].mxu0 %vm1385_vm2, %v9368_v34  ;;  %v14876_v30 = vpack.c.bf16 %v11817_v16, %v11816_v61  ;;  %v11843_v61 = vld [vmem:[%s21906_s7 + $0xa0] sm:$0xff]  ;;  %v11844_v16 = vld [vmem:[%s21906_s7 + $0xa8] sm:$0xff] }
 0x539   : > { %14839 = vmatpush3.bf16.msra.mxu0 %v14838_v54  ;;  %9664 = vmatprep.mubr.f32.mxu0 %v9310_v31  ;;  %v21539_v54 = vld [vmem:[#allocation3 + $0x28] sm:$0xff]  ;;  %v21559_v31 = vld [vmem:[#allocation3 + $0x58] sm:$0xff] }
 0x53a   : > { %14841 = vmatprep.subr.bf16.mxu0 %v14840_v38  ;;  %v11819_v38 = vld [vmem:[%s21902_s3 + $0x2e8] sm:$0xff] }
 0x53b   : > { %v14880_v34 = vpack.c.bf16 %v11819_v38, %v11818_v10  ;;  %v11859_v38 = vld [vmem:[%s21906_s7 + $0x120] sm:$0xff] }
 0x53d   : > { %14843 = vmatpush3.bf16.msra.mxu0 %v14842_v35  ;;  %v11820_v35 = vld [vmem:[%s21902_s3 + $0x2f0] sm:$0xff] }
 0x53e   : > { %14845 = vmatprep.subr.bf16.mxu0 %v14844_v52  ;;  %v11821_v52 = vld [vmem:[%s21902_s3 + $0x2f8] sm:$0xff] }
 0x53f   : > { %v14884_v0 = vpack.c.bf16 %v11821_v52, %v11820_v35  ;;  %v11862_v35 = vld [vmem:[%s21906_s7 + $0x138] sm:$0xff]  ;;  %v11849_v52 = vld [vmem:[%s21906_s7 + $0xd0] sm:$0xff] }
 0x541   : > { %14847 = vmatpush3.bf16.msra.mxu0 %v14846_v29  ;;  %v11822_v29 = vld [vmem:[%s21902_s3 + $0x300] sm:$0xff] }
 0x542   : > { %14849 = vmatprep.subr.bf16.mxu0 %v14848_v27  ;;  %v11823_v27 = vld [vmem:[%s21902_s3 + $0x308] sm:$0xff] }
 0x543   : > { %v14888_v23 = vpack.c.bf16 %v11823_v27, %v11822_v29  ;;  %v11864_v29 = vld [vmem:[%s21906_s7 + $0x148] sm:$0xff]  ;;  %v11851_v27 = vld [vmem:[%s21906_s7 + $0xe0] sm:$0xff] }
 0x545   : > { %14851 = vmatpush3.bf16.msra.mxu0 %v14850_v25  ;;  %v11824_v25 = vld [vmem:[%s21902_s3 + $0x310] sm:$0xff] }
 0x546   : > { %14853 = vmatprep.subr.bf16.mxu0 %v14852_v20  ;;  %v11825_v20 = vld [vmem:[%s21902_s3 + $0x318] sm:$0xff] }
 0x547   : > { %v14892_v21 = vpack.c.bf16 %v11825_v20, %v11824_v25  ;;  %v11866_v25 = vld [vmem:[%s21906_s7 + $0x158] sm:$0xff] }
 0x548   : > { %v14976_v20 = vpack.c.bf16 %v11866_v25, %v11865_v24 }
 0x549   : > { %14855 = vmatpush3.bf16.msra.mxu0 %v14854_v63  ;;  %v11826_v63 = vld [vmem:[%s21902_s3 + $0x320] sm:$0xff] }
 0x54a   : > { %14857 = vmatprep.subr.bf16.mxu0 %v14856_v12  ;;  %v11827_v12 = vld [vmem:[%s21902_s3 + $0x328] sm:$0xff] }
 0x54b   : > { %v14896_v51 = vpack.c.bf16 %v11827_v12, %v11826_v63 }
 0x54d   : > { %14859 = vmatpush3.bf16.msra.mxu0 %v14858_v56  ;;  %v11828_v56 = vld [vmem:[%s21902_s3 + $0x330] sm:$0xff] }
 0x54e   : > { %14861 = vmatprep.subr.bf16.mxu0 %v14860_v28  ;;  %v11829_v28 = vld [vmem:[%s21902_s3 + $0x338] sm:$0xff] }
 0x54f   : > { %v14900_v42 = vpack.c.bf16 %v11829_v28, %v11828_v56  ;;  %v11869_v56 = vld [vmem:[%s21906_s7 + $0x170] sm:$0xff] }
 0x551   : > { %14863 = vmatpush3.bf16.msra.mxu0 %v14862_v19  ;;  %v11830_v19 = vld [vmem:[%s21902_s3 + $0x340] sm:$0xff] }
 0x552   : > { %14865 = vmatprep.subr.bf16.mxu0 %v14864_v14 }
 0x554   : > { %9665 = vmatmul.mubr.f32.vlgmr.msra.gmra.mrb[106].mxu0 %v9309_v4  ;;  %v11833_v4 = vld [vmem:[%s21902_s3 + $0x358] sm:$0xff] }
 0x555   : > { %9669 = vmatprep.mubr.f32.mxu0 %v9313_v55  ;;  %14867 = vmatpush3.bf16.msra.mxu0 %v14864_v14  ;;  %v11831_v14 = vld [vmem:[%s21902_s3 + $0x348] sm:$0xff] }
 0x556   : > { %14869 = vmatprep.subr.bf16.mxu0 %v14868_v40  ;;  %v14904_v33 = vpack.c.bf16 %v11831_v14, %v11830_v19 }
 0x558   : > { %9670 = vmatmul.mubr.f32.gmra.mrb[108].mxu0 %v21505_v39 }
 0x559   : > { %9674 = vmatprep.mubr.f32.mxu0 %v21508_v18  ;;  %14871 = vmatpush3.bf16.msra.mxu0 %v14868_v40  ;;  %v11832_v40 = vld [vmem:[%s21902_s3 + $0x350] sm:$0xff] }
 0x55a   : > { %14873 = vmatprep.subr.bf16.mxu0 %v14872_v48  ;;  %v14908_v9 = vpack.c.bf16 %v11833_v4, %v11832_v40  ;;  %v11841_v48 = vld [vmem:[%s21906_s7 + $0x90] sm:$0xff] }
 0x55c   : > { %9675 = vmatmul.mubr.f32.gmra.mrb[110].mxu0 %v21511_v22 }
 0x55d   : > { %9679 = vmatprep.mubr.f32.mxu0 %v21514_v7 }
 0x560   : > { %9680 = vmatmul.mubr.f32.gmra.mrb[112].mxu0 %v21523_v17 }
 0x561   : > { %13096 = vmatprep.mubr.msk.f32.mxu0 %vm1385_vm2, %v9311_v59  ;;  %v14919_v59 = vpack.c.bf16 %v11844_v16, %v11843_v61 }
 0x564   : > { %13097 = vmatmul.mubr.msk.f32.vlgmr.msra.gmra.mrb[102].mxu0 %vm1385_vm2, %v21539_v54 }
 0x565   : > { %14875 = vmatpush3.bf16.msra.mxu0 %v14874_v47  ;;  %13099 = vmatprep.mubr.msk.f32.mxu0 %vm1385_vm2, %v21549_v62  ;;  %v11857_v47 = vld [vmem:[%s21906_s7 + $0x110] sm:$0xff] }
 0x566   : > { %14877 = vmatprep.subr.bf16.mxu0 %v14876_v30  ;;  %v11858_v30 = vld [vmem:[%s21906_s7 + $0x118] sm:$0xff] }
 0x567   : > { %v14964_v36 = vpack.c.bf16 %v11858_v30, %v11857_v47 }
 0x568   : > { %13100 = vmatmul.mubr.msk.f32.gmra.mrb[104].mxu0 %vm1385_vm2, %v21559_v31 }
 0x569   : > { %14879 = vmatpush3.bf16.msra.mxu0 %v14878_v13  ;;  %9895 = vmatprep.mubr.f32.mxu0 %v9313_v55  ;;  %v11839_v55 = vld [vmem:[%s21906_s7 + $0x80] sm:$0xff] }
 0x56a   : > { %14881 = vmatprep.subr.bf16.mxu0 %v14880_v34  ;;  %v11847_v13 = vld [vmem:[%s21906_s7 + $0xc0] sm:$0xff] }
 0x56b   : > { %v14925_v1 = vpack.c.bf16 %v11848_v11, %v11847_v13 }
 0x56d   : > { %14883 = vmatpush3.bf16.msra.mxu0 %v14882_v58 }
 0x56e   : > { %14885 = vmatprep.subr.bf16.mxu0 %v14884_v0  ;;  %v11850_v0 = vld [vmem:[%s21906_s7 + $0xd8] sm:$0xff] }
 0x56f   : > { %v14928_v32 = vpack.c.bf16 %v11850_v0, %v11849_v52 }
 0x571   : > { %14887 = vmatpush3.bf16.msra.mxu0 %v14886_v15  ;;  %v14973_v15 = vpack.c.bf16 %v11864_v29, %v11863_v2  ;;  %v11838_v2 = vld [vmem:[%s21905_s6] ss:$0 sm:$0xff] }
 0x572   : > { %14889 = vmatprep.subr.bf16.mxu0 %v14888_v23  ;;  %v11852_v23 = vld [vmem:[%s21906_s7 + $0xe8] sm:$0xff] }
 0x573   : > { %v14931_v6 = vpack.c.bf16 %v11852_v23, %v11851_v27  ;;  %v10025_v23 = vld [vmem:[%s21906_s7] sm:$0xff] }
 0x575   : > { %14891 = vmatpush3.bf16.msra.mxu0 %v14890_v43 }
 0x576   : > { %14893 = vmatprep.subr.bf16.mxu0 %v14892_v21  ;;  %v11853_v21 = vld [vmem:[%s21906_s7 + $0xf0] sm:$0xff] }
 0x577   : > { %v14934_v63 = vpack.c.bf16 %v11854_v44, %v11853_v21 }
 0x579   : > { %14895 = vmatpush3.bf16.msra.mxu0 %v14894_v8  ;;  %v11867_v8 = vld [vmem:[%s21906_s7 + $0x160] sm:$0xff] }
 0x57a   : > { %14897 = vmatprep.subr.bf16.mxu0 %v14896_v51  ;;  %v11868_v51 = vld [vmem:[%s21906_s7 + $0x168] sm:$0xff] }
 0x57b   : > { %v14979_v46 = vpack.c.bf16 %v11868_v51, %v11867_v8 }
 0x57d   : > { %14899 = vmatpush3.bf16.msra.mxu0 %v14898_v53  ;;  %v21758_v53 = vld [vmem:[#allocation2 + $0xa0] sm:$0xff] }
 0x57e   : > { %14901 = vmatprep.subr.bf16.mxu0 %v14900_v42  ;;  %v11870_v42 = vld [vmem:[%s21906_s7 + $0x178] sm:$0xff]  ;;  %13218 = vmatprep.mubr.msk.f32.mxu1 %vm15430_vm3, %v21758_v53 }
 0x57f   : > { %v14982_v60 = vpack.c.bf16 %v11870_v42, %v11869_v56  ;;  %v10029_v56 = vld [vmem:[%s21906_s7 + $0x20] sm:$0xff] }
 0x581   : > { %14903 = vmatpush3.bf16.msra.mxu0 %v14902_v37 }
 0x582   : > { %14905 = vmatprep.subr.bf16.mxu0 %v14904_v33 }
 0x584   : > { %9896 = vmatmul.mubr.f32.vlgmr.msra.gmra.mrb[114].mxu0 %v21505_v39  ;;  %v15429_v39 = vmov 0.0|0.0  }
 0x585   : > { %9900 = vmatprep.mubr.f32.mxu0 %v21508_v18  ;;  %14907 = vmatpush3.bf16.msra.mxu0 %v14904_v33 }
 0x586   : > { %14909 = vmatprep.subr.bf16.mxu0 %v14908_v9  ;;  %14960 = vmatprep.subr.bf16.mxu1 %v15429_v39 }
 0x588   : > { %9901 = vmatmul.mubr.f32.gmra.mrb[116].mxu0 %v21511_v22  ;;  %v11842_v22 = vld [vmem:[%s21906_s7 + $0x98] sm:$0xff] }
 0x589   : > { %9905 = vmatprep.mubr.f32.mxu0 %v21514_v7  ;;  %14911 = vmatpush3.bf16.msra.mxu0 %v14908_v9  ;;  %v11855_v7 = vld [vmem:[%s21906_s7 + $0x100] sm:$0xff] }
 0x58a   : > { %14912 = vmatprep.subr.bf16.mxu0 %v15429_v39  ;;  %v14961_v50 = vpack.c.bf16 %v11856_v45, %v11855_v7 }
 0x58c   : > { %9906 = vmatmul.mubr.f32.gmra.mrb[118].mxu0 %v21523_v17  ;;  %v14916_v17 = vpack.c.bf16 %v11842_v22, %v11841_v48  ;;  %14962 = vmatpush3.bf16.msra.mxu1 %v14961_v50 }
 0x58d   : > { %9910 = vmatprep.mubr.f32.mxu0 %v21094_v26  ;;  %14963 = vmatprep.subr.bf16.mxu1 %v15429_v39 }
 0x590   : > { %9911 = vmatmul.mubr.f32.gmra.mrb[120].mxu0 %v21094_v26  ;;  %v11840_v26 = vld [vmem:[%s21906_s7 + $0x88] sm:$0xff]  ;;  %14965 = vmatpush3.bf16.msra.mxu1 %v14964_v36 }
 0x591   : > { %13110 = vmatprep.mubr.msk.f32.mxu0 %vm1385_vm2, %v21539_v54  ;;  %v14913_v18 = vpack.c.bf16 %v11840_v26, %v11839_v55  ;;  %v11846_v54 = vld [vmem:[%s21906_s7 + $0xb8] sm:$0xff]  ;;  %14966 = vmatprep.subr.bf16.mxu1 %v15429_v39 }
 0x592   : > { %v14922_v10 = vpack.c.bf16 %v11846_v54, %v11845_v41 }
 0x594   : > { %13111 = vmatmul.mubr.msk.f32.vlgmr.msra.gmra.mrb[102].mxu0 %vm1385_vm2, %v21549_v62  ;;  %v11860_v62 = vld [vmem:[%s21906_s7 + $0x128] sm:$0xff] }
 0x595   : > { %13113 = vmatprep.mubr.msk.f32.mxu0 %vm1385_vm2, %v21559_v31  ;;  %14914 = vmatpush3.bf16.msra.mxu0 %v14913_v18  ;;  %v14967_v34 = vpack.c.bf16 %v11860_v62, %v11859_v38  ;;  %v11861_v31 = vld [vmem:[%s21906_s7 + $0x130] sm:$0xff] }
 0x596   : > { %14915 = vmatprep.subr.bf16.mxu0 %v15429_v39  ;;  %v14970_v58 = vpack.c.bf16 %v11862_v35, %v11861_v31 }
 0x597   : > { %14968 = vmatpush3.bf16.msra.mxu1 %v14967_v34 }
 0x598   : > { %13114 = vmatmul.mubr.msk.f32.gmra.mrb[104].mxu0 %vm1385_vm2, %v9781_v49  ;;  %14969 = vmatprep.subr.bf16.mxu1 %v15429_v39 }
 0x599   : > { %14917 = vmatpush3.bf16.msra.mxu0 %v14916_v17  ;;  %13148 = vmatprep.mubr.msk.f32.mxu0 %vm15430_vm3, %v21758_v53 }
 0x59a   : > { %14918 = vmatprep.subr.bf16.mxu0 %v15429_v39 }
 0x59b   : > { %14971 = vmatpush3.bf16.msra.mxu1 %v14970_v58 }
 0x59c   : > { %14972 = vmatprep.subr.bf16.mxu1 %v15429_v39 }
 0x59d   : > { %14920 = vmatpush3.bf16.msra.mxu0 %v14919_v59 }
 0x59e   : > { %14921 = vmatprep.subr.bf16.mxu0 %v15429_v39 }
 0x59f   : > { %14974 = vmatpush3.bf16.msra.mxu1 %v14973_v15 }
 0x5a0   : > { %14975 = vmatprep.subr.bf16.mxu1 %v15429_v39 }
 0x5a1   : > { %14923 = vmatpush3.bf16.msra.mxu0 %v14922_v10 }
 0x5a2   : > { %14924 = vmatprep.subr.bf16.mxu0 %v15429_v39 }
 0x5a3   : > { %14977 = vmatpush3.bf16.msra.mxu1 %v14976_v20 }
 0x5a4   : > { %14978 = vmatprep.subr.bf16.mxu1 %v15429_v39 }
 0x5a5   : > { %14926 = vmatpush3.bf16.msra.mxu0 %v14925_v1 }
 0x5a6   : > { %14927 = vmatprep.subr.bf16.mxu0 %v15429_v39 }
 0x5a7   : > { %14980 = vmatpush3.bf16.msra.mxu1 %v14979_v46 }
 0x5a8   : > { %14981 = vmatprep.subr.bf16.mxu1 %v15429_v39 }
 0x5a9   : > { %14929 = vmatpush3.bf16.msra.mxu0 %v14928_v32 }
 0x5aa   : > { %14930 = vmatprep.subr.bf16.mxu0 %v15429_v39 }
 0x5ab   : > { %14983 = vmatpush3.bf16.msra.mxu1 %v14982_v60  ;;  %v10031_v60 = vld [vmem:[%s21906_s7 + $0x30] sm:$0xff] }
 0x5ad   : > { %14932 = vmatpush3.bf16.msra.mxu0 %v14931_v6  ;;  %v10026_v6 = vld [vmem:[%s21906_s7 + $0x8] sm:$0xff] }
 0x5ae   : > { %14933 = vmatprep.subr.bf16.mxu0 %v15429_v39 }
 0x5b1   : > { %14935 = vmatpush3.bf16.msra.mxu0 %v14934_v63  ;;  %v10027_v63 = vld [vmem:[%s21906_s7 + $0x10] sm:$0xff] }
 0x5b2   : > { %14936 = vmatprep.subr.bf16.mxu0 %v15429_v39 }
 0x5ed   : > { %v12606_v43 = vpop.f32.mrb[94].mxu0 }
 0x5ee   : > { %v12607_v5 = vpop.f32.mrb[95].mxu0 }
 0x5ef   : > { %v12608_v12 = vadd.f32 %v12607_v5, %v12606_v43  ;;  %v14937_v43 = vpack.c.bf16 %v10026_v6, %v10025_v23 }
 0x5f1   : > { %v12609_v3 = vpop.f32.mrb[96].mxu0 }
 0x5f2   : > { %v12610_v28 = vpop.f32.mrb[97].mxu0 }
 0x5f3   : > { %v12611_v57 = vadd.f32 %v12610_v28, %v12609_v3  ;;  %v10030_v28 = vld [vmem:[%s21906_s7 + $0x28] sm:$0xff] }
 0x5f5   : > { %v12612_v19 = vpop.f32.mrb[98].mxu0 }
 0x5f6   : > { %v12613_v14 = vpop.f32.mrb[99].mxu0 }
 0x5f7   : > { %v12614_v37 = vadd.f32 %v12613_v14, %v12612_v19  ;;  %v10032_v19 = vld [vmem:[%s21906_s7 + $0x38] sm:$0xff] }
 0x5f8   : > { %v14946_v14 = vpack.c.bf16 %v10032_v19, %v10031_v60 }
 0x5f9   : > { %v12615_v33 = vpop.f32.mrb[100].mxu0 }
 0x5fa   : > { %v12616_v40 = vpop.f32.mrb[101].mxu0 }
 0x5fb   : > { %v12617_v4 = vadd.f32 %v12616_v40, %v12615_v33  ;;  %v10034_v33 = vld [vmem:[%s21906_s7 + $0x48] sm:$0xff] }
 0x627   : > { %v12658_v9 = vpop.f32.mrb[106].mxu0 }
 0x628   : > { %v12659_v49 = vpop.f32.mrb[107].mxu0 }
 0x629   : > { %v12660_v55 = vadd.f32 %v12659_v49, %v12658_v9  ;;  %v10036_v9 = vld [vmem:[%s21906_s7 + $0x58] sm:$0xff] }
 0x62b   : > { %v15067_v26 = vadd.f32 %v12660_v55, %v12608_v12  ;;  %v12661_v48 = vpop.f32.mrb[108].mxu0  ;;  %v10028_v12 = vld [vmem:[%s21906_s7 + $0x18] sm:$0xff]  ;;  %v10037_v55 = vld [vmem:[%s21906_s7 + $0x60] sm:$0xff] }
 0x62c   : > { %v12662_v18 = vpop.f32.mrb[109].mxu0  ;;  %v14940_v3 = vpack.c.bf16 %v10028_v12, %v10027_v63 }
 0x62d   : > { %v12663_v22 = vadd.f32 %v12662_v18, %v12661_v48  ;;  %v10039_v18 = vld [vmem:[%s21906_s7 + $0x70] sm:$0xff] }
 0x62f   : > { %v15064_v7 = vadd.f32 %v12663_v22, %v12611_v57  ;;  %v12664_v45 = vpop.f32.mrb[110].mxu0  ;;  %v14943_v57 = vpack.c.bf16 %v10030_v28, %v10029_v56  ;;  %v10040_v22 = vld [vmem:[%s21906_s7 + $0x78] sm:$0xff] }
 0x630   : > { %v12665_v50 = vpop.f32.mrb[111].mxu0 }
 0x631   : > { %v12666_v17 = vadd.f32 %v12665_v50, %v12664_v45  ;;  %v11871_v50 = vld [vmem:[%s21906_s7 + $0x180] sm:$0xff] }
 0x633   : > { %v15073_v61 = vadd.f32 %v12666_v17, %v12614_v37  ;;  %v12667_v16 = vpop.f32.mrb[112].mxu0  ;;  %v10033_v37 = vld [vmem:[%s21906_s7 + $0x40] sm:$0xff]  ;;  %v11872_v17 = vld [vmem:[%s21906_s7 + $0x188] sm:$0xff] }
 0x634   : > { %v12668_v59 = vpop.f32.mrb[113].mxu0  ;;  %v14949_v40 = vpack.c.bf16 %v10034_v33, %v10033_v37 }
 0x635   : > { %v12669_v47 = vadd.f32 %v12668_v59, %v12667_v16  ;;  %v11873_v59 = vld [vmem:[%s21906_s7 + $0x190] sm:$0xff] }
 0x637   : > { %v15070_v30 = vadd.f32 %v12669_v47, %v12617_v4  ;;  %v10035_v4 = vld [vmem:[%s21906_s7 + $0x50] sm:$0xff]  ;;  %v11874_v47 = vld [vmem:[%s21906_s7 + $0x198] sm:$0xff] }
 0x638   : > { %v14952_v49 = vpack.c.bf16 %v10036_v9, %v10035_v4 }
 0x657   : > { %v12710_v41 = vpop.f32.mrb[114].mxu0 }
 0x658   : > { %v12711_v36 = vpop.f32.mrb[115].mxu0 }
 0x659   : > { %v12712_v54 = vadd.f32 %v12711_v36, %v12710_v41  ;;  %v11875_v41 = vld [vmem:[%s21906_s7 + $0x1a0] sm:$0xff]  ;;  %v11876_v36 = vld [vmem:[%s21906_s7 + $0x1a8] sm:$0xff] }
 0x65b   : > { %v12713_v10 = vpop.f32.mrb[116].mxu0  ;;  %v15068_v38 = vadd.f32 %v15067_v26, %v12712_v54  ;;  %v10038_v26 = vld [vmem:[%s21906_s7 + $0x68] sm:$0xff]  ;;  %v14991_v54 = vpack.c.bf16 %v11876_v36, %v11875_v41 }
 0x65c   : > { %v12714_v62 = vpop.f32.mrb[117].mxu0  ;;  %v14955_v48 = vpack.c.bf16 %v10038_v26, %v10037_v55 }
 0x65d   : > { %v12715_v13 = vadd.f32 %v12714_v62, %v12713_v10  ;;  %v11877_v10 = vld [vmem:[%s21906_s7 + $0x1b0] sm:$0xff]  ;;  %v11879_v62 = vld [vmem:[%s21906_s7 + $0x1c0] sm:$0xff] }
 0x65f   : > { %v12716_v34 = vpop.f32.mrb[118].mxu0  ;;  %v15065_v11 = vadd.f32 %v15064_v7, %v12715_v13  ;;  %v14958_v7 = vpack.c.bf16 %v10040_v22, %v10039_v18  ;;  %v11880_v13 = vld [vmem:[%s21906_s7 + $0x1c8] sm:$0xff] }
 0x660   : > { %v12717_v1 = vpop.f32.mrb[119].mxu0 }
 0x661   : > { %v12718_v31 = vadd.f32 %v12717_v1, %v12716_v34  ;;  %v14997_v34 = vpack.c.bf16 %v11880_v13, %v11879_v62  ;;  %v11882_v1 = vld [vmem:[%s21906_s7 + $0x1d8] sm:$0xff] }
 0x663   : > { %v12719_v35 = vpop.f32.mrb[120].mxu0  ;;  %v15074_v52 = vadd.f32 %v15073_v61, %v12718_v31  ;;  %v14985_v61 = vpack.c.bf16 %v11872_v17, %v11871_v50 }
 0x664   : > { %v12720_v58 = vpop.f32.mrb[121].mxu0 }
 0x665   : > { %v12721_v0 = vadd.f32 %v12720_v58, %v12719_v35  ;;  %v11883_v35 = vld [vmem:[%s21906_s7 + $0x1e0] sm:$0xff] }
 0x667   : > { %v13112_v32 = vpop.f32.mrb[102].mxu0  ;;  %v15071_v29 = vadd.f32 %v15070_v30, %v12721_v0  ;;  %v14988_v30 = vpack.c.bf16 %v11874_v47, %v11873_v59  ;;  %v11885_v0 = vld [vmem:[%s21906_s7 + $0x1f0] sm:$0xff] }
 0x668   : > { %v15066_v27 = vadd.f32 %v15065_v11, %v13112_v32  ;;  %v9982_v15 = vpop.f32.mrb[103].mxu0  ;;  %v11881_v11 = vld [vmem:[%s21906_s7 + $0x1d0] sm:$0xff]  ;;  %v11886_v32 = vld [vmem:[%s21906_s7 + $0x1f8] sm:$0xff] }
 0x669   : > { %v15069_v24 = vadd.f32 %v15068_v38, %v9982_v15  ;;  %v15000_v31 = vpack.c.bf16 %v11882_v1, %v11881_v11 }
 0x66a   : > { %v10013_v25 = vadd.f32 %v15066_v27, %v11838_v2 }
 0x66b   : > { %v13115_v20 = vpop.f32.mrb[104].mxu0  ;;  %v10012_v45 = vadd.f32 %v15069_v24, %v11838_v2 }
 0x66c   : > { %v10017_v21 = vmax.f32 %v10013_v25, 0.0  ;;  %v15072_v44 = vadd.f32 %v15071_v29, %v13115_v20  ;;  %v9992_v5 = vpop.f32.mrb[105].mxu0 }
 0x66d   : > { %v15075_v8 = vadd.f32 %v15074_v52, %v9992_v5  ;;  %v10016_v16 = vmax.f32 %v10012_v45, 0.0  ;;  %v11884_v52 = vld [vmem:[%s21906_s7 + $0x1e8] sm:$0xff] }
 0x66e   : > { %v21783_v51 = vadd.f32 %v15072_v44, %v11838_v2  ;;  %13149 = vmatmul.mubr.f32.vlgmr.msra.gmra.mrb[122].mxu0 %v10017_v21  ;;  %v15003_v58 = vpack.c.bf16 %v11884_v52, %v11883_v35  ;;  %v11887_v44 = vld [vmem:[%s21907_s8] ss:$0 sm:$0xff] }
 0x66f   : > { %v10014_v46 = vadd.f32 %v15075_v8, %v11838_v2  ;;  %14938 = vmatpush3.bf16.msra.mxu0 %v14937_v43  ;;  %13183 = vmatprep.mubr.msk.f32.mxu0 %vm15430_vm3, %v21758_v53  ;;  %v15006_v2 = vpack.c.bf16 %v11886_v32, %v11885_v0 }
 0x670   : > { %14939 = vmatprep.subr.bf16.mxu0 %v15429_v39  ;;  %v10019_v29 = vmax.f32 %v21783_v51, 0.0 }
 0x671   : > { %v10018_v42 = vmax.f32 %v10014_v46, 0.0 }
 0x673   : > { %14941 = vmatpush3.bf16.msra.mxu0 %v14940_v3  ;;  %13219 = vmatmul.mubr.f32.vlgmr.msra.gmra.mrb[124].mxu1 %v10018_v42 }
 0x674   : > { %14942 = vmatprep.subr.bf16.mxu0 %v15429_v39 }
 0x677   : > { %14944 = vmatpush3.bf16.msra.mxu0 %v14943_v57 }
 0x678   : > { %14945 = vmatprep.subr.bf16.mxu0 %v15429_v39 }
 0x67b   : > { %14947 = vmatpush3.bf16.msra.mxu0 %v14946_v14 }
 0x67c   : > { %14948 = vmatprep.subr.bf16.mxu0 %v15429_v39 }
 0x67f   : > { %14950 = vmatpush3.bf16.msra.mxu0 %v14949_v40 }
 0x680   : > { %14951 = vmatprep.subr.bf16.mxu0 %v15429_v39 }
 0x683   : > { %14953 = vmatpush3.bf16.msra.mxu0 %v14952_v49 }
 0x684   : > { %14954 = vmatprep.subr.bf16.mxu0 %v15429_v39 }
 0x687   : > { %14956 = vmatpush3.bf16.msra.mxu0 %v14955_v48 }
 0x688   : > { %14957 = vmatprep.subr.bf16.mxu0 %v15429_v39 }
 0x68b   : > { %14959 = vmatpush3.bf16.msra.mxu0 %v14958_v7 }
 0x68c   : > { %14984 = vmatprep.subr.bf16.mxu0 %v15429_v39 }
 0x68e   : > { %13184 = vmatmul.mubr.f32.vlgmr.msra.gmra.mrb[124].mxu0 %v10016_v16 }
 0x68f   : > { %14986 = vmatpush3.bf16.msra.mxu0 %v14985_v61  ;;  %13253 = vmatprep.mubr.msk.f32.mxu0 %vm15430_vm3, %v21758_v53  ;;  %v11878_v53 = vld [vmem:[%s21906_s7 + $0x1b8] sm:$0xff] }
 0x690   : > { %14987 = vmatprep.subr.bf16.mxu0 %v15429_v39  ;;  %v14994_v38 = vpack.c.bf16 %v11878_v53, %v11877_v10 }
 0x693   : > { %14989 = vmatpush3.bf16.msra.mxu0 %v14988_v30 }
 0x694   : > { %14990 = vmatprep.subr.bf16.mxu0 %v15429_v39 }
 0x697   : > { %14992 = vmatpush3.bf16.msra.mxu0 %v14991_v54 }
 0x698   : > { %14993 = vmatprep.subr.bf16.mxu0 %v15429_v39 }
 0x69b   : > { %14995 = vmatpush3.bf16.msra.mxu0 %v14994_v38 }
 0x69c   : > { %14996 = vmatprep.subr.bf16.mxu0 %v15429_v39 }
 0x69f   : > { %14998 = vmatpush3.bf16.msra.mxu0 %v14997_v34 }
 0x6a0   : > { %14999 = vmatprep.subr.bf16.mxu0 %v15429_v39 }
 0x6a3   : > { %15001 = vmatpush3.bf16.msra.mxu0 %v15000_v31 }
 0x6a4   : > { %15002 = vmatprep.subr.bf16.mxu0 %v15429_v39 }
 0x6a7   : > { %15004 = vmatpush3.bf16.msra.mxu0 %v15003_v58 }
 0x6a8   : > { %15005 = vmatprep.subr.bf16.mxu0 %v15429_v39 }
 0x6ab   : > { %15007 = vmatpush3.bf16.msra.mxu0 %v15006_v2 }
 0x6ae   : > { %13254 = vmatmul.mubr.f32.vlgmr.msra.gmra.mrb[126].mxu0 %v10019_v29 }
 0x741   : > { %v10125_v27 = vpop.f32.mrb[122].mxu0 }
 0x742   : > { %v13150_v15 = vpop.f32.mrb[123].mxu0 }
 0x746   : > { %v10283_v23 = vpop.f32.mrb[124].mxu1 }
 0x747   : > { %v13220_v6 = vpop.f32.mrb[125].mxu1 }
 0x761   : > { %v10195_v24 = vpop.f32.mrb[124].mxu0 }
 0x762   : > { %v10196_v25 = vadd.f32 %v10195_v24, %v10125_v27  ;;  %v13185_v20 = vpop.f32.mrb[125].mxu0 }
 0x764   : > { %v10287_v43 = vadd.f32 %v10283_v23, %v10196_v25 }
 0x781   : > { %v10372_v21 = vpop.f32.mrb[126].mxu0 }
 0x782   : > { %v10376_v5 = vadd.f32 %v10372_v21, %v10287_v43  ;;  %v13255_v39 = vpop.f32.mrb[127].mxu0 }
 0x784   : > { %v10384_v63 = vadd.f32 %v11887_v44, %v10376_v5 }
 0x786   : > { %10385 = vst [vmem:[%s330_s15] sm:$0xff] %v10384_v63 }
 0x787 PF: > { %s19_s30 = sadd.s32 1, %s15426_s30  }
 0x788   : > { %p16_p4 = scmp.ge.s32.totalorder %s19_s30, 4  }
 0x78a   :  { %18 = sbr.rel (!%p16_p4) target bundleno = 1 (0x1), region = 106 }

</bundles_post_ra>
